<compile_context>
chip_gen: v6e
topology: v6e:2x2x1
jax: 0.10.0
libtpu: 0.0.40
codegen_flags: <defaults>
</compile_context>

<pallas_src>
import functools
import math

import jax
import jax.numpy as jnp
from jax.experimental import pallas as pl
from jax.experimental.pallas import tpu as pltpu


_VMEM_FULL = pl.BlockSpec(memory_space=pltpu.MemorySpace.VMEM)

# Packed per-layer f32 parameter rows (width E):
#   0 ln0_w, 1 ln0_b, 2 attn_out_bias, 3 ln1_w, 4 ln1_b, 5 fc2_b, 6..7 padding
_NVEC = 8


# ----------------------------------------------------------------------------
# In-kernel helpers (operate on loaded jnp values)
# ----------------------------------------------------------------------------

def _ln(z, g, b):
    mu = jnp.mean(z, axis=-1, keepdims=True)
    zc = z - mu
    var = jnp.mean(zc * zc, axis=-1, keepdims=True)
    return zc * jax.lax.rsqrt(var + 1e-5) * g + b


def _mmf32(a, w_bf16):
    # a (M, K) f32/bf16  @  w (K, N) bf16  ->  f32
    return jax.lax.dot_general(
        a.astype(jnp.bfloat16), w_bf16,
        (((1,), (0,)), ((), ())), preferred_element_type=jnp.float32)


def _mha_masked(q, k, v, wo, *, num_heads, head_dim, batch):
    """Multi-head attention over flattened (t*B + b) rows with a same-batch mask.

    The mask is generated in-kernel (iota + compare); each head's output is folded
    directly into the output projection (no lane-axis concat).
    """
    mq = q.shape[0]
    mk = k.shape[0]
    r = jax.lax.broadcasted_iota(jnp.int32, (mq, mk), 0) % batch
    c = jax.lax.broadcasted_iota(jnp.int32, (mq, mk), 1) % batch
    neg = jnp.where(r == c, 0.0, -1e9).astype(jnp.float32)

    qb = q.astype(jnp.bfloat16)
    kb = k.astype(jnp.bfloat16)
    vb = v.astype(jnp.bfloat16)

    out = jnp.zeros((mq, wo.shape[1]), jnp.float32)
    for h in range(num_heads):
        lo = h * head_dim
        s = jax.lax.dot_general(
            qb[:, lo:lo + head_dim], kb[:, lo:lo + head_dim],
            (((1,), (1,)), ((), ())), preferred_element_type=jnp.float32)
        s = s + neg
        s = s - jnp.max(s, axis=-1, keepdims=True)
        p = jnp.exp(s)
        p = p * pl.reciprocal(jnp.sum(p, axis=-1, keepdims=True), approx=False)
        oh = jax.lax.dot_general(
            p.astype(jnp.bfloat16), vb[:, lo:lo + head_dim],
            (((1,), (0,)), ((), ())), preferred_element_type=jnp.float32)
        out = out + _mmf32(oh, wo[lo:lo + head_dim, :])
    return out


def _mha_blockdiag(q, k, v, wo, *, num_heads, head_dim, n_time, n_batch):
    """Block-diagonal attention for the temporal ('final') encoders.

    Rows are ordered t * n_batch + b; each query attends only to the n_time rows of
    its own batch element, so scores are computed with elementwise mul + per-head
    lane reductions (VPU/XLU) instead of an (M, M) masked score matrix.
    """
    out = jnp.zeros((q.shape[0], wo.shape[1]), jnp.float32)
    k_rep = [jnp.concatenate([k[t * n_batch:(t + 1) * n_batch, :]] * n_time, axis=0)
             for t in range(n_time)]
    v_rep = [jnp.concatenate([v[t * n_batch:(t + 1) * n_batch, :]] * n_time, axis=0)
             for t in range(n_time)]
    for h in range(num_heads):
        lo = h * head_dim
        qh = q[:, lo:lo + head_dim]
        logits = [jnp.sum(qh * kr[:, lo:lo + head_dim], axis=-1, keepdims=True)
                  for kr in k_rep]
        mx = logits[0]
        for lg in logits[1:]:
            mx = jnp.maximum(mx, lg)
        exps = [jnp.exp(lg - mx) for lg in logits]
        denom = exps[0]
        for ex in exps[1:]:
            denom = denom + ex
        inv = pl.reciprocal(denom, approx=False)
        oh = exps[0] * v_rep[0][:, lo:lo + head_dim]
        for t in range(1, n_time):
            oh = oh + exps[t] * v_rep[t][:, lo:lo + head_dim]
        oh = oh * inv
        out = out + _mmf32(oh, wo[lo:lo + head_dim, :])
    return out


def _ffn_residual(x1, vec, fc1_w, fc2_w, fc1_b):
    x1n = _ln(x1, vec[3:4], vec[4:5])
    h1 = jnp.maximum(_mmf32(x1n, fc1_w) + fc1_b, 0.0)
    return x1 + _mmf32(h1, fc2_w) + vec[5:6]


# ----------------------------------------------------------------------------
# Fused encoder-group kernels: grid = (encoder, layer)
# ----------------------------------------------------------------------------

def _cross_group_kernel(xq_ref, xkv_ref, wq_ref, wkv_ref, wo_ref, fc1_w_ref,
                        fc2_w_ref, vec_ref, bqkv_ref, fc1_b_ref, lnf_ref,
                        o_ref, x_res, *, num_heads, head_dim, scaling, batch):
    l = pl.program_id(1)

    @pl.when(l == 0)
    def _():
        x_res[...] = xq_ref[...]

    x = x_res[...]
    vec = vec_ref[...]
    e = x.shape[1]

    x_n = _ln(x, vec[0:1], vec[1:2])
    kv_n = _ln(xkv_ref[...], vec[0:1], vec[1:2])

    b_all = bqkv_ref[...]                                   # (1, 3E) = [bq | bk | bv]
    q = (_mmf32(x_n, wq_ref[...]) + b_all[:, :e]) * scaling
    kv = _mmf32(kv_n, wkv_ref[...]) + b_all[:, e:]          # fused K/V projection
    k = kv[:, :e]
    v = kv[:, e:]

    attn = _mha_masked(q, k, v, wo_ref[...], num_heads=num_heads,
                       head_dim=head_dim, batch=batch)
    x1 = x + attn + vec[2:3]
    x2 = _ffn_residual(x1, vec, fc1_w_ref[...], fc2_w_ref[...], fc1_b_ref[...])

    x_res[...] = x2

    @pl.when(l == pl.num_programs(1) - 1)
    def _():
        lnf = lnf_ref[...]
        o_ref[...] = _ln(x2, lnf[0:1], lnf[1:2])


def _self_group_kernel(x_ref, wqkv_ref, wo_ref, fc1_w_ref, fc2_w_ref,
                       vec_ref, bqkv_ref, fc1_b_ref, lnf_ref,
                       o_ref, x_res, *, num_heads, head_dim, scaling, batch, n_time):
    l = pl.program_id(1)

    @pl.when(l == 0)
    def _():
        x_res[...] = x_ref[...]

    x = x_res[...]
    vec = vec_ref[...]
    e = x.shape[1]

    x_n = _ln(x, vec[0:1], vec[1:2])
    qkv = _mmf32(x_n, wqkv_ref[...]) + bqkv_ref[...]        # fused Q/K/V projection
    q = qkv[:, :e] * scaling
    k = qkv[:, e:2 * e]
    v = qkv[:, 2 * e:]

    if n_time is None:
        attn = _mha_masked(q, k, v, wo_ref[...], num_heads=num_heads,
                           head_dim=head_dim, batch=batch)
    else:
        attn = _mha_blockdiag(q, k, v, wo_ref[...], num_heads=num_heads,
                              head_dim=head_dim, n_time=n_time, n_batch=batch)

    x1 = x + attn + vec[2:3]
    x2 = _ffn_residual(x1, vec, fc1_w_ref[...], fc2_w_ref[...], fc1_b_ref[...])

    x_res[...] = x2

    @pl.when(l == pl.num_programs(1) - 1)
    def _():
        lnf = lnf_ref[...]
        o_ref[...] = _ln(x2, lnf[0:1], lnf[1:2])


# ----------------------------------------------------------------------------
# pallas_call builders (cached per static shape config)
# ----------------------------------------------------------------------------

def _w_spec(kk, nn):
    # per-(encoder, layer) parameter tile; leading dims squeezed
    return pl.BlockSpec((None, None, kk, nn), lambda en, l: (en, l, 0, 0))


def _s_spec(m, e):
    # per-encoder stream/table tile, constant over the layer axis (revisit-dedup'd)
    return pl.BlockSpec((None, m, e), lambda en, l: (en, 0, 0))


@functools.lru_cache(maxsize=None)
def _cross_group_call(n_enc, n_layers, m_q, m_k, e, hidden, num_heads, batch):
    assert e % num_heads == 0
    head_dim = e // num_heads
    kern = functools.partial(_cross_group_kernel, num_heads=num_heads,
                             head_dim=head_dim, scaling=head_dim ** -0.5,
                             batch=batch)
    in_specs = [
        _s_spec(m_q, e),            # xq (query stream, scaled + pos-embedded)
        _s_spec(m_k, e),            # xkv (key/value source)
        _w_spec(e, e),              # wq
        _w_spec(e, 2 * e),          # wkv (fused)
        _w_spec(e, e),              # wo
        _w_spec(e, hidden),         # fc1_w
        _w_spec(hidden, e),         # fc2_w
        _w_spec(_NVEC, e),          # vec (ln0/ln1 params, bo, fc2_b)
        _w_spec(1, 3 * e),          # bqkv = [bq | bk | bv]
        _w_spec(1, hidden),         # fc1_b
        _s_spec(2, e),              # encoder-final LayerNorm params
    ]
    return pl.pallas_call(
        kern,
        grid=(n_enc, n_layers),
        in_specs=in_specs,
        out_specs=_s_spec(m_q, e),
        out_shape=jax.ShapeDtypeStruct((n_enc, m_q, e), jnp.float32),
        scratch_shapes=[pltpu.VMEM((m_q, e), jnp.float32)],
        compiler_params=pltpu.CompilerParams(
            dimension_semantics=("parallel", "arbitrary")),
    )


@functools.lru_cache(maxsize=None)
def _self_group_call(n_enc, n_layers, m, e, hidden, num_heads, batch, n_time):
    assert e % num_heads == 0
    head_dim = e // num_heads
    kern = functools.partial(_self_group_kernel, num_heads=num_heads,
                             head_dim=head_dim, scaling=head_dim ** -0.5,
                             batch=batch, n_time=n_time)
    in_specs = [
        _s_spec(m, e),              # x (residual stream input)
        _w_spec(e, 3 * e),          # wqkv (fused)
        _w_spec(e, e),              # wo
        _w_spec(e, hidden),         # fc1_w
        _w_spec(hidden, e),         # fc2_w
        _w_spec(_NVEC, e),          # vec
        _w_spec(1, 3 * e),          # bqkv
        _w_spec(1, hidden),         # fc1_b
        _s_spec(2, e),              # encoder-final LayerNorm params
    ]
    return pl.pallas_call(
        kern,
        grid=(n_enc, n_layers),
        in_specs=in_specs,
        out_specs=_s_spec(m, e),
        out_shape=jax.ShapeDtypeStruct((n_enc, m, e), jnp.float32),
        scratch_shapes=[pltpu.VMEM((m, e), jnp.float32)],
        compiler_params=pltpu.CompilerParams(
            dimension_semantics=("parallel", "arbitrary")),
    )


def run_cross_group(gp, xq, xkv, num_heads, batch):
    n_enc, m_q, e = xq.shape
    m_k = xkv.shape[1]
    n_layers = gp['wq'].shape[1]
    hidden = gp['fc1_w'].shape[-1]
    call = _cross_group_call(n_enc, n_layers, m_q, m_k, e, hidden, num_heads, batch)
    return call(xq, xkv, gp['wq'], gp['wkv'], gp['wo'], gp['fc1_w'], gp['fc2_w'],
                gp['vec'], gp['bqkv'], gp['fc1_b'], gp['lnf'])


def run_self_group(gp, xq, num_heads, batch, n_time):
    n_enc, m, e = xq.shape
    n_layers = gp['wqkv'].shape[1]
    hidden = gp['fc1_w'].shape[-1]
    call = _self_group_call(n_enc, n_layers, m, e, hidden, num_heads, batch, n_time)
    return call(xq, gp['wqkv'], gp['wo'], gp['fc1_w'], gp['fc2_w'],
                gp['vec'], gp['bqkv'], gp['fc1_b'], gp['lnf'])


# ----------------------------------------------------------------------------
# Conv1d projection (PyTorch Conv1d, bias=False, padding=(k-1)//2) = im2col + matmul
# ----------------------------------------------------------------------------

def _matmul_kernel(x_ref, w_ref, o_ref):
    o_ref[...] = jax.lax.dot_general(
        x_ref[...].astype(jnp.bfloat16), w_ref[...],
        (((1,), (0,)), ((), ())), preferred_element_type=jnp.float32)


@functools.lru_cache(maxsize=None)
def _matmul_call(m, k, n):
    del k  # kept in cache key only
    return pl.pallas_call(
        _matmul_kernel,
        out_shape=jax.ShapeDtypeStruct((m, n), jnp.float32),
        in_specs=[_VMEM_FULL, _VMEM_FULL],
        out_specs=_VMEM_FULL,
    )


def conv1d_proj(x_btc, w_flat, ksize):
    # x_btc: (B, T, Cin); w_flat: (ksize*Cin, Cout) bf16, row index = tau*Cin + ci
    B, T, Cin = x_btc.shape
    Cout = w_flat.shape[1]
    p = (ksize - 1) // 2
    t_out = T + 2 * p - ksize + 1
    xp = jnp.pad(x_btc, ((0, 0), (p, p), (0, 0)))
    cols = jnp.stack([xp[:, tau:tau + t_out, :] for tau in range(ksize)], axis=2)
    cols = cols.reshape(B * t_out, ksize * Cin)
    out = _matmul_call(B * t_out, ksize * Cin, Cout)(cols, w_flat)
    return out.reshape(B, t_out, Cout)


# ----------------------------------------------------------------------------
# Positional embedding (fairseq sinusoidal, padding_idx=0 -> positions 1..T)
# ----------------------------------------------------------------------------

def sinusoidal_pos_emb(T, E):
    # TODO(synk): fairseq make_positions treats exact-0.0 feature values as padding;
    #             we assume no input value is exactly zero (true for random floats).
    half = E // 2
    freq = jnp.exp(jnp.arange(half, dtype=jnp.float32)
                   * (-math.log(10000.0) / (half - 1)))
    pos = jnp.arange(1, T + 1, dtype=jnp.float32)[:, None]
    ang = pos * freq[None, :]
    emb = jnp.concatenate([jnp.sin(ang), jnp.cos(ang)], axis=1)
    if E % 2 == 1:
        emb = jnp.concatenate([emb, jnp.zeros((T, 1), jnp.float32)], axis=1)
    return emb  # (T, E)


# ----------------------------------------------------------------------------
# Parameter initialization (deterministic synthetic; matmul weights (K, N) bf16)
# ----------------------------------------------------------------------------

def _rand_w(key, shape):
    return (0.02 * jax.random.normal(key, shape, jnp.float32)).astype(jnp.bfloat16)


def init_group_params(key, n_enc, n_layers, e, cross):
    hidden = 4 * e
    ks = jax.random.split(key, 8)
    vec = jnp.zeros((n_enc, n_layers, _NVEC, e), jnp.float32)
    vec = vec.at[:, :, 0].set(1.0)   # ln0 weight
    vec = vec.at[:, :, 3].set(1.0)   # ln1 weight
    vec = vec.at[:, :, 2].set(0.02 * jax.random.normal(ks[5], (n_enc, n_layers, e)))
    vec = vec.at[:, :, 5].set(0.02 * jax.random.normal(ks[6], (n_enc, n_layers, e)))
    p = dict(
        wo=_rand_w(ks[0], (n_enc, n_layers, e, e)),
        fc1_w=_rand_w(ks[1], (n_enc, n_layers, e, hidden)),
        fc2_w=_rand_w(ks[2], (n_enc, n_layers, hidden, e)),
        vec=vec,
        bqkv=0.02 * jax.random.normal(ks[7], (n_enc, n_layers, 1, 3 * e), jnp.float32),
        fc1_b=jnp.zeros((n_enc, n_layers, 1, hidden), jnp.float32),
        lnf=jnp.stack([jnp.ones((n_enc, e), jnp.float32),
                       jnp.zeros((n_enc, e), jnp.float32)], axis=1),   # (n_enc, 2, e)
    )
    if cross:
        p['wq'] = _rand_w(ks[3], (n_enc, n_layers, e, e))
        p['wkv'] = _rand_w(ks[4], (n_enc, n_layers, e, 2 * e))
    else:
        p['wqkv'] = _rand_w(ks[3], (n_enc, n_layers, e, 3 * e))
    return p


def init_conv_w(key, cout, cin, ksize):
    w = 0.02 * jax.random.normal(key, (cout, cin, ksize), jnp.float32)
    # flatten to (k*Cin, Cout) with row index tau*Cin + ci (matches im2col order)
    return w.transpose(2, 1, 0).reshape(ksize * cin, cout).astype(jnp.bfloat16)


# ----------------------------------------------------------------------------
# CM_ATTN config + forward
# ----------------------------------------------------------------------------

class Config:
    seq_lens = (8, 8, 8)
    feature_dims = (20, 5, 12)             # orig_d_l, orig_d_a, orig_d_v
    dst_feature_dim_nheads = (32, 4)       # d, nheads
    nlevels = 2
    num_temporal_head = 2
    conv1d_kernel_size_l = 5
    conv1d_kernel_size_a = 1
    conv1d_kernel_size_v = 3
    attn_mask = False                      # TODO(synk): causal attn_mask=True not implemented


def init_cm_attn_params(key, cfg):
    d, _ = cfg.dst_feature_dim_nheads
    od_l, od_a, od_v = cfg.feature_dims
    nlv = cfg.nlevels
    ks = jax.random.split(key, 6)
    return dict(
        proj_l_w=init_conv_w(ks[0], d, od_l, cfg.conv1d_kernel_size_l),
        proj_a_w=init_conv_w(ks[1], d, od_a, cfg.conv1d_kernel_size_a),
        proj_v_w=init_conv_w(ks[2], d, od_v, cfg.conv1d_kernel_size_v),
        # order: [l_with_a, l_with_v, a_with_l, a_with_v, v_with_l, v_with_a]
        cross=init_group_params(ks[3], 6, nlv, d, cross=True),
        # order: [l_mem, a_mem, v_mem]
        mem=init_group_params(ks[4], 3, max(nlv, 3), d, cross=False),
        # order: [l_final, a_final, v_final]; embed dim = seq_len
        final=init_group_params(ks[5], 3, max(nlv, 3), cfg.seq_lens[0], cross=False),
    )


def cm_attn_forward(params, text, audio, vision, *, cfg):
    d, nheads = cfg.dst_feature_dim_nheads
    od_l, od_a, od_v = cfg.feature_dims
    T_l, T_a, T_v = cfg.seq_lens
    B = text.shape[0]

    # TODO(synk): grouped-encoder kernels assume equal seq lens across modalities
    # (true for this config); unequal lengths would need per-modality calls.
    assert T_l == T_a == T_v

    # text_dropout / embed_dropout are identities in eval mode.
    def project(x_btf, w_flat, ksize, orig_d):
        return x_btf if orig_d == d else conv1d_proj(x_btf, w_flat, ksize)

    proj_l = project(text, params['proj_l_w'], cfg.conv1d_kernel_size_l, od_l)
    proj_a = project(audio, params['proj_a_w'], cfg.conv1d_kernel_size_a, od_a)
    proj_v = project(vision, params['proj_v_w'], cfg.conv1d_kernel_size_v, od_v)

    def prep(x_btd):
        # (B, T, d) -> (T, B, d), scale + sinusoidal positions, flatten rows t*B + b
        x = jnp.transpose(x_btd, (1, 0, 2))
        T = x.shape[0]
        x = math.sqrt(d) * x + sinusoidal_pos_emb(T, d)[:, None, :]
        return x.reshape(T * B, d)

    sl, sa, sv = prep(proj_l), prep(proj_a), prep(proj_v)

    # ---- 6 cross-modal encoders in one fused, layer-gridded pallas_call ----
    xq_c = jnp.stack([sl, sl, sa, sa, sv, sv])
    xkv_c = jnp.stack([sa, sv, sl, sv, sl, sa])
    out_c = run_cross_group(params['cross'], xq_c, xkv_c, nheads, B)

    # ---- 3 self-attention ("mem") encoders in one fused call ----
    xq_m = jnp.stack([sl, sa, sv])
    out_m = run_self_group(params['mem'], xq_m, nheads, B, n_time=None)

    def unflat(x2, T):
        return x2.reshape(T, B, d)

    h_l_with_as, h_l_with_vs = unflat(out_c[0], T_l), unflat(out_c[1], T_l)
    h_a_with_ls, h_a_with_vs = unflat(out_c[2], T_a), unflat(out_c[3], T_a)
    h_v_with_ls, h_v_with_as = unflat(out_c[4], T_v), unflat(out_c[5], T_v)
    h_l, h_a, h_v = unflat(out_m[0], T_l), unflat(out_m[1], T_a), unflat(out_m[2], T_v)

    h_ls = jnp.concatenate([h_l, h_l_with_as, h_l_with_vs], axis=2)   # (T, B, 3d)
    h_as = jnp.concatenate([h_a, h_a_with_ls, h_a_with_vs], axis=2)
    h_vs = jnp.concatenate([h_v, h_v_with_ls, h_v_with_as], axis=2)

    # ---- 3 temporal ("final") encoders: seq = B, batch = 3d, embed = T, no positions ----
    def prep_final(h_tb3, T):
        x = jnp.transpose(h_tb3, (1, 2, 0))                  # (B, 3d, T)
        return (math.sqrt(T) * x).reshape(B * 3 * d, T)      # rows ordered t*(3d) + b

    xf = jnp.stack([prep_final(h_ls, T_l), prep_final(h_as, T_a), prep_final(h_vs, T_v)])
    out_f = run_self_group(params['final'], xf, cfg.num_temporal_head, 3 * d, n_time=B)

    def post_final(y2, T):
        return jnp.transpose(y2.reshape(B, 3 * d, T), (0, 2, 1))   # (B, T, 3d)

    return (jnp.transpose(h_ls, (1, 0, 2)),
            jnp.transpose(h_as, (1, 0, 2)),
            jnp.transpose(h_vs, (1, 0, 2)),
            post_final(out_f[0], T_l),
            post_final(out_f[1], T_a),
            post_final(out_f[2], T_v))


# ----------------------------------------------------------------------------
# Demo
# ----------------------------------------------------------------------------

if __name__ == "__main__":
    cfg = Config()
    B = 2
    key = jax.random.PRNGKey(0)
    k_par, k_l, k_a, k_v = jax.random.split(key, 4)

    params = init_cm_attn_params(k_par, cfg)
    text = jax.random.normal(k_l, (B, cfg.seq_lens[0], cfg.feature_dims[0]), jnp.float32)
    audio = jax.random.normal(k_a, (B, cfg.seq_lens[1], cfg.feature_dims[1]), jnp.float32)
    vision = jax.random.normal(k_v, (B, cfg.seq_lens[2], cfg.feature_dims[2]), jnp.float32)

    # One jit over the entire forward; only 6 pallas_calls are dispatched inside it.
    forward = jax.jit(functools.partial(cm_attn_forward, cfg=cfg))

    outs = forward(params, text, audio, vision)
    outs = jax.block_until_ready(outs)

    d = cfg.dst_feature_dim_nheads[0]
    assert outs[0].shape == (B, cfg.seq_lens[0], 3 * d)
    assert outs[1].shape == (B, cfg.seq_lens[1], 3 * d)
    assert outs[2].shape == (B, cfg.seq_lens[2], 3 * d)
    assert outs[3].shape == (B, cfg.seq_lens[0], 3 * d)
    assert outs[4].shape == (B, cfg.seq_lens[1], 3 * d)
    assert outs[5].shape == (B, cfg.seq_lens[2], 3 * d)
    assert all(bool(jnp.isfinite(o).all()) for o in outs)
    print("KERNEL_OK")
</pallas_src>

<mosaic_0001>
module attributes {stable_mosaic.version = 11 : i64} {
  func.func @_matmul_kernel(%arg0: memref<16x5xf32, #tpu.memory_space<vmem>>, %arg1: memref<5x32xbf16, #tpu.memory_space<vmem>>, %arg2: memref<16x32xf32, #tpu.memory_space<vmem>>) attributes {dimension_semantics = [], scalar_prefetch = 0 : i64, scratch_operands = 0 : i64, tpu.core_type = #tpu.core_type<tc>} {
    %c0 = arith.constant 0 : index
    %c0_0 = arith.constant 0 : index
    %0 = vector.load %arg0[%c0, %c0_0] : memref<16x5xf32, #tpu.memory_space<vmem>>, vector<16x5xf32>
    %1 = arith.truncf %0 : vector<16x5xf32> to vector<16x5xbf16>
    %c0_1 = arith.constant 0 : index
    %c0_2 = arith.constant 0 : index
    %2 = vector.load %arg1[%c0_1, %c0_2] : memref<5x32xbf16, #tpu.memory_space<vmem>>, vector<5x32xbf16>
    %cst = arith.constant dense<0.000000e+00> : vector<16x32xf32>
    %3 = tpu.matmul %1, %2, %cst {dimension_numbers = #tpu.dot_dimension_numbers<[1], [0], [0], [1], [0, 0, 1, 1], [], []>} : vector<16x5xbf16>, vector<5x32xbf16>, vector<16x32xf32> -> vector<16x32xf32>
    %c0_3 = arith.constant 0 : index
    %c0_4 = arith.constant 0 : index
    %4 = vector.load %arg2[%c0_3, %c0_4] : memref<16x32xf32, #tpu.memory_space<vmem>>, vector<16x32xf32>
    tpu.vector_store %arg2[%c0_3, %c0_4], %3 {strides = array<i32>} : memref<16x32xf32, #tpu.memory_space<vmem>>, vector<16x32xf32>,
    return
  }
}

module attributes {stable_mosaic.version = 11 : i64} {
  func.func @_matmul_kernel(%arg0: memref<16x36xf32, #tpu.memory_space<vmem>>, %arg1: memref<36x32xbf16, #tpu.memory_space<vmem>>, %arg2: memref<16x32xf32, #tpu.memory_space<vmem>>) attributes {dimension_semantics = [], scalar_prefetch = 0 : i64, scratch_operands = 0 : i64, tpu.core_type = #tpu.core_type<tc>} {
    %c0 = arith.constant 0 : index
    %c0_0 = arith.constant 0 : index
    %0 = vector.load %arg0[%c0, %c0_0] : memref<16x36xf32, #tpu.memory_space<vmem>>, vector<16x36xf32>
    %1 = arith.truncf %0 : vector<16x36xf32> to vector<16x36xbf16>
    %c0_1 = arith.constant 0 : index
    %c0_2 = arith.constant 0 : index
    %2 = vector.load %arg1[%c0_1, %c0_2] : memref<36x32xbf16, #tpu.memory_space<vmem>>, vector<36x32xbf16>
    %cst = arith.constant dense<0.000000e+00> : vector<16x32xf32>
    %3 = tpu.matmul %1, %2, %cst {dimension_numbers = #tpu.dot_dimension_numbers<[1], [0], [0], [1], [0, 0, 1, 1], [], []>} : vector<16x36xbf16>, vector<36x32xbf16>, vector<16x32xf32> -> vector<16x32xf32>
    %c0_3 = arith.constant 0 : index
    %c0_4 = arith.constant 0 : index
    %4 = vector.load %arg2[%c0_3, %c0_4] : memref<16x32xf32, #tpu.memory_space<vmem>>, vector<16x32xf32>
    tpu.vector_store %arg2[%c0_3, %c0_4], %3 {strides = array<i32>} : memref<16x32xf32, #tpu.memory_space<vmem>>, vector<16x32xf32>,
    return
  }
}

module attributes {stable_mosaic.version = 11 : i64} {
  func.func @_matmul_kernel(%arg0: memref<16x100xf32, #tpu.memory_space<vmem>>, %arg1: memref<100x32xbf16, #tpu.memory_space<vmem>>, %arg2: memref<16x32xf32, #tpu.memory_space<vmem>>) attributes {dimension_semantics = [], scalar_prefetch = 0 : i64, scratch_operands = 0 : i64, tpu.core_type = #tpu.core_type<tc>} {
    %c0 = arith.constant 0 : index
    %c0_0 = arith.constant 0 : index
    %0 = vector.load %arg0[%c0, %c0_0] : memref<16x100xf32, #tpu.memory_space<vmem>>, vector<16x100xf32>
    %1 = arith.truncf %0 : vector<16x100xf32> to vector<16x100xbf16>
    %c0_1 = arith.constant 0 : index
    %c0_2 = arith.constant 0 : index
    %2 = vector.load %arg1[%c0_1, %c0_2] : memref<100x32xbf16, #tpu.memory_space<vmem>>, vector<100x32xbf16>
    %cst = arith.constant dense<0.000000e+00> : vector<16x32xf32>
    %3 = tpu.matmul %1, %2, %cst {dimension_numbers = #tpu.dot_dimension_numbers<[1], [0], [0], [1], [0, 0, 1, 1], [], []>} : vector<16x100xbf16>, vector<100x32xbf16>, vector<16x32xf32> -> vector<16x32xf32>
    %c0_3 = arith.constant 0 : index
    %c0_4 = arith.constant 0 : index
    %4 = vector.load %arg2[%c0_3, %c0_4] : memref<16x32xf32, #tpu.memory_space<vmem>>, vector<16x32xf32>
    tpu.vector_store %arg2[%c0_3, %c0_4], %3 {strides = array<i32>} : memref<16x32xf32, #tpu.memory_space<vmem>>, vector<16x32xf32>,
    return
  }
}

module attributes {stable_mosaic.version = 11 : i64} {
  func.func @_self_group_kernel(%arg0: i32, %arg1: i32, %arg2: memref<1x16x32xf32, #tpu.memory_space<vmem>>, %arg3: memref<1x1x32x96xbf16, #tpu.memory_space<vmem>>, %arg4: memref<1x1x32x32xbf16, #tpu.memory_space<vmem>>, %arg5: memref<1x1x32x128xbf16, #tpu.memory_space<vmem>>, %arg6: memref<1x1x128x32xbf16, #tpu.memory_space<vmem>>, %arg7: memref<1x1x8x32xf32, #tpu.memory_space<vmem>>, %arg8: memref<1x1x1x96xf32, #tpu.memory_space<vmem>>, %arg9: memref<1x1x1x128xf32, #tpu.memory_space<vmem>>, %arg10: memref<1x2x32xf32, #tpu.memory_space<vmem>>, %arg11: memref<1x16x32xf32, #tpu.memory_space<vmem>>, %arg12: memref<16x32xf32, #tpu.memory_space<vmem>>) attributes {dimension_semantics = [#tpu.dimension_semantics<parallel>, #tpu.dimension_semantics<arbitrary>], iteration_bounds = array<i64: 3, 3>, scalar_prefetch = 0 : i64, scratch_operands = 1 : i64, tpu.core_type = #tpu.core_type<tc>, window_params = [{transform_indices = @transform_0, window_bounds = array<i64: 1, 16, 32>}, {transform_indices = @transform_1, window_bounds = array<i64: 1, 1, 32, 96>}, {transform_indices = @transform_2, window_bounds = array<i64: 1, 1, 32, 32>}, {transform_indices = @transform_3, window_bounds = array<i64: 1, 1, 32, 128>}, {transform_indices = @transform_4, window_bounds = array<i64: 1, 1, 128, 32>}, {transform_indices = @transform_5, window_bounds = array<i64: 1, 1, 8, 32>}, {transform_indices = @transform_6, window_bounds = array<i64: 1, 1, 1, 96>}, {transform_indices = @transform_7, window_bounds = array<i64: 1, 1, 1, 128>}, {transform_indices = @transform_8, window_bounds = array<i64: 1, 2, 32>}, {transform_indices = @transform_9, window_bounds = array<i64: 1, 16, 32>}]} {
    %c0_i32 = arith.constant 0 : i32
    %0 = arith.cmpi eq, %arg1, %c0_i32 : i32
    %1 = arith.extui %0 : i1 to i32
    %c0_i32_0 = arith.constant 0 : i32
    %2 = arith.cmpi ne, %1, %c0_i32_0 : i32
    scf.if %2 {
      %c0_81 = arith.constant 0 : index
      %c0_82 = arith.constant 0 : index
      %c0_83 = arith.constant 0 : index
      %217 = vector.load %arg2[%c0_81, %c0_82, %c0_83] : memref<1x16x32xf32, #tpu.memory_space<vmem>>, vector<1x16x32xf32>
      %218 = vector.shape_cast %217 : vector<1x16x32xf32> to vector<16x32xf32>
      %c0_84 = arith.constant 0 : index
      %c0_85 = arith.constant 0 : index
      %219 = vector.load %arg12[%c0_84, %c0_85] : memref<16x32xf32, #tpu.memory_space<vmem>>, vector<16x32xf32>
      tpu.vector_store %arg12[%c0_84, %c0_85], %218 {strides = array<i32>} : memref<16x32xf32, #tpu.memory_space<vmem>>, vector<16x32xf32>,
    } else {
    }
    %c0 = arith.constant 0 : index
    %c0_1 = arith.constant 0 : index
    %3 = vector.load %arg12[%c0, %c0_1] : memref<16x32xf32, #tpu.memory_space<vmem>>, vector<16x32xf32>
    %c0_2 = arith.constant 0 : index
    %c0_3 = arith.constant 0 : index
    %c0_4 = arith.constant 0 : index
    %c0_5 = arith.constant 0 : index
    %4 = vector.load %arg7[%c0_2, %c0_3, %c0_4, %c0_5] : memref<1x1x8x32xf32, #tpu.memory_space<vmem>>, vector<1x1x8x32xf32>
    %5 = vector.shape_cast %4 : vector<1x1x8x32xf32> to vector<8x32xf32>
    %6 = vector.extract_strided_slice %5 {offsets = [0, 0], sizes = [1, 32], strides = [1, 1]} : vector<8x32xf32> to vector<1x32xf32>
    %7 = vector.extract_strided_slice %5 {offsets = [1, 0], sizes = [1, 32], strides = [1, 1]} : vector<8x32xf32> to vector<1x32xf32>
    %cst = arith.constant dense<0.000000e+00> : vector<16xf32>
    %8 = vector.multi_reduction <add>, %3, %cst [1] : vector<16x32xf32> to vector<16xf32>
    %9 = vector.shape_cast %8 : vector<16xf32> to vector<16x1xf32>
    %cst_6 = arith.constant 3.200000e+01 : f32
    %10 = vector.broadcast %cst_6 : f32 to vector<16x1xf32>
    %11 = arith.divf %9, %10 : vector<16x1xf32>
    %12 = vector.broadcast %11 : vector<16x1xf32> to vector<16x32xf32>
    %13 = arith.subf %3, %12 : vector<16x32xf32>
    %14 = arith.mulf %13, %13 : vector<16x32xf32>
    %cst_7 = arith.constant dense<0.000000e+00> : vector<16xf32>
    %15 = vector.multi_reduction <add>, %14, %cst_7 [1] : vector<16x32xf32> to vector<16xf32>
    %16 = vector.shape_cast %15 : vector<16xf32> to vector<16x1xf32>
    %cst_8 = arith.constant 3.200000e+01 : f32
    %17 = vector.broadcast %cst_8 : f32 to vector<16x1xf32>
    %18 = arith.divf %16, %17 : vector<16x1xf32>
    %cst_9 = arith.constant 9.99999974E-6 : f32
    %19 = vector.broadcast %cst_9 : f32 to vector<16x1xf32>
    %20 = arith.addf %18, %19 : vector<16x1xf32>
    %21 = math.rsqrt %20 : vector<16x1xf32>
    %22 = vector.broadcast %21 : vector<16x1xf32> to vector<16x32xf32>
    %23 = arith.mulf %13, %22 : vector<16x32xf32>
    %24 = vector.broadcast %6 : vector<1x32xf32> to vector<16x32xf32>
    %25 = arith.mulf %23, %24 : vector<16x32xf32>
    %26 = vector.broadcast %7 : vector<1x32xf32> to vector<16x32xf32>
    %27 = arith.addf %25, %26 : vector<16x32xf32>
    %c0_10 = arith.constant 0 : index
    %c0_11 = arith.constant 0 : index
    %c0_12 = arith.constant 0 : index
    %c0_13 = arith.constant 0 : index
    %28 = vector.load %arg3[%c0_10, %c0_11, %c0_12, %c0_13] : memref<1x1x32x96xbf16, #tpu.memory_space<vmem>>, vector<1x1x32x96xbf16>
    %29 = vector.shape_cast %28 : vector<1x1x32x96xbf16> to vector<32x96xbf16>
    %30 = arith.truncf %27 : vector<16x32xf32> to vector<16x32xbf16>
    %cst_14 = arith.constant dense<0.000000e+00> : vector<16x96xf32>
    %31 = tpu.matmul %30, %29, %cst_14 {dimension_numbers = #tpu.dot_dimension_numbers<[1], [0], [0], [1], [0, 0, 1, 1], [], []>} : vector<16x32xbf16>, vector<32x96xbf16>, vector<16x96xf32> -> vector<16x96xf32>
    %c0_15 = arith.constant 0 : index
    %c0_16 = arith.constant 0 : index
    %c0_17 = arith.constant 0 : index
    %c0_18 = arith.constant 0 : index
    %32 = vector.load %arg8[%c0_15, %c0_16, %c0_17, %c0_18] : memref<1x1x1x96xf32, #tpu.memory_space<vmem>>, vector<1x1x1x96xf32>
    %33 = vector.shape_cast %32 : vector<1x1x1x96xf32> to vector<1x96xf32>
    %34 = vector.broadcast %33 : vector<1x96xf32> to vector<16x96xf32>
    %35 = arith.addf %31, %34 : vector<16x96xf32>
    %36 = vector.extract_strided_slice %35 {offsets = [0, 0], sizes = [16, 32], strides = [1, 1]} : vector<16x96xf32> to vector<16x32xf32>
    %cst_19 = arith.constant 0.353553385 : f32
    %37 = vector.broadcast %cst_19 : f32 to vector<16x32xf32>
    %38 = arith.mulf %36, %37 : vector<16x32xf32>
    %39 = vector.extract_strided_slice %35 {offsets = [0, 32], sizes = [16, 32], strides = [1, 1]} : vector<16x96xf32> to vector<16x32xf32>
    %40 = vector.extract_strided_slice %35 {offsets = [0, 64], sizes = [16, 32], strides = [1, 1]} : vector<16x96xf32> to vector<16x32xf32>
    %c0_20 = arith.constant 0 : index
    %c0_21 = arith.constant 0 : index
    %c0_22 = arith.constant 0 : index
    %c0_23 = arith.constant 0 : index
    %41 = vector.load %arg4[%c0_20, %c0_21, %c0_22, %c0_23] : memref<1x1x32x32xbf16, #tpu.memory_space<vmem>>, vector<1x1x32x32xbf16>
    %42 = vector.shape_cast %41 : vector<1x1x32x32xbf16> to vector<32x32xbf16>
    %43 = tpu.iota {dimensions = array<i32: 0>} : vector<16x16xi32>
    %c2_i32 = arith.constant 2 : i32
    %c0_i32_24 = arith.constant 0 : i32
    %44 = arith.cmpi eq, %c2_i32, %c0_i32_24 : i32
    %c1_i32 = arith.constant 1 : i32
    %45 = arith.select %44, %c1_i32, %c2_i32 : i32
    %46 = vector.broadcast %45 : i32 to vector<16x16xi32>
    %47 = arith.remsi %43, %46 : vector<16x16xi32>
    %c0_i32_25 = arith.constant 0 : i32
    %48 = vector.broadcast %c0_i32_25 : i32 to vector<16x16xi32>
    %49 = arith.cmpi ne, %47, %48 : vector<16x16xi32>
    %c0_i32_26 = arith.constant 0 : i32
    %50 = vector.broadcast %c0_i32_26 : i32 to vector<16x16xi32>
    %51 = arith.cmpi slt, %47, %50 : vector<16x16xi32>
    %c0_i32_27 = arith.constant 0 : i32
    %52 = arith.cmpi slt, %45, %c0_i32_27 : i32
    %53 = vector.broadcast %52 : i1 to vector<16x16xi1>
    %54 = vector.broadcast %53 : vector<16x16xi1> to vector<16x16xi1>
    %55 = arith.xori %51, %54 : vector<16x16xi1>
    %56 = arith.andi %55, %49 : vector<16x16xi1>
    %57 = vector.broadcast %45 : i32 to vector<16x16xi32>
    %58 = arith.addi %47, %57 : vector<16x16xi32>
    %59 = arith.select %56, %58, %47 : vector<16x16xi1>, vector<16x16xi32>
    %60 = tpu.iota {dimensions = array<i32: 1>} : vector<16x16xi32>
    %c2_i32_28 = arith.constant 2 : i32
    %c0_i32_29 = arith.constant 0 : i32
    %61 = arith.cmpi eq, %c2_i32_28, %c0_i32_29 : i32
    %c1_i32_30 = arith.constant 1 : i32
    %62 = arith.select %61, %c1_i32_30, %c2_i32_28 : i32
    %63 = vector.broadcast %62 : i32 to vector<16x16xi32>
    %64 = arith.remsi %60, %63 : vector<16x16xi32>
    %c0_i32_31 = arith.constant 0 : i32
    %65 = vector.broadcast %c0_i32_31 : i32 to vector<16x16xi32>
    %66 = arith.cmpi ne, %64, %65 : vector<16x16xi32>
    %c0_i32_32 = arith.constant 0 : i32
    %67 = vector.broadcast %c0_i32_32 : i32 to vector<16x16xi32>
    %68 = arith.cmpi slt, %64, %67 : vector<16x16xi32>
    %c0_i32_33 = arith.constant 0 : i32
    %69 = arith.cmpi slt, %62, %c0_i32_33 : i32
    %70 = vector.broadcast %69 : i1 to vector<16x16xi1>
    %71 = vector.broadcast %70 : vector<16x16xi1> to vector<16x16xi1>
    %72 = arith.xori %68, %71 : vector<16x16xi1>
    %73 = arith.andi %72, %66 : vector<16x16xi1>
    %74 = vector.broadcast %62 : i32 to vector<16x16xi32>
    %75 = arith.addi %64, %74 : vector<16x16xi32>
    %76 = arith.select %73, %75, %64 : vector<16x16xi1>, vector<16x16xi32>
    %77 = arith.cmpi eq, %59, %76 : vector<16x16xi32>
    %cst_34 = arith.constant 0.000000e+00 : f32
    %cst_35 = arith.constant -1.000000e+09 : f32
    %78 = vector.broadcast %cst_34 : f32 to vector<16x16xf32>
    %79 = vector.broadcast %cst_35 : f32 to vector<16x16xf32>
    %80 = arith.select %77, %78, %79 : vector<16x16xi1>, vector<16x16xf32>
    %81 = arith.truncf %38 : vector<16x32xf32> to vector<16x32xbf16>
    %82 = arith.truncf %39 : vector<16x32xf32> to vector<16x32xbf16>
    %83 = arith.truncf %40 : vector<16x32xf32> to vector<16x32xbf16>
    %cst_36 = arith.constant 0.000000e+00 : f32
    %84 = vector.broadcast %cst_36 : f32 to vector<16x32xf32>
    %85 = vector.extract_strided_slice %81 {offsets = [0, 0], sizes = [16, 8], strides = [1, 1]} : vector<16x32xbf16> to vector<16x8xbf16>
    %86 = vector.extract_strided_slice %82 {offsets = [0, 0], sizes = [16, 8], strides = [1, 1]} : vector<16x32xbf16> to vector<16x8xbf16>
    %cst_37 = arith.constant dense<0.000000e+00> : vector<16x16xf32>
    %87 = tpu.matmul %85, %86, %cst_37 {dimension_numbers = #tpu.dot_dimension_numbers<[1], [1], [0], [0], [0, 0, 1, 0], [], []>} : vector<16x8xbf16>, vector<16x8xbf16>, vector<16x16xf32> -> vector<16x16xf32>
    %88 = arith.addf %87, %80 : vector<16x16xf32>
    %cst_38 = arith.constant dense<0xFF800000> : vector<16xf32>
    %89 = vector.multi_reduction <maximumf>, %88, %cst_38 [1] : vector<16x16xf32> to vector<16xf32>
    %90 = vector.shape_cast %89 : vector<16xf32> to vector<16x1xf32>
    %91 = vector.broadcast %90 : vector<16x1xf32> to vector<16x16xf32>
    %92 = arith.subf %88, %91 : vector<16x16xf32>
    %93 = math.exp %92 : vector<16x16xf32>
    %cst_39 = arith.constant dense<0.000000e+00> : vector<16xf32>
    %94 = vector.multi_reduction <add>, %93, %cst_39 [1] : vector<16x16xf32> to vector<16xf32>
    %95 = vector.shape_cast %94 : vector<16xf32> to vector<16x1xf32>
    %96 = tpu.reciprocal %95 : vector<16x1xf32> -> vector<16x1xf32>
    %97 = vector.broadcast %96 : vector<16x1xf32> to vector<16x16xf32>
    %98 = arith.mulf %93, %97 : vector<16x16xf32>
    %99 = arith.truncf %98 : vector<16x16xf32> to vector<16x16xbf16>
    %100 = vector.extract_strided_slice %83 {offsets = [0, 0], sizes = [16, 8], strides = [1, 1]} : vector<16x32xbf16> to vector<16x8xbf16>
    %cst_40 = arith.constant dense<0.000000e+00> : vector<16x8xf32>
    %101 = tpu.matmul %99, %100, %cst_40 {dimension_numbers = #tpu.dot_dimension_numbers<[1], [0], [0], [1], [0, 0, 1, 1], [], []>} : vector<16x16xbf16>, vector<16x8xbf16>, vector<16x8xf32> -> vector<16x8xf32>
    %102 = vector.extract_strided_slice %42 {offsets = [0, 0], sizes = [8, 32], strides = [1, 1]} : vector<32x32xbf16> to vector<8x32xbf16>
    %103 = arith.truncf %101 : vector<16x8xf32> to vector<16x8xbf16>
    %cst_41 = arith.constant dense<0.000000e+00> : vector<16x32xf32>
    %104 = tpu.matmul %103, %102, %cst_41 {dimension_numbers = #tpu.dot_dimension_numbers<[1], [0], [0], [1], [0, 0, 1, 1], [], []>} : vector<16x8xbf16>, vector<8x32xbf16>, vector<16x32xf32> -> vector<16x32xf32>
    %105 = arith.addf %84, %104 : vector<16x32xf32>
    %106 = vector.extract_strided_slice %81 {offsets = [0, 8], sizes = [16, 8], strides = [1, 1]} : vector<16x32xbf16> to vector<16x8xbf16>
    %107 = vector.extract_strided_slice %82 {offsets = [0, 8], sizes = [16, 8], strides = [1, 1]} : vector<16x32xbf16> to vector<16x8xbf16>
    %cst_42 = arith.constant dense<0.000000e+00> : vector<16x16xf32>
    %108 = tpu.matmul %106, %107, %cst_42 {dimension_numbers = #tpu.dot_dimension_numbers<[1], [1], [0], [0], [0, 0, 1, 0], [], []>} : vector<16x8xbf16>, vector<16x8xbf16>, vector<16x16xf32> -> vector<16x16xf32>
    %109 = arith.addf %108, %80 : vector<16x16xf32>
    %cst_43 = arith.constant dense<0xFF800000> : vector<16xf32>
    %110 = vector.multi_reduction <maximumf>, %109, %cst_43 [1] : vector<16x16xf32> to vector<16xf32>
    %111 = vector.shape_cast %110 : vector<16xf32> to vector<16x1xf32>
    %112 = vector.broadcast %111 : vector<16x1xf32> to vector<16x16xf32>
    %113 = arith.subf %109, %112 : vector<16x16xf32>
    %114 = math.exp %113 : vector<16x16xf32>
    %cst_44 = arith.constant dense<0.000000e+00> : vector<16xf32>
    %115 = vector.multi_reduction <add>, %114, %cst_44 [1] : vector<16x16xf32> to vector<16xf32>
    %116 = vector.shape_cast %115 : vector<16xf32> to vector<16x1xf32>
    %117 = tpu.reciprocal %116 : vector<16x1xf32> -> vector<16x1xf32>
    %118 = vector.broadcast %117 : vector<16x1xf32> to vector<16x16xf32>
    %119 = arith.mulf %114, %118 : vector<16x16xf32>
    %120 = arith.truncf %119 : vector<16x16xf32> to vector<16x16xbf16>
    %121 = vector.extract_strided_slice %83 {offsets = [0, 8], sizes = [16, 8], strides = [1, 1]} : vector<16x32xbf16> to vector<16x8xbf16>
    %cst_45 = arith.constant dense<0.000000e+00> : vector<16x8xf32>
    %122 = tpu.matmul %120, %121, %cst_45 {dimension_numbers = #tpu.dot_dimension_numbers<[1], [0], [0], [1], [0, 0, 1, 1], [], []>} : vector<16x16xbf16>, vector<16x8xbf16>, vector<16x8xf32> -> vector<16x8xf32>
    %123 = vector.extract_strided_slice %42 {offsets = [8, 0], sizes = [8, 32], strides = [1, 1]} : vector<32x32xbf16> to vector<8x32xbf16>
    %124 = arith.truncf %122 : vector<16x8xf32> to vector<16x8xbf16>
    %cst_46 = arith.constant dense<0.000000e+00> : vector<16x32xf32>
    %125 = tpu.matmul %124, %123, %cst_46 {dimension_numbers = #tpu.dot_dimension_numbers<[1], [0], [0], [1], [0, 0, 1, 1], [], []>} : vector<16x8xbf16>, vector<8x32xbf16>, vector<16x32xf32> -> vector<16x32xf32>
    %126 = arith.addf %105, %125 : vector<16x32xf32>
    %127 = vector.extract_strided_slice %81 {offsets = [0, 16], sizes = [16, 8], strides = [1, 1]} : vector<16x32xbf16> to vector<16x8xbf16>
    %128 = vector.extract_strided_slice %82 {offsets = [0, 16], sizes = [16, 8], strides = [1, 1]} : vector<16x32xbf16> to vector<16x8xbf16>
    %cst_47 = arith.constant dense<0.000000e+00> : vector<16x16xf32>
    %129 = tpu.matmul %127, %128, %cst_47 {dimension_numbers = #tpu.dot_dimension_numbers<[1], [1], [0], [0], [0, 0, 1, 0], [], []>} : vector<16x8xbf16>, vector<16x8xbf16>, vector<16x16xf32> -> vector<16x16xf32>
    %130 = arith.addf %129, %80 : vector<16x16xf32>
    %cst_48 = arith.constant dense<0xFF800000> : vector<16xf32>
    %131 = vector.multi_reduction <maximumf>, %130, %cst_48 [1] : vector<16x16xf32> to vector<16xf32>
    %132 = vector.shape_cast %131 : vector<16xf32> to vector<16x1xf32>
    %133 = vector.broadcast %132 : vector<16x1xf32> to vector<16x16xf32>
    %134 = arith.subf %130, %133 : vector<16x16xf32>
    %135 = math.exp %134 : vector<16x16xf32>
    %cst_49 = arith.constant dense<0.000000e+00> : vector<16xf32>
    %136 = vector.multi_reduction <add>, %135, %cst_49 [1] : vector<16x16xf32> to vector<16xf32>
    %137 = vector.shape_cast %136 : vector<16xf32> to vector<16x1xf32>
    %138 = tpu.reciprocal %137 : vector<16x1xf32> -> vector<16x1xf32>
    %139 = vector.broadcast %138 : vector<16x1xf32> to vector<16x16xf32>
    %140 = arith.mulf %135, %139 : vector<16x16xf32>
    %141 = arith.truncf %140 : vector<16x16xf32> to vector<16x16xbf16>
    %142 = vector.extract_strided_slice %83 {offsets = [0, 16], sizes = [16, 8], strides = [1, 1]} : vector<16x32xbf16> to vector<16x8xbf16>
    %cst_50 = arith.constant dense<0.000000e+00> : vector<16x8xf32>
    %143 = tpu.matmul %141, %142, %cst_50 {dimension_numbers = #tpu.dot_dimension_numbers<[1], [0], [0], [1], [0, 0, 1, 1], [], []>} : vector<16x16xbf16>, vector<16x8xbf16>, vector<16x8xf32> -> vector<16x8xf32>
    %144 = vector.extract_strided_slice %42 {offsets = [16, 0], sizes = [8, 32], strides = [1, 1]} : vector<32x32xbf16> to vector<8x32xbf16>
    %145 = arith.truncf %143 : vector<16x8xf32> to vector<16x8xbf16>
    %cst_51 = arith.constant dense<0.000000e+00> : vector<16x32xf32>
    %146 = tpu.matmul %145, %144, %cst_51 {dimension_numbers = #tpu.dot_dimension_numbers<[1], [0], [0], [1], [0, 0, 1, 1], [], []>} : vector<16x8xbf16>, vector<8x32xbf16>, vector<16x32xf32> -> vector<16x32xf32>
    %147 = arith.addf %126, %146 : vector<16x32xf32>
    %148 = vector.extract_strided_slice %81 {offsets = [0, 24], sizes = [16, 8], strides = [1, 1]} : vector<16x32xbf16> to vector<16x8xbf16>
    %149 = vector.extract_strided_slice %82 {offsets = [0, 24], sizes = [16, 8], strides = [1, 1]} : vector<16x32xbf16> to vector<16x8xbf16>
    %cst_52 = arith.constant dense<0.000000e+00> : vector<16x16xf32>
    %150 = tpu.matmul %148, %149, %cst_52 {dimension_numbers = #tpu.dot_dimension_numbers<[1], [1], [0], [0], [0, 0, 1, 0], [], []>} : vector<16x8xbf16>, vector<16x8xbf16>, vector<16x16xf32> -> vector<16x16xf32>
    %151 = arith.addf %150, %80 : vector<16x16xf32>
    %cst_53 = arith.constant dense<0xFF800000> : vector<16xf32>
    %152 = vector.multi_reduction <maximumf>, %151, %cst_53 [1] : vector<16x16xf32> to vector<16xf32>
    %153 = vector.shape_cast %152 : vector<16xf32> to vector<16x1xf32>
    %154 = vector.broadcast %153 : vector<16x1xf32> to vector<16x16xf32>
    %155 = arith.subf %151, %154 : vector<16x16xf32>
    %156 = math.exp %155 : vector<16x16xf32>
    %cst_54 = arith.constant dense<0.000000e+00> : vector<16xf32>
    %157 = vector.multi_reduction <add>, %156, %cst_54 [1] : vector<16x16xf32> to vector<16xf32>
    %158 = vector.shape_cast %157 : vector<16xf32> to vector<16x1xf32>
    %159 = tpu.reciprocal %158 : vector<16x1xf32> -> vector<16x1xf32>
    %160 = vector.broadcast %159 : vector<16x1xf32> to vector<16x16xf32>
    %161 = arith.mulf %156, %160 : vector<16x16xf32>
    %162 = arith.truncf %161 : vector<16x16xf32> to vector<16x16xbf16>
    %163 = vector.extract_strided_slice %83 {offsets = [0, 24], sizes = [16, 8], strides = [1, 1]} : vector<16x32xbf16> to vector<16x8xbf16>
    %cst_55 = arith.constant dense<0.000000e+00> : vector<16x8xf32>
    %164 = tpu.matmul %162, %163, %cst_55 {dimension_numbers = #tpu.dot_dimension_numbers<[1], [0], [0], [1], [0, 0, 1, 1], [], []>} : vector<16x16xbf16>, vector<16x8xbf16>, vector<16x8xf32> -> vector<16x8xf32>
    %165 = vector.extract_strided_slice %42 {offsets = [24, 0], sizes = [8, 32], strides = [1, 1]} : vector<32x32xbf16> to vector<8x32xbf16>
    %166 = arith.truncf %164 : vector<16x8xf32> to vector<16x8xbf16>
    %cst_56 = arith.constant dense<0.000000e+00> : vector<16x32xf32>
    %167 = tpu.matmul %166, %165, %cst_56 {dimension_numbers = #tpu.dot_dimension_numbers<[1], [0], [0], [1], [0, 0, 1, 1], [], []>} : vector<16x8xbf16>, vector<8x32xbf16>, vector<16x32xf32> -> vector<16x32xf32>
    %168 = arith.addf %147, %167 : vector<16x32xf32>
    %169 = arith.addf %3, %168 : vector<16x32xf32>
    %170 = vector.extract_strided_slice %5 {offsets = [2, 0], sizes = [1, 32], strides = [1, 1]} : vector<8x32xf32> to vector<1x32xf32>
    %171 = vector.broadcast %170 : vector<1x32xf32> to vector<16x32xf32>
    %172 = arith.addf %169, %171 : vector<16x32xf32>
    %c0_57 = arith.constant 0 : index
    %c0_58 = arith.constant 0 : index
    %c0_59 = arith.constant 0 : index
    %c0_60 = arith.constant 0 : index
    %173 = vector.load %arg5[%c0_57, %c0_58, %c0_59, %c0_60] : memref<1x1x32x128xbf16, #tpu.memory_space<vmem>>, vector<1x1x32x128xbf16>
    %174 = vector.shape_cast %173 : vector<1x1x32x128xbf16> to vector<32x128xbf16>
    %c0_61 = arith.constant 0 : index
    %c0_62 = arith.constant 0 : index
    %c0_63 = arith.constant 0 : index
    %c0_64 = arith.constant 0 : index
    %175 = vector.load %arg6[%c0_61, %c0_62, %c0_63, %c0_64] : memref<1x1x128x32xbf16, #tpu.memory_space<vmem>>, vector<1x1x128x32xbf16>
    %176 = vector.shape_cast %175 : vector<1x1x128x32xbf16> to vector<128x32xbf16>
    %c0_65 = arith.constant 0 : index
    %c0_66 = arith.constant 0 : index
    %c0_67 = arith.constant 0 : index
    %c0_68 = arith.constant 0 : index
    %177 = vector.load %arg9[%c0_65, %c0_66, %c0_67, %c0_68] : memref<1x1x1x128xf32, #tpu.memory_space<vmem>>, vector<1x1x1x128xf32>
    %178 = vector.shape_cast %177 : vector<1x1x1x128xf32> to vector<1x128xf32>
    %179 = vector.extract_strided_slice %5 {offsets = [3, 0], sizes = [1, 32], strides = [1, 1]} : vector<8x32xf32> to vector<1x32xf32>
    %180 = vector.extract_strided_slice %5 {offsets = [4, 0], sizes = [1, 32], strides = [1, 1]} : vector<8x32xf32> to vector<1x32xf32>
    %cst_69 = arith.constant dense<0.000000e+00> : vector<16xf32>
    %181 = vector.multi_reduction <add>, %172, %cst_69 [1] : vector<16x32xf32> to vector<16xf32>
    %182 = vector.shape_cast %181 : vector<16xf32> to vector<16x1xf32>
    %cst_70 = arith.constant 3.200000e+01 : f32
    %183 = vector.broadcast %cst_70 : f32 to vector<16x1xf32>
    %184 = arith.divf %182, %183 : vector<16x1xf32>
    %185 = vector.broadcast %184 : vector<16x1xf32> to vector<16x32xf32>
    %186 = arith.subf %172, %185 : vector<16x32xf32>
    %187 = arith.mulf %186, %186 : vector<16x32xf32>
    %cst_71 = arith.constant dense<0.000000e+00> : vector<16xf32>
    %188 = vector.multi_reduction <add>, %187, %cst_71 [1] : vector<16x32xf32> to vector<16xf32>
    %189 = vector.shape_cast %188 : vector<16xf32> to vector<16x1xf32>
    %cst_72 = arith.constant 3.200000e+01 : f32
    %190 = vector.broadcast %cst_72 : f32 to vector<16x1xf32>
    %191 = arith.divf %189, %190 : vector<16x1xf32>
    %cst_73 = arith.constant 9.99999974E-6 : f32
    %192 = vector.broadcast %cst_73 : f32 to vector<16x1xf32>
    %193 = arith.addf %191, %192 : vector<16x1xf32>
    %194 = math.rsqrt %193 : vector<16x1xf32>
    %195 = vector.broadcast %194 : vector<16x1xf32> to vector<16x32xf32>
    %196 = arith.mulf %186, %195 : vector<16x32xf32>
    %197 = vector.broadcast %179 : vector<1x32xf32> to vector<16x32xf32>
    %198 = arith.mulf %196, %197 : vector<16x32xf32>
    %199 = vector.broadcast %180 : vector<1x32xf32> to vector<16x32xf32>
    %200 = arith.addf %198, %199 : vector<16x32xf32>
    %201 = arith.truncf %200 : vector<16x32xf32> to vector<16x32xbf16>
    %cst_74 = arith.constant dense<0.000000e+00> : vector<16x128xf32>
    %202 = tpu.matmul %201, %174, %cst_74 {dimension_numbers = #tpu.dot_dimension_numbers<[1], [0], [0], [1], [0, 0, 1, 1], [], []>} : vector<16x32xbf16>, vector<32x128xbf16>, vector<16x128xf32> -> vector<16x128xf32>
    %203 = vector.broadcast %178 : vector<1x128xf32> to vector<16x128xf32>
    %204 = arith.addf %202, %203 : vector<16x128xf32>
    %cst_75 = arith.constant 0.000000e+00 : f32
    %205 = vector.broadcast %cst_75 : f32 to vector<16x128xf32>
    %206 = arith.maximumf %204, %205 : vector<16x128xf32>
    %207 = arith.truncf %206 : vector<16x128xf32> to vector<16x128xbf16>
    %cst_76 = arith.constant dense<0.000000e+00> : vector<16x32xf32>
    %208 = tpu.matmul %207, %176, %cst_76 {dimension_numbers = #tpu.dot_dimension_numbers<[1], [0], [0], [1], [0, 0, 1, 1], [], []>} : vector<16x128xbf16>, vector<128x32xbf16>, vector<16x32xf32> -> vector<16x32xf32>
    %209 = arith.addf %172, %208 : vector<16x32xf32>
    %210 = vector.extract_strided_slice %5 {offsets = [5, 0], sizes = [1, 32], strides = [1, 1]} : vector<8x32xf32> to vector<1x32xf32>
    %211 = vector.broadcast %210 : vector<1x32xf32> to vector<16x32xf32>
    %212 = arith.addf %209, %211 : vector<16x32xf32>
    %c0_77 = arith.constant 0 : index
    %c0_78 = arith.constant 0 : index
    %213 = vector.load %arg12[%c0_77, %c0_78] : memref<16x32xf32, #tpu.memory_space<vmem>>, vector<16x32xf32>
    tpu.vector_store %arg12[%c0_77, %c0_78], %212 {strides = array<i32>} : memref<16x32xf32, #tpu.memory_space<vmem>>, vector<16x32xf32>,
    %c2_i32_79 = arith.constant 2 : i32
    %214 = arith.cmpi eq, %arg1, %c2_i32_79 : i32
    %215 = arith.extui %214 : i1 to i32
    %c0_i32_80 = arith.constant 0 : i32
    %216 = arith.cmpi ne, %215, %c0_i32_80 : i32
    scf.if %216 {
      %c0_81 = arith.constant 0 : index
      %c0_82 = arith.constant 0 : index
      %c0_83 = arith.constant 0 : index
      %217 = vector.load %arg10[%c0_81, %c0_82, %c0_83] : memref<1x2x32xf32, #tpu.memory_space<vmem>>, vector<1x2x32xf32>
      %218 = vector.shape_cast %217 : vector<1x2x32xf32> to vector<2x32xf32>
      %219 = vector.extract_strided_slice %218 {offsets = [0, 0], sizes = [1, 32], strides = [1, 1]} : vector<2x32xf32> to vector<1x32xf32>
      %220 = vector.extract_strided_slice %218 {offsets = [1, 0], sizes = [1, 32], strides = [1, 1]} : vector<2x32xf32> to vector<1x32xf32>
      %cst_84 = arith.constant dense<0.000000e+00> : vector<16xf32>
      %221 = vector.multi_reduction <add>, %212, %cst_84 [1] : vector<16x32xf32> to vector<16xf32>
      %222 = vector.shape_cast %221 : vector<16xf32> to vector<16x1xf32>
      %cst_85 = arith.constant 3.200000e+01 : f32
      %223 = vector.broadcast %cst_85 : f32 to vector<16x1xf32>
      %224 = arith.divf %222, %223 : vector<16x1xf32>
      %225 = vector.broadcast %224 : vector<16x1xf32> to vector<16x32xf32>
      %226 = arith.subf %212, %225 : vector<16x32xf32>
      %227 = arith.mulf %226, %226 : vector<16x32xf32>
      %cst_86 = arith.constant dense<0.000000e+00> : vector<16xf32>
      %228 = vector.multi_reduction <add>, %227, %cst_86 [1] : vector<16x32xf32> to vector<16xf32>
      %229 = vector.shape_cast %228 : vector<16xf32> to vector<16x1xf32>
      %cst_87 = arith.constant 3.200000e+01 : f32
      %230 = vector.broadcast %cst_87 : f32 to vector<16x1xf32>
      %231 = arith.divf %229, %230 : vector<16x1xf32>
      %cst_88 = arith.constant 9.99999974E-6 : f32
      %232 = vector.broadcast %cst_88 : f32 to vector<16x1xf32>
      %233 = arith.addf %231, %232 : vector<16x1xf32>
      %234 = math.rsqrt %233 : vector<16x1xf32>
      %235 = vector.broadcast %234 : vector<16x1xf32> to vector<16x32xf32>
      %236 = arith.mulf %226, %235 : vector<16x32xf32>
      %237 = vector.broadcast %219 : vector<1x32xf32> to vector<16x32xf32>
      %238 = arith.mulf %236, %237 : vector<16x32xf32>
      %239 = vector.broadcast %220 : vector<1x32xf32> to vector<16x32xf32>
      %240 = arith.addf %238, %239 : vector<16x32xf32>
      %c0_89 = arith.constant 0 : index
      %c0_90 = arith.constant 0 : index
      %c0_91 = arith.constant 0 : index
      %241 = vector.load %arg11[%c0_89, %c0_90, %c0_91] : memref<1x16x32xf32, #tpu.memory_space<vmem>>, vector<1x16x32xf32>
      %242 = vector.shape_cast %241 : vector<1x16x32xf32> to vector<16x32xf32>
      %243 = vector.shape_cast %240 : vector<16x32xf32> to vector<1x16x32xf32>
      tpu.vector_store %arg11[%c0_89, %c0_90, %c0_91], %243 {strides = array<i32>} : memref<1x16x32xf32, #tpu.memory_space<vmem>>, vector<1x16x32xf32>,
    } else {
    }
    return
  }
  func.func @transform_0(%arg0: i32, %arg1: i32) -> (i32, i32, i32) {
    %c0_i32 = arith.constant 0 : i32
    %c0_i32_0 = arith.constant 0 : i32
    %c0_i32_1 = arith.constant 0 : i32
    return %arg0, %c0_i32, %c0_i32_0 : i32, i32, i32
  }
  func.func @transform_1(%arg0: i32, %arg1: i32) -> (i32, i32, i32, i32) {
    %c0_i32 = arith.constant 0 : i32
    %c0_i32_0 = arith.constant 0 : i32
    %c0_i32_1 = arith.constant 0 : i32
    return %arg0, %arg1, %c0_i32, %c0_i32_0 : i32, i32, i32, i32
  }
  func.func @transform_2(%arg0: i32, %arg1: i32) -> (i32, i32, i32, i32) {
    %c0_i32 = arith.constant 0 : i32
    %c0_i32_0 = arith.constant 0 : i32
    %c0_i32_1 = arith.constant 0 : i32
    return %arg0, %arg1, %c0_i32, %c0_i32_0 : i32, i32, i32, i32
  }
  func.func @transform_3(%arg0: i32, %arg1: i32) -> (i32, i32, i32, i32) {
    %c0_i32 = arith.constant 0 : i32
    %c0_i32_0 = arith.constant 0 : i32
    %c0_i32_1 = arith.constant 0 : i32
    return %arg0, %arg1, %c0_i32, %c0_i32_0 : i32, i32, i32, i32
  }
  func.func @transform_4(%arg0: i32, %arg1: i32) -> (i32, i32, i32, i32) {
    %c0_i32 = arith.constant 0 : i32
    %c0_i32_0 = arith.constant 0 : i32
    %c0_i32_1 = arith.constant 0 : i32
    return %arg0, %arg1, %c0_i32, %c0_i32_0 : i32, i32, i32, i32
  }
  func.func @transform_5(%arg0: i32, %arg1: i32) -> (i32, i32, i32, i32) {
    %c0_i32 = arith.constant 0 : i32
    %c0_i32_0 = arith.constant 0 : i32
    %c0_i32_1 = arith.constant 0 : i32
    return %arg0, %arg1, %c0_i32, %c0_i32_0 : i32, i32, i32, i32
  }
  func.func @transform_6(%arg0: i32, %arg1: i32) -> (i32, i32, i32, i32) {
    %c0_i32 = arith.constant 0 : i32
    %c0_i32_0 = arith.constant 0 : i32
    %c0_i32_1 = arith.constant 0 : i32
    return %arg0, %arg1, %c0_i32, %c0_i32_0 : i32, i32, i32, i32
  }
  func.func @transform_7(%arg0: i32, %arg1: i32) -> (i32, i32, i32, i32) {
    %c0_i32 = arith.constant 0 : i32
    %c0_i32_0 = arith.constant 0 : i32
    %c0_i32_1 = arith.constant 0 : i32
    return %arg0, %arg1, %c0_i32, %c0_i32_0 : i32, i32, i32, i32
  }
  func.func @transform_8(%arg0: i32, %arg1: i32) -> (i32, i32, i32) {
    %c0_i32 = arith.constant 0 : i32
    %c0_i32_0 = arith.constant 0 : i32
    %c0_i32_1 = arith.constant 0 : i32
    return %arg0, %c0_i32, %c0_i32_0 : i32, i32, i32
  }
  func.func @transform_9(%arg0: i32, %arg1: i32) -> (i32, i32, i32) {
    %c0_i32 = arith.constant 0 : i32
    %c0_i32_0 = arith.constant 0 : i32
    %c0_i32_1 = arith.constant 0 : i32
    return %arg0, %c0_i32, %c0_i32_0 : i32, i32, i32
  }
}

module attributes {stable_mosaic.version = 11 : i64} {
  func.func @_cross_group_kernel(%arg0: i32, %arg1: i32, %arg2: memref<1x16x32xf32, #tpu.memory_space<vmem>>, %arg3: memref<1x16x32xf32, #tpu.memory_space<vmem>>, %arg4: memref<1x1x32x32xbf16, #tpu.memory_space<vmem>>, %arg5: memref<1x1x32x64xbf16, #tpu.memory_space<vmem>>, %arg6: memref<1x1x32x32xbf16, #tpu.memory_space<vmem>>, %arg7: memref<1x1x32x128xbf16, #tpu.memory_space<vmem>>, %arg8: memref<1x1x128x32xbf16, #tpu.memory_space<vmem>>, %arg9: memref<1x1x8x32xf32, #tpu.memory_space<vmem>>, %arg10: memref<1x1x1x96xf32, #tpu.memory_space<vmem>>, %arg11: memref<1x1x1x128xf32, #tpu.memory_space<vmem>>, %arg12: memref<1x2x32xf32, #tpu.memory_space<vmem>>, %arg13: memref<1x16x32xf32, #tpu.memory_space<vmem>>, %arg14: memref<16x32xf32, #tpu.memory_space<vmem>>) attributes {dimension_semantics = [#tpu.dimension_semantics<parallel>, #tpu.dimension_semantics<arbitrary>], iteration_bounds = array<i64: 6, 2>, scalar_prefetch = 0 : i64, scratch_operands = 1 : i64, tpu.core_type = #tpu.core_type<tc>, window_params = [{transform_indices = @transform_0, window_bounds = array<i64: 1, 16, 32>}, {transform_indices = @transform_1, window_bounds = array<i64: 1, 16, 32>}, {transform_indices = @transform_2, window_bounds = array<i64: 1, 1, 32, 32>}, {transform_indices = @transform_3, window_bounds = array<i64: 1, 1, 32, 64>}, {transform_indices = @transform_4, window_bounds = array<i64: 1, 1, 32, 32>}, {transform_indices = @transform_5, window_bounds = array<i64: 1, 1, 32, 128>}, {transform_indices = @transform_6, window_bounds = array<i64: 1, 1, 128, 32>}, {transform_indices = @transform_7, window_bounds = array<i64: 1, 1, 8, 32>}, {transform_indices = @transform_8, window_bounds = array<i64: 1, 1, 1, 96>}, {transform_indices = @transform_9, window_bounds = array<i64: 1, 1, 1, 128>}, {transform_indices = @transform_10, window_bounds = array<i64: 1, 2, 32>}, {transform_indices = @transform_11, window_bounds = array<i64: 1, 16, 32>}]} {
    %c0_i32 = arith.constant 0 : i32
    %0 = arith.cmpi eq, %arg1, %c0_i32 : i32
    %1 = arith.extui %0 : i1 to i32
    %c0_i32_0 = arith.constant 0 : i32
    %2 = arith.cmpi ne, %1, %c0_i32_0 : i32
    scf.if %2 {
      %c0_94 = arith.constant 0 : index
      %c0_95 = arith.constant 0 : index
      %c0_96 = arith.constant 0 : index
      %248 = vector.load %arg2[%c0_94, %c0_95, %c0_96] : memref<1x16x32xf32, #tpu.memory_space<vmem>>, vector<1x16x32xf32>
      %249 = vector.shape_cast %248 : vector<1x16x32xf32> to vector<16x32xf32>
      %c0_97 = arith.constant 0 : index
      %c0_98 = arith.constant 0 : index
      %250 = vector.load %arg14[%c0_97, %c0_98] : memref<16x32xf32, #tpu.memory_space<vmem>>, vector<16x32xf32>
      tpu.vector_store %arg14[%c0_97, %c0_98], %249 {strides = array<i32>} : memref<16x32xf32, #tpu.memory_space<vmem>>, vector<16x32xf32>,
    } else {
    }
    %c0 = arith.constant 0 : index
    %c0_1 = arith.constant 0 : index
    %3 = vector.load %arg14[%c0, %c0_1] : memref<16x32xf32, #tpu.memory_space<vmem>>, vector<16x32xf32>
    %c0_2 = arith.constant 0 : index
    %c0_3 = arith.constant 0 : index
    %c0_4 = arith.constant 0 : index
    %c0_5 = arith.constant 0 : index
    %4 = vector.load %arg9[%c0_2, %c0_3, %c0_4, %c0_5] : memref<1x1x8x32xf32, #tpu.memory_space<vmem>>, vector<1x1x8x32xf32>
    %5 = vector.shape_cast %4 : vector<1x1x8x32xf32> to vector<8x32xf32>
    %6 = vector.extract_strided_slice %5 {offsets = [0, 0], sizes = [1, 32], strides = [1, 1]} : vector<8x32xf32> to vector<1x32xf32>
    %7 = vector.extract_strided_slice %5 {offsets = [1, 0], sizes = [1, 32], strides = [1, 1]} : vector<8x32xf32> to vector<1x32xf32>
    %cst = arith.constant dense<0.000000e+00> : vector<16xf32>
    %8 = vector.multi_reduction <add>, %3, %cst [1] : vector<16x32xf32> to vector<16xf32>
    %9 = vector.shape_cast %8 : vector<16xf32> to vector<16x1xf32>
    %cst_6 = arith.constant 3.200000e+01 : f32
    %10 = vector.broadcast %cst_6 : f32 to vector<16x1xf32>
    %11 = arith.divf %9, %10 : vector<16x1xf32>
    %12 = vector.broadcast %11 : vector<16x1xf32> to vector<16x32xf32>
    %13 = arith.subf %3, %12 : vector<16x32xf32>
    %14 = arith.mulf %13, %13 : vector<16x32xf32>
    %cst_7 = arith.constant dense<0.000000e+00> : vector<16xf32>
    %15 = vector.multi_reduction <add>, %14, %cst_7 [1] : vector<16x32xf32> to vector<16xf32>
    %16 = vector.shape_cast %15 : vector<16xf32> to vector<16x1xf32>
    %cst_8 = arith.constant 3.200000e+01 : f32
    %17 = vector.broadcast %cst_8 : f32 to vector<16x1xf32>
    %18 = arith.divf %16, %17 : vector<16x1xf32>
    %cst_9 = arith.constant 9.99999974E-6 : f32
    %19 = vector.broadcast %cst_9 : f32 to vector<16x1xf32>
    %20 = arith.addf %18, %19 : vector<16x1xf32>
    %21 = math.rsqrt %20 : vector<16x1xf32>
    %22 = vector.broadcast %21 : vector<16x1xf32> to vector<16x32xf32>
    %23 = arith.mulf %13, %22 : vector<16x32xf32>
    %24 = vector.broadcast %6 : vector<1x32xf32> to vector<16x32xf32>
    %25 = arith.mulf %23, %24 : vector<16x32xf32>
    %26 = vector.broadcast %7 : vector<1x32xf32> to vector<16x32xf32>
    %27 = arith.addf %25, %26 : vector<16x32xf32>
    %c0_10 = arith.constant 0 : index
    %c0_11 = arith.constant 0 : index
    %c0_12 = arith.constant 0 : index
    %28 = vector.load %arg3[%c0_10, %c0_11, %c0_12] : memref<1x16x32xf32, #tpu.memory_space<vmem>>, vector<1x16x32xf32>
    %29 = vector.shape_cast %28 : vector<1x16x32xf32> to vector<16x32xf32>
    %30 = vector.extract_strided_slice %5 {offsets = [0, 0], sizes = [1, 32], strides = [1, 1]} : vector<8x32xf32> to vector<1x32xf32>
    %31 = vector.extract_strided_slice %5 {offsets = [1, 0], sizes = [1, 32], strides = [1, 1]} : vector<8x32xf32> to vector<1x32xf32>
    %cst_13 = arith.constant dense<0.000000e+00> : vector<16xf32>
    %32 = vector.multi_reduction <add>, %29, %cst_13 [1] : vector<16x32xf32> to vector<16xf32>
    %33 = vector.shape_cast %32 : vector<16xf32> to vector<16x1xf32>
    %cst_14 = arith.constant 3.200000e+01 : f32
    %34 = vector.broadcast %cst_14 : f32 to vector<16x1xf32>
    %35 = arith.divf %33, %34 : vector<16x1xf32>
    %36 = vector.broadcast %35 : vector<16x1xf32> to vector<16x32xf32>
    %37 = arith.subf %29, %36 : vector<16x32xf32>
    %38 = arith.mulf %37, %37 : vector<16x32xf32>
    %cst_15 = arith.constant dense<0.000000e+00> : vector<16xf32>
    %39 = vector.multi_reduction <add>, %38, %cst_15 [1] : vector<16x32xf32> to vector<16xf32>
    %40 = vector.shape_cast %39 : vector<16xf32> to vector<16x1xf32>
    %cst_16 = arith.constant 3.200000e+01 : f32
    %41 = vector.broadcast %cst_16 : f32 to vector<16x1xf32>
    %42 = arith.divf %40, %41 : vector<16x1xf32>
    %cst_17 = arith.constant 9.99999974E-6 : f32
    %43 = vector.broadcast %cst_17 : f32 to vector<16x1xf32>
    %44 = arith.addf %42, %43 : vector<16x1xf32>
    %45 = math.rsqrt %44 : vector<16x1xf32>
    %46 = vector.broadcast %45 : vector<16x1xf32> to vector<16x32xf32>
    %47 = arith.mulf %37, %46 : vector<16x32xf32>
    %48 = vector.broadcast %30 : vector<1x32xf32> to vector<16x32xf32>
    %49 = arith.mulf %47, %48 : vector<16x32xf32>
    %50 = vector.broadcast %31 : vector<1x32xf32> to vector<16x32xf32>
    %51 = arith.addf %49, %50 : vector<16x32xf32>
    %c0_18 = arith.constant 0 : index
    %c0_19 = arith.constant 0 : index
    %c0_20 = arith.constant 0 : index
    %c0_21 = arith.constant 0 : index
    %52 = vector.load %arg10[%c0_18, %c0_19, %c0_20, %c0_21] : memref<1x1x1x96xf32, #tpu.memory_space<vmem>>, vector<1x1x1x96xf32>
    %53 = vector.shape_cast %52 : vector<1x1x1x96xf32> to vector<1x96xf32>
    %c0_22 = arith.constant 0 : index
    %c0_23 = arith.constant 0 : index
    %c0_24 = arith.constant 0 : index
    %c0_25 = arith.constant 0 : index
    %54 = vector.load %arg4[%c0_22, %c0_23, %c0_24, %c0_25] : memref<1x1x32x32xbf16, #tpu.memory_space<vmem>>, vector<1x1x32x32xbf16>
    %55 = vector.shape_cast %54 : vector<1x1x32x32xbf16> to vector<32x32xbf16>
    %56 = arith.truncf %27 : vector<16x32xf32> to vector<16x32xbf16>
    %cst_26 = arith.constant dense<0.000000e+00> : vector<16x32xf32>
    %57 = tpu.matmul %56, %55, %cst_26 {dimension_numbers = #tpu.dot_dimension_numbers<[1], [0], [0], [1], [0, 0, 1, 1], [], []>} : vector<16x32xbf16>, vector<32x32xbf16>, vector<16x32xf32> -> vector<16x32xf32>
    %58 = vector.extract_strided_slice %53 {offsets = [0, 0], sizes = [1, 32], strides = [1, 1]} : vector<1x96xf32> to vector<1x32xf32>
    %59 = vector.broadcast %58 : vector<1x32xf32> to vector<16x32xf32>
    %60 = arith.addf %57, %59 : vector<16x32xf32>
    %cst_27 = arith.constant 0.353553385 : f32
    %61 = vector.broadcast %cst_27 : f32 to vector<16x32xf32>
    %62 = arith.mulf %60, %61 : vector<16x32xf32>
    %c0_28 = arith.constant 0 : index
    %c0_29 = arith.constant 0 : index
    %c0_30 = arith.constant 0 : index
    %c0_31 = arith.constant 0 : index
    %63 = vector.load %arg5[%c0_28, %c0_29, %c0_30, %c0_31] : memref<1x1x32x64xbf16, #tpu.memory_space<vmem>>, vector<1x1x32x64xbf16>
    %64 = vector.shape_cast %63 : vector<1x1x32x64xbf16> to vector<32x64xbf16>
    %65 = arith.truncf %51 : vector<16x32xf32> to vector<16x32xbf16>
    %cst_32 = arith.constant dense<0.000000e+00> : vector<16x64xf32>
    %66 = tpu.matmul %65, %64, %cst_32 {dimension_numbers = #tpu.dot_dimension_numbers<[1], [0], [0], [1], [0, 0, 1, 1], [], []>} : vector<16x32xbf16>, vector<32x64xbf16>, vector<16x64xf32> -> vector<16x64xf32>
    %67 = vector.extract_strided_slice %53 {offsets = [0, 32], sizes = [1, 64], strides = [1, 1]} : vector<1x96xf32> to vector<1x64xf32>
    %68 = vector.broadcast %67 : vector<1x64xf32> to vector<16x64xf32>
    %69 = arith.addf %66, %68 : vector<16x64xf32>
    %70 = vector.extract_strided_slice %69 {offsets = [0, 0], sizes = [16, 32], strides = [1, 1]} : vector<16x64xf32> to vector<16x32xf32>
    %71 = vector.extract_strided_slice %69 {offsets = [0, 32], sizes = [16, 32], strides = [1, 1]} : vector<16x64xf32> to vector<16x32xf32>
    %c0_33 = arith.constant 0 : index
    %c0_34 = arith.constant 0 : index
    %c0_35 = arith.constant 0 : index
    %c0_36 = arith.constant 0 : index
    %72 = vector.load %arg6[%c0_33, %c0_34, %c0_35, %c0_36] : memref<1x1x32x32xbf16, #tpu.memory_space<vmem>>, vector<1x1x32x32xbf16>
    %73 = vector.shape_cast %72 : vector<1x1x32x32xbf16> to vector<32x32xbf16>
    %74 = tpu.iota {dimensions = array<i32: 0>} : vector<16x16xi32>
    %c2_i32 = arith.constant 2 : i32
    %c0_i32_37 = arith.constant 0 : i32
    %75 = arith.cmpi eq, %c2_i32, %c0_i32_37 : i32
    %c1_i32 = arith.constant 1 : i32
    %76 = arith.select %75, %c1_i32, %c2_i32 : i32
    %77 = vector.broadcast %76 : i32 to vector<16x16xi32>
    %78 = arith.remsi %74, %77 : vector<16x16xi32>
    %c0_i32_38 = arith.constant 0 : i32
    %79 = vector.broadcast %c0_i32_38 : i32 to vector<16x16xi32>
    %80 = arith.cmpi ne, %78, %79 : vector<16x16xi32>
    %c0_i32_39 = arith.constant 0 : i32
    %81 = vector.broadcast %c0_i32_39 : i32 to vector<16x16xi32>
    %82 = arith.cmpi slt, %78, %81 : vector<16x16xi32>
    %c0_i32_40 = arith.constant 0 : i32
    %83 = arith.cmpi slt, %76, %c0_i32_40 : i32
    %84 = vector.broadcast %83 : i1 to vector<16x16xi1>
    %85 = vector.broadcast %84 : vector<16x16xi1> to vector<16x16xi1>
    %86 = arith.xori %82, %85 : vector<16x16xi1>
    %87 = arith.andi %86, %80 : vector<16x16xi1>
    %88 = vector.broadcast %76 : i32 to vector<16x16xi32>
    %89 = arith.addi %78, %88 : vector<16x16xi32>
    %90 = arith.select %87, %89, %78 : vector<16x16xi1>, vector<16x16xi32>
    %91 = tpu.iota {dimensions = array<i32: 1>} : vector<16x16xi32>
    %c2_i32_41 = arith.constant 2 : i32
    %c0_i32_42 = arith.constant 0 : i32
    %92 = arith.cmpi eq, %c2_i32_41, %c0_i32_42 : i32
    %c1_i32_43 = arith.constant 1 : i32
    %93 = arith.select %92, %c1_i32_43, %c2_i32_41 : i32
    %94 = vector.broadcast %93 : i32 to vector<16x16xi32>
    %95 = arith.remsi %91, %94 : vector<16x16xi32>
    %c0_i32_44 = arith.constant 0 : i32
    %96 = vector.broadcast %c0_i32_44 : i32 to vector<16x16xi32>
    %97 = arith.cmpi ne, %95, %96 : vector<16x16xi32>
    %c0_i32_45 = arith.constant 0 : i32
    %98 = vector.broadcast %c0_i32_45 : i32 to vector<16x16xi32>
    %99 = arith.cmpi slt, %95, %98 : vector<16x16xi32>
    %c0_i32_46 = arith.constant 0 : i32
    %100 = arith.cmpi slt, %93, %c0_i32_46 : i32
    %101 = vector.broadcast %100 : i1 to vector<16x16xi1>
    %102 = vector.broadcast %101 : vector<16x16xi1> to vector<16x16xi1>
    %103 = arith.xori %99, %102 : vector<16x16xi1>
    %104 = arith.andi %103, %97 : vector<16x16xi1>
    %105 = vector.broadcast %93 : i32 to vector<16x16xi32>
    %106 = arith.addi %95, %105 : vector<16x16xi32>
    %107 = arith.select %104, %106, %95 : vector<16x16xi1>, vector<16x16xi32>
    %108 = arith.cmpi eq, %90, %107 : vector<16x16xi32>
    %cst_47 = arith.constant 0.000000e+00 : f32
    %cst_48 = arith.constant -1.000000e+09 : f32
    %109 = vector.broadcast %cst_47 : f32 to vector<16x16xf32>
    %110 = vector.broadcast %cst_48 : f32 to vector<16x16xf32>
    %111 = arith.select %108, %109, %110 : vector<16x16xi1>, vector<16x16xf32>
    %112 = arith.truncf %62 : vector<16x32xf32> to vector<16x32xbf16>
    %113 = arith.truncf %70 : vector<16x32xf32> to vector<16x32xbf16>
    %114 = arith.truncf %71 : vector<16x32xf32> to vector<16x32xbf16>
    %cst_49 = arith.constant 0.000000e+00 : f32
    %115 = vector.broadcast %cst_49 : f32 to vector<16x32xf32>
    %116 = vector.extract_strided_slice %112 {offsets = [0, 0], sizes = [16, 8], strides = [1, 1]} : vector<16x32xbf16> to vector<16x8xbf16>
    %117 = vector.extract_strided_slice %113 {offsets = [0, 0], sizes = [16, 8], strides = [1, 1]} : vector<16x32xbf16> to vector<16x8xbf16>
    %cst_50 = arith.constant dense<0.000000e+00> : vector<16x16xf32>
    %118 = tpu.matmul %116, %117, %cst_50 {dimension_numbers = #tpu.dot_dimension_numbers<[1], [1], [0], [0], [0, 0, 1, 0], [], []>} : vector<16x8xbf16>, vector<16x8xbf16>, vector<16x16xf32> -> vector<16x16xf32>
    %119 = arith.addf %118, %111 : vector<16x16xf32>
    %cst_51 = arith.constant dense<0xFF800000> : vector<16xf32>
    %120 = vector.multi_reduction <maximumf>, %119, %cst_51 [1] : vector<16x16xf32> to vector<16xf32>
    %121 = vector.shape_cast %120 : vector<16xf32> to vector<16x1xf32>
    %122 = vector.broadcast %121 : vector<16x1xf32> to vector<16x16xf32>
    %123 = arith.subf %119, %122 : vector<16x16xf32>
    %124 = math.exp %123 : vector<16x16xf32>
    %cst_52 = arith.constant dense<0.000000e+00> : vector<16xf32>
    %125 = vector.multi_reduction <add>, %124, %cst_52 [1] : vector<16x16xf32> to vector<16xf32>
    %126 = vector.shape_cast %125 : vector<16xf32> to vector<16x1xf32>
    %127 = tpu.reciprocal %126 : vector<16x1xf32> -> vector<16x1xf32>
    %128 = vector.broadcast %127 : vector<16x1xf32> to vector<16x16xf32>
    %129 = arith.mulf %124, %128 : vector<16x16xf32>
    %130 = arith.truncf %129 : vector<16x16xf32> to vector<16x16xbf16>
    %131 = vector.extract_strided_slice %114 {offsets = [0, 0], sizes = [16, 8], strides = [1, 1]} : vector<16x32xbf16> to vector<16x8xbf16>
    %cst_53 = arith.constant dense<0.000000e+00> : vector<16x8xf32>
    %132 = tpu.matmul %130, %131, %cst_53 {dimension_numbers = #tpu.dot_dimension_numbers<[1], [0], [0], [1], [0, 0, 1, 1], [], []>} : vector<16x16xbf16>, vector<16x8xbf16>, vector<16x8xf32> -> vector<16x8xf32>
    %133 = vector.extract_strided_slice %73 {offsets = [0, 0], sizes = [8, 32], strides = [1, 1]} : vector<32x32xbf16> to vector<8x32xbf16>
    %134 = arith.truncf %132 : vector<16x8xf32> to vector<16x8xbf16>
    %cst_54 = arith.constant dense<0.000000e+00> : vector<16x32xf32>
    %135 = tpu.matmul %134, %133, %cst_54 {dimension_numbers = #tpu.dot_dimension_numbers<[1], [0], [0], [1], [0, 0, 1, 1], [], []>} : vector<16x8xbf16>, vector<8x32xbf16>, vector<16x32xf32> -> vector<16x32xf32>
    %136 = arith.addf %115, %135 : vector<16x32xf32>
    %137 = vector.extract_strided_slice %112 {offsets = [0, 8], sizes = [16, 8], strides = [1, 1]} : vector<16x32xbf16> to vector<16x8xbf16>
    %138 = vector.extract_strided_slice %113 {offsets = [0, 8], sizes = [16, 8], strides = [1, 1]} : vector<16x32xbf16> to vector<16x8xbf16>
    %cst_55 = arith.constant dense<0.000000e+00> : vector<16x16xf32>
    %139 = tpu.matmul %137, %138, %cst_55 {dimension_numbers = #tpu.dot_dimension_numbers<[1], [1], [0], [0], [0, 0, 1, 0], [], []>} : vector<16x8xbf16>, vector<16x8xbf16>, vector<16x16xf32> -> vector<16x16xf32>
    %140 = arith.addf %139, %111 : vector<16x16xf32>
    %cst_56 = arith.constant dense<0xFF800000> : vector<16xf32>
    %141 = vector.multi_reduction <maximumf>, %140, %cst_56 [1] : vector<16x16xf32> to vector<16xf32>
    %142 = vector.shape_cast %141 : vector<16xf32> to vector<16x1xf32>
    %143 = vector.broadcast %142 : vector<16x1xf32> to vector<16x16xf32>
    %144 = arith.subf %140, %143 : vector<16x16xf32>
    %145 = math.exp %144 : vector<16x16xf32>
    %cst_57 = arith.constant dense<0.000000e+00> : vector<16xf32>
    %146 = vector.multi_reduction <add>, %145, %cst_57 [1] : vector<16x16xf32> to vector<16xf32>
    %147 = vector.shape_cast %146 : vector<16xf32> to vector<16x1xf32>
    %148 = tpu.reciprocal %147 : vector<16x1xf32> -> vector<16x1xf32>
    %149 = vector.broadcast %148 : vector<16x1xf32> to vector<16x16xf32>
    %150 = arith.mulf %145, %149 : vector<16x16xf32>
    %151 = arith.truncf %150 : vector<16x16xf32> to vector<16x16xbf16>
    %152 = vector.extract_strided_slice %114 {offsets = [0, 8], sizes = [16, 8], strides = [1, 1]} : vector<16x32xbf16> to vector<16x8xbf16>
    %cst_58 = arith.constant dense<0.000000e+00> : vector<16x8xf32>
    %153 = tpu.matmul %151, %152, %cst_58 {dimension_numbers = #tpu.dot_dimension_numbers<[1], [0], [0], [1], [0, 0, 1, 1], [], []>} : vector<16x16xbf16>, vector<16x8xbf16>, vector<16x8xf32> -> vector<16x8xf32>
    %154 = vector.extract_strided_slice %73 {offsets = [8, 0], sizes = [8, 32], strides = [1, 1]} : vector<32x32xbf16> to vector<8x32xbf16>
    %155 = arith.truncf %153 : vector<16x8xf32> to vector<16x8xbf16>
    %cst_59 = arith.constant dense<0.000000e+00> : vector<16x32xf32>
    %156 = tpu.matmul %155, %154, %cst_59 {dimension_numbers = #tpu.dot_dimension_numbers<[1], [0], [0], [1], [0, 0, 1, 1], [], []>} : vector<16x8xbf16>, vector<8x32xbf16>, vector<16x32xf32> -> vector<16x32xf32>
    %157 = arith.addf %136, %156 : vector<16x32xf32>
    %158 = vector.extract_strided_slice %112 {offsets = [0, 16], sizes = [16, 8], strides = [1, 1]} : vector<16x32xbf16> to vector<16x8xbf16>
    %159 = vector.extract_strided_slice %113 {offsets = [0, 16], sizes = [16, 8], strides = [1, 1]} : vector<16x32xbf16> to vector<16x8xbf16>
    %cst_60 = arith.constant dense<0.000000e+00> : vector<16x16xf32>
    %160 = tpu.matmul %158, %159, %cst_60 {dimension_numbers = #tpu.dot_dimension_numbers<[1], [1], [0], [0], [0, 0, 1, 0], [], []>} : vector<16x8xbf16>, vector<16x8xbf16>, vector<16x16xf32> -> vector<16x16xf32>
    %161 = arith.addf %160, %111 : vector<16x16xf32>
    %cst_61 = arith.constant dense<0xFF800000> : vector<16xf32>
    %162 = vector.multi_reduction <maximumf>, %161, %cst_61 [1] : vector<16x16xf32> to vector<16xf32>
    %163 = vector.shape_cast %162 : vector<16xf32> to vector<16x1xf32>
    %164 = vector.broadcast %163 : vector<16x1xf32> to vector<16x16xf32>
    %165 = arith.subf %161, %164 : vector<16x16xf32>
    %166 = math.exp %165 : vector<16x16xf32>
    %cst_62 = arith.constant dense<0.000000e+00> : vector<16xf32>
    %167 = vector.multi_reduction <add>, %166, %cst_62 [1] : vector<16x16xf32> to vector<16xf32>
    %168 = vector.shape_cast %167 : vector<16xf32> to vector<16x1xf32>
    %169 = tpu.reciprocal %168 : vector<16x1xf32> -> vector<16x1xf32>
    %170 = vector.broadcast %169 : vector<16x1xf32> to vector<16x16xf32>
    %171 = arith.mulf %166, %170 : vector<16x16xf32>
    %172 = arith.truncf %171 : vector<16x16xf32> to vector<16x16xbf16>
    %173 = vector.extract_strided_slice %114 {offsets = [0, 16], sizes = [16, 8], strides = [1, 1]} : vector<16x32xbf16> to vector<16x8xbf16>
    %cst_63 = arith.constant dense<0.000000e+00> : vector<16x8xf32>
    %174 = tpu.matmul %172, %173, %cst_63 {dimension_numbers = #tpu.dot_dimension_numbers<[1], [0], [0], [1], [0, 0, 1, 1], [], []>} : vector<16x16xbf16>, vector<16x8xbf16>, vector<16x8xf32> -> vector<16x8xf32>
    %175 = vector.extract_strided_slice %73 {offsets = [16, 0], sizes = [8, 32], strides = [1, 1]} : vector<32x32xbf16> to vector<8x32xbf16>
    %176 = arith.truncf %174 : vector<16x8xf32> to vector<16x8xbf16>
    %cst_64 = arith.constant dense<0.000000e+00> : vector<16x32xf32>
    %177 = tpu.matmul %176, %175, %cst_64 {dimension_numbers = #tpu.dot_dimension_numbers<[1], [0], [0], [1], [0, 0, 1, 1], [], []>} : vector<16x8xbf16>, vector<8x32xbf16>, vector<16x32xf32> -> vector<16x32xf32>
    %178 = arith.addf %157, %177 : vector<16x32xf32>
    %179 = vector.extract_strided_slice %112 {offsets = [0, 24], sizes = [16, 8], strides = [1, 1]} : vector<16x32xbf16> to vector<16x8xbf16>
    %180 = vector.extract_strided_slice %113 {offsets = [0, 24], sizes = [16, 8], strides = [1, 1]} : vector<16x32xbf16> to vector<16x8xbf16>
    %cst_65 = arith.constant dense<0.000000e+00> : vector<16x16xf32>
    %181 = tpu.matmul %179, %180, %cst_65 {dimension_numbers = #tpu.dot_dimension_numbers<[1], [1], [0], [0], [0, 0, 1, 0], [], []>} : vector<16x8xbf16>, vector<16x8xbf16>, vector<16x16xf32> -> vector<16x16xf32>
    %182 = arith.addf %181, %111 : vector<16x16xf32>
    %cst_66 = arith.constant dense<0xFF800000> : vector<16xf32>
    %183 = vector.multi_reduction <maximumf>, %182, %cst_66 [1] : vector<16x16xf32> to vector<16xf32>
    %184 = vector.shape_cast %183 : vector<16xf32> to vector<16x1xf32>
    %185 = vector.broadcast %184 : vector<16x1xf32> to vector<16x16xf32>
    %186 = arith.subf %182, %185 : vector<16x16xf32>
    %187 = math.exp %186 : vector<16x16xf32>
    %cst_67 = arith.constant dense<0.000000e+00> : vector<16xf32>
    %188 = vector.multi_reduction <add>, %187, %cst_67 [1] : vector<16x16xf32> to vector<16xf32>
    %189 = vector.shape_cast %188 : vector<16xf32> to vector<16x1xf32>
    %190 = tpu.reciprocal %189 : vector<16x1xf32> -> vector<16x1xf32>
    %191 = vector.broadcast %190 : vector<16x1xf32> to vector<16x16xf32>
    %192 = arith.mulf %187, %191 : vector<16x16xf32>
    %193 = arith.truncf %192 : vector<16x16xf32> to vector<16x16xbf16>
    %194 = vector.extract_strided_slice %114 {offsets = [0, 24], sizes = [16, 8], strides = [1, 1]} : vector<16x32xbf16> to vector<16x8xbf16>
    %cst_68 = arith.constant dense<0.000000e+00> : vector<16x8xf32>
    %195 = tpu.matmul %193, %194, %cst_68 {dimension_numbers = #tpu.dot_dimension_numbers<[1], [0], [0], [1], [0, 0, 1, 1], [], []>} : vector<16x16xbf16>, vector<16x8xbf16>, vector<16x8xf32> -> vector<16x8xf32>
    %196 = vector.extract_strided_slice %73 {offsets = [24, 0], sizes = [8, 32], strides = [1, 1]} : vector<32x32xbf16> to vector<8x32xbf16>
    %197 = arith.truncf %195 : vector<16x8xf32> to vector<16x8xbf16>
    %cst_69 = arith.constant dense<0.000000e+00> : vector<16x32xf32>
    %198 = tpu.matmul %197, %196, %cst_69 {dimension_numbers = #tpu.dot_dimension_numbers<[1], [0], [0], [1], [0, 0, 1, 1], [], []>} : vector<16x8xbf16>, vector<8x32xbf16>, vector<16x32xf32> -> vector<16x32xf32>
    %199 = arith.addf %178, %198 : vector<16x32xf32>
    %200 = arith.addf %3, %199 : vector<16x32xf32>
    %201 = vector.extract_strided_slice %5 {offsets = [2, 0], sizes = [1, 32], strides = [1, 1]} : vector<8x32xf32> to vector<1x32xf32>
    %202 = vector.broadcast %201 : vector<1x32xf32> to vector<16x32xf32>
    %203 = arith.addf %200, %202 : vector<16x32xf32>
    %c0_70 = arith.constant 0 : index
    %c0_71 = arith.constant 0 : index
    %c0_72 = arith.constant 0 : index
    %c0_73 = arith.constant 0 : index
    %204 = vector.load %arg7[%c0_70, %c0_71, %c0_72, %c0_73] : memref<1x1x32x128xbf16, #tpu.memory_space<vmem>>, vector<1x1x32x128xbf16>
    %205 = vector.shape_cast %204 : vector<1x1x32x128xbf16> to vector<32x128xbf16>
    %c0_74 = arith.constant 0 : index
    %c0_75 = arith.constant 0 : index
    %c0_76 = arith.constant 0 : index
    %c0_77 = arith.constant 0 : index
    %206 = vector.load %arg8[%c0_74, %c0_75, %c0_76, %c0_77] : memref<1x1x128x32xbf16, #tpu.memory_space<vmem>>, vector<1x1x128x32xbf16>
    %207 = vector.shape_cast %206 : vector<1x1x128x32xbf16> to vector<128x32xbf16>
    %c0_78 = arith.constant 0 : index
    %c0_79 = arith.constant 0 : index
    %c0_80 = arith.constant 0 : index
    %c0_81 = arith.constant 0 : index
    %208 = vector.load %arg11[%c0_78, %c0_79, %c0_80, %c0_81] : memref<1x1x1x128xf32, #tpu.memory_space<vmem>>, vector<1x1x1x128xf32>
    %209 = vector.shape_cast %208 : vector<1x1x1x128xf32> to vector<1x128xf32>
    %210 = vector.extract_strided_slice %5 {offsets = [3, 0], sizes = [1, 32], strides = [1, 1]} : vector<8x32xf32> to vector<1x32xf32>
    %211 = vector.extract_strided_slice %5 {offsets = [4, 0], sizes = [1, 32], strides = [1, 1]} : vector<8x32xf32> to vector<1x32xf32>
    %cst_82 = arith.constant dense<0.000000e+00> : vector<16xf32>
    %212 = vector.multi_reduction <add>, %203, %cst_82 [1] : vector<16x32xf32> to vector<16xf32>
    %213 = vector.shape_cast %212 : vector<16xf32> to vector<16x1xf32>
    %cst_83 = arith.constant 3.200000e+01 : f32
    %214 = vector.broadcast %cst_83 : f32 to vector<16x1xf32>
    %215 = arith.divf %213, %214 : vector<16x1xf32>
    %216 = vector.broadcast %215 : vector<16x1xf32> to vector<16x32xf32>
    %217 = arith.subf %203, %216 : vector<16x32xf32>
    %218 = arith.mulf %217, %217 : vector<16x32xf32>
    %cst_84 = arith.constant dense<0.000000e+00> : vector<16xf32>
    %219 = vector.multi_reduction <add>, %218, %cst_84 [1] : vector<16x32xf32> to vector<16xf32>
    %220 = vector.shape_cast %219 : vector<16xf32> to vector<16x1xf32>
    %cst_85 = arith.constant 3.200000e+01 : f32
    %221 = vector.broadcast %cst_85 : f32 to vector<16x1xf32>
    %222 = arith.divf %220, %221 : vector<16x1xf32>
    %cst_86 = arith.constant 9.99999974E-6 : f32
    %223 = vector.broadcast %cst_86 : f32 to vector<16x1xf32>
    %224 = arith.addf %222, %223 : vector<16x1xf32>
    %225 = math.rsqrt %224 : vector<16x1xf32>
    %226 = vector.broadcast %225 : vector<16x1xf32> to vector<16x32xf32>
    %227 = arith.mulf %217, %226 : vector<16x32xf32>
    %228 = vector.broadcast %210 : vector<1x32xf32> to vector<16x32xf32>
    %229 = arith.mulf %227, %228 : vector<16x32xf32>
    %230 = vector.broadcast %211 : vector<1x32xf32> to vector<16x32xf32>
    %231 = arith.addf %229, %230 : vector<16x32xf32>
    %232 = arith.truncf %231 : vector<16x32xf32> to vector<16x32xbf16>
    %cst_87 = arith.constant dense<0.000000e+00> : vector<16x128xf32>
    %233 = tpu.matmul %232, %205, %cst_87 {dimension_numbers = #tpu.dot_dimension_numbers<[1], [0], [0], [1], [0, 0, 1, 1], [], []>} : vector<16x32xbf16>, vector<32x128xbf16>, vector<16x128xf32> -> vector<16x128xf32>
    %234 = vector.broadcast %209 : vector<1x128xf32> to vector<16x128xf32>
    %235 = arith.addf %233, %234 : vector<16x128xf32>
    %cst_88 = arith.constant 0.000000e+00 : f32
    %236 = vector.broadcast %cst_88 : f32 to vector<16x128xf32>
    %237 = arith.maximumf %235, %236 : vector<16x128xf32>
    %238 = arith.truncf %237 : vector<16x128xf32> to vector<16x128xbf16>
    %cst_89 = arith.constant dense<0.000000e+00> : vector<16x32xf32>
    %239 = tpu.matmul %238, %207, %cst_89 {dimension_numbers = #tpu.dot_dimension_numbers<[1], [0], [0], [1], [0, 0, 1, 1], [], []>} : vector<16x128xbf16>, vector<128x32xbf16>, vector<16x32xf32> -> vector<16x32xf32>
    %240 = arith.addf %203, %239 : vector<16x32xf32>
    %241 = vector.extract_strided_slice %5 {offsets = [5, 0], sizes = [1, 32], strides = [1, 1]} : vector<8x32xf32> to vector<1x32xf32>
    %242 = vector.broadcast %241 : vector<1x32xf32> to vector<16x32xf32>
    %243 = arith.addf %240, %242 : vector<16x32xf32>
    %c0_90 = arith.constant 0 : index
    %c0_91 = arith.constant 0 : index
    %244 = vector.load %arg14[%c0_90, %c0_91] : memref<16x32xf32, #tpu.memory_space<vmem>>, vector<16x32xf32>
    tpu.vector_store %arg14[%c0_90, %c0_91], %243 {strides = array<i32>} : memref<16x32xf32, #tpu.memory_space<vmem>>, vector<16x32xf32>,
    %c1_i32_92 = arith.constant 1 : i32
    %245 = arith.cmpi eq, %arg1, %c1_i32_92 : i32
    %246 = arith.extui %245 : i1 to i32
    %c0_i32_93 = arith.constant 0 : i32
    %247 = arith.cmpi ne, %246, %c0_i32_93 : i32
    scf.if %247 {
      %c0_94 = arith.constant 0 : index
      %c0_95 = arith.constant 0 : index
      %c0_96 = arith.constant 0 : index
      %248 = vector.load %arg12[%c0_94, %c0_95, %c0_96] : memref<1x2x32xf32, #tpu.memory_space<vmem>>, vector<1x2x32xf32>
      %249 = vector.shape_cast %248 : vector<1x2x32xf32> to vector<2x32xf32>
      %250 = vector.extract_strided_slice %249 {offsets = [0, 0], sizes = [1, 32], strides = [1, 1]} : vector<2x32xf32> to vector<1x32xf32>
      %251 = vector.extract_strided_slice %249 {offsets = [1, 0], sizes = [1, 32], strides = [1, 1]} : vector<2x32xf32> to vector<1x32xf32>
      %cst_97 = arith.constant dense<0.000000e+00> : vector<16xf32>
      %252 = vector.multi_reduction <add>, %243, %cst_97 [1] : vector<16x32xf32> to vector<16xf32>
      %253 = vector.shape_cast %252 : vector<16xf32> to vector<16x1xf32>
      %cst_98 = arith.constant 3.200000e+01 : f32
      %254 = vector.broadcast %cst_98 : f32 to vector<16x1xf32>
      %255 = arith.divf %253, %254 : vector<16x1xf32>
      %256 = vector.broadcast %255 : vector<16x1xf32> to vector<16x32xf32>
      %257 = arith.subf %243, %256 : vector<16x32xf32>
      %258 = arith.mulf %257, %257 : vector<16x32xf32>
      %cst_99 = arith.constant dense<0.000000e+00> : vector<16xf32>
      %259 = vector.multi_reduction <add>, %258, %cst_99 [1] : vector<16x32xf32> to vector<16xf32>
      %260 = vector.shape_cast %259 : vector<16xf32> to vector<16x1xf32>
      %cst_100 = arith.constant 3.200000e+01 : f32
      %261 = vector.broadcast %cst_100 : f32 to vector<16x1xf32>
      %262 = arith.divf %260, %261 : vector<16x1xf32>
      %cst_101 = arith.constant 9.99999974E-6 : f32
      %263 = vector.broadcast %cst_101 : f32 to vector<16x1xf32>
      %264 = arith.addf %262, %263 : vector<16x1xf32>
      %265 = math.rsqrt %264 : vector<16x1xf32>
      %266 = vector.broadcast %265 : vector<16x1xf32> to vector<16x32xf32>
      %267 = arith.mulf %257, %266 : vector<16x32xf32>
      %268 = vector.broadcast %250 : vector<1x32xf32> to vector<16x32xf32>
      %269 = arith.mulf %267, %268 : vector<16x32xf32>
      %270 = vector.broadcast %251 : vector<1x32xf32> to vector<16x32xf32>
      %271 = arith.addf %269, %270 : vector<16x32xf32>
      %c0_102 = arith.constant 0 : index
      %c0_103 = arith.constant 0 : index
      %c0_104 = arith.constant 0 : index
      %272 = vector.load %arg13[%c0_102, %c0_103, %c0_104] : memref<1x16x32xf32, #tpu.memory_space<vmem>>, vector<1x16x32xf32>
      %273 = vector.shape_cast %272 : vector<1x16x32xf32> to vector<16x32xf32>
      %274 = vector.shape_cast %271 : vector<16x32xf32> to vector<1x16x32xf32>
      tpu.vector_store %arg13[%c0_102, %c0_103, %c0_104], %274 {strides = array<i32>} : memref<1x16x32xf32, #tpu.memory_space<vmem>>, vector<1x16x32xf32>,
    } else {
    }
    return
  }
  func.func @transform_0(%arg0: i32, %arg1: i32) -> (i32, i32, i32) {
    %c0_i32 = arith.constant 0 : i32
    %c0_i32_0 = arith.constant 0 : i32
    %c0_i32_1 = arith.constant 0 : i32
    return %arg0, %c0_i32, %c0_i32_0 : i32, i32, i32
  }
  func.func @transform_1(%arg0: i32, %arg1: i32) -> (i32, i32, i32) {
    %c0_i32 = arith.constant 0 : i32
    %c0_i32_0 = arith.constant 0 : i32
    %c0_i32_1 = arith.constant 0 : i32
    return %arg0, %c0_i32, %c0_i32_0 : i32, i32, i32
  }
  func.func @transform_2(%arg0: i32, %arg1: i32) -> (i32, i32, i32, i32) {
    %c0_i32 = arith.constant 0 : i32
    %c0_i32_0 = arith.constant 0 : i32
    %c0_i32_1 = arith.constant 0 : i32
    return %arg0, %arg1, %c0_i32, %c0_i32_0 : i32, i32, i32, i32
  }
  func.func @transform_3(%arg0: i32, %arg1: i32) -> (i32, i32, i32, i32) {
    %c0_i32 = arith.constant 0 : i32
    %c0_i32_0 = arith.constant 0 : i32
    %c0_i32_1 = arith.constant 0 : i32
    return %arg0, %arg1, %c0_i32, %c0_i32_0 : i32, i32, i32, i32
  }
  func.func @transform_4(%arg0: i32, %arg1: i32) -> (i32, i32, i32, i32) {
    %c0_i32 = arith.constant 0 : i32
    %c0_i32_0 = arith.constant 0 : i32
    %c0_i32_1 = arith.constant 0 : i32
    return %arg0, %arg1, %c0_i32, %c0_i32_0 : i32, i32, i32, i32
  }
  func.func @transform_5(%arg0: i32, %arg1: i32) -> (i32, i32, i32, i32) {
    %c0_i32 = arith.constant 0 : i32
    %c0_i32_0 = arith.constant 0 : i32
    %c0_i32_1 = arith.constant 0 : i32
    return %arg0, %arg1, %c0_i32, %c0_i32_0 : i32, i32, i32, i32
  }
  func.func @transform_6(%arg0: i32, %arg1: i32) -> (i32, i32, i32, i32) {
    %c0_i32 = arith.constant 0 : i32
    %c0_i32_0 = arith.constant 0 : i32
    %c0_i32_1 = arith.constant 0 : i32
    return %arg0, %arg1, %c0_i32, %c0_i32_0 : i32, i32, i32, i32
  }
  func.func @transform_7(%arg0: i32, %arg1: i32) -> (i32, i32, i32, i32) {
    %c0_i32 = arith.constant 0 : i32
    %c0_i32_0 = arith.constant 0 : i32
    %c0_i32_1 = arith.constant 0 : i32
    return %arg0, %arg1, %c0_i32, %c0_i32_0 : i32, i32, i32, i32
  }
  func.func @transform_8(%arg0: i32, %arg1: i32) -> (i32, i32, i32, i32) {
    %c0_i32 = arith.constant 0 : i32
    %c0_i32_0 = arith.constant 0 : i32
    %c0_i32_1 = arith.constant 0 : i32
    return %arg0, %arg1, %c0_i32, %c0_i32_0 : i32, i32, i32, i32
  }
  func.func @transform_9(%arg0: i32, %arg1: i32) -> (i32, i32, i32, i32) {
    %c0_i32 = arith.constant 0 : i32
    %c0_i32_0 = arith.constant 0 : i32
    %c0_i32_1 = arith.constant 0 : i32
    return %arg0, %arg1, %c0_i32, %c0_i32_0 : i32, i32, i32, i32
  }
  func.func @transform_10(%arg0: i32, %arg1: i32) -> (i32, i32, i32) {
    %c0_i32 = arith.constant 0 : i32
    %c0_i32_0 = arith.constant 0 : i32
    %c0_i32_1 = arith.constant 0 : i32
    return %arg0, %c0_i32, %c0_i32_0 : i32, i32, i32
  }
  func.func @transform_11(%arg0: i32, %arg1: i32) -> (i32, i32, i32) {
    %c0_i32 = arith.constant 0 : i32
    %c0_i32_0 = arith.constant 0 : i32
    %c0_i32_1 = arith.constant 0 : i32
    return %arg0, %c0_i32, %c0_i32_0 : i32, i32, i32
  }
}

module attributes {stable_mosaic.version = 11 : i64} {
  func.func @_self_group_kernel(%arg0: i32, %arg1: i32, %arg2: memref<1x192x8xf32, #tpu.memory_space<vmem>>, %arg3: memref<1x1x8x24xbf16, #tpu.memory_space<vmem>>, %arg4: memref<1x1x8x8xbf16, #tpu.memory_space<vmem>>, %arg5: memref<1x1x8x32xbf16, #tpu.memory_space<vmem>>, %arg6: memref<1x1x32x8xbf16, #tpu.memory_space<vmem>>, %arg7: memref<1x1x8x8xf32, #tpu.memory_space<vmem>>, %arg8: memref<1x1x1x24xf32, #tpu.memory_space<vmem>>, %arg9: memref<1x1x1x32xf32, #tpu.memory_space<vmem>>, %arg10: memref<1x2x8xf32, #tpu.memory_space<vmem>>, %arg11: memref<1x192x8xf32, #tpu.memory_space<vmem>>, %arg12: memref<192x8xf32, #tpu.memory_space<vmem>>) attributes {dimension_semantics = [#tpu.dimension_semantics<parallel>, #tpu.dimension_semantics<arbitrary>], iteration_bounds = array<i64: 3, 3>, scalar_prefetch = 0 : i64, scratch_operands = 1 : i64, tpu.core_type = #tpu.core_type<tc>, window_params = [{transform_indices = @transform_0, window_bounds = array<i64: 1, 192, 8>}, {transform_indices = @transform_1, window_bounds = array<i64: 1, 1, 8, 24>}, {transform_indices = @transform_2, window_bounds = array<i64: 1, 1, 8, 8>}, {transform_indices = @transform_3, window_bounds = array<i64: 1, 1, 8, 32>}, {transform_indices = @transform_4, window_bounds = array<i64: 1, 1, 32, 8>}, {transform_indices = @transform_5, window_bounds = array<i64: 1, 1, 8, 8>}, {transform_indices = @transform_6, window_bounds = array<i64: 1, 1, 1, 24>}, {transform_indices = @transform_7, window_bounds = array<i64: 1, 1, 1, 32>}, {transform_indices = @transform_8, window_bounds = array<i64: 1, 2, 8>}, {transform_indices = @transform_9, window_bounds = array<i64: 1, 192, 8>}]} {
    %c0_i32 = arith.constant 0 : i32
    %0 = arith.cmpi eq, %arg1, %c0_i32 : i32
    %1 = arith.extui %0 : i1 to i32
    %c0_i32_0 = arith.constant 0 : i32
    %2 = arith.cmpi ne, %1, %c0_i32_0 : i32
    scf.if %2 {
      %c0_54 = arith.constant 0 : index
      %c0_55 = arith.constant 0 : index
      %c0_56 = arith.constant 0 : index
      %158 = vector.load %arg2[%c0_54, %c0_55, %c0_56] : memref<1x192x8xf32, #tpu.memory_space<vmem>>, vector<1x192x8xf32>
      %159 = vector.shape_cast %158 : vector<1x192x8xf32> to vector<192x8xf32>
      %c0_57 = arith.constant 0 : index
      %c0_58 = arith.constant 0 : index
      %160 = vector.load %arg12[%c0_57, %c0_58] : memref<192x8xf32, #tpu.memory_space<vmem>>, vector<192x8xf32>
      tpu.vector_store %arg12[%c0_57, %c0_58], %159 {strides = array<i32>} : memref<192x8xf32, #tpu.memory_space<vmem>>, vector<192x8xf32>,
    } else {
    }
    %c0 = arith.constant 0 : index
    %c0_1 = arith.constant 0 : index
    %3 = vector.load %arg12[%c0, %c0_1] : memref<192x8xf32, #tpu.memory_space<vmem>>, vector<192x8xf32>
    %c0_2 = arith.constant 0 : index
    %c0_3 = arith.constant 0 : index
    %c0_4 = arith.constant 0 : index
    %c0_5 = arith.constant 0 : index
    %4 = vector.load %arg7[%c0_2, %c0_3, %c0_4, %c0_5] : memref<1x1x8x8xf32, #tpu.memory_space<vmem>>, vector<1x1x8x8xf32>
    %5 = vector.shape_cast %4 : vector<1x1x8x8xf32> to vector<8x8xf32>
    %6 = vector.extract_strided_slice %5 {offsets = [0, 0], sizes = [1, 8], strides = [1, 1]} : vector<8x8xf32> to vector<1x8xf32>
    %7 = vector.extract_strided_slice %5 {offsets = [1, 0], sizes = [1, 8], strides = [1, 1]} : vector<8x8xf32> to vector<1x8xf32>
    %cst = arith.constant dense<0.000000e+00> : vector<192xf32>
    %8 = vector.multi_reduction <add>, %3, %cst [1] : vector<192x8xf32> to vector<192xf32>
    %9 = vector.shape_cast %8 : vector<192xf32> to vector<192x1xf32>
    %cst_6 = arith.constant 8.000000e+00 : f32
    %10 = vector.broadcast %cst_6 : f32 to vector<192x1xf32>
    %11 = arith.divf %9, %10 : vector<192x1xf32>
    %12 = vector.broadcast %11 : vector<192x1xf32> to vector<192x8xf32>
    %13 = arith.subf %3, %12 : vector<192x8xf32>
    %14 = arith.mulf %13, %13 : vector<192x8xf32>
    %cst_7 = arith.constant dense<0.000000e+00> : vector<192xf32>
    %15 = vector.multi_reduction <add>, %14, %cst_7 [1] : vector<192x8xf32> to vector<192xf32>
    %16 = vector.shape_cast %15 : vector<192xf32> to vector<192x1xf32>
    %cst_8 = arith.constant 8.000000e+00 : f32
    %17 = vector.broadcast %cst_8 : f32 to vector<192x1xf32>
    %18 = arith.divf %16, %17 : vector<192x1xf32>
    %cst_9 = arith.constant 9.99999974E-6 : f32
    %19 = vector.broadcast %cst_9 : f32 to vector<192x1xf32>
    %20 = arith.addf %18, %19 : vector<192x1xf32>
    %21 = math.rsqrt %20 : vector<192x1xf32>
    %22 = vector.broadcast %21 : vector<192x1xf32> to vector<192x8xf32>
    %23 = arith.mulf %13, %22 : vector<192x8xf32>
    %24 = vector.broadcast %6 : vector<1x8xf32> to vector<192x8xf32>
    %25 = arith.mulf %23, %24 : vector<192x8xf32>
    %26 = vector.broadcast %7 : vector<1x8xf32> to vector<192x8xf32>
    %27 = arith.addf %25, %26 : vector<192x8xf32>
    %c0_10 = arith.constant 0 : index
    %c0_11 = arith.constant 0 : index
    %c0_12 = arith.constant 0 : index
    %c0_13 = arith.constant 0 : index
    %28 = vector.load %arg3[%c0_10, %c0_11, %c0_12, %c0_13] : memref<1x1x8x24xbf16, #tpu.memory_space<vmem>>, vector<1x1x8x24xbf16>
    %29 = vector.shape_cast %28 : vector<1x1x8x24xbf16> to vector<8x24xbf16>
    %30 = arith.truncf %27 : vector<192x8xf32> to vector<192x8xbf16>
    %cst_14 = arith.constant dense<0.000000e+00> : vector<192x24xf32>
    %31 = tpu.matmul %30, %29, %cst_14 {dimension_numbers = #tpu.dot_dimension_numbers<[1], [0], [0], [1], [0, 0, 1, 1], [], []>} : vector<192x8xbf16>, vector<8x24xbf16>, vector<192x24xf32> -> vector<192x24xf32>
    %c0_15 = arith.constant 0 : index
    %c0_16 = arith.constant 0 : index
    %c0_17 = arith.constant 0 : index
    %c0_18 = arith.constant 0 : index
    %32 = vector.load %arg8[%c0_15, %c0_16, %c0_17, %c0_18] : memref<1x1x1x24xf32, #tpu.memory_space<vmem>>, vector<1x1x1x24xf32>
    %33 = vector.shape_cast %32 : vector<1x1x1x24xf32> to vector<1x24xf32>
    %34 = vector.broadcast %33 : vector<1x24xf32> to vector<192x24xf32>
    %35 = arith.addf %31, %34 : vector<192x24xf32>
    %36 = vector.extract_strided_slice %35 {offsets = [0, 0], sizes = [192, 8], strides = [1, 1]} : vector<192x24xf32> to vector<192x8xf32>
    %cst_19 = arith.constant 5.000000e-01 : f32
    %37 = vector.broadcast %cst_19 : f32 to vector<192x8xf32>
    %38 = arith.mulf %36, %37 : vector<192x8xf32>
    %39 = vector.extract_strided_slice %35 {offsets = [0, 8], sizes = [192, 8], strides = [1, 1]} : vector<192x24xf32> to vector<192x8xf32>
    %40 = vector.extract_strided_slice %35 {offsets = [0, 16], sizes = [192, 8], strides = [1, 1]} : vector<192x24xf32> to vector<192x8xf32>
    %c0_20 = arith.constant 0 : index
    %c0_21 = arith.constant 0 : index
    %c0_22 = arith.constant 0 : index
    %c0_23 = arith.constant 0 : index
    %41 = vector.load %arg4[%c0_20, %c0_21, %c0_22, %c0_23] : memref<1x1x8x8xbf16, #tpu.memory_space<vmem>>, vector<1x1x8x8xbf16>
    %42 = vector.shape_cast %41 : vector<1x1x8x8xbf16> to vector<8x8xbf16>
    %cst_24 = arith.constant 0.000000e+00 : f32
    %43 = vector.broadcast %cst_24 : f32 to vector<192x8xf32>
    %44 = vector.extract_strided_slice %39 {offsets = [0, 0], sizes = [96, 8], strides = [1, 1]} : vector<192x8xf32> to vector<96x8xf32>
    %45 = tpu.concatenate %44, %44 in 0 : vector<96x8xf32>, vector<96x8xf32> -> vector<192x8xf32>
    %46 = vector.extract_strided_slice %39 {offsets = [96, 0], sizes = [96, 8], strides = [1, 1]} : vector<192x8xf32> to vector<96x8xf32>
    %47 = tpu.concatenate %46, %46 in 0 : vector<96x8xf32>, vector<96x8xf32> -> vector<192x8xf32>
    %48 = vector.extract_strided_slice %40 {offsets = [0, 0], sizes = [96, 8], strides = [1, 1]} : vector<192x8xf32> to vector<96x8xf32>
    %49 = tpu.concatenate %48, %48 in 0 : vector<96x8xf32>, vector<96x8xf32> -> vector<192x8xf32>
    %50 = vector.extract_strided_slice %40 {offsets = [96, 0], sizes = [96, 8], strides = [1, 1]} : vector<192x8xf32> to vector<96x8xf32>
    %51 = tpu.concatenate %50, %50 in 0 : vector<96x8xf32>, vector<96x8xf32> -> vector<192x8xf32>
    %52 = vector.extract_strided_slice %38 {offsets = [0, 0], sizes = [192, 4], strides = [1, 1]} : vector<192x8xf32> to vector<192x4xf32>
    %53 = vector.extract_strided_slice %45 {offsets = [0, 0], sizes = [192, 4], strides = [1, 1]} : vector<192x8xf32> to vector<192x4xf32>
    %54 = arith.mulf %52, %53 : vector<192x4xf32>
    %cst_25 = arith.constant dense<0.000000e+00> : vector<192xf32>
    %55 = vector.multi_reduction <add>, %54, %cst_25 [1] : vector<192x4xf32> to vector<192xf32>
    %56 = vector.shape_cast %55 : vector<192xf32> to vector<192x1xf32>
    %57 = vector.extract_strided_slice %47 {offsets = [0, 0], sizes = [192, 4], strides = [1, 1]} : vector<192x8xf32> to vector<192x4xf32>
    %58 = arith.mulf %52, %57 : vector<192x4xf32>
    %cst_26 = arith.constant dense<0.000000e+00> : vector<192xf32>
    %59 = vector.multi_reduction <add>, %58, %cst_26 [1] : vector<192x4xf32> to vector<192xf32>
    %60 = vector.shape_cast %59 : vector<192xf32> to vector<192x1xf32>
    %61 = arith.maximumf %56, %60 : vector<192x1xf32>
    %62 = arith.subf %56, %61 : vector<192x1xf32>
    %63 = math.exp %62 : vector<192x1xf32>
    %64 = arith.subf %60, %61 : vector<192x1xf32>
    %65 = math.exp %64 : vector<192x1xf32>
    %66 = arith.addf %63, %65 : vector<192x1xf32>
    %67 = tpu.reciprocal %66 : vector<192x1xf32> -> vector<192x1xf32>
    %68 = vector.extract_strided_slice %49 {offsets = [0, 0], sizes = [192, 4], strides = [1, 1]} : vector<192x8xf32> to vector<192x4xf32>
    %69 = vector.broadcast %63 : vector<192x1xf32> to vector<192x4xf32>
    %70 = arith.mulf %69, %68 : vector<192x4xf32>
    %71 = vector.extract_strided_slice %51 {offsets = [0, 0], sizes = [192, 4], strides = [1, 1]} : vector<192x8xf32> to vector<192x4xf32>
    %72 = vector.broadcast %65 : vector<192x1xf32> to vector<192x4xf32>
    %73 = arith.mulf %72, %71 : vector<192x4xf32>
    %74 = arith.addf %70, %73 : vector<192x4xf32>
    %75 = vector.broadcast %67 : vector<192x1xf32> to vector<192x4xf32>
    %76 = arith.mulf %74, %75 : vector<192x4xf32>
    %77 = vector.extract_strided_slice %42 {offsets = [0, 0], sizes = [4, 8], strides = [1, 1]} : vector<8x8xbf16> to vector<4x8xbf16>
    %78 = arith.truncf %76 : vector<192x4xf32> to vector<192x4xbf16>
    %cst_27 = arith.constant dense<0.000000e+00> : vector<192x8xf32>
    %79 = tpu.matmul %78, %77, %cst_27 {dimension_numbers = #tpu.dot_dimension_numbers<[1], [0], [0], [1], [0, 0, 1, 1], [], []>} : vector<192x4xbf16>, vector<4x8xbf16>, vector<192x8xf32> -> vector<192x8xf32>
    %80 = arith.addf %43, %79 : vector<192x8xf32>
    %81 = vector.extract_strided_slice %38 {offsets = [0, 4], sizes = [192, 4], strides = [1, 1]} : vector<192x8xf32> to vector<192x4xf32>
    %82 = vector.extract_strided_slice %45 {offsets = [0, 4], sizes = [192, 4], strides = [1, 1]} : vector<192x8xf32> to vector<192x4xf32>
    %83 = arith.mulf %81, %82 : vector<192x4xf32>
    %cst_28 = arith.constant dense<0.000000e+00> : vector<192xf32>
    %84 = vector.multi_reduction <add>, %83, %cst_28 [1] : vector<192x4xf32> to vector<192xf32>
    %85 = vector.shape_cast %84 : vector<192xf32> to vector<192x1xf32>
    %86 = vector.extract_strided_slice %47 {offsets = [0, 4], sizes = [192, 4], strides = [1, 1]} : vector<192x8xf32> to vector<192x4xf32>
    %87 = arith.mulf %81, %86 : vector<192x4xf32>
    %cst_29 = arith.constant dense<0.000000e+00> : vector<192xf32>
    %88 = vector.multi_reduction <add>, %87, %cst_29 [1] : vector<192x4xf32> to vector<192xf32>
    %89 = vector.shape_cast %88 : vector<192xf32> to vector<192x1xf32>
    %90 = arith.maximumf %85, %89 : vector<192x1xf32>
    %91 = arith.subf %85, %90 : vector<192x1xf32>
    %92 = math.exp %91 : vector<192x1xf32>
    %93 = arith.subf %89, %90 : vector<192x1xf32>
    %94 = math.exp %93 : vector<192x1xf32>
    %95 = arith.addf %92, %94 : vector<192x1xf32>
    %96 = tpu.reciprocal %95 : vector<192x1xf32> -> vector<192x1xf32>
    %97 = vector.extract_strided_slice %49 {offsets = [0, 4], sizes = [192, 4], strides = [1, 1]} : vector<192x8xf32> to vector<192x4xf32>
    %98 = vector.broadcast %92 : vector<192x1xf32> to vector<192x4xf32>
    %99 = arith.mulf %98, %97 : vector<192x4xf32>
    %100 = vector.extract_strided_slice %51 {offsets = [0, 4], sizes = [192, 4], strides = [1, 1]} : vector<192x8xf32> to vector<192x4xf32>
    %101 = vector.broadcast %94 : vector<192x1xf32> to vector<192x4xf32>
    %102 = arith.mulf %101, %100 : vector<192x4xf32>
    %103 = arith.addf %99, %102 : vector<192x4xf32>
    %104 = vector.broadcast %96 : vector<192x1xf32> to vector<192x4xf32>
    %105 = arith.mulf %103, %104 : vector<192x4xf32>
    %106 = vector.extract_strided_slice %42 {offsets = [4, 0], sizes = [4, 8], strides = [1, 1]} : vector<8x8xbf16> to vector<4x8xbf16>
    %107 = arith.truncf %105 : vector<192x4xf32> to vector<192x4xbf16>
    %cst_30 = arith.constant dense<0.000000e+00> : vector<192x8xf32>
    %108 = tpu.matmul %107, %106, %cst_30 {dimension_numbers = #tpu.dot_dimension_numbers<[1], [0], [0], [1], [0, 0, 1, 1], [], []>} : vector<192x4xbf16>, vector<4x8xbf16>, vector<192x8xf32> -> vector<192x8xf32>
    %109 = arith.addf %80, %108 : vector<192x8xf32>
    %110 = arith.addf %3, %109 : vector<192x8xf32>
    %111 = vector.extract_strided_slice %5 {offsets = [2, 0], sizes = [1, 8], strides = [1, 1]} : vector<8x8xf32> to vector<1x8xf32>
    %112 = vector.broadcast %111 : vector<1x8xf32> to vector<192x8xf32>
    %113 = arith.addf %110, %112 : vector<192x8xf32>
    %c0_31 = arith.constant 0 : index
    %c0_32 = arith.constant 0 : index
    %c0_33 = arith.constant 0 : index
    %c0_34 = arith.constant 0 : index
    %114 = vector.load %arg5[%c0_31, %c0_32, %c0_33, %c0_34] : memref<1x1x8x32xbf16, #tpu.memory_space<vmem>>, vector<1x1x8x32xbf16>
    %115 = vector.shape_cast %114 : vector<1x1x8x32xbf16> to vector<8x32xbf16>
    %c0_35 = arith.constant 0 : index
    %c0_36 = arith.constant 0 : index
    %c0_37 = arith.constant 0 : index
    %c0_38 = arith.constant 0 : index
    %116 = vector.load %arg6[%c0_35, %c0_36, %c0_37, %c0_38] : memref<1x1x32x8xbf16, #tpu.memory_space<vmem>>, vector<1x1x32x8xbf16>
    %117 = vector.shape_cast %116 : vector<1x1x32x8xbf16> to vector<32x8xbf16>
    %c0_39 = arith.constant 0 : index
    %c0_40 = arith.constant 0 : index
    %c0_41 = arith.constant 0 : index
    %c0_42 = arith.constant 0 : index
    %118 = vector.load %arg9[%c0_39, %c0_40, %c0_41, %c0_42] : memref<1x1x1x32xf32, #tpu.memory_space<vmem>>, vector<1x1x1x32xf32>
    %119 = vector.shape_cast %118 : vector<1x1x1x32xf32> to vector<1x32xf32>
    %120 = vector.extract_strided_slice %5 {offsets = [3, 0], sizes = [1, 8], strides = [1, 1]} : vector<8x8xf32> to vector<1x8xf32>
    %121 = vector.extract_strided_slice %5 {offsets = [4, 0], sizes = [1, 8], strides = [1, 1]} : vector<8x8xf32> to vector<1x8xf32>
    %cst_43 = arith.constant dense<0.000000e+00> : vector<192xf32>
    %122 = vector.multi_reduction <add>, %113, %cst_43 [1] : vector<192x8xf32> to vector<192xf32>
    %123 = vector.shape_cast %122 : vector<192xf32> to vector<192x1xf32>
    %cst_44 = arith.constant 8.000000e+00 : f32
    %124 = vector.broadcast %cst_44 : f32 to vector<192x1xf32>
    %125 = arith.divf %123, %124 : vector<192x1xf32>
    %126 = vector.broadcast %125 : vector<192x1xf32> to vector<192x8xf32>
    %127 = arith.subf %113, %126 : vector<192x8xf32>
    %128 = arith.mulf %127, %127 : vector<192x8xf32>
    %cst_45 = arith.constant dense<0.000000e+00> : vector<192xf32>
    %129 = vector.multi_reduction <add>, %128, %cst_45 [1] : vector<192x8xf32> to vector<192xf32>
    %130 = vector.shape_cast %129 : vector<192xf32> to vector<192x1xf32>
    %cst_46 = arith.constant 8.000000e+00 : f32
    %131 = vector.broadcast %cst_46 : f32 to vector<192x1xf32>
    %132 = arith.divf %130, %131 : vector<192x1xf32>
    %cst_47 = arith.constant 9.99999974E-6 : f32
    %133 = vector.broadcast %cst_47 : f32 to vector<192x1xf32>
    %134 = arith.addf %132, %133 : vector<192x1xf32>
    %135 = math.rsqrt %134 : vector<192x1xf32>
    %136 = vector.broadcast %135 : vector<192x1xf32> to vector<192x8xf32>
    %137 = arith.mulf %127, %136 : vector<192x8xf32>
    %138 = vector.broadcast %120 : vector<1x8xf32> to vector<192x8xf32>
    %139 = arith.mulf %137, %138 : vector<192x8xf32>
    %140 = vector.broadcast %121 : vector<1x8xf32> to vector<192x8xf32>
    %141 = arith.addf %139, %140 : vector<192x8xf32>
    %142 = arith.truncf %141 : vector<192x8xf32> to vector<192x8xbf16>
    %cst_48 = arith.constant dense<0.000000e+00> : vector<192x32xf32>
    %143 = tpu.matmul %142, %115, %cst_48 {dimension_numbers = #tpu.dot_dimension_numbers<[1], [0], [0], [1], [0, 0, 1, 1], [], []>} : vector<192x8xbf16>, vector<8x32xbf16>, vector<192x32xf32> -> vector<192x32xf32>
    %144 = vector.broadcast %119 : vector<1x32xf32> to vector<192x32xf32>
    %145 = arith.addf %143, %144 : vector<192x32xf32>
    %cst_49 = arith.constant 0.000000e+00 : f32
    %146 = vector.broadcast %cst_49 : f32 to vector<192x32xf32>
    %147 = arith.maximumf %145, %146 : vector<192x32xf32>
    %148 = arith.truncf %147 : vector<192x32xf32> to vector<192x32xbf16>
    %cst_50 = arith.constant dense<0.000000e+00> : vector<192x8xf32>
    %149 = tpu.matmul %148, %117, %cst_50 {dimension_numbers = #tpu.dot_dimension_numbers<[1], [0], [0], [1], [0, 0, 1, 1], [], []>} : vector<192x32xbf16>, vector<32x8xbf16>, vector<192x8xf32> -> vector<192x8xf32>
    %150 = arith.addf %113, %149 : vector<192x8xf32>
    %151 = vector.extract_strided_slice %5 {offsets = [5, 0], sizes = [1, 8], strides = [1, 1]} : vector<8x8xf32> to vector<1x8xf32>
    %152 = vector.broadcast %151 : vector<1x8xf32> to vector<192x8xf32>
    %153 = arith.addf %150, %152 : vector<192x8xf32>
    %c0_51 = arith.constant 0 : index
    %c0_52 = arith.constant 0 : index
    %154 = vector.load %arg12[%c0_51, %c0_52] : memref<192x8xf32, #tpu.memory_space<vmem>>, vector<192x8xf32>
    tpu.vector_store %arg12[%c0_51, %c0_52], %153 {strides = array<i32>} : memref<192x8xf32, #tpu.memory_space<vmem>>, vector<192x8xf32>,
    %c2_i32 = arith.constant 2 : i32
    %155 = arith.cmpi eq, %arg1, %c2_i32 : i32
    %156 = arith.extui %155 : i1 to i32
    %c0_i32_53 = arith.constant 0 : i32
    %157 = arith.cmpi ne, %156, %c0_i32_53 : i32
    scf.if %157 {
      %c0_54 = arith.constant 0 : index
      %c0_55 = arith.constant 0 : index
      %c0_56 = arith.constant 0 : index
      %158 = vector.load %arg10[%c0_54, %c0_55, %c0_56] : memref<1x2x8xf32, #tpu.memory_space<vmem>>, vector<1x2x8xf32>
      %159 = vector.shape_cast %158 : vector<1x2x8xf32> to vector<2x8xf32>
      %160 = vector.extract_strided_slice %159 {offsets = [0, 0], sizes = [1, 8], strides = [1, 1]} : vector<2x8xf32> to vector<1x8xf32>
      %161 = vector.extract_strided_slice %159 {offsets = [1, 0], sizes = [1, 8], strides = [1, 1]} : vector<2x8xf32> to vector<1x8xf32>
      %cst_57 = arith.constant dense<0.000000e+00> : vector<192xf32>
      %162 = vector.multi_reduction <add>, %153, %cst_57 [1] : vector<192x8xf32> to vector<192xf32>
      %163 = vector.shape_cast %162 : vector<192xf32> to vector<192x1xf32>
      %cst_58 = arith.constant 8.000000e+00 : f32
      %164 = vector.broadcast %cst_58 : f32 to vector<192x1xf32>
      %165 = arith.divf %163, %164 : vector<192x1xf32>
      %166 = vector.broadcast %165 : vector<192x1xf32> to vector<192x8xf32>
      %167 = arith.subf %153, %166 : vector<192x8xf32>
      %168 = arith.mulf %167, %167 : vector<192x8xf32>
      %cst_59 = arith.constant dense<0.000000e+00> : vector<192xf32>
      %169 = vector.multi_reduction <add>, %168, %cst_59 [1] : vector<192x8xf32> to vector<192xf32>
      %170 = vector.shape_cast %169 : vector<192xf32> to vector<192x1xf32>
      %cst_60 = arith.constant 8.000000e+00 : f32
      %171 = vector.broadcast %cst_60 : f32 to vector<192x1xf32>
      %172 = arith.divf %170, %171 : vector<192x1xf32>
      %cst_61 = arith.constant 9.99999974E-6 : f32
      %173 = vector.broadcast %cst_61 : f32 to vector<192x1xf32>
      %174 = arith.addf %172, %173 : vector<192x1xf32>
      %175 = math.rsqrt %174 : vector<192x1xf32>
      %176 = vector.broadcast %175 : vector<192x1xf32> to vector<192x8xf32>
      %177 = arith.mulf %167, %176 : vector<192x8xf32>
      %178 = vector.broadcast %160 : vector<1x8xf32> to vector<192x8xf32>
      %179 = arith.mulf %177, %178 : vector<192x8xf32>
      %180 = vector.broadcast %161 : vector<1x8xf32> to vector<192x8xf32>
      %181 = arith.addf %179, %180 : vector<192x8xf32>
      %c0_62 = arith.constant 0 : index
      %c0_63 = arith.constant 0 : index
      %c0_64 = arith.constant 0 : index
      %182 = vector.load %arg11[%c0_62, %c0_63, %c0_64] : memref<1x192x8xf32, #tpu.memory_space<vmem>>, vector<1x192x8xf32>
      %183 = vector.shape_cast %182 : vector<1x192x8xf32> to vector<192x8xf32>
      %184 = vector.shape_cast %181 : vector<192x8xf32> to vector<1x192x8xf32>
      tpu.vector_store %arg11[%c0_62, %c0_63, %c0_64], %184 {strides = array<i32>} : memref<1x192x8xf32, #tpu.memory_space<vmem>>, vector<1x192x8xf32>,
    } else {
    }
    return
  }
  func.func @transform_0(%arg0: i32, %arg1: i32) -> (i32, i32, i32) {
    %c0_i32 = arith.constant 0 : i32
    %c0_i32_0 = arith.constant 0 : i32
    %c0_i32_1 = arith.constant 0 : i32
    return %arg0, %c0_i32, %c0_i32_0 : i32, i32, i32
  }
  func.func @transform_1(%arg0: i32, %arg1: i32) -> (i32, i32, i32, i32) {
    %c0_i32 = arith.constant 0 : i32
    %c0_i32_0 = arith.constant 0 : i32
    %c0_i32_1 = arith.constant 0 : i32
    return %arg0, %arg1, %c0_i32, %c0_i32_0 : i32, i32, i32, i32
  }
  func.func @transform_2(%arg0: i32, %arg1: i32) -> (i32, i32, i32, i32) {
    %c0_i32 = arith.constant 0 : i32
    %c0_i32_0 = arith.constant 0 : i32
    %c0_i32_1 = arith.constant 0 : i32
    return %arg0, %arg1, %c0_i32, %c0_i32_0 : i32, i32, i32, i32
  }
  func.func @transform_3(%arg0: i32, %arg1: i32) -> (i32, i32, i32, i32) {
    %c0_i32 = arith.constant 0 : i32
    %c0_i32_0 = arith.constant 0 : i32
    %c0_i32_1 = arith.constant 0 : i32
    return %arg0, %arg1, %c0_i32, %c0_i32_0 : i32, i32, i32, i32
  }
  func.func @transform_4(%arg0: i32, %arg1: i32) -> (i32, i32, i32, i32) {
    %c0_i32 = arith.constant 0 : i32
    %c0_i32_0 = arith.constant 0 : i32
    %c0_i32_1 = arith.constant 0 : i32
    return %arg0, %arg1, %c0_i32, %c0_i32_0 : i32, i32, i32, i32
  }
  func.func @transform_5(%arg0: i32, %arg1: i32) -> (i32, i32, i32, i32) {
    %c0_i32 = arith.constant 0 : i32
    %c0_i32_0 = arith.constant 0 : i32
    %c0_i32_1 = arith.constant 0 : i32
    return %arg0, %arg1, %c0_i32, %c0_i32_0 : i32, i32, i32, i32
  }
  func.func @transform_6(%arg0: i32, %arg1: i32) -> (i32, i32, i32, i32) {
    %c0_i32 = arith.constant 0 : i32
    %c0_i32_0 = arith.constant 0 : i32
    %c0_i32_1 = arith.constant 0 : i32
    return %arg0, %arg1, %c0_i32, %c0_i32_0 : i32, i32, i32, i32
  }
  func.func @transform_7(%arg0: i32, %arg1: i32) -> (i32, i32, i32, i32) {
    %c0_i32 = arith.constant 0 : i32
    %c0_i32_0 = arith.constant 0 : i32
    %c0_i32_1 = arith.constant 0 : i32
    return %arg0, %arg1, %c0_i32, %c0_i32_0 : i32, i32, i32, i32
  }
  func.func @transform_8(%arg0: i32, %arg1: i32) -> (i32, i32, i32) {
    %c0_i32 = arith.constant 0 : i32
    %c0_i32_0 = arith.constant 0 : i32
    %c0_i32_1 = arith.constant 0 : i32
    return %arg0, %c0_i32, %c0_i32_0 : i32, i32, i32
  }
  func.func @transform_9(%arg0: i32, %arg1: i32) -> (i32, i32, i32) {
    %c0_i32 = arith.constant 0 : i32
    %c0_i32_0 = arith.constant 0 : i32
    %c0_i32_1 = arith.constant 0 : i32
    return %arg0, %c0_i32, %c0_i32_0 : i32, i32, i32
  }
}

</mosaic_0001>

<bundles_post_ra>
// kernel: cm_attn_forward.6
= control target key start
LH: loop header
LB: loop body
LE: loop exit
PB: predicated region body
PF: predicated region fallthrough
CT: control target
= control target key end

     0   :  { %vm71_vm0 = vcmask 1041408   ;;  %v166_v0 = vmov 0.0   ;;  %vm167_vm1 = vmmov 0   ;;  %vm67_vm2 = vcmask 818176   ;;  %s216_s1 = inlined_call_operand.vmem [shape: bf16[100,32], index: 1, kind: input, shape index: {}]   ;;  %s217_s0 = inlined_call_operand.vmem [shape: f32[16,100], index: 0, kind: input, shape index: {}]   ;;  %s218_s2 = inlined_call_operand.vmem [shape: f32[16,32], index: 2, kind: output, shape index: {}]  }
   0x1   :  { %139 = vmatprep.subr.bf16.mxu0 %v166_v0  ;;  %v159_v1 = vld [vmem:[%s216_s1 + $0x30] ss:$0 sps:$4 sm:$0x33]   ;;  %153 = vmatprep.mubr.msk.bf16.mxu0 %vm167_vm1, %v166_v0  ;;  %v160_v3 = vld [vmem:[%s216_s1 + $0x28] sm:$0xff]   ;;  %v161_v4 = vld [vmem:[%s216_s1 + $0x20] sm:$0xff]   ;;  %vm116_vm3 = vcmask 261120  }
   0x2   :  { %v73_v2 = vsel %vm71_vm0, %v159_v1, 0  ;;  %v162_v5 = vld [vmem:[%s216_s1 + $0x18] sm:$0xff]   ;;  %v163_v6 = vld [vmem:[%s216_s1 + $0x10] sm:$0xff]   ;;  %v164_v7 = vld [vmem:[%s216_s1 + $0x8] sm:$0xff]  }
   0x3   :  { %140 = vmatpush3.bf16.msra.mxu0 %v73_v2  ;;  %v165_v8 = vld [vmem:[%s216_s1] sm:$0xff]   ;;  %v13_v10 = vld [vmem:[%s217_s0 + $0x8] sm:$0xff] }
   0x4   :  { %141 = vmatprep.subr.bf16.mxu0 %v166_v0  ;;  %v12_v9 = vld [vmem:[%s217_s0] sm:$0xff] }
   0x5   :  { %v14_v11 = vpack.c.bf16 %v13_v10, %v12_v9 }
   0x7   :  { %142 = vmatpush3.bf16.msra.mxu0 %v160_v3 }
   0x8   :  { %143 = vmatprep.subr.bf16.mxu0 %v166_v0 }
   0xb   :  { %144 = vmatpush3.bf16.msra.mxu0 %v161_v4 }
   0xc   :  { %145 = vmatprep.subr.bf16.mxu0 %v166_v0 }
   0xf   :  { %146 = vmatpush3.bf16.msra.mxu0 %v162_v5 }
  0x10   :  { %147 = vmatprep.subr.bf16.mxu0 %v166_v0 }
  0x13   :  { %148 = vmatpush3.bf16.msra.mxu0 %v163_v6 }
  0x14   :  { %149 = vmatprep.subr.bf16.mxu0 %v166_v0 }
  0x17   :  { %150 = vmatpush3.bf16.msra.mxu0 %v164_v7 }
  0x18   :  { %151 = vmatprep.subr.bf16.mxu0 %v166_v0 }
  0x1b   :  { %152 = vmatpush3.bf16.msra.mxu0 %v165_v8 }
  0x1e   :  { %154 = vmatmul.mubr.msk.bf16.vlgmr.msra.gmra.mxu0 %vm67_vm2, %v14_v11 }
  0xde   :  { %v109_v12 = vpop.f32.mrf.mxu0 }
  0xdf   :  { %117 = vst.msk [vmem:[%s218_s2] sm:$0xff] %vm116_vm3, %v109_v12 }
  0xe0   :  { %v155_v13 = vpop.f32.mrf.mxu0 }
  0xe2   :  { %v112_v14 = vpop.f32.mrf.mxu0 }
  0xe3   :  { %118 = vst.msk [vmem:[%s218_s2 + $0x8] sm:$0xff] %vm116_vm3, %v112_v14 }
  0xe4   :  { %v156_v15 = vpop.f32.mrf.mxu0 }

// kernel: cm_attn_forward.7
= control target key start
LH: loop header
LB: loop body
LE: loop exit
PB: predicated region body
PF: predicated region fallthrough
CT: control target
= control target key end

     0   :  { %vm20_vm0 = vcmask 1041408   ;;  %vm21_vm1 = vcmask 1042432   ;;  %v87_v0 = vmov 0.0   ;;  %v88_v2 = vmov 65535   ;;  %s120_s1 = inlined_call_operand.vmem [shape: bf16[5,32], index: 1, kind: input, shape index: {}]   ;;  %s121_s0 = inlined_call_operand.vmem [shape: f32[16,5], index: 0, kind: input, shape index: {}]   ;;  %s122_s2 = inlined_call_operand.vmem [shape: f32[16,32], index: 2, kind: output, shape index: {}]  }
   0x1   :  { %78 = vmatprep.subr.bf16.mxu0 %v87_v0  ;;  %v15_v1 = vld [vmem:[%s120_s1] sm:$0x7]  ;;  %v22_v3 = vsel %vm20_vm0, 4294967295, %v88_v2  ;;  %v13_v5 = vld [vmem:[%s121_s0 + $0x8] sm:$0xff]  ;;  %vm89_vm2 = vmmov 0   ;;  %vm16_vm3 = vcmask 39936  }
   0x2   :  { %v12_v4 = vld [vmem:[%s121_s0] sm:$0xff]  ;;  %v23_v6 = vsel %vm21_vm1, %v22_v3, 0  ;;  %80 = vmatprep.mubr.msk.bf16.mxu0 %vm89_vm2, %v87_v0  ;;  %vm68_vm4 = vcmask 261120  }
   0x3   :  { %v25_v7 = vand.u32 %v23_v6, %v15_v1  ;;  %v14_v8 = vpack.c.bf16 %v13_v5, %v12_v4 }
   0x5   :  { %79 = vmatpush3.bf16.msra.mxu0 %v25_v7 }
   0x8   :  { %81 = vmatmul.mubr.msk.bf16.vlgmr.msra.gmra.mxu0 %vm16_vm3, %v14_v8 }
  0xc8   :  { %v61_v9 = vpop.f32.mrf.mxu0 }
  0xc9   :  { %69 = vst.msk [vmem:[%s122_s2] sm:$0xff] %vm68_vm4, %v61_v9 }
  0xca   :  { %v82_v10 = vpop.f32.mrf.mxu0 }
  0xcc   :  { %v64_v11 = vpop.f32.mrf.mxu0 }
  0xcd   :  { %70 = vst.msk [vmem:[%s122_s2 + $0x8] sm:$0xff] %vm68_vm4, %v64_v11 }
  0xce   :  { %v83_v12 = vpop.f32.mrf.mxu0 }

// kernel: cm_attn_forward.8
= control target key start
LH: loop header
LB: loop body
LE: loop exit
PB: predicated region body
PF: predicated region fallthrough
CT: control target
= control target key end

     0   :  { %vm39_vm0 = vcmask 1041408   ;;  %v114_v0 = vmov 0.0   ;;  %vm115_vm1 = vmmov 0   ;;  %vm35_vm2 = vcmask 293888   ;;  %s152_s1 = inlined_call_operand.vmem [shape: bf16[36,32], index: 1, kind: input, shape index: {}]   ;;  %s153_s0 = inlined_call_operand.vmem [shape: f32[16,36], index: 0, kind: input, shape index: {}]   ;;  %s154_s2 = inlined_call_operand.vmem [shape: f32[16,32], index: 2, kind: output, shape index: {}]  }
   0x1   :  { %99 = vmatprep.subr.bf16.mxu0 %v114_v0  ;;  %v111_v1 = vld [vmem:[%s152_s1 + $0x10] ss:$0 sps:$4 sm:$0x33]   ;;  %105 = vmatprep.mubr.msk.bf16.mxu0 %vm115_vm1, %v114_v0  ;;  %v112_v3 = vld [vmem:[%s152_s1 + $0x8] sm:$0xff]   ;;  %v113_v4 = vld [vmem:[%s152_s1] sm:$0xff]   ;;  %vm84_vm3 = vcmask 261120  }
   0x2   :  { %v41_v2 = vsel %vm39_vm0, %v111_v1, 0  ;;  %v12_v5 = vld [vmem:[%s153_s0] sm:$0xff]  ;;  %v13_v6 = vld [vmem:[%s153_s0 + $0x8] sm:$0xff] }
   0x3   :  { %100 = vmatpush3.bf16.msra.mxu0 %v41_v2  ;;  %v14_v7 = vpack.c.bf16 %v13_v6, %v12_v5 }
   0x4   :  { %101 = vmatprep.subr.bf16.mxu0 %v114_v0 }
   0x7   :  { %102 = vmatpush3.bf16.msra.mxu0 %v112_v3 }
   0x8   :  { %103 = vmatprep.subr.bf16.mxu0 %v114_v0 }
   0xb   :  { %104 = vmatpush3.bf16.msra.mxu0 %v113_v4 }
   0xe   :  { %106 = vmatmul.mubr.msk.bf16.vlgmr.msra.gmra.mxu0 %vm35_vm2, %v14_v7 }
  0xce   :  { %v77_v8 = vpop.f32.mrf.mxu0 }
  0xcf   :  { %85 = vst.msk [vmem:[%s154_s2] sm:$0xff] %vm84_vm3, %v77_v8 }
  0xd0   :  { %v107_v9 = vpop.f32.mrf.mxu0 }
  0xd2   :  { %v80_v10 = vpop.f32.mrf.mxu0 }
  0xd3   :  { %86 = vst.msk [vmem:[%s154_s2 + $0x8] sm:$0xff] %vm84_vm3, %v80_v10 }
  0xd4   :  { %v108_v11 = vpop.f32.mrf.mxu0 }

// kernel: cm_attn_forward.10
= control target key start
LH: loop header
LB: loop body
LE: loop exit
PB: predicated region body
PF: predicated region fallthrough
CT: control target
= control target key end

     0   :  { %s2346_s30 = smov 0   ;;  %s2348_s10 = smov 0   ;;  %s2670_s0 = inlined_call_operand.vmem [shape: f32[3,16,32], index: 0, kind: input, shape index: {}]   ;;  %s2671_s1 = inlined_call_operand.vmem [shape: bf16[3,3,32,96], index: 1, kind: input, shape index: {}]   ;;  %s2672_s2 = inlined_call_operand.vmem [shape: bf16[3,3,32,32], index: 2, kind: input, shape index: {}]   ;;  %s2673_s3 = inlined_call_operand.vmem [shape: bf16[3,3,32,128], index: 3, kind: input, shape index: {}]   ;;  %s2674_s4 = inlined_call_operand.vmem [shape: bf16[3,3,128,32], index: 4, kind: input, shape index: {}]   ;;  %s2675_s5 = inlined_call_operand.vmem [shape: f32[3,3,8,32], index: 5, kind: input, shape index: {}]   ;;  %s2676_s6 = inlined_call_operand.vmem [shape: f32[3,3,1,96], index: 6, kind: input, shape index: {}]   ;;  %s2677_s7 = inlined_call_operand.vmem [shape: f32[3,3,1,128], index: 7, kind: input, shape index: {}]   ;;  %s2678_s8 = inlined_call_operand.vmem [shape: f32[3,2,32], index: 8, kind: input, shape index: {}]   ;;  %s2679_s9 = inlined_call_operand.vmem [shape: f32[3,16,32], index: 9, kind: output, shape index: {}]  }
   0x1   :  { %2684 = sst [smem:[#allocation9_spill]] %s2670_s0  ;;  %s2350_s11 = smov 0  }
   0x2   :  { %2685 = sst [smem:[#allocation10_spill]] %s2671_s1  ;;  %s2352_s12 = smov 0  }
   0x3   :  { %s2354_s13 = smov 0  }
   0x4 LB: > { %2686 = sst [smem:[#allocation3_spill]] %s2264_s30  ;;  %s28_s14 = sadd.s32 1, %s2272_s11  ;;  %s2280_s13 = sphi %s2354_s13, %s19_s13   ;;  %s2276_s12 = sphi %s2352_s12, %s2700_s12   ;;  %s2272_s11 = sphi %s2350_s11, %s2699_s11   ;;  %s2268_s10 = sphi %s2348_s10, %s2698_s10   ;;  %s2264_s30 = sphi %s2346_s30, %s2697_s30  }
   0x5   : > { %2687 = sst [smem:[#allocation4_spill]] %s2272_s11  ;;  %s31_s15 = sadd.s32 1, %s2276_s12 }
   0x6   : > { %2688 = sst [smem:[#allocation5_spill]] %s2276_s12  ;;  %p29_p0 = scmp.ge.s32.totalorder %s28_s14, 3 }
   0x7   : > { %2689 = sst [smem:[#allocation6_spill]] %s2280_s13  ;;  %p1933_p1 = scmp.ge.s32.totalorder %s2280_s13, 1 }
   0x8   : > { %p415_p2 = scmp.lt.s32.totalorder %s2280_s13, 10  ;;  %s2702_s14 = smov (%p29_p0, %s28_s14), 0 }
   0x9   : > { %2690 = sst [smem:[#allocation7_spill]] %s2702_s14  ;;  %s2704_s15 = smov (!%p29_p0, %s31_s15), %s2276_s12 }
   0xa   : > { %p416_p3 = pnand %p1933_p1, %p415_p2  ;;  %p33_p4 = scmp.ge.s32.totalorder %s2704_s15, 3 }
   0xb   : > { %p513_p5 = scmp.lt.s32.totalorder (!%p416_p3), %s2268_s10, 2  ;;  %p520_p6 = scmp.lt.s32.totalorder (!%p416_p3), %s2264_s30, 2 }
   0xc   : > { %s2706_s15 = smov (%p33_p4, %s2704_s15), 0  ;;  %419 = sbr.rel (%p416_p3) target bundleno = 4395 (0x112b), region = 56 }
   0xd   : > { %2691 = sst [smem:[#allocation8_spill]] %s2706_s15 }
   0xe   : > { %s2692_s0 = sld [smem:[#allocation9_spill]] (!%p416_p3) }
   0xf   : > { %s2693_s1 = sld [smem:[#allocation10_spill]] (!%p416_p3) }
  0x11   : > { %s2708_s10 = smov (!%p513_p5, %s2268_s10), 2 }
  0x12   : > { %s521_s16 = scalar_select %p520_p6, %s2264_s30, 2 }
  0x13   : > { %s1980_s17 = sshll.u32 %s2708_s10, 4  ;;  %s2129_s18 = smul.u32 12, %s2708_s10 }
  0x14   : > { %s517_s21 = scalar_lea.vmem %s2692_s0, %s1980_s17  ;;  %s1936_s22 = sshll.u32 %s521_s16, 2 }
  0x15   : > { %s524_s23 = sadd.s32 %s2129_s18, %s1936_s22  ;;  %s1942_s24 = sshll.u32 %s521_s16, 4 }
  0x16   : > { %s1937_s25 = sshll.u32 %s524_s23, 2  ;;  %s2130_s26 = smul.u32 48, %s2708_s10 }
  0x17   : > { %s2386_s29 = scalar_lea.vmem %s2693_s1, %s1937_s25  ;;  %s2391_s12 = scalar_lea.vmem %s2672_s2, %s1937_s25 }
  0x18   : > { %s2396_s19 = scalar_lea.vmem %s2673_s3, %s1937_s25  ;;  %s551_s20 = sadd.s32 %s2130_s26, %s1942_s24 }
  0x19   : > { %s1943_s18 = sshll.u32 %s551_s20, 2  ;;  %s2131_s22 = smul.u32 3, %s2708_s10 }
  0x1a   : > { %s2401_s30 = scalar_lea.vmem %s2674_s4, %s1943_s18  ;;  %s1945_s27 = sshll.u32 %s2708_s10, 1 }
  0x1b   : > { %s2403_s28 = sadd.s32 %s2131_s22, %s521_s16  ;;  %s2408_s11 = scalar_lea.vmem %s2678_s8, %s1945_s27 }
  0x1c   : > { %s1944_s13 = sshll.u32 %s2403_s28, 3  ;;  %s568_s25 = scalar_lea.vmem %s2676_s6, %s2403_s28 }
  0x1d   : > { %s2418_s20 = scalar_lea.vmem %s2675_s5, %s1944_s13  ;;  %s575_s18 = scalar_lea.vmem %s2677_s7, %s2403_s28 }
  0x1e   : > { %s2427_s23 = scalar_lea.vmem %s2679_s9, %s1980_s17  ;;  %s2694_s27 = sld [smem:[#allocation3_spill]] }
  0x24   : > { %p1948_p7 = scmp.ne.s32.totalorder %s2694_s27, 0 }
  0x26   : > { %589 = sbr.rel (%p1948_p7) target bundleno = 45 (0x2d), region = 60 }
  0x2b   : > { %v590_v0 = vld [vmem:[%s517_s21] sm:$0xff]  ;;  %vm592_vm0 = vcmask 261120   ;;  %v591_v1 = vld [vmem:[%s517_s21 + $0x8] sm:$0xff] }
  0x2c   : > { %593 = vst.msk [vmem:[#allocation2] sm:$0xff] %vm592_vm0, %v590_v0  ;;  %594 = vst.msk [vmem:[#allocation2 + $0x8] sm:$0xff] %vm592_vm0, %v591_v1 }
  0x2d PF: > { %vm598_vm1 = vcmask 261120   ;;  %v2186_v16 = vld [vmem:[%s2386_s29 + $0x8] sm:$0xff]   ;;  %v2282_v17 = vmov 0.0   ;;  %vm2283_vm2 = vmmov 0   ;;  %v2187_v18 = vld [vmem:[%s2386_s29] sm:$0xff]   ;;  %v626_v25 = vlaneseq  ;;  %s2284_s29 = smov 96  }
  0x2e   : > { %2021 = vmatprep.subr.bf16.mxu1 %v2282_v17  ;;  %2025 = vmatprep.mubr.msk.bf16.mxu1 %vm2283_vm2, %v2282_v17  ;;  %v2456_v28 = vld [vmem:[%s2418_s20] sm:$0xff]  ;;  %s2285_s14 = smov 88   ;;  %s2286_s13 = smov 120   ;;  %vm762_vm3 = vcmask 64512   ;;  %v2287_v59 = vmov -1e+09  }
  0x2f   : > { %2022 = vmatpush3.bf16.msra.mxu1 %v2186_v16  ;;  %2047 = vmatprep.subr.bf16.mxu0 %v2282_v17  ;;  %v2452_v26 = vshrl.u32 %v626_v25, 7  ;;  %v1949_v42 = vld [vmem:[%s568_s25] ss:$0 sm:$0xff]  ;;  %v740_v54 = vand.u32 127, %v626_v25  ;;  %vm810_vm6 = vcmask 130048   ;;  %s2288_s15 = smov 64  }
  0x30   : > { %2023 = vmatprep.subr.bf16.mxu1 %v2282_v17  ;;  %2049 = vmatprep.mubr.msk.bf16.mxu0 %vm2283_vm2, %v2282_v17  ;;  %s2289_s24 = smov 80   ;;  %s2290_s25 = smov 112   ;;  %vm1008_vm7 = vcmask 1043456  }
  0x31   : > { %v628_v27 = vsub.s32 0, %v2452_v26  ;;  %v634_v32 = vsub.s32 1, %v2452_v26  ;;  %v719_v55 = vand.u32 1, %v2452_v26  ;;  %v745_v56 = vand.u32 1, %v740_v54  ;;  %s2291_s26 = smov 56   ;;  %s2292_s0 = smov 48  }
  0x32   : > { %v714_v57 = vadd.s32 8, %v2452_v26  ;;  %s2293_s20 = smov 104   ;;  %s2294_s10 = smov 72  }
  0x33   : > { %v2430_v2 = vld [vmem:[#allocation2] sm:$0xff]  ;;  %v2432_v3 = vld [vmem:[#allocation2 + $0x8] sm:$0xff]  ;;  %2024 = vmatpush3.bf16.msra.mxu1 %v2187_v18  ;;  %v629_v31 = vrot.slane %v2456_v28, %v628_v27  ;;  %v635_v36 = vrot.slane %v2456_v28, %v634_v32  ;;  %vm753_vm4 = vcmp.eq.s32.totalorder %v719_v55, %v745_v56  ;;  %s2295_s16 = smov 40  }
  0x34   : > { %v599_v4 = vsel %vm598_vm1, %v2430_v2, 0.0  ;;  %v602_v5 = vsel %vm598_vm1, %v2432_v3, 0.0  ;;  %2029 = vmatprep.subr.bf16.mxu1 %v2282_v17  ;;  %v726_v58 = vand.u32 1, %v714_v57  ;;  %v2488_v60 = vsel %vm753_vm4, 0.0, %v2287_v59 }
  0x35   : > { %600 = vadd.xlane.f32.xlu0 %v599_v4 }
  0x36   : > { %vm754_vm5 = vcmp.eq.s32.totalorder %v726_v58, %v745_v56 }
  0x37   : > { %v2491_v0 = vsel %vm754_vm5, 0.0, %v2287_v59 }
  0x39   : > { %603 = vadd.xlane.f32.xlu0 %v602_v5 }
  0xbe   : > { %v601_v6 = vpop.xlane.xlu0 %600 }
  0xbf   : > { %v606_v7 = vmul.f32 0.03125, %v601_v6 }
  0xc1   : > { %v608_v8 = vsub.f32 %v2430_v2, %v606_v7 }
  0xc2   : > { %v604_v9 = vpop.xlane.xlu0 %603 }
  0xc3   : > { %v607_v10 = vmul.f32 0.03125, %v604_v9  ;;  %v610_v11 = vmul.f32 %v608_v8, %v608_v8 }
  0xc5   : > { %v609_v12 = vsub.f32 %v2432_v3, %v607_v10  ;;  %v612_v13 = vsel %vm598_vm1, %v610_v11, 0.0 }
  0xc6   : > { %613 = vadd.xlane.f32.xlu1 %v612_v13 }
  0xc7   : > { %v611_v14 = vmul.f32 %v609_v12, %v609_v12 }
  0xc9   : > { %v615_v15 = vsel %vm598_vm1, %v611_v14, 0.0 }
  0xca   : > { %616 = vadd.xlane.f32.xlu1 %v615_v15 }
 0x14f   : > { %v614_v19 = vpop.xlane.xlu1 %613 }
 0x150   : > { %v618_v20 = vmul.f32 0.03125, %v614_v19 }
 0x152   : > { %v620_v21 = vadd.f32 1e-05, %v618_v20 }
 0x153   : > { %v617_v22 = vpop.xlane.xlu1 %616 }
 0x154   : > { %2198 = vrsqrt.f32 %v620_v21  ;;  %v619_v23 = vmul.f32 0.03125, %v617_v22 }
 0x156   : > { %v621_v24 = vadd.f32 1e-05, %v619_v23 }
 0x158   : > { %2200 = vrsqrt.f32 %v621_v24 }
 0x161   : > { %v2199_v29 = vpop.eup %2198 }
 0x162   : > { %v624_v30 = vmul.f32 %v2199_v29, %v608_v8 }
 0x164   : > { %v630_v35 = vmul.f32 %v629_v31, %v624_v30 }
 0x165   : > { %v2201_v33 = vpop.eup %2200 }
 0x166   : > { %v625_v34 = vmul.f32 %v2201_v33, %v609_v12  ;;  %v636_v38 = vadd.f32 %v635_v36, %v630_v35 }
 0x168   : > { %v631_v37 = vmul.f32 %v629_v31, %v625_v34 }
 0x16a   : > { %v637_v39 = vadd.f32 %v635_v36, %v631_v37 }
 0x16c   : > { %v642_v40 = vpack.c.bf16 %v637_v39, %v636_v38 }
 0x16e   : > { %2026 = vmatmul.mubr.msk.bf16.vlgmr.msra.gmra.mxu1 %vm598_vm1, %v642_v40 }
 0x16f   : > { %2031 = vmatprep.mubr.msk.bf16.mxu1 %vm2283_vm2, %v2282_v17 }
 0x22e   : > { %v699_v41 = vpop.f32.mrf.mxu1 }
 0x22f   : > { %v700_v45 = vadd.f32 %v1949_v42, %v699_v41 }
 0x230   : > { %v2027_v43 = vpop.f32.mrf.mxu1 }
 0x231   : > { %v706_v50 = vmul.f32 0.35355338, %v700_v45 }
 0x232   : > { %v702_v44 = vpop.f32.mrf.mxu1 }
 0x233   : > { %v703_v46 = vadd.f32 %v1949_v42, %v702_v44 }
 0x234   : > { %v2028_v47 = vpop.f32.mrf.mxu1 }
 0x235   : > { %v2473_v48 = vpack.c.bf16 %v703_v46, %v700_v45  ;;  %v707_v49 = vmul.f32 0.35355338, %v703_v46 }
 0x237   : > { %760 = vrot.lane.b32.xlu0 %v2473_v48, %s2284_s29  ;;  %v2477_v51 = vpack.c.bf16 %v707_v49, %v706_v50 }
 0x23b   : > { %885 = vrot.lane.b32.xlu0 %v2473_v48, %s2285_s14 }
 0x23f   : > { %883 = vrot.lane.b32.xlu0 %v2477_v51, %s2286_s13 }
 0x2a9   : > { %v761_v52 = vpop.permute.xlu0 %760 }
 0x2aa   : > { %v767_v53 = vsel %vm762_vm3, %v761_v52, 0 }
 0x2ab   : > { %2030 = vmatpush3.bf16.xpose.msra.mxu1 %v767_v53 }
 0x2ac   : > { %2035 = vmatprep.subr.bf16.mxu1 %v2282_v17 }
 0x2ad   : > { %v886_v29 = vpop.permute.xlu0 %885 }
 0x2ae   : > { %v891_v31 = vsel %vm762_vm3, %v886_v29, 0 }
 0x2b1   : > { %v884_v33 = vpop.permute.xlu0 %883 }
 0x2b2   : > { %2032 = vmatmul.mubr.msk.bf16.vlgmr.msra.gmra.mxu1 %vm762_vm3, %v2477_v51 }
 0x2b3   : > { %2037 = vmatprep.mubr.msk.bf16.mxu1 %vm2283_vm2, %v2282_v17 }
 0x372   : > { %v803_v61 = vpop.f32.mrf.mxu1 }
 0x373   : > { %v804_v62 = vadd.f32 %v803_v61, %v2488_v60 }
 0x374   : > { %v2033_v63 = vpop.f32.mrf.mxu1 }
 0x375   : > { %v811_v1 = vsel %vm810_vm6, %v804_v62, -inf }
 0x376   : > { %812 = vmax.xlane.f32.xlu1 %v811_v1  ;;  %v806_v4 = vpop.f32.mrf.mxu1 }
 0x377   : > { %v807_v5 = vadd.f32 %v806_v4, %v2491_v0  ;;  %v708_v4 = vld [vmem:[%s2391_s12] sm:$0xf] }
 0x378   : > { %v2034_v6 = vpop.f32.mrf.mxu1 }
 0x379   : > { %v814_v7 = vsel %vm810_vm6, %v807_v5, -inf }
 0x37a   : > { %815 = vmax.xlane.f32.xlu1 %v814_v7 }
 0x3ff   : > { %v813_v8 = vpop.xlane.xlu1 %812 }
 0x400   : > { %v817_v9 = vsub.f32 %v804_v62, %v813_v8  ;;  %v1057_v8 = vsel %vm1008_vm7, %v708_v4, 0 }
 0x402   : > { %v819_v10 = vmul.f32 1.442695, %v817_v9  ;;  %v709_v9 = vld [vmem:[%s2391_s12 + $0x4] sm:$0xf] }
 0x403   : > { %v816_v11 = vpop.xlane.xlu1 %815 }
 0x404   : > { %2202 = vpow2.f32 %v819_v10  ;;  %v818_v12 = vsub.f32 %v807_v5, %v816_v11  ;;  %v1010_v10 = vsel %vm1008_vm7, %v709_v9, 0 }
 0x406   : > { %v821_v13 = vmul.f32 1.442695, %v818_v12 }
 0x408   : > { %2204 = vpow2.f32 %v821_v13 }
 0x411   : > { %v2203_v14 = vpop.eup %2202 }
 0x412   : > { %v823_v15 = vsel %vm810_vm6, %v2203_v14, 0.0 }
 0x413   : > { %824 = vadd.xlane.f32.xlu1 %v823_v15 }
 0x415   : > { %v2205_v16 = vpop.eup %2204 }
 0x416   : > { %v826_v18 = vsel %vm810_vm6, %v2205_v16, 0.0 }
 0x417   : > { %827 = vadd.xlane.f32.xlu1 %v826_v18 }
 0x428   : > { %834 = vrot.lane.b32.xlu1 %v2473_v48, %s2288_s15 }
 0x49c   : > { %v825_v19 = vpop.xlane.xlu1 %824 }
 0x49d   : > { %2206 = vrcp.f32 %v825_v19 }
 0x4a0   : > { %v828_v20 = vpop.xlane.xlu1 %827 }
 0x4a1   : > { %2208 = vrcp.f32 %v828_v20 }
 0x4a4   : > { %v835_v21 = vpop.permute.xlu1 %834 }
 0x4a5   : > { %2036 = vmatpush3.bf16.msra.mxu1 %v835_v21 }
 0x4a6   : > { %2041 = vmatprep.subr.bf16.mxu1 %v2282_v17 }
 0x4aa   : > { %v2207_v22 = vpop.eup %2206 }
 0x4ab   : > { %v831_v24 = vmul.f32 %v2207_v22, %v2203_v14 }
 0x4ae   : > { %v2209_v23 = vpop.eup %2208 }
 0x4af   : > { %v832_v25 = vmul.f32 %v2209_v23, %v2205_v16 }
 0x4b1   : > { %v833_v30 = vpack.c.bf16 %v832_v25, %v831_v24 }
 0x4b3   : > { %2038 = vmatmul.mubr.msk.bf16.vlgmr.msra.gmra.mxu1 %vm810_vm6, %v833_v30 }
 0x4b4   : > { %2042 = vmatpush3.bf16.xpose.msra.mxu1 %v891_v31  ;;  %2043 = vmatprep.mubr.msk.bf16.mxu1 %vm2283_vm2, %v2282_v17 }
 0x4b5   : > { %2053 = vmatprep.subr.bf16.mxu1 %v2282_v17 }
 0x4bb   : > { %2044 = vmatmul.mubr.msk.bf16.vlgmr.msra.gmra.mxu1 %vm762_vm3, %v884_v33 }
 0x4bc   : > { %2055 = vmatprep.mubr.msk.bf16.mxu1 %vm2283_vm2, %v2282_v17  ;;  %2054 = vmatpush3.bf16.msra.mxu1 %v1010_v10 }
 0x4bd   : > { %2065 = vmatprep.subr.bf16.mxu1 %v2282_v17 }
 0x573   : > { %v874_v34 = vpop.f32.mrf.mxu1 }
 0x575   : > { %v2039_v35 = vpop.f32.mrf.mxu1 }
 0x577   : > { %v877_v36 = vpop.f32.mrf.mxu1 }
 0x578   : > { %v881_v37 = vpack.c.bf16 %v877_v36, %v874_v34 }
 0x579   : > { %v2040_v38 = vpop.f32.mrf.mxu1 }
 0x57b   : > { %v927_v39 = vpop.f32.mrf.mxu1 }
 0x57c   : > { %v928_v40 = vadd.f32 %v927_v39, %v2488_v60 }
 0x57d   : > { %v2045_v41 = vpop.f32.mrf.mxu1 }
 0x57e   : > { %v934_v42 = vsel %vm810_vm6, %v928_v40, -inf }
 0x57f   : > { %935 = vmax.xlane.f32.xlu0 %v934_v42  ;;  %v930_v43 = vpop.f32.mrf.mxu1 }
 0x580   : > { %v931_v44 = vadd.f32 %v930_v43, %v2491_v0 }
 0x581   : > { %v2046_v45 = vpop.f32.mrf.mxu1 }
 0x582   : > { %v937_v46 = vsel %vm810_vm6, %v931_v44, -inf }
 0x583   : > { %938 = vmax.xlane.f32.xlu1 %v937_v46 }
 0x594   : > { %1102 = vrot.lane.b32.xlu1 %v2473_v48, %s2289_s24 }
 0x598   : > { %1100 = vrot.lane.b32.xlu1 %v2477_v51, %s2290_s25 }
 0x608   : > { %v936_v47 = vpop.xlane.xlu0 %935 }
 0x609   : > { %v940_v49 = vsub.f32 %v928_v40, %v936_v47 }
 0x60b   : > { %v942_v50 = vmul.f32 1.442695, %v940_v49 }
 0x60c   : > { %v939_v52 = vpop.xlane.xlu1 %938 }
 0x60d   : > { %2210 = vpow2.f32 %v942_v50  ;;  %v941_v53 = vsub.f32 %v931_v44, %v939_v52 }
 0x60f   : > { %v944_v54 = vmul.f32 1.442695, %v941_v53 }
 0x610   : > { %v1103_v13 = vpop.permute.xlu1 %1102 }
 0x611   : > { %2212 = vpow2.f32 %v944_v54  ;;  %v1108_v18 = vsel %vm762_vm3, %v1103_v13, 0 }
 0x614   : > { %v1101_v22 = vpop.permute.xlu1 %1100 }
 0x61a   : > { %v2211_v55 = vpop.eup %2210 }
 0x61b   : > { %v946_v56 = vsel %vm810_vm6, %v2211_v55, 0.0 }
 0x61c   : > { %947 = vadd.xlane.f32.xlu0 %v946_v56 }
 0x61e   : > { %v2213_v57 = vpop.eup %2212 }
 0x61f   : > { %v949_v58 = vsel %vm810_vm6, %v2213_v57, 0.0 }
 0x620   : > { %950 = vadd.xlane.f32.xlu0 %v949_v58 }
 0x636   : > { %957 = vrot.lane.b32.xlu0 %v2473_v48, %s2291_s26 }
 0x6a5   : > { %v948_v59 = vpop.xlane.xlu0 %947 }
 0x6a6   : > { %2214 = vrcp.f32 %v948_v59 }
 0x6a9   : > { %v951_v61 = vpop.xlane.xlu0 %950 }
 0x6aa   : > { %2216 = vrcp.f32 %v951_v61 }
 0x6ad   : > { %v958_v62 = vpop.permute.xlu0 %957 }
 0x6ae   : > { %2048 = vmatpush3.bf16.msra.mxu0 %v958_v62 }
 0x6af   : > { %2059 = vmatprep.subr.bf16.mxu0 %v2282_v17 }
 0x6b3   : > { %v2215_v63 = vpop.eup %2214 }
 0x6b4   : > { %v954_v5 = vmul.f32 %v2215_v63, %v2211_v55  ;;  %v710_v63 = vld [vmem:[%s2391_s12 + $0x8] sm:$0xf] }
 0x6b7   : > { %v2217_v1 = vpop.eup %2216 }
 0x6b8   : > { %v955_v6 = vmul.f32 %v2217_v1, %v2213_v57  ;;  %v1226_v1 = vsel %vm1008_vm7, %v710_v63, 0 }
 0x6ba   : > { %v956_v7 = vpack.c.bf16 %v955_v6, %v954_v5 }
 0x6bc   : > { %2050 = vmatmul.mubr.msk.bf16.vlgmr.msra.gmra.mxu0 %vm810_vm6, %v956_v7 }
 0x6bd   : > { %2060 = vmatpush3.bf16.msra.mxu0 %v1057_v8  ;;  %2061 = vmatprep.mubr.msk.bf16.mxu0 %vm2283_vm2, %v2282_v17 }
 0x6be   : > { %2071 = vmatprep.subr.bf16.mxu0 %v2282_v17 }
 0x6c4   : > { %2062 = vmatmul.mubr.msk.bf16.vlgmr.msra.gmra.mxu0 %vm762_vm3, %v881_v37 }
 0x6c5   : > { %2073 = vmatprep.mubr.msk.bf16.mxu0 %vm2283_vm2, %v2282_v17 }
 0x77c   : > { %v997_v11 = vpop.f32.mrf.mxu0 }
 0x77e   : > { %v2051_v12 = vpop.f32.mrf.mxu0 }
 0x780   : > { %v1000_v14 = vpop.f32.mrf.mxu0 }
 0x781   : > { %v1004_v15 = vpack.c.bf16 %v1000_v14, %v997_v11 }
 0x782   : > { %v2052_v16 = vpop.f32.mrf.mxu0 }
 0x783   : > { %2056 = vmatmul.mubr.msk.bf16.vlgmr.msra.gmra.mxu1 %vm762_vm3, %v1004_v15 }
 0x784   : > { %2066 = vmatpush3.bf16.xpose.msra.mxu1 %v1108_v18  ;;  %v2532_v19 = vpop.f32.mrf.mxu0  ;;  %2067 = vmatprep.mubr.msk.bf16.mxu1 %vm2283_vm2, %v2282_v17 }
 0x785   : > { %2077 = vmatprep.subr.bf16.mxu1 %v2282_v17 }
 0x786   : > { %v2063_v20 = vpop.f32.mrf.mxu0 }
 0x788   : > { %v2537_v21 = vpop.f32.mrf.mxu0 }
 0x78a   : > { %v2064_v23 = vpop.f32.mrf.mxu0 }
 0x78b   : > { %2068 = vmatmul.mubr.msk.bf16.vlgmr.msra.gmra.mxu1 %vm762_vm3, %v1101_v22 }
 0x78c   : > { %2079 = vmatprep.mubr.msk.bf16.mxu1 %vm2283_vm2, %v2282_v17  ;;  %2078 = vmatpush3.bf16.msra.mxu1 %v1226_v1 }
 0x78d   : > { %2089 = vmatprep.subr.bf16.mxu1 %v2282_v17 }
 0x843   : > { %v2542_v24 = vpop.f32.mrf.mxu1 }
 0x845   : > { %v2057_v25 = vpop.f32.mrf.mxu1 }
 0x847   : > { %v2544_v29 = vpop.f32.mrf.mxu1 }
 0x849   : > { %v2058_v30 = vpop.f32.mrf.mxu1 }
 0x84b   : > { %v1144_v31 = vpop.f32.mrf.mxu1 }
 0x84c   : > { %v1145_v33 = vadd.f32 %v1144_v31, %v2488_v60 }
 0x84d   : > { %v2069_v34 = vpop.f32.mrf.mxu1 }
 0x84e   : > { %v1151_v35 = vsel %vm810_vm6, %v1145_v33, -inf }
 0x84f   : > { %1152 = vmax.xlane.f32.xlu1 %v1151_v35  ;;  %v1147_v36 = vpop.f32.mrf.mxu1 }
 0x850   : > { %v1148_v37 = vadd.f32 %v1147_v36, %v2491_v0 }
 0x851   : > { %v2070_v38 = vpop.f32.mrf.mxu1 }
 0x852   : > { %v1154_v39 = vsel %vm810_vm6, %v1148_v37, -inf  ;;  %v1097_v38 = vadd.f32 %v2537_v21, %v2544_v29  ;;  %v711_v21 = vld [vmem:[%s2391_s12 + $0xc] sm:$0xf] }
 0x853   : > { %1155 = vmax.xlane.f32.xlu0 %v1154_v39  ;;  %v1397_v29 = vsel %vm1008_vm7, %v711_v21, 0  ;;  %v2197_v21 = vld [vmem:[%s2401_s30] sm:$0xff]  }
 0x860   : > { %1174 = vrot.lane.b32.xlu1 %v2473_v48, %s2292_s0 }
 0x864   : > { %1271 = vrot.lane.b32.xlu1 %v2477_v51, %s2293_s20 }
 0x8d8   : > { %v1153_v40 = vpop.xlane.xlu1 %1152 }
 0x8d9   : > { %v1157_v41 = vsub.f32 %v1145_v33, %v1153_v40 }
 0x8db   : > { %v1159_v42 = vmul.f32 1.442695, %v1157_v41 }
 0x8dc   : > { %v1175_v43 = vpop.permute.xlu1 %1174  ;;  %v1156_v44 = vpop.xlane.xlu0 %1155 }
 0x8dd   : > { %2218 = vpow2.f32 %v1159_v42  ;;  %v1158_v45 = vsub.f32 %v1148_v37, %v1156_v44  ;;  %2072 = vmatpush3.bf16.msra.mxu0 %v1175_v43 }
 0x8de   : > { %2083 = vmatprep.subr.bf16.mxu0 %v2282_v17 }
 0x8df   : > { %v1161_v46 = vmul.f32 1.442695, %v1158_v45 }
 0x8e0   : > { %v1272_v62 = vpop.permute.xlu1 %1271 }
 0x8e1   : > { %2220 = vpow2.f32 %v1161_v46 }
 0x8ea   : > { %v2219_v47 = vpop.eup %2218 }
 0x8eb   : > { %v1163_v49 = vsel %vm810_vm6, %v2219_v47, 0.0 }
 0x8ec   : > { %1164 = vadd.xlane.f32.xlu0 %v1163_v49 }
 0x8ee   : > { %v2221_v50 = vpop.eup %2220 }
 0x8ef   : > { %v1166_v52 = vsel %vm810_vm6, %v2221_v50, 0.0 }
 0x8f0   : > { %1167 = vadd.xlane.f32.xlu0 %v1166_v52 }
 0x906   : > { %1273 = vrot.lane.b32.xlu0 %v2473_v48, %s2294_s10 }
 0x975   : > { %v1165_v51 = vpop.xlane.xlu0 %1164 }
 0x976   : > { %2222 = vrcp.f32 %v1165_v51 }
 0x979   : > { %v1168_v53 = vpop.xlane.xlu0 %1167 }
 0x97a   : > { %2224 = vrcp.f32 %v1168_v53  ;;  %v1446_v53 = vsub.s32 2, %v2452_v26 }
 0x97d   : > { %v1274_v58 = vpop.permute.xlu0 %1273 }
 0x97e   : > { %v1279_v61 = vsel %vm762_vm3, %v1274_v58, 0 }
 0x983   : > { %v2223_v54 = vpop.eup %2222 }
 0x984   : > { %v1171_v56 = vmul.f32 %v2223_v54, %v2219_v47 }
 0x987   : > { %v2225_v55 = vpop.eup %2224 }
 0x988   : > { %v1172_v57 = vmul.f32 %v2225_v55, %v2221_v50 }
 0x98a   : > { %v1173_v59 = vpack.c.bf16 %v1172_v57, %v1171_v56  ;;  %v1447_v56 = vrot.slane %v2456_v28, %v1446_v53 }
 0x98c   : > { %2074 = vmatmul.mubr.msk.bf16.vlgmr.msra.gmra.mxu0 %vm810_vm6, %v1173_v59 }
 0x98d   : > { %2084 = vmatpush3.bf16.xpose.msra.mxu0 %v1279_v61  ;;  %2085 = vmatprep.mubr.msk.bf16.mxu0 %vm2283_vm2, %v2282_v17 }
 0x98e   : > { %2095 = vmatprep.subr.bf16.mxu0 %v2282_v17 }
 0x994   : > { %2086 = vmatmul.mubr.msk.bf16.vlgmr.msra.gmra.mxu0 %vm762_vm3, %v1272_v62 }
 0x995   : > { %2097 = vmatprep.mubr.msk.bf16.mxu0 %vm2283_vm2, %v2282_v17  ;;  %2096 = vmatpush3.bf16.msra.mxu0 %v1397_v29  ;;  %v1965_v29 = vld [vmem:[%s575_s18] ss:$0 sm:$0xff] }
 0x996   : > { %2109 = vmatprep.subr.bf16.mxu0 %v2282_v17 }
 0xa4c   : > { %v1214_v4 = vpop.f32.mrf.mxu0 }
 0xa4e   : > { %v2075_v5 = vpop.f32.mrf.mxu0 }
 0xa50   : > { %v1217_v6 = vpop.f32.mrf.mxu0 }
 0xa51   : > { %v1221_v7 = vpack.c.bf16 %v1217_v6, %v1214_v4 }
 0xa52   : > { %v2076_v8 = vpop.f32.mrf.mxu0 }
 0xa53   : > { %2080 = vmatmul.mubr.msk.bf16.vlgmr.msra.gmra.mxu1 %vm762_vm3, %v1221_v7 }
 0xa54   : > { %v1315_v9 = vpop.f32.mrf.mxu0  ;;  %2091 = vmatprep.mubr.msk.bf16.mxu1 %vm2283_vm2, %v2282_v17 }
 0xa55   : > { %v1316_v10 = vadd.f32 %v1315_v9, %v2488_v60 }
 0xa56   : > { %v2087_v11 = vpop.f32.mrf.mxu0 }
 0xa57   : > { %v1322_v12 = vsel %vm810_vm6, %v1316_v10, -inf }
 0xa58   : > { %1323 = vmax.xlane.f32.xlu1 %v1322_v12  ;;  %v1318_v13 = vpop.f32.mrf.mxu0 }
 0xa59   : > { %v1319_v14 = vadd.f32 %v1318_v13, %v2491_v0  ;;  %v1094_v0 = vadd.f32 %v2532_v19, %v2542_v24 }
 0xa5a   : > { %v2088_v15 = vpop.f32.mrf.mxu0 }
 0xa5b   : > { %v1325_v16 = vsel %vm810_vm6, %v1319_v14, -inf  ;;  %v2188_v15 = vld [vmem:[%s2396_s19 + $0x8] sm:$0xff]  }
 0xa5c   : > { %1326 = vmax.xlane.f32.xlu0 %v1325_v16  ;;  %v2189_v16 = vld [vmem:[%s2396_s19] sm:$0xff]  }
 0xae1   : > { %v1324_v18 = vpop.xlane.xlu1 %1323 }
 0xae2   : > { %v1328_v20 = vsub.f32 %v1316_v10, %v1324_v18  ;;  %v2190_v18 = vld [vmem:[%s2401_s30 + $0x38] sm:$0xff]  }
 0xae4   : > { %v1330_v22 = vmul.f32 1.442695, %v1328_v20  ;;  %v2191_v20 = vld [vmem:[%s2401_s30 + $0x30] sm:$0xff]  }
 0xae5   : > { %v1327_v23 = vpop.xlane.xlu0 %1326 }
 0xae6   : > { %2226 = vpow2.f32 %v1330_v22  ;;  %v1329_v25 = vsub.f32 %v1319_v14, %v1327_v23  ;;  %v2192_v22 = vld [vmem:[%s2401_s30 + $0x28] sm:$0xff]   ;;  %v2193_v23 = vld [vmem:[%s2401_s30 + $0x20] sm:$0xff]  }
 0xae8   : > { %v1332_v30 = vmul.f32 1.442695, %v1329_v25  ;;  %v2194_v25 = vld [vmem:[%s2401_s30 + $0x18] sm:$0xff]  }
 0xaea   : > { %2228 = vpow2.f32 %v1332_v30 }
 0xaf3   : > { %v2227_v60 = vpop.eup %2226 }
 0xaf4   : > { %v1334_v31 = vsel %vm810_vm6, %v2227_v60, 0.0 }
 0xaf5   : > { %1335 = vadd.xlane.f32.xlu0 %v1334_v31 }
 0xaf7   : > { %v2229_v33 = vpop.eup %2228 }
 0xaf8   : > { %v1337_v34 = vsel %vm810_vm6, %v2229_v33, 0.0 }
 0xaf9   : > { %1338 = vadd.xlane.f32.xlu1 %v1337_v34 }
 0xb0b   : > { %1345 = vrot.lane.b32.xlu0 %v2473_v48, %s2295_s16 }
 0xb13   : > { %v1262_v35 = vpop.f32.mrf.mxu1 }
 0xb14   : > { %v1269_v36 = vadd.f32 %v1262_v35, %v1094_v0  ;;  %v1499_v35 = vsub.s32 3, %v2452_v26 }
 0xb15   : > { %v2081_v37 = vpop.f32.mrf.mxu1 }
 0xb17   : > { %v1265_v39 = vpop.f32.mrf.mxu1 }
 0xb18   : > { %v1270_v40 = vadd.f32 %v1265_v39, %v1097_v38  ;;  %v1500_v38 = vrot.slane %v2456_v28, %v1499_v35  ;;  %v1505_v39 = vsub.s32 4, %v2452_v26 }
 0xb19   : > { %v2082_v41 = vpop.f32.mrf.mxu1 }
 0xb7e   : > { %v1336_v42 = vpop.xlane.xlu0 %1335 }
 0xb7f   : > { %2230 = vrcp.f32 %v1336_v42 }
 0xb82   : > { %v1339_v43 = vpop.xlane.xlu1 %1338  ;;  %v1346_v44 = vpop.permute.xlu0 %1345 }
 0xb83   : > { %2232 = vrcp.f32 %v1339_v43  ;;  %2090 = vmatpush3.bf16.msra.mxu1 %v1346_v44  ;;  %v1506_v43 = vrot.slane %v2456_v28, %v1505_v39 }
 0xb84   : > { %2101 = vmatprep.subr.bf16.mxu1 %v2282_v17 }
 0xb8c   : > { %v2231_v48 = vpop.eup %2230 }
 0xb8d   : > { %v1342_v24 = vmul.f32 %v2231_v48, %v2227_v60 }
 0xb90   : > { %v2233_v19 = vpop.eup %2232 }
 0xb91   : > { %v1343_v45 = vmul.f32 %v2233_v19, %v2229_v33 }
 0xb93   : > { %v1344_v46 = vpack.c.bf16 %v1343_v45, %v1342_v24  ;;  %v2195_v45 = vld [vmem:[%s2401_s30 + $0x10] sm:$0xff]  }
 0xb95   : > { %2092 = vmatmul.mubr.msk.bf16.vlgmr.msra.gmra.mxu1 %vm810_vm6, %v1344_v46  ;;  %v2196_v46 = vld [vmem:[%s2401_s30 + $0x8] sm:$0xff]   ;;  %s2695_s30 = sld [smem:[#allocation3_spill]] }
 0xb96   : > { %2105 = vmatprep.mubr.msk.bf16.mxu1 %vm2283_vm2, %v2282_v17  ;;  %2102 = vmatpush3.bf16.msra.mxu1 %v2188_v15 }
 0xb97   : > { %2103 = vmatprep.subr.bf16.mxu1 %v2282_v17 }
 0xb9a   : > { %2104 = vmatpush3.bf16.msra.mxu1 %v2189_v16 }
 0xb9b   : > { %p1977_p8 = scmp.ne.s32.totalorder %s2695_s30, 2 }
 0xc55   : > { %v1385_v47 = vpop.f32.mrf.mxu1 }
 0xc57   : > { %v2093_v49 = vpop.f32.mrf.mxu1 }
 0xc59   : > { %v1388_v50 = vpop.f32.mrf.mxu1 }
 0xc5a   : > { %v1392_v52 = vpack.c.bf16 %v1388_v50, %v1385_v47 }
 0xc5b   : > { %v2094_v51 = vpop.f32.mrf.mxu1 }
 0xc5c   : > { %2098 = vmatmul.mubr.msk.bf16.vlgmr.msra.gmra.mxu0 %vm762_vm3, %v1392_v52 }
 0xc5d   : > { %2125 = vmatprep.mubr.msk.bf16.mxu0 %vm2283_vm2, %v2282_v17  ;;  %2110 = vmatpush3.bf16.msra.mxu0 %v2190_v18 }
 0xc5e   : > { %2111 = vmatprep.subr.bf16.mxu0 %v2282_v17 }
 0xc61   : > { %2112 = vmatpush3.bf16.msra.mxu0 %v2191_v20 }
 0xc62   : > { %2113 = vmatprep.subr.bf16.mxu0 %v2282_v17 }
 0xc65   : > { %2114 = vmatpush3.bf16.msra.mxu0 %v2192_v22 }
 0xc66   : > { %2115 = vmatprep.subr.bf16.mxu0 %v2282_v17 }
 0xc69   : > { %2116 = vmatpush3.bf16.msra.mxu0 %v2193_v23 }
 0xc6a   : > { %2117 = vmatprep.subr.bf16.mxu0 %v2282_v17 }
 0xc6d   : > { %2118 = vmatpush3.bf16.msra.mxu0 %v2194_v25 }
 0xc6e   : > { %2119 = vmatprep.subr.bf16.mxu0 %v2282_v17 }
 0xc71   : > { %2120 = vmatpush3.bf16.msra.mxu0 %v2195_v45 }
 0xc72   : > { %2121 = vmatprep.subr.bf16.mxu0 %v2282_v17 }
 0xc75   : > { %2122 = vmatpush3.bf16.msra.mxu0 %v2196_v46 }
 0xc76   : > { %2123 = vmatprep.subr.bf16.mxu0 %v2282_v17 }
 0xc79   : > { %2124 = vmatpush3.bf16.msra.mxu0 %v2197_v21 }
 0xd1c   : > { %v1433_v54 = vpop.f32.mrf.mxu0 }
 0xd1d   : > { %v1440_v55 = vadd.f32 %v1433_v54, %v1269_v36 }
 0xd1e   : > { %v2099_v57 = vpop.f32.mrf.mxu0 }
 0xd1f   : > { %v1442_v58 = vadd.f32 %v1440_v55, %v2430_v2  ;;  %v1668_v57 = vsub.s32 5, %v2452_v26 }
 0xd20   : > { %v1436_v59 = vpop.f32.mrf.mxu0 }
 0xd21   : > { %v2594_v61 = vadd.f32 %v1447_v56, %v1442_v58  ;;  %v1441_v62 = vadd.f32 %v1436_v59, %v1270_v40  ;;  %v1669_v17 = vrot.slane %v2456_v28, %v1668_v57 }
 0xd22   : > { %v2100_v63 = vpop.f32.mrf.mxu0 }
 0xd23   : > { %v1443_v1 = vadd.f32 %v1441_v62, %v2432_v3  ;;  %v1471_v4 = vsel %vm598_vm1, %v2594_v61, 0.0 }
 0xd24   : > { %1472 = vadd.xlane.f32.xlu1 %v1471_v4 }
 0xd25   : > { %v2599_v5 = vadd.f32 %v1447_v56, %v1443_v1 }
 0xd27   : > { %v1474_v6 = vsel %vm598_vm1, %v2599_v5, 0.0 }
 0xd28   : > { %1475 = vadd.xlane.f32.xlu1 %v1474_v6 }
 0xdad   : > { %v1473_v2 = vpop.xlane.xlu1 %1472 }
 0xdae   : > { %v1477_v7 = vmul.f32 0.03125, %v1473_v2 }
 0xdb0   : > { %v1479_v8 = vsub.f32 %v2594_v61, %v1477_v7 }
 0xdb1   : > { %v1476_v9 = vpop.xlane.xlu1 %1475 }
 0xdb2   : > { %v1478_v3 = vmul.f32 0.03125, %v1476_v9  ;;  %v1481_v10 = vmul.f32 %v1479_v8, %v1479_v8 }
 0xdb4   : > { %v1480_v11 = vsub.f32 %v2599_v5, %v1478_v3  ;;  %v1483_v12 = vsel %vm598_vm1, %v1481_v10, 0.0 }
 0xdb5   : > { %1484 = vadd.xlane.f32.xlu1 %v1483_v12 }
 0xdb6   : > { %v1482_v13 = vmul.f32 %v1480_v11, %v1480_v11 }
 0xdb8   : > { %v1486_v14 = vsel %vm598_vm1, %v1482_v13, 0.0 }
 0xdb9   : > { %1487 = vadd.xlane.f32.xlu1 %v1486_v14 }
 0xe3e   : > { %v1485_v30 = vpop.xlane.xlu1 %1484 }
 0xe3f   : > { %v1489_v60 = vmul.f32 0.03125, %v1485_v30 }
 0xe41   : > { %v1491_v31 = vadd.f32 1e-05, %v1489_v60 }
 0xe42   : > { %v1488_v33 = vpop.xlane.xlu1 %1487 }
 0xe43   : > { %2234 = vrsqrt.f32 %v1491_v31  ;;  %v1490_v34 = vmul.f32 0.03125, %v1488_v33 }
 0xe45   : > { %v1492_v0 = vadd.f32 1e-05, %v1490_v34 }
 0xe47   : > { %2236 = vrsqrt.f32 %v1492_v0 }
 0xe50   : > { %v2235_v36 = vpop.eup %2234 }
 0xe51   : > { %v1495_v37 = vmul.f32 %v2235_v36, %v1479_v8 }
 0xe53   : > { %v1501_v42 = vmul.f32 %v1500_v38, %v1495_v37 }
 0xe54   : > { %v2237_v40 = vpop.eup %2236 }
 0xe55   : > { %v1496_v41 = vmul.f32 %v2237_v40, %v1480_v11  ;;  %v1507_v48 = vadd.f32 %v1506_v43, %v1501_v42 }
 0xe57   : > { %v1502_v44 = vmul.f32 %v1500_v38, %v1496_v41 }
 0xe59   : > { %v1508_v19 = vadd.f32 %v1506_v43, %v1502_v44 }
 0xe5b   : > { %v1509_v24 = vpack.c.bf16 %v1508_v19, %v1507_v48 }
 0xe5d   : > { %2106 = vmatmul.mubr.msk.bf16.vlgmr.msra.gmra.mxu1 %vm598_vm1, %v1509_v24 }
 0xf1d   : > { %v1565_v47 = vpop.f32.mrf.mxu1 }
 0xf1e   : > { %v1566_v50 = vadd.f32 %v1965_v29, %v1565_v47 }
 0xf1f   : > { %v2107_v49 = vpop.f32.mrf.mxu1 }
 0xf20   : > { %v1572_v54 = vmax.f32 %v1566_v50, 0.0 }
 0xf21   : > { %v1568_v52 = vpop.f32.mrf.mxu1 }
 0xf22   : > { %v1569_v51 = vadd.f32 %v1965_v29, %v1568_v52 }
 0xf23   : > { %v2108_v53 = vpop.f32.mrf.mxu1 }
 0xf24   : > { %v1573_v55 = vmax.f32 %v1569_v51, 0.0 }
 0xf26   : > { %v1574_v56 = vpack.c.bf16 %v1573_v55, %v1572_v54 }
 0xf28   : > { %2126 = vmatmul.mubr.bf16.vlgmr.msra.gmra.mxu0 %v1574_v56 }
 0xfe8   : > { %v1657_v58 = vpop.f32.mrf.mxu0 }
 0xfe9   : > { %v1664_v59 = vadd.f32 %v1657_v58, %v2594_v61 }
 0xfea   : > { %v2127_v62 = vpop.f32.mrf.mxu0 }
 0xfeb   : > { %v1670_v63 = vadd.f32 %v1669_v17, %v1664_v59 }
 0xfec   : > { %v1660_v1 = vpop.f32.mrf.mxu0 }
 0xfed   : > { %1672 = vst.msk [vmem:[#allocation2] sm:$0xff] %vm598_vm1, %v1670_v63  ;;  %v1665_v4 = vadd.f32 %v1660_v1, %v2599_v5  ;;  %1677 = sbr.rel (%p1977_p8) target bundleno = 4395 (0x112b), region = 64 }
 0xfee   : > { %v2128_v6 = vpop.f32.mrf.mxu0 }
 0xfef   : > { %v1671_v2 = vadd.f32 %v1669_v17, %v1665_v4 }
 0xff1   : > { %1673 = vst.msk [vmem:[#allocation2 + $0x8] sm:$0xff] %vm598_vm1, %v1671_v2 }
 0xff2   : > { %v1679_v7 = vsel %vm598_vm1, %v1670_v63, 0.0  ;;  %v1682_v28 = vsel %vm598_vm1, %v1671_v2, 0.0  ;;  %v1678_v25 = vld [vmem:[%s2408_s11] sm:$0x3] }
 0xff3   : > { %1680 = vadd.xlane.f32.xlu0 %v1679_v7  ;;  %v1708_v30 = vrot.slane %v1678_v25, %v628_v27  ;;  %v1714_v33 = vrot.slane %v1678_v25, %v634_v32 }
 0xff7   : > { %1683 = vadd.xlane.f32.xlu0 %v1682_v28 }
0x107c   : > { %v1681_v61 = vpop.xlane.xlu0 %1680 }
0x107d   : > { %v1685_v8 = vmul.f32 0.03125, %v1681_v61 }
0x107f   : > { %v1687_v9 = vsub.f32 %v1670_v63, %v1685_v8 }
0x1080   : > { %v1684_v3 = vpop.xlane.xlu0 %1683 }
0x1081   : > { %v1686_v10 = vmul.f32 0.03125, %v1684_v3  ;;  %v1689_v5 = vmul.f32 %v1687_v9, %v1687_v9 }
0x1083   : > { %v1688_v11 = vsub.f32 %v1671_v2, %v1686_v10  ;;  %v1691_v12 = vsel %vm598_vm1, %v1689_v5, 0.0 }
0x1084   : > { %1692 = vadd.xlane.f32.xlu1 %v1691_v12 }
0x1085   : > { %v1690_v13 = vmul.f32 %v1688_v11, %v1688_v11 }
0x1087   : > { %v1694_v14 = vsel %vm598_vm1, %v1690_v13, 0.0 }
0x1088   : > { %1695 = vadd.xlane.f32.xlu1 %v1694_v14 }
0x110d   : > { %v1693_v15 = vpop.xlane.xlu1 %1692 }
0x110e   : > { %v1697_v16 = vmul.f32 0.03125, %v1693_v15 }
0x1110   : > { %v1699_v18 = vadd.f32 1e-05, %v1697_v16 }
0x1111   : > { %v1696_v20 = vpop.xlane.xlu1 %1695 }
0x1112   : > { %2238 = vrsqrt.f32 %v1699_v18  ;;  %v1698_v22 = vmul.f32 0.03125, %v1696_v20 }
0x1114   : > { %v1700_v23 = vadd.f32 1e-05, %v1698_v22 }
0x1116   : > { %2240 = vrsqrt.f32 %v1700_v23 }
0x111f   : > { %v2239_v60 = vpop.eup %2238 }
0x1120   : > { %v1703_v31 = vmul.f32 %v2239_v60, %v1687_v9 }
0x1122   : > { %v1709_v34 = vmul.f32 %v1708_v30, %v1703_v31 }
0x1123   : > { %v2241_v0 = vpop.eup %2240 }
0x1124   : > { %v1715_v35 = vadd.f32 %v1714_v33, %v1709_v34  ;;  %v1704_v36 = vmul.f32 %v2241_v0, %v1688_v11 }
0x1126   : > { %1717 = vst.msk [vmem:[%s2427_s23] sm:$0xff] %vm598_vm1, %v1715_v35  ;;  %v1710_v37 = vmul.f32 %v1708_v30, %v1704_v36 }
0x1128   : > { %v1716_v38 = vadd.f32 %v1714_v33, %v1710_v37 }
0x112a   : > { %1718 = vst.msk [vmem:[%s2427_s23 + $0x8] sm:$0xff] %vm598_vm1, %v1716_v38 }
0x112b PF: > { %s2696_s28 = sld [smem:[#allocation6_spill]] }
0x112c   : > { %s2697_s30 = sld [smem:[#allocation4_spill]] }
0x112d   : > { %s2698_s10 = sld [smem:[#allocation5_spill]] }
0x112e   : > { %s2699_s11 = sld [smem:[#allocation7_spill]] }
0x112f   : > { %s2700_s12 = sld [smem:[#allocation8_spill]] }
0x1131   : > { %s19_s13 = sadd.s32 1, %s2696_s28  }
0x1132   : > { %p16_p9 = scmp.ge.s32.totalorder %s19_s13, 11  }
0x1134   :  { %18 = sbr.rel (!%p16_p9) target bundleno = 4 (0x4), region = 118 }

// kernel: cm_attn_forward.9
= control target key start
LH: loop header
LB: loop body
LE: loop exit
PB: predicated region body
PF: predicated region fallthrough
CT: control target
= control target key end

     0   :  { %s2613_s17 = smov 0   ;;  %s2615_s18 = smov 0   ;;  %s2968_s0 = inlined_call_operand.vmem [shape: f32[6,16,32], index: 0, kind: input, shape index: {}]   ;;  %s2969_s1 = inlined_call_operand.vmem [shape: f32[6,16,32], index: 1, kind: input, shape index: {}]   ;;  %s2970_s2 = inlined_call_operand.vmem [shape: bf16[6,2,32,32], index: 2, kind: input, shape index: {}]   ;;  %s2971_s3 = inlined_call_operand.vmem [shape: bf16[6,2,32,64], index: 3, kind: input, shape index: {}]   ;;  %s2972_s4 = inlined_call_operand.vmem [shape: bf16[6,2,32,32], index: 4, kind: input, shape index: {}]   ;;  %s2973_s5 = inlined_call_operand.vmem [shape: bf16[6,2,32,128], index: 5, kind: input, shape index: {}]   ;;  %s2974_s6 = inlined_call_operand.vmem [shape: bf16[6,2,128,32], index: 6, kind: input, shape index: {}]   ;;  %s2975_s7 = inlined_call_operand.vmem [shape: f32[6,2,8,32], index: 7, kind: input, shape index: {}]   ;;  %s2976_s8 = inlined_call_operand.vmem [shape: f32[6,2,1,96], index: 8, kind: input, shape index: {}]   ;;  %s2977_s9 = inlined_call_operand.vmem [shape: f32[6,2,1,128], index: 9, kind: input, shape index: {}]   ;;  %s2978_s10 = inlined_call_operand.vmem [shape: f32[6,2,32], index: 10, kind: input, shape index: {}]   ;;  %s2979_s11 = inlined_call_operand.vmem [shape: f32[6,16,32], index: 11, kind: output, shape index: {}]  }
   0x1   :  { %2984 = sst [smem:[#allocation9_spill]] %s2968_s0  ;;  %s2617_s19 = smov 0  }
   0x2   :  { %2985 = sst [smem:[#allocation10_spill]] %s2969_s1  ;;  %s2619_s20 = smov 0  }
   0x3   :  { %2986 = sst [smem:[#allocation11_spill]] %s2970_s2  ;;  %s2621_s21 = smov 0  }
   0x4   :  { %2987 = sst [smem:[#allocation12_spill]] %s2971_s3 }
   0x5   :  { %2988 = sst [smem:[#allocation13_spill]] %s2972_s4 }
   0x6   :  { %2989 = sst [smem:[#allocation14_spill]] %s2973_s5 }
   0x7   :  { %2990 = sst [smem:[#allocation15_spill]] %s2974_s6 }
   0x8   :  { %2991 = sst [smem:[#allocation16_spill]] %s2978_s10 }
   0x9   :  { %2992 = sst [smem:[#allocation17_spill]] %s2979_s11 }
   0xa LB: > { %2993 = sst [smem:[#allocation3_spill]] %s2525_s17  ;;  %s30_s22 = sadd.s32 1, %s2533_s19  ;;  %s2541_s21 = sphi %s2621_s21, %s21_s21   ;;  %s2537_s20 = sphi %s2619_s20, %s3014_s20   ;;  %s2533_s19 = sphi %s2617_s19, %s3013_s19   ;;  %s2529_s18 = sphi %s2615_s18, %s3012_s18   ;;  %s2525_s17 = sphi %s2613_s17, %s3011_s17  }
   0xb   : > { %2994 = sst [smem:[#allocation4_spill]] %s2533_s19  ;;  %s33_s23 = sadd.s32 1, %s2537_s20 }
   0xc   : > { %2995 = sst [smem:[#allocation5_spill]] %s2537_s20  ;;  %p31_p0 = scmp.ge.s32.totalorder %s30_s22, 2 }
   0xd   : > { %2996 = sst [smem:[#allocation6_spill]] %s2541_s21  ;;  %p2168_p1 = scmp.ge.s32.totalorder %s2541_s21, 1 }
   0xe   : > { %p491_p2 = scmp.lt.s32.totalorder %s2541_s21, 13  ;;  %s3016_s22 = smov (%p31_p0, %s30_s22), 0 }
   0xf   : > { %2997 = sst [smem:[#allocation7_spill]] %s3016_s22  ;;  %s3018_s23 = smov (!%p31_p0, %s33_s23), %s2537_s20 }
  0x10   : > { %p492_p3 = pnand %p2168_p1, %p491_p2  ;;  %p35_p4 = scmp.ge.s32.totalorder %s3018_s23, 6 }
  0x11   : > { %p607_p5 = scmp.lt.s32.totalorder (!%p492_p3), %s2529_s18, 5  ;;  %p619_p6 = scmp.lt.s32.totalorder (!%p492_p3), %s2525_s17, 1 }
  0x12   : > { %s3020_s23 = smov (%p35_p4, %s3018_s23), 0  ;;  %495 = sbr.rel (%p492_p3) target bundleno = 3888 (0xf30), region = 64 }
  0x13   : > { %2998 = sst [smem:[#allocation8_spill]] %s3020_s23 }
  0x14   : > { %s2999_s0 = sld [smem:[#allocation9_spill]] (!%p492_p3) }
  0x15   : > { %s3000_s1 = sld [smem:[#allocation10_spill]] (!%p492_p3) }
  0x16   : > { %s3001_s2 = sld [smem:[#allocation11_spill]] (!%p492_p3) }
  0x17   : > { %s3022_s18 = smov (!%p607_p5, %s2529_s18), 5  ;;  %s3002_s3 = sld [smem:[#allocation12_spill]] }
  0x18   : > { %s620_s24 = scalar_select %p619_p6, %s2525_s17, 1 }
  0x19   : > { %s2230_s25 = sshll.u32 %s3022_s18, 4  ;;  %s2174_s26 = sshll.u32 %s3022_s18, 3 }
  0x1a   : > { %s611_s29 = scalar_lea.vmem %s2999_s0, %s2230_s25  ;;  %s2173_s14 = sshll.u32 %s620_s24, 2 }
  0x1b   : > { %s2653_s13 = scalar_lea.vmem %s3000_s1, %s2230_s25  ;;  %s2185_s15 = sshll.u32 %s620_s24, 4 }
  0x1c   : > { %s623_s16 = sadd.s32 %s2174_s26, %s2173_s14  ;;  %s2186_s23 = sshll.u32 %s3022_s18, 5 }
  0x1d   : > { %s2175_s22 = sshll.u32 %s623_s16, 2  ;;  %s659_s20 = sadd.s32 %s2186_s23, %s2185_s15 }
  0x1e   : > { %s2658_s17 = scalar_lea.vmem %s3001_s2, %s2175_s22  ;;  %s2663_s27 = scalar_lea.vmem %s3002_s3, %s2175_s22 }
  0x1f   : > { %s3003_s4 = sld [smem:[#allocation13_spill]]  ;;  %s2187_s23 = sshll.u32 %s659_s20, 2 }
  0x20   : > { %s3004_s5 = sld [smem:[#allocation14_spill]]  ;;  %s2188_s15 = sshll.u32 %s3022_s18, 1 }
  0x21   : > { %s3005_s6 = sld [smem:[#allocation15_spill]]  ;;  %s2680_s10 = sadd.s32 %s2188_s15, %s620_s24 }
  0x22   : > { %s2189_s11 = sshll.u32 %s2680_s10, 3  ;;  %s676_s1 = scalar_lea.vmem %s2976_s8, %s2680_s10 }
  0x23   : > { %s2690_s20 = scalar_lea.vmem %s2975_s7, %s2189_s11  ;;  %s3006_s21 = sld [smem:[#allocation16_spill]] }
  0x24   : > { %s3008_s28 = sld [smem:[#allocation3_spill]] }
  0x25   : > { %s2668_s12 = scalar_lea.vmem %s3003_s4, %s2175_s22 }
  0x26   : > { %s2673_s14 = scalar_lea.vmem %s3004_s5, %s2175_s22  ;;  %s3007_s5 = sld [smem:[#allocation17_spill]] }
  0x27   : > { %s2678_s16 = scalar_lea.vmem %s3005_s6, %s2187_s23  ;;  %s683_s23 = scalar_lea.vmem %s2977_s9, %s2680_s10 }
  0x29   : > { %s2699_s2 = scalar_lea.vmem %s3006_s21, %s2188_s15 }
  0x2a   : > { %p2195_p7 = scmp.ne.s32.totalorder %s3008_s28, 0 }
  0x2c   : > { %s2704_s6 = scalar_lea.vmem %s3007_s5, %s2230_s25  ;;  %697 = sbr.rel (%p2195_p7) target bundleno = 51 (0x33), region = 68 }
  0x31   : > { %v698_v0 = vld [vmem:[%s611_s29] sm:$0xff]  ;;  %vm700_vm0 = vcmask 261120   ;;  %v699_v1 = vld [vmem:[%s611_s29 + $0x8] sm:$0xff] }
  0x32   : > { %701 = vst.msk [vmem:[#allocation2] sm:$0xff] %vm700_vm0, %v698_v0  ;;  %702 = vst.msk [vmem:[#allocation2 + $0x8] sm:$0xff] %vm700_vm0, %v699_v1 }
  0x33 PF: > { %vm706_vm1 = vcmask 261120   ;;  %v746_v3 = vld [vmem:[%s2653_s13] sm:$0xff]  ;;  %v747_v7 = vld [vmem:[%s2653_s13 + $0x8] sm:$0xff]  ;;  %v2543_v31 = vmov 0.0   ;;  %vm2544_vm2 = vmmov 0   ;;  %s2545_s5 = smov 96   ;;  %v734_v43 = vlaneseq }
  0x34   : > { %v748_v6 = vsel %vm706_vm1, %v746_v3, 0.0  ;;  %v751_v9 = vsel %vm706_vm1, %v747_v7, 0.0  ;;  %v2441_v30 = vld [vmem:[%s2658_s17 + $0x8] sm:$0xff]   ;;  %2275 = vmatprep.subr.bf16.mxu0 %v2543_v31  ;;  %2297 = vmatprep.subr.bf16.mxu1 %v2543_v31  ;;  %v2442_v32 = vld [vmem:[%s2658_s17] sm:$0xff]   ;;  %vm963_vm3 = vcmask 64512   ;;  %vm1011_vm6 = vcmask 130048  }
  0x35   : > { %749 = vadd.xlane.f32.xlu1 %v748_v6  ;;  %2276 = vmatpush3.bf16.msra.mxu0 %v2441_v30  ;;  %v2744_v33 = vld [vmem:[%s676_s1] ss:$0 sm:$0xff]  ;;  %v2749_v47 = vshrl.u32 %v734_v43, 7  ;;  %v2443_v1 = vld [vmem:[%s2663_s27 + $0x8] sm:$0xff]   ;;  %s2546_s1 = smov 120   ;;  %s2548_s17 = smov 112  }
  0x36   : > { %2277 = vmatprep.subr.bf16.mxu0 %v2543_v31  ;;  %2279 = vmatprep.mubr.msk.bf16.mxu0 %vm2544_vm2, %v2543_v31  ;;  %v2753_v49 = vld [vmem:[%s2690_s20] sm:$0xff]  ;;  %s2549_s25 = smov 88   ;;  %vm1210_vm7 = vcmask 1043456   ;;  %s2550_s29 = smov 80  }
  0x37   : > { %2299 = vmatprep.mubr.msk.bf16.mxu1 %vm2544_vm2, %v2543_v31  ;;  %v736_v48 = vsub.s32 0, %v2749_v47  ;;  %v742_v53 = vsub.s32 1, %v2749_v47  ;;  %s2551_s13 = smov 104   ;;  %s3009_s15 = sld [smem:[#allocation3_spill]] }
  0x39   : > { %v2707_v2 = vld [vmem:[#allocation2] sm:$0xff]  ;;  %v2710_v4 = vld [vmem:[#allocation2 + $0x8] sm:$0xff]  ;;  %752 = vadd.xlane.f32.xlu1 %v751_v9  ;;  %2278 = vmatpush3.bf16.msra.mxu0 %v2442_v32  ;;  %v737_v52 = vrot.slane %v2753_v49, %v736_v48  ;;  %v743_v57 = vrot.slane %v2753_v49, %v742_v53 }
  0x3a   : > { %v707_v5 = vsel %vm706_vm1, %v2707_v2, 0.0  ;;  %v710_v8 = vsel %vm706_vm1, %v2710_v4, 0.0  ;;  %2283 = vmatprep.subr.bf16.mxu0 %v2543_v31 }
  0x3b   : > { %708 = vadd.xlane.f32.xlu0 %v707_v5 }
  0x3d   : > { %p2227_p8 = scmp.ne.s32.totalorder %s3009_s15, 1 }
  0x3f   : > { %711 = vadd.xlane.f32.xlu0 %v710_v8 }
  0xbe   : > { %v750_v11 = vpop.xlane.xlu1 %749 }
  0xbf   : > { %v754_v13 = vmul.f32 0.03125, %v750_v11 }
  0xc1   : > { %v2720_v15 = vsub.f32 %v746_v3, %v754_v13 }
  0xc2   : > { %v753_v17 = vpop.xlane.xlu1 %752 }
  0xc3   : > { %v755_v19 = vmul.f32 0.03125, %v753_v17  ;;  %v758_v21 = vmul.f32 %v2720_v15, %v2720_v15 }
  0xc4   : > { %v709_v10 = vpop.xlane.xlu0 %708 }
  0xc5   : > { %v714_v12 = vmul.f32 0.03125, %v709_v10  ;;  %v757_v23 = vsub.f32 %v747_v7, %v755_v19  ;;  %v760_v25 = vsel %vm706_vm1, %v758_v21, 0.0  ;;  %v2444_v7 = vld [vmem:[%s2663_s27] sm:$0xff]   ;;  %s2552_s27 = smov 72  }
  0xc7   : > { %v716_v14 = vsub.f32 %v2707_v2, %v714_v12  ;;  %v759_v27 = vmul.f32 %v757_v23, %v757_v23 }
  0xc8   : > { %v712_v16 = vpop.xlane.xlu0 %711 }
  0xc9   : > { %v715_v18 = vmul.f32 0.03125, %v712_v16  ;;  %v718_v20 = vmul.f32 %v716_v14, %v716_v14  ;;  %v763_v29 = vsel %vm706_vm1, %v759_v27, 0.0 }
  0xcb   : > { %v717_v22 = vsub.f32 %v2710_v4, %v715_v18  ;;  %v720_v24 = vsel %vm706_vm1, %v718_v20, 0.0 }
  0xcc   : > { %721 = vadd.xlane.f32.xlu0 %v720_v24 }
  0xcd   : > { %v719_v26 = vmul.f32 %v717_v22, %v717_v22 }
  0xcf   : > { %v723_v28 = vsel %vm706_vm1, %v719_v26, 0.0 }
  0xd0   : > { %761 = vadd.xlane.f32.xlu0 %v760_v25  ;;  %724 = vadd.xlane.f32.xlu1 %v723_v28 }
  0xd4   : > { %764 = vadd.xlane.f32.xlu1 %v763_v29 }
  0xe6   : > { %865 = vrot.lane.b32.xlu0 %v2744_v33, %s2545_s5 }
 0x155   : > { %v722_v34 = vpop.xlane.xlu0 %721 }
 0x156   : > { %v726_v35 = vmul.f32 0.03125, %v722_v34  ;;  %v923_v34 = vand.u32 1, %v2749_v47 }
 0x158   : > { %v728_v36 = vadd.f32 1e-05, %v726_v35 }
 0x159   : > { %v725_v37 = vpop.xlane.xlu1 %724  ;;  %v762_v38 = vpop.xlane.xlu0 %761 }
 0x15a   : > { %2455 = vrsqrt.f32 %v728_v36  ;;  %v727_v39 = vmul.f32 0.03125, %v725_v37  ;;  %v766_v40 = vmul.f32 0.03125, %v762_v38  ;;  %v918_v36 = vadd.s32 8, %v2749_v47 }
 0x15b   : > { %v2547_v38 = vmov -1e+09  }
 0x15c   : > { %v729_v41 = vadd.f32 1e-05, %v727_v39  ;;  %v768_v42 = vadd.f32 1e-05, %v766_v40  ;;  %v930_v37 = vand.u32 1, %v918_v36 }
 0x15d   : > { %v765_v44 = vpop.xlane.xlu1 %764  ;;  %v866_v16 = vpop.permute.xlu0 %865 }
 0x15e   : > { %2457 = vrsqrt.f32 %v729_v41  ;;  %v767_v45 = vmul.f32 0.03125, %v765_v44 }
 0x15f   : > { %2459 = vrsqrt.f32 %v768_v42 }
 0x160   : > { %v769_v46 = vadd.f32 1e-05, %v767_v45 }
 0x162   : > { %2461 = vrsqrt.f32 %v769_v46 }
 0x167   : > { %v2456_v50 = vpop.eup %2455 }
 0x168   : > { %v732_v51 = vmul.f32 %v2456_v50, %v716_v14 }
 0x16a   : > { %v738_v56 = vmul.f32 %v737_v52, %v732_v51 }
 0x16b   : > { %v2458_v54 = vpop.eup %2457 }
 0x16c   : > { %v733_v55 = vmul.f32 %v2458_v54, %v717_v22  ;;  %v2460_v58 = vpop.eup %2459  ;;  %v744_v63 = vadd.f32 %v743_v57, %v738_v56 }
 0x16d   : > { %v772_v61 = vmul.f32 %v2460_v58, %v2720_v15 }
 0x16e   : > { %v739_v59 = vmul.f32 %v737_v52, %v733_v55 }
 0x16f   : > { %v2462_v60 = vpop.eup %2461  ;;  %v774_v6 = vmul.f32 %v772_v61, %v737_v52 }
 0x170   : > { %v773_v62 = vmul.f32 %v2462_v60, %v757_v23  ;;  %v745_v0 = vadd.f32 %v743_v57, %v739_v59 }
 0x171   : > { %v776_v9 = vadd.f32 %v774_v6, %v743_v57 }
 0x172   : > { %v783_v3 = vpack.c.bf16 %v745_v0, %v744_v63  ;;  %v775_v5 = vmul.f32 %v773_v62, %v737_v52 }
 0x174   : > { %2280 = vmatmul.mubr.msk.bf16.vlgmr.msra.gmra.mxu0 %vm706_vm1, %v783_v3  ;;  %v777_v8 = vadd.f32 %v775_v5, %v743_v57 }
 0x175   : > { %2284 = vmatpush3.bf16.msra.mxu0 %v2443_v1  ;;  %2287 = vmatprep.mubr.msk.bf16.mxu0 %vm2544_vm2, %v2543_v31 }
 0x176   : > { %2285 = vmatprep.subr.bf16.mxu0 %v2543_v31  ;;  %v852_v10 = vpack.c.bf16 %v777_v8, %v776_v9 }
 0x179   : > { %2286 = vmatpush3.bf16.msra.mxu0 %v2444_v7 }
 0x17a   : > { %2291 = vmatprep.subr.bf16.mxu0 %v2543_v31 }
 0x17c   : > { %2288 = vmatmul.mubr.msk.bf16.vlgmr.msra.gmra.mxu0 %vm706_vm1, %v852_v10 }
 0x17d   : > { %2293 = vmatprep.mubr.msk.bf16.mxu0 %vm2544_vm2, %v2543_v31 }
 0x234   : > { %v839_v11 = vpop.f32.mrf.mxu0 }
 0x235   : > { %v840_v20 = vadd.f32 %v2744_v33, %v839_v11 }
 0x236   : > { %v2281_v12 = vpop.f32.mrf.mxu0 }
 0x237   : > { %v846_v26 = vmul.f32 0.35355338, %v840_v20 }
 0x238   : > { %v842_v13 = vpop.f32.mrf.mxu0 }
 0x239   : > { %v843_v18 = vadd.f32 %v2744_v33, %v842_v13  ;;  %v944_v33 = vand.u32 127, %v734_v43 }
 0x23a   : > { %v2282_v14 = vpop.f32.mrf.mxu0 }
 0x23b   : > { %v847_v24 = vmul.f32 0.35355338, %v843_v18  ;;  %v949_v35 = vand.u32 1, %v944_v33 }
 0x23c   : > { %v905_v15 = vpop.f32.mrf.mxu0 }
 0x23d   : > { %v906_v21 = vadd.f32 %v905_v15, %v866_v16  ;;  %v2780_v28 = vpack.c.bf16 %v847_v24, %v846_v26  ;;  %vm957_vm4 = vcmp.eq.s32.totalorder %v923_v34, %v949_v35  ;;  %vm958_vm5 = vcmp.eq.s32.totalorder %v930_v37, %v949_v35 }
 0x23e   : > { %v2289_v17 = vpop.f32.mrf.mxu0  ;;  %v2796_v39 = vsel %vm957_vm4, 0.0, %v2547_v38  ;;  %v2799_v44 = vsel %vm958_vm5, 0.0, %v2547_v38  ;;  %v912_v38 = vld [vmem:[%s2668_s12] sm:$0xf] }
 0x240   : > { %v908_v19 = vpop.f32.mrf.mxu0 }
 0x241   : > { %v909_v22 = vadd.f32 %v908_v19, %v866_v16 }
 0x242   : > { %v2290_v23 = vpop.f32.mrf.mxu0 }
 0x243   : > { %v2775_v25 = vpack.c.bf16 %v909_v22, %v906_v21 }
 0x245   : > { %1087 = vrot.lane.b32.xlu1 %v2775_v25, %s2546_s1  ;;  %v968_v27 = vsel %vm963_vm3, %v2775_v25, 0 }
 0x246   : > { %2292 = vmatpush3.bf16.xpose.msra.mxu0 %v968_v27 }
 0x247   : > { %2303 = vmatprep.subr.bf16.mxu0 %v2543_v31 }
 0x249   : > { %1085 = vrot.lane.b32.xlu1 %v2780_v28, %s2546_s1 }
 0x24d   : > { %2294 = vmatmul.mubr.msk.bf16.vlgmr.msra.gmra.mxu0 %vm963_vm3, %v2780_v28 }
 0x24e   : > { %2305 = vmatprep.mubr.msk.bf16.mxu0 %vm2544_vm2, %v2543_v31 }
 0x2b7   : > { %v1088_v29 = vpop.permute.xlu1 %1087 }
 0x2b8   : > { %v1093_v30 = vsel %vm963_vm3, %v1088_v29, 0 }
 0x2b9   : > { %2304 = vmatpush3.bf16.xpose.msra.mxu0 %v1093_v30 }
 0x2ba   : > { %2315 = vmatprep.subr.bf16.mxu0 %v2543_v31 }
 0x2bb   : > { %v1086_v32 = vpop.permute.xlu1 %1085 }
 0x2c0   : > { %2306 = vmatmul.mubr.msk.bf16.vlgmr.msra.gmra.mxu0 %vm963_vm3, %v1086_v32 }
 0x2c1   : > { %2317 = vmatprep.mubr.msk.bf16.mxu0 %vm2544_vm2, %v2543_v31 }
 0x30d   : > { %v1004_v40 = vpop.f32.mrf.mxu0 }
 0x30e   : > { %v1005_v41 = vadd.f32 %v1004_v40, %v2796_v39  ;;  %v1259_v40 = vsel %vm1210_vm7, %v912_v38, 0 }
 0x30f   : > { %v2295_v42 = vpop.f32.mrf.mxu0 }
 0x310   : > { %v1012_v43 = vsel %vm1011_vm6, %v1005_v41, -inf }
 0x311   : > { %1013 = vmax.xlane.f32.xlu1 %v1012_v43  ;;  %v1007_v45 = vpop.f32.mrf.mxu0 }
 0x312   : > { %v1008_v46 = vadd.f32 %v1007_v45, %v2799_v44 }
 0x313   : > { %v2296_v50 = vpop.f32.mrf.mxu0 }
 0x314   : > { %v1015_v51 = vsel %vm1011_vm6, %v1008_v46, -inf }
 0x315   : > { %1016 = vmax.xlane.f32.xlu0 %v1015_v51 }
 0x380   : > { %v1129_v52 = vpop.f32.mrf.mxu0 }
 0x381   : > { %v1130_v54 = vadd.f32 %v1129_v52, %v2796_v39 }
 0x382   : > { %v2307_v55 = vpop.f32.mrf.mxu0 }
 0x383   : > { %v1136_v56 = vsel %vm1011_vm6, %v1130_v54, -inf }
 0x384   : > { %1137 = vmax.xlane.f32.xlu0 %v1136_v56  ;;  %v1132_v57 = vpop.f32.mrf.mxu0 }
 0x385   : > { %v1133_v58 = vadd.f32 %v1132_v57, %v2799_v44 }
 0x386   : > { %v2308_v59 = vpop.f32.mrf.mxu0 }
 0x387   : > { %v1139_v60 = vsel %vm1011_vm6, %v1133_v58, -inf }
 0x388   : > { %1140 = vmax.xlane.f32.xlu0 %v1139_v60 }
 0x39a   : > { %v1014_v61 = vpop.xlane.xlu1 %1013 }
 0x39b   : > { %v1018_v62 = vsub.f32 %v1005_v41, %v1014_v61  ;;  %v913_v41 = vld [vmem:[%s2668_s12 + $0x4] sm:$0xf] }
 0x39c   : > { %v1212_v42 = vsel %vm1210_vm7, %v913_v41, 0  ;;  %v914_v41 = vld [vmem:[%s2668_s12 + $0x8] sm:$0xf] }
 0x39d   : > { %v1020_v63 = vmul.f32 1.442695, %v1018_v62  ;;  %2316 = vmatpush3.bf16.msra.mxu0 %v1212_v42  ;;  %v1428_v42 = vsel %vm1210_vm7, %v914_v41, 0 }
 0x39e   : > { %v1017_v0 = vpop.xlane.xlu0 %1016  ;;  %2327 = vmatprep.subr.bf16.mxu0 %v2543_v31 }
 0x39f   : > { %2463 = vpow2.f32 %v1020_v63  ;;  %v1019_v1 = vsub.f32 %v1008_v46, %v1017_v0 }
 0x3a1   : > { %v1022_v3 = vmul.f32 1.442695, %v1019_v1 }
 0x3a3   : > { %2465 = vpow2.f32 %v1022_v3 }
 0x3ac   : > { %v2464_v5 = vpop.eup %2463 }
 0x3ad   : > { %v1024_v6 = vsel %vm1011_vm6, %v2464_v5, 0.0 }
 0x3ae   : > { %1025 = vadd.xlane.f32.xlu1 %v1024_v6 }
 0x3b0   : > { %v2466_v7 = vpop.eup %2465 }
 0x3b1   : > { %v1027_v8 = vsel %vm1011_vm6, %v2466_v7, 0.0 }
 0x3b2   : > { %1028 = vadd.xlane.f32.xlu0 %v1027_v8 }
 0x40d   : > { %v1138_v9 = vpop.xlane.xlu0 %1137 }
 0x40e   : > { %v1142_v10 = vsub.f32 %v1130_v54, %v1138_v9 }
 0x410   : > { %v1144_v11 = vmul.f32 1.442695, %v1142_v10 }
 0x411   : > { %v1141_v12 = vpop.xlane.xlu0 %1140 }
 0x412   : > { %2467 = vpow2.f32 %v1144_v11  ;;  %v1143_v13 = vsub.f32 %v1133_v58, %v1141_v12 }
 0x414   : > { %v1146_v14 = vmul.f32 1.442695, %v1143_v13 }
 0x416   : > { %2469 = vpow2.f32 %v1146_v14 }
 0x41f   : > { %v2468_v15 = vpop.eup %2467 }
 0x420   : > { %v1148_v16 = vsel %vm1011_vm6, %v2468_v15, 0.0 }
 0x421   : > { %1149 = vadd.xlane.f32.xlu1 %v1148_v16 }
 0x423   : > { %v2470_v17 = vpop.eup %2469 }
 0x424   : > { %v1151_v18 = vsel %vm1011_vm6, %v2470_v17, 0.0 }
 0x425   : > { %1152 = vadd.xlane.f32.xlu0 %v1151_v18 }
 0x432   : > { %1036 = vrot.lane.b32.xlu1 %v2775_v25, %s2545_s5 }
 0x436   : > { %1304 = vrot.lane.b32.xlu1 %v2775_v25, %s2548_s17 }
 0x437   : > { %v1026_v20 = vpop.xlane.xlu1 %1025 }
 0x43a   : > { %1302 = vrot.lane.b32.xlu1 %v2780_v28, %s2548_s17 }
 0x43b   : > { %1159 = vrot.lane.b32.xlu0 %v2775_v25, %s2549_s25  ;;  %v1029_v19 = vpop.xlane.xlu0 %1028 }
 0x43c   : > { %2471 = vrcp.f32 %v1029_v19 }
 0x43d   : > { %2473 = vrcp.f32 %v1026_v20 }
 0x449   : > { %v2472_v21 = vpop.eup %2471 }
 0x44a   : > { %v2474_v23 = vpop.eup %2473  ;;  %v1033_v24 = vmul.f32 %v2472_v21, %v2466_v7 }
 0x44b   : > { %v1032_v29 = vmul.f32 %v2474_v23, %v2464_v5 }
 0x44d   : > { %v1034_v30 = vpack.c.bf16 %v1033_v24, %v1032_v29 }
 0x4aa   : > { %v1150_v22 = vpop.xlane.xlu1 %1149 }
 0x4ab   : > { %2475 = vrcp.f32 %v1150_v22 }
 0x4ae   : > { %v1037_v26 = vpop.permute.xlu1 %1036  ;;  %v1153_v27 = vpop.xlane.xlu0 %1152 }
 0x4af   : > { %2477 = vrcp.f32 %v1153_v27  ;;  %2298 = vmatpush3.bf16.msra.mxu1 %v1037_v26 }
 0x4b0   : > { %2309 = vmatprep.subr.bf16.mxu1 %v2543_v31 }
 0x4b2   : > { %2300 = vmatmul.mubr.msk.bf16.vlgmr.msra.gmra.mxu1 %vm1011_vm6, %v1034_v30  ;;  %v1160_v32 = vpop.permute.xlu0 %1159  ;;  %v1305_v55 = vpop.permute.xlu1 %1304 }
 0x4b3   : > { %2310 = vmatpush3.bf16.msra.mxu1 %v1160_v32  ;;  %2311 = vmatprep.mubr.msk.bf16.mxu1 %vm2544_vm2, %v2543_v31  ;;  %v1310_v59 = vsel %vm963_vm3, %v1305_v55, 0 }
 0x4b4   : > { %2321 = vmatprep.subr.bf16.mxu1 %v2543_v31 }
 0x4b6   : > { %v1303_v60 = vpop.permute.xlu1 %1302 }
 0x4b8   : > { %v2476_v33 = vpop.eup %2475 }
 0x4b9   : > { %v1156_v35 = vmul.f32 %v2476_v33, %v2468_v15 }
 0x4bc   : > { %v2478_v34 = vpop.eup %2477 }
 0x4bd   : > { %v1157_v36 = vmul.f32 %v2478_v34, %v2470_v17 }
 0x4bf   : > { %v1158_v37 = vpack.c.bf16 %v1157_v36, %v1156_v35 }
 0x4c1   : > { %2312 = vmatmul.mubr.msk.bf16.vlgmr.msra.gmra.mxu1 %vm1011_vm6, %v1158_v37 }
 0x4c2   : > { %2323 = vmatprep.mubr.msk.bf16.mxu1 %vm2544_vm2, %v2543_v31  ;;  %2322 = vmatpush3.bf16.msra.mxu1 %v1259_v40 }
 0x4c3   : > { %2333 = vmatprep.subr.bf16.mxu1 %v2543_v31 }
 0x572   : > { %v1076_v43 = vpop.f32.mrf.mxu1 }
 0x574   : > { %v2301_v45 = vpop.f32.mrf.mxu1 }
 0x576   : > { %v1079_v46 = vpop.f32.mrf.mxu1 }
 0x577   : > { %v1083_v50 = vpack.c.bf16 %v1079_v46, %v1076_v43 }
 0x578   : > { %v2302_v51 = vpop.f32.mrf.mxu1 }
 0x579   : > { %2324 = vmatmul.mubr.msk.bf16.vlgmr.msra.gmra.mxu1 %vm963_vm3, %v1083_v50 }
 0x57a   : > { %2335 = vmatprep.mubr.msk.bf16.mxu1 %vm2544_vm2, %v2543_v31 }
 0x581   : > { %v1199_v52 = vpop.f32.mrf.mxu1 }
 0x583   : > { %v2313_v54 = vpop.f32.mrf.mxu1 }
 0x585   : > { %v1202_v56 = vpop.f32.mrf.mxu1 }
 0x586   : > { %v1206_v57 = vpack.c.bf16 %v1202_v56, %v1199_v52 }
 0x587   : > { %v2314_v58 = vpop.f32.mrf.mxu1 }
 0x588   : > { %2318 = vmatmul.mubr.msk.bf16.vlgmr.msra.gmra.mxu0 %vm963_vm3, %v1206_v57 }
 0x589   : > { %2328 = vmatpush3.bf16.xpose.msra.mxu0 %v1310_v59  ;;  %2329 = vmatprep.mubr.msk.bf16.mxu0 %vm2544_vm2, %v2543_v31 }
 0x58a   : > { %2339 = vmatprep.subr.bf16.mxu0 %v2543_v31 }
 0x590   : > { %2330 = vmatmul.mubr.msk.bf16.vlgmr.msra.gmra.mxu0 %vm963_vm3, %v1303_v60 }
 0x591   : > { %2341 = vmatprep.mubr.msk.bf16.mxu0 %vm2544_vm2, %v2543_v31  ;;  %2340 = vmatpush3.bf16.msra.mxu0 %v1428_v42 }
 0x592   : > { %2351 = vmatprep.subr.bf16.mxu0 %v2543_v31 }
 0x639   : > { %v1295_v61 = vpop.f32.mrf.mxu1 }
 0x63b   : > { %v2325_v62 = vpop.f32.mrf.mxu1 }
 0x63d   : > { %v1298_v63 = vpop.f32.mrf.mxu1 }
 0x63f   : > { %v2326_v0 = vpop.f32.mrf.mxu1 }
 0x648   : > { %v1248_v1 = vpop.f32.mrf.mxu0 }
 0x649   : > { %v2842_v3 = vadd.f32 %v1295_v61, %v1248_v1 }
 0x64a   : > { %v2319_v5 = vpop.f32.mrf.mxu0 }
 0x64c   : > { %v1251_v6 = vpop.f32.mrf.mxu0 }
 0x64d   : > { %v2844_v7 = vadd.f32 %v1298_v63, %v1251_v6 }
 0x64e   : > { %v2320_v8 = vpop.f32.mrf.mxu0 }
 0x650   : > { %v1346_v9 = vpop.f32.mrf.mxu0 }
 0x651   : > { %v1347_v10 = vadd.f32 %v1346_v9, %v2796_v39 }
 0x652   : > { %v2331_v11 = vpop.f32.mrf.mxu0 }
 0x653   : > { %v1353_v12 = vsel %vm1011_vm6, %v1347_v10, -inf }
 0x654   : > { %1354 = vmax.xlane.f32.xlu1 %v1353_v12  ;;  %v1349_v13 = vpop.f32.mrf.mxu0 }
 0x655   : > { %v1350_v14 = vadd.f32 %v1349_v13, %v2799_v44 }
 0x656   : > { %v2332_v15 = vpop.f32.mrf.mxu0 }
 0x657   : > { %v1356_v16 = vsel %vm1011_vm6, %v1350_v14, -inf }
 0x658   : > { %1357 = vmax.xlane.f32.xlu0 %v1356_v16 }
 0x665   : > { %1376 = vrot.lane.b32.xlu1 %v2775_v25, %s2550_s29 }
 0x669   : > { %1473 = vrot.lane.b32.xlu1 %v2780_v28, %s2551_s13 }
 0x6dd   : > { %v1355_v17 = vpop.xlane.xlu1 %1354 }
 0x6de   : > { %v1359_v18 = vsub.f32 %v1347_v10, %v1355_v17 }
 0x6e0   : > { %v1361_v19 = vmul.f32 1.442695, %v1359_v18 }
 0x6e1   : > { %v1377_v20 = vpop.permute.xlu1 %1376  ;;  %v1358_v21 = vpop.xlane.xlu0 %1357 }
 0x6e2   : > { %2479 = vpow2.f32 %v1361_v19  ;;  %v1360_v22 = vsub.f32 %v1350_v14, %v1358_v21  ;;  %2334 = vmatpush3.bf16.msra.mxu1 %v1377_v20 }
 0x6e3   : > { %2345 = vmatprep.subr.bf16.mxu1 %v2543_v31 }
 0x6e4   : > { %v1363_v23 = vmul.f32 1.442695, %v1360_v22 }
 0x6e5   : > { %v1474_v40 = vpop.permute.xlu1 %1473 }
 0x6e6   : > { %2481 = vpow2.f32 %v1363_v23 }
 0x6ef   : > { %v2480_v24 = vpop.eup %2479 }
 0x6f0   : > { %v1365_v26 = vsel %vm1011_vm6, %v2480_v24, 0.0 }
 0x6f1   : > { %1366 = vadd.xlane.f32.xlu0 %v1365_v26 }
 0x6f3   : > { %v2482_v27 = vpop.eup %2481 }
 0x6f4   : > { %v1368_v29 = vsel %vm1011_vm6, %v2482_v27, 0.0 }
 0x6f5   : > { %1369 = vadd.xlane.f32.xlu0 %v1368_v29  ;;  %v1648_v29 = vsub.s32 2, %v2749_v47 }
 0x70b   : > { %1475 = vrot.lane.b32.xlu0 %v2775_v25, %s2551_s13 }
 0x77a   : > { %v1367_v28 = vpop.xlane.xlu0 %1366 }
 0x77b   : > { %2483 = vrcp.f32 %v1367_v28 }
 0x77e   : > { %v1370_v30 = vpop.xlane.xlu0 %1369 }
 0x77f   : > { %2485 = vrcp.f32 %v1370_v30 }
 0x782   : > { %v1476_v36 = vpop.permute.xlu0 %1475 }
 0x783   : > { %v1481_v38 = vsel %vm963_vm3, %v1476_v36, 0 }
 0x788   : > { %v2484_v32 = vpop.eup %2483 }
 0x789   : > { %v1373_v34 = vmul.f32 %v2484_v32, %v2480_v24  ;;  %v1649_v32 = vrot.slane %v2753_v49, %v1648_v29 }
 0x78c   : > { %v2486_v33 = vpop.eup %2485 }
 0x78d   : > { %v1374_v35 = vmul.f32 %v2486_v33, %v2482_v27 }
 0x78f   : > { %v1375_v37 = vpack.c.bf16 %v1374_v35, %v1373_v34 }
 0x791   : > { %2336 = vmatmul.mubr.msk.bf16.vlgmr.msra.gmra.mxu1 %vm1011_vm6, %v1375_v37 }
 0x792   : > { %2346 = vmatpush3.bf16.xpose.msra.mxu1 %v1481_v38  ;;  %2347 = vmatprep.mubr.msk.bf16.mxu1 %vm2544_vm2, %v2543_v31 }
 0x793   : > { %2357 = vmatprep.subr.bf16.mxu1 %v2543_v31 }
 0x799   : > { %2348 = vmatmul.mubr.msk.bf16.vlgmr.msra.gmra.mxu1 %vm963_vm3, %v1474_v40 }
 0x79a   : > { %2359 = vmatprep.mubr.msk.bf16.mxu1 %vm2544_vm2, %v2543_v31 }
 0x851   : > { %v1416_v43 = vpop.f32.mrf.mxu1 }
 0x853   : > { %v2337_v45 = vpop.f32.mrf.mxu1 }
 0x855   : > { %v1419_v46 = vpop.f32.mrf.mxu1 }
 0x856   : > { %v1423_v50 = vpack.c.bf16 %v1419_v46, %v1416_v43 }
 0x857   : > { %v2338_v51 = vpop.f32.mrf.mxu1 }
 0x858   : > { %2342 = vmatmul.mubr.msk.bf16.vlgmr.msra.gmra.mxu0 %vm963_vm3, %v1423_v50 }
 0x859   : > { %v1517_v52 = vpop.f32.mrf.mxu1  ;;  %2353 = vmatprep.mubr.msk.bf16.mxu0 %vm2544_vm2, %v2543_v31 }
 0x85a   : > { %v1518_v54 = vadd.f32 %v1517_v52, %v2796_v39 }
 0x85b   : > { %v2349_v55 = vpop.f32.mrf.mxu1 }
 0x85c   : > { %v1524_v56 = vsel %vm1011_vm6, %v1518_v54, -inf }
 0x85d   : > { %1525 = vmax.xlane.f32.xlu1 %v1524_v56  ;;  %v1520_v57 = vpop.f32.mrf.mxu1 }
 0x85e   : > { %v1521_v58 = vadd.f32 %v1520_v57, %v2799_v44  ;;  %v2445_v57 = vld [vmem:[%s2673_s14 + $0x8] sm:$0xff]  }
 0x85f   : > { %v2350_v59 = vpop.f32.mrf.mxu1 }
 0x860   : > { %v1527_v60 = vsel %vm1011_vm6, %v1521_v58, -inf  ;;  %v2447_v59 = vld [vmem:[%s2678_s16 + $0x38] sm:$0xff]  }
 0x861   : > { %1528 = vmax.xlane.f32.xlu0 %v1527_v60  ;;  %v2448_v60 = vld [vmem:[%s2678_s16 + $0x30] sm:$0xff]  }
 0x8e6   : > { %v1526_v61 = vpop.xlane.xlu1 %1525 }
 0x8e7   : > { %v1530_v62 = vsub.f32 %v1518_v54, %v1526_v61  ;;  %v2449_v61 = vld [vmem:[%s2678_s16 + $0x28] sm:$0xff]  }
 0x8e9   : > { %v1532_v63 = vmul.f32 1.442695, %v1530_v62  ;;  %v2450_v62 = vld [vmem:[%s2678_s16 + $0x20] sm:$0xff]  }
 0x8ea   : > { %v1529_v0 = vpop.xlane.xlu0 %1528 }
 0x8eb   : > { %2487 = vpow2.f32 %v1532_v63  ;;  %v1531_v1 = vsub.f32 %v1521_v58, %v1529_v0  ;;  %v2446_v58 = vld [vmem:[%s2673_s14] sm:$0xff]   ;;  %v2451_v63 = vld [vmem:[%s2678_s16 + $0x18] sm:$0xff]  }
 0x8ed   : > { %v1534_v5 = vmul.f32 1.442695, %v1531_v1 }
 0x8ef   : > { %2489 = vpow2.f32 %v1534_v5 }
 0x8f8   : > { %v2488_v39 = vpop.eup %2487 }
 0x8f9   : > { %v1536_v6 = vsel %vm1011_vm6, %v2488_v39, 0.0 }
 0x8fa   : > { %1537 = vadd.xlane.f32.xlu0 %v1536_v6 }
 0x8fc   : > { %v2490_v8 = vpop.eup %2489 }
 0x8fd   : > { %v1539_v9 = vsel %vm1011_vm6, %v2490_v8, 0.0 }
 0x8fe   : > { %1540 = vadd.xlane.f32.xlu1 %v1539_v9  ;;  %v1701_v9 = vsub.s32 3, %v2749_v47 }
 0x910   : > { %1547 = vrot.lane.b32.xlu0 %v2775_v25, %s2552_s27 }
 0x918   : > { %v1464_v44 = vpop.f32.mrf.mxu0 }
 0x919   : > { %v1471_v10 = vadd.f32 %v1464_v44, %v2842_v3  ;;  %v915_v3 = vld [vmem:[%s2668_s12 + $0xc] sm:$0xf] }
 0x91a   : > { %v2343_v11 = vpop.f32.mrf.mxu0 }
 0x91b   : > { %v1702_v11 = vrot.slane %v2753_v49, %v1701_v9 }
 0x91c   : > { %v1467_v12 = vpop.f32.mrf.mxu0 }
 0x91d   : > { %v1472_v13 = vadd.f32 %v1467_v12, %v2844_v7  ;;  %v1599_v7 = vsel %vm1210_vm7, %v915_v3, 0  ;;  %v1707_v12 = vsub.s32 4, %v2749_v47  ;;  %v2454_v3 = vld [vmem:[%s2678_s16] sm:$0xff]  }
 0x91e   : > { %v2344_v14 = vpop.f32.mrf.mxu0  ;;  %2358 = vmatpush3.bf16.msra.mxu1 %v1599_v7  ;;  %v2215_v7 = vld [vmem:[%s683_s23] ss:$0 sm:$0xff] }
 0x91f   : > { %2371 = vmatprep.subr.bf16.mxu1 %v2543_v31 }
 0x983   : > { %v1538_v15 = vpop.xlane.xlu0 %1537 }
 0x984   : > { %2491 = vrcp.f32 %v1538_v15 }
 0x987   : > { %v1541_v16 = vpop.xlane.xlu1 %1540  ;;  %v1548_v17 = vpop.permute.xlu0 %1547 }
 0x988   : > { %2493 = vrcp.f32 %v1541_v16  ;;  %2352 = vmatpush3.bf16.msra.mxu0 %v1548_v17  ;;  %v1708_v16 = vrot.slane %v2753_v49, %v1707_v12 }
 0x989   : > { %2363 = vmatprep.subr.bf16.mxu0 %v2543_v31 }
 0x991   : > { %v2492_v18 = vpop.eup %2491 }
 0x992   : > { %v1544_v25 = vmul.f32 %v2492_v18, %v2488_v39 }
 0x995   : > { %v2494_v19 = vpop.eup %2493 }
 0x996   : > { %v1545_v20 = vmul.f32 %v2494_v19, %v2490_v8 }
 0x998   : > { %v1546_v21 = vpack.c.bf16 %v1545_v20, %v1544_v25  ;;  %v2452_v20 = vld [vmem:[%s2678_s16 + $0x10] sm:$0xff]  }
 0x99a   : > { %2354 = vmatmul.mubr.msk.bf16.vlgmr.msra.gmra.mxu0 %vm1011_vm6, %v1546_v21  ;;  %v2453_v21 = vld [vmem:[%s2678_s16 + $0x8] sm:$0xff]  }
 0x99b   : > { %2367 = vmatprep.mubr.msk.bf16.mxu0 %vm2544_vm2, %v2543_v31  ;;  %2364 = vmatpush3.bf16.msra.mxu0 %v2445_v57 }
 0x99c   : > { %2365 = vmatprep.subr.bf16.mxu0 %v2543_v31 }
 0x99f   : > { %2366 = vmatpush3.bf16.msra.mxu0 %v2446_v58 }
 0xa5a   : > { %v1587_v22 = vpop.f32.mrf.mxu0 }
 0xa5c   : > { %v2355_v23 = vpop.f32.mrf.mxu0 }
 0xa5e   : > { %v1590_v24 = vpop.f32.mrf.mxu0 }
 0xa5f   : > { %v1594_v26 = vpack.c.bf16 %v1590_v24, %v1587_v22 }
 0xa60   : > { %v2356_v27 = vpop.f32.mrf.mxu0 }
 0xa61   : > { %2360 = vmatmul.mubr.msk.bf16.vlgmr.msra.gmra.mxu1 %vm963_vm3, %v1594_v26 }
 0xa62   : > { %2387 = vmatprep.mubr.msk.bf16.mxu1 %vm2544_vm2, %v2543_v31  ;;  %2372 = vmatpush3.bf16.msra.mxu1 %v2447_v59 }
 0xa63   : > { %2373 = vmatprep.subr.bf16.mxu1 %v2543_v31 }
 0xa66   : > { %2374 = vmatpush3.bf16.msra.mxu1 %v2448_v60 }
 0xa67   : > { %2375 = vmatprep.subr.bf16.mxu1 %v2543_v31 }
 0xa6a   : > { %2376 = vmatpush3.bf16.msra.mxu1 %v2449_v61 }
 0xa6b   : > { %2377 = vmatprep.subr.bf16.mxu1 %v2543_v31 }
 0xa6e   : > { %2378 = vmatpush3.bf16.msra.mxu1 %v2450_v62 }
 0xa6f   : > { %2379 = vmatprep.subr.bf16.mxu1 %v2543_v31 }
 0xa72   : > { %2380 = vmatpush3.bf16.msra.mxu1 %v2451_v63 }
 0xa73   : > { %2381 = vmatprep.subr.bf16.mxu1 %v2543_v31 }
 0xa76   : > { %2382 = vmatpush3.bf16.msra.mxu1 %v2452_v20 }
 0xa77   : > { %2383 = vmatprep.subr.bf16.mxu1 %v2543_v31 }
 0xa7a   : > { %2384 = vmatpush3.bf16.msra.mxu1 %v2453_v21 }
 0xa7b   : > { %2385 = vmatprep.subr.bf16.mxu1 %v2543_v31 }
 0xa7e   : > { %2386 = vmatpush3.bf16.msra.mxu1 %v2454_v3 }
 0xb21   : > { %v1635_v28 = vpop.f32.mrf.mxu1 }
 0xb22   : > { %v1642_v30 = vadd.f32 %v1635_v28, %v1471_v10 }
 0xb23   : > { %v2361_v33 = vpop.f32.mrf.mxu1 }
 0xb24   : > { %v1644_v34 = vadd.f32 %v1642_v30, %v2707_v2  ;;  %v1870_v33 = vsub.s32 5, %v2749_v47 }
 0xb25   : > { %v1638_v35 = vpop.f32.mrf.mxu1 }
 0xb26   : > { %v2892_v36 = vadd.f32 %v1649_v32, %v1644_v34  ;;  %v1643_v37 = vadd.f32 %v1638_v35, %v1472_v13  ;;  %v1871_v31 = vrot.slane %v2753_v49, %v1870_v33 }
 0xb27   : > { %v2362_v38 = vpop.f32.mrf.mxu1 }
 0xb28   : > { %v1645_v40 = vadd.f32 %v1643_v37, %v2710_v4  ;;  %v1673_v41 = vsel %vm706_vm1, %v2892_v36, 0.0 }
 0xb29   : > { %1674 = vadd.xlane.f32.xlu1 %v1673_v41 }
 0xb2a   : > { %v2897_v42 = vadd.f32 %v1649_v32, %v1645_v40 }
 0xb2c   : > { %v1676_v43 = vsel %vm706_vm1, %v2897_v42, 0.0 }
 0xb2d   : > { %1677 = vadd.xlane.f32.xlu1 %v1676_v43 }
 0xbb2   : > { %v1675_v2 = vpop.xlane.xlu1 %1674 }
 0xbb3   : > { %v1679_v45 = vmul.f32 0.03125, %v1675_v2 }
 0xbb5   : > { %v1681_v46 = vsub.f32 %v2892_v36, %v1679_v45 }
 0xbb6   : > { %v1678_v50 = vpop.xlane.xlu1 %1677 }
 0xbb7   : > { %v1680_v4 = vmul.f32 0.03125, %v1678_v50  ;;  %v1683_v51 = vmul.f32 %v1681_v46, %v1681_v46 }
 0xbb9   : > { %v1682_v52 = vsub.f32 %v2897_v42, %v1680_v4  ;;  %v1685_v54 = vsel %vm706_vm1, %v1683_v51, 0.0 }
 0xbba   : > { %1686 = vadd.xlane.f32.xlu1 %v1685_v54 }
 0xbbb   : > { %v1684_v55 = vmul.f32 %v1682_v52, %v1682_v52 }
 0xbbd   : > { %v1688_v56 = vsel %vm706_vm1, %v1684_v55, 0.0 }
 0xbbe   : > { %1689 = vadd.xlane.f32.xlu1 %v1688_v56 }
 0xc43   : > { %v1687_v0 = vpop.xlane.xlu1 %1686 }
 0xc44   : > { %v1691_v1 = vmul.f32 0.03125, %v1687_v0 }
 0xc46   : > { %v1693_v5 = vadd.f32 1e-05, %v1691_v1 }
 0xc47   : > { %v1690_v39 = vpop.xlane.xlu1 %1689 }
 0xc48   : > { %2495 = vrsqrt.f32 %v1693_v5  ;;  %v1692_v6 = vmul.f32 0.03125, %v1690_v39 }
 0xc4a   : > { %v1694_v8 = vadd.f32 1e-05, %v1692_v6 }
 0xc4c   : > { %2497 = vrsqrt.f32 %v1694_v8 }
 0xc55   : > { %v2496_v44 = vpop.eup %2495 }
 0xc56   : > { %v1697_v10 = vmul.f32 %v2496_v44, %v1681_v46 }
 0xc58   : > { %v1703_v15 = vmul.f32 %v1702_v11, %v1697_v10 }
 0xc59   : > { %v2498_v13 = vpop.eup %2497 }
 0xc5a   : > { %v1698_v14 = vmul.f32 %v2498_v13, %v1682_v52  ;;  %v1709_v18 = vadd.f32 %v1708_v16, %v1703_v15 }
 0xc5c   : > { %v1704_v17 = vmul.f32 %v1702_v11, %v1698_v14 }
 0xc5e   : > { %v1710_v19 = vadd.f32 %v1708_v16, %v1704_v17 }
 0xc60   : > { %v1711_v25 = vpack.c.bf16 %v1710_v19, %v1709_v18 }
 0xc62   : > { %2368 = vmatmul.mubr.msk.bf16.vlgmr.msra.gmra.mxu0 %vm706_vm1, %v1711_v25 }
 0xd22   : > { %v1767_v22 = vpop.f32.mrf.mxu0 }
 0xd23   : > { %v1768_v24 = vadd.f32 %v2215_v7, %v1767_v22 }
 0xd24   : > { %v2369_v23 = vpop.f32.mrf.mxu0 }
 0xd25   : > { %v1774_v28 = vmax.f32 %v1768_v24, 0.0 }
 0xd26   : > { %v1770_v26 = vpop.f32.mrf.mxu0 }
 0xd27   : > { %v1771_v27 = vadd.f32 %v2215_v7, %v1770_v26 }
 0xd28   : > { %v2370_v29 = vpop.f32.mrf.mxu0 }
 0xd29   : > { %v1775_v30 = vmax.f32 %v1771_v27, 0.0 }
 0xd2b   : > { %v1776_v32 = vpack.c.bf16 %v1775_v30, %v1774_v28 }
 0xd2d   : > { %2388 = vmatmul.mubr.bf16.vlgmr.msra.gmra.mxu1 %v1776_v32 }
 0xded   : > { %v1859_v34 = vpop.f32.mrf.mxu1 }
 0xdee   : > { %v1866_v35 = vadd.f32 %v1859_v34, %v2892_v36 }
 0xdef   : > { %v2389_v37 = vpop.f32.mrf.mxu1 }
 0xdf0   : > { %v1872_v38 = vadd.f32 %v1871_v31, %v1866_v35 }
 0xdf1   : > { %v1862_v40 = vpop.f32.mrf.mxu1 }
 0xdf2   : > { %1874 = vst.msk [vmem:[#allocation2] sm:$0xff] %vm706_vm1, %v1872_v38  ;;  %v1867_v41 = vadd.f32 %v1862_v40, %v2897_v42  ;;  %1879 = sbr.rel (%p2227_p8) target bundleno = 3888 (0xf30), region = 72 }
 0xdf3   : > { %v2390_v43 = vpop.f32.mrf.mxu1 }
 0xdf4   : > { %v1873_v2 = vadd.f32 %v1871_v31, %v1867_v41 }
 0xdf6   : > { %1875 = vst.msk [vmem:[#allocation2 + $0x8] sm:$0xff] %vm706_vm1, %v1873_v2 }
 0xdf7   : > { %v1881_v45 = vsel %vm706_vm1, %v1872_v38, 0.0  ;;  %v1884_v49 = vsel %vm706_vm1, %v1873_v2, 0.0  ;;  %v1880_v63 = vld [vmem:[%s2699_s2] sm:$0x3] }
 0xdf8   : > { %1882 = vadd.xlane.f32.xlu0 %v1881_v45  ;;  %v1910_v0 = vrot.slane %v1880_v63, %v736_v48  ;;  %v1916_v39 = vrot.slane %v1880_v63, %v742_v53 }
 0xdfc   : > { %1885 = vadd.xlane.f32.xlu0 %v1884_v49 }
 0xe81   : > { %v1883_v36 = vpop.xlane.xlu0 %1882 }
 0xe82   : > { %v1887_v46 = vmul.f32 0.03125, %v1883_v36 }
 0xe84   : > { %v1889_v50 = vsub.f32 %v1872_v38, %v1887_v46 }
 0xe85   : > { %v1886_v4 = vpop.xlane.xlu0 %1885 }
 0xe86   : > { %v1888_v51 = vmul.f32 0.03125, %v1886_v4  ;;  %v1891_v42 = vmul.f32 %v1889_v50, %v1889_v50 }
 0xe88   : > { %v1890_v52 = vsub.f32 %v1873_v2, %v1888_v51  ;;  %v1893_v54 = vsel %vm706_vm1, %v1891_v42, 0.0 }
 0xe89   : > { %1894 = vadd.xlane.f32.xlu1 %v1893_v54 }
 0xe8a   : > { %v1892_v55 = vmul.f32 %v1890_v52, %v1890_v52 }
 0xe8c   : > { %v1896_v56 = vsel %vm706_vm1, %v1892_v55, 0.0 }
 0xe8d   : > { %1897 = vadd.xlane.f32.xlu1 %v1896_v56 }
 0xf12   : > { %v1895_v57 = vpop.xlane.xlu1 %1894 }
 0xf13   : > { %v1899_v58 = vmul.f32 0.03125, %v1895_v57 }
 0xf15   : > { %v1901_v59 = vadd.f32 1e-05, %v1899_v58 }
 0xf16   : > { %v1898_v60 = vpop.xlane.xlu1 %1897 }
 0xf17   : > { %2499 = vrsqrt.f32 %v1901_v59  ;;  %v1900_v61 = vmul.f32 0.03125, %v1898_v60 }
 0xf19   : > { %v1902_v62 = vadd.f32 1e-05, %v1900_v61 }
 0xf1b   : > { %2501 = vrsqrt.f32 %v1902_v62 }
 0xf24   : > { %v2500_v1 = vpop.eup %2499 }
 0xf25   : > { %v1905_v5 = vmul.f32 %v2500_v1, %v1889_v50 }
 0xf27   : > { %v1911_v6 = vmul.f32 %v1910_v0, %v1905_v5 }
 0xf28   : > { %v2502_v8 = vpop.eup %2501 }
 0xf29   : > { %v1917_v9 = vadd.f32 %v1916_v39, %v1911_v6  ;;  %v1906_v44 = vmul.f32 %v2502_v8, %v1890_v52 }
 0xf2b   : > { %1919 = vst.msk [vmem:[%s2704_s6] sm:$0xff] %vm706_vm1, %v1917_v9  ;;  %v1912_v10 = vmul.f32 %v1910_v0, %v1906_v44 }
 0xf2d   : > { %v1918_v11 = vadd.f32 %v1916_v39, %v1912_v10 }
 0xf2f   : > { %1920 = vst.msk [vmem:[%s2704_s6 + $0x8] sm:$0xff] %vm706_vm1, %v1918_v11 }
 0xf30 PF: > { %s3010_s2 = sld [smem:[#allocation6_spill]] }
 0xf31   : > { %s3011_s17 = sld [smem:[#allocation4_spill]] }
 0xf32   : > { %s3012_s18 = sld [smem:[#allocation5_spill]] }
 0xf33   : > { %s3013_s19 = sld [smem:[#allocation7_spill]] }
 0xf34   : > { %s3014_s20 = sld [smem:[#allocation8_spill]] }
 0xf36   : > { %s21_s21 = sadd.s32 1, %s3010_s2  }
 0xf37   : > { %p18_p9 = scmp.ge.s32.totalorder %s21_s21, 14  }
 0xf39   :  { %20 = sbr.rel (!%p18_p9) target bundleno = 10 (0xa), region = 132 }

// kernel: cm_attn_forward.11
= control target key start
LH: loop header
LB: loop body
LE: loop exit
PB: predicated region body
PF: predicated region fallthrough
CT: control target
= control target key end

     0   :  { %s5315_s30 = smov 0   ;;  %s5317_s10 = smov 0   ;;  %s8003_s0 = inlined_call_operand.vmem [shape: f32[3,192,8], index: 0, kind: input, shape index: {}]   ;;  %s8004_s1 = inlined_call_operand.vmem [shape: bf16[3,3,8,24], index: 1, kind: input, shape index: {}]   ;;  %s8005_s2 = inlined_call_operand.vmem [shape: bf16[3,3,8,8], index: 2, kind: input, shape index: {}]   ;;  %s8006_s3 = inlined_call_operand.vmem [shape: bf16[3,3,8,32], index: 3, kind: input, shape index: {}]   ;;  %s8007_s4 = inlined_call_operand.vmem [shape: bf16[3,3,32,8], index: 4, kind: input, shape index: {}]   ;;  %s8008_s5 = inlined_call_operand.vmem [shape: f32[3,3,8,8], index: 5, kind: input, shape index: {}]   ;;  %s8009_s6 = inlined_call_operand.vmem [shape: f32[3,3,1,24], index: 6, kind: input, shape index: {}]   ;;  %s8010_s7 = inlined_call_operand.vmem [shape: f32[3,3,1,32], index: 7, kind: input, shape index: {}]   ;;  %s8011_s8 = inlined_call_operand.vmem [shape: f32[3,2,8], index: 8, kind: input, shape index: {}]   ;;  %s8012_s9 = inlined_call_operand.vmem [shape: f32[3,192,8], index: 9, kind: output, shape index: {}]  }
   0x1   :  { %8093 = sst [smem:[#allocation47_spill]] %s8003_s0  ;;  %s5319_s11 = smov 0  }
   0x2   :  { %8094 = sst [smem:[#allocation48_spill]] %s8011_s8  ;;  %s5321_s12 = smov 0  }
   0x3   :  { %s5323_s13 = smov 0  }
   0x4 LB: > { %8095 = sst [smem:[#allocation3_spill]] %s5251_s11  ;;  %s28_s14 = sadd.s32 1, %s5251_s11  ;;  %s5259_s13 = sphi %s5323_s13, %s19_s13   ;;  %s5255_s12 = sphi %s5321_s12, %s8227_s12   ;;  %s5251_s11 = sphi %s5319_s11, %s8226_s11   ;;  %s5247_s10 = sphi %s5317_s10, %s8225_s10   ;;  %s5243_s30 = sphi %s5315_s30, %s8224_s30  }
   0x5   : > { %8096 = sst [smem:[#allocation4_spill]] %s5255_s12  ;;  %s31_s15 = sadd.s32 1, %s5255_s12 }
   0x6   : > { %8097 = sst [smem:[#allocation5_spill]] %s5259_s13  ;;  %p29_p0 = scmp.ge.s32.totalorder %s28_s14, 3 }
   0x7   : > { %p4429_p1 = scmp.ge.s32.totalorder %s5259_s13, 1  ;;  %p412_p2 = scmp.lt.s32.totalorder %s5259_s13, 10 }
   0x8   : > { %s8229_s14 = smov (%p29_p0, %s28_s14), 0  ;;  %s8231_s15 = smov (!%p29_p0, %s31_s15), %s5255_s12 }
   0x9   : > { %8098 = sst [smem:[#allocation6_spill]] %s8229_s14  ;;  %p413_p3 = pnand %p4429_p1, %p412_p2 }
   0xa   : > { %p33_p4 = scmp.ge.s32.totalorder %s8231_s15, 3 }
   0xb   : > { %416 = sbr.rel (%p413_p3) target bundleno = 2811 (0xafb), region = 56 }
   0xc   : > { %s8233_s15 = smov (%p33_p4, %s8231_s15), 0 }
   0xd   : > { %8099 = sst [smem:[#allocation7_spill]] %s8233_s15 }
  0x10   : > { %p507_p5 = scmp.lt.s32.totalorder %s5247_s10, 2  ;;  %p514_p6 = scmp.lt.s32.totalorder %s5243_s30, 2 }
  0x11   : > { %s8100_s0 = sld [smem:[#allocation47_spill]]  ;;  %p4439_p7 = scmp.ne.s32.totalorder %s5243_s30, 0 }
  0x12   : > { %s8235_s10 = smov (!%p507_p5, %s5247_s10), 2  ;;  %s8101_s8 = sld [smem:[#allocation48_spill]] }
  0x13   : > { %s515_s16 = scalar_select %p514_p6, %s5243_s30, 2 }
  0x14   : > { %s4713_s17 = smul.u32 192, %s8235_s10  ;;  %s4437_s18 = sshll.u32 %s8235_s10, 1 }
  0x15   : > { %s4714_s19 = smul.u32 3, %s8235_s10  ;;  %s4434_s20 = sshll.u32 %s515_s16, 2 }
  0x16   : > { %s4715_s24 = smul.u32 12, %s8235_s10 }
  0x17   : > { %s5352_s23 = scalar_lea.vmem %s8100_s0, %s4713_s17  ;;  %s5354_s25 = sadd.s32 %s4714_s19, %s515_s16 }
  0x18   : > { %s5359_s28 = scalar_lea.vmem %s8101_s8, %s4437_s18  ;;  %s5362_s29 = sshll.u32 %s5354_s25, 2 }
  0x19   : > { %s542_s21 = sadd.s32 %s4715_s24, %s4434_s20  ;;  %s535_s14 = scalar_lea.vmem %s8006_s3, %s5362_s29 }
  0x1a   : > { %s4435_s18 = sshll.u32 %s542_s21, 2  ;;  %s4436_s13 = sshll.u32 %s5354_s25, 3 }
  0x1b   : > { %s5379_s11 = scalar_lea.vmem %s8007_s4, %s4435_s18  ;;  %s5385_s0 = scalar_lea.vmem %s8008_s5, %s4436_s13 }
  0x1c   : > { %s559_s16 = scalar_lea.vmem %s8009_s6, %s5354_s25  ;;  %s566_s15 = scalar_lea.vmem %s8010_s7, %s5354_s25 }
  0x1d   : > { %s5398_s8 = scalar_lea.vmem %s8012_s9, %s4713_s17  ;;  %580 = sbr.rel (%p4439_p7) target bundleno = 47 (0x2f), region = 60 }
  0x22   : > { %v581_v0 = vld [vmem:[%s5352_s23] sm:$0xff]  ;;  %vm605_vm0 = vcmask 64512   ;;  %v582_v1 = vld [vmem:[%s5352_s23 + $0x8] sm:$0xff]  ;;  %v583_v2 = vld [vmem:[%s5352_s23 + $0x10] sm:$0xff] }
  0x23   : > { %606 = vst.msk [vmem:[#allocation2] sm:$0xff] %vm605_vm0, %v581_v0  ;;  %607 = vst.msk [vmem:[#allocation2 + $0x8] sm:$0xff] %vm605_vm0, %v582_v1  ;;  %v584_v3 = vld [vmem:[%s5352_s23 + $0x18] sm:$0xff]  ;;  %v585_v4 = vld [vmem:[%s5352_s23 + $0x20] sm:$0xff] }
  0x24   : > { %608 = vst.msk [vmem:[#allocation2 + $0x10] sm:$0xff] %vm605_vm0, %v583_v2  ;;  %v586_v5 = vld [vmem:[%s5352_s23 + $0x28] sm:$0xff]  ;;  %609 = vst.msk [vmem:[#allocation2 + $0x18] sm:$0xff] %vm605_vm0, %v584_v3  ;;  %v587_v6 = vld [vmem:[%s5352_s23 + $0x30] sm:$0xff] }
  0x25   : > { %610 = vst.msk [vmem:[#allocation2 + $0x20] sm:$0xff] %vm605_vm0, %v585_v4  ;;  %611 = vst.msk [vmem:[#allocation2 + $0x28] sm:$0xff] %vm605_vm0, %v586_v5  ;;  %v588_v7 = vld [vmem:[%s5352_s23 + $0x38] sm:$0xff]  ;;  %v589_v8 = vld [vmem:[%s5352_s23 + $0x40] sm:$0xff] }
  0x26   : > { %612 = vst.msk [vmem:[#allocation2 + $0x30] sm:$0xff] %vm605_vm0, %v587_v6  ;;  %613 = vst.msk [vmem:[#allocation2 + $0x38] sm:$0xff] %vm605_vm0, %v588_v7  ;;  %v590_v9 = vld [vmem:[%s5352_s23 + $0x48] sm:$0xff]  ;;  %v591_v10 = vld [vmem:[%s5352_s23 + $0x50] sm:$0xff] }
  0x27   : > { %614 = vst.msk [vmem:[#allocation2 + $0x40] sm:$0xff] %vm605_vm0, %v589_v8  ;;  %v592_v11 = vld [vmem:[%s5352_s23 + $0x58] sm:$0xff]  ;;  %615 = vst.msk [vmem:[#allocation2 + $0x48] sm:$0xff] %vm605_vm0, %v590_v9  ;;  %v593_v12 = vld [vmem:[%s5352_s23 + $0x60] sm:$0xff] }
  0x28   : > { %616 = vst.msk [vmem:[#allocation2 + $0x50] sm:$0xff] %vm605_vm0, %v591_v10  ;;  %617 = vst.msk [vmem:[#allocation2 + $0x58] sm:$0xff] %vm605_vm0, %v592_v11  ;;  %v594_v13 = vld [vmem:[%s5352_s23 + $0x68] sm:$0xff]  ;;  %v595_v14 = vld [vmem:[%s5352_s23 + $0x70] sm:$0xff] }
  0x29   : > { %618 = vst.msk [vmem:[#allocation2 + $0x60] sm:$0xff] %vm605_vm0, %v593_v12  ;;  %619 = vst.msk [vmem:[#allocation2 + $0x68] sm:$0xff] %vm605_vm0, %v594_v13  ;;  %v596_v15 = vld [vmem:[%s5352_s23 + $0x78] sm:$0xff]  ;;  %v597_v16 = vld [vmem:[%s5352_s23 + $0x80] sm:$0xff] }
  0x2a   : > { %620 = vst.msk [vmem:[#allocation2 + $0x70] sm:$0xff] %vm605_vm0, %v595_v14  ;;  %v598_v17 = vld [vmem:[%s5352_s23 + $0x88] sm:$0xff]  ;;  %621 = vst.msk [vmem:[#allocation2 + $0x78] sm:$0xff] %vm605_vm0, %v596_v15  ;;  %v599_v18 = vld [vmem:[%s5352_s23 + $0x90] sm:$0xff] }
  0x2b   : > { %622 = vst.msk [vmem:[#allocation2 + $0x80] sm:$0xff] %vm605_vm0, %v597_v16  ;;  %623 = vst.msk [vmem:[#allocation2 + $0x88] sm:$0xff] %vm605_vm0, %v598_v17  ;;  %v600_v19 = vld [vmem:[%s5352_s23 + $0x98] sm:$0xff]  ;;  %v601_v20 = vld [vmem:[%s5352_s23 + $0xa0] sm:$0xff] }
  0x2c   : > { %624 = vst.msk [vmem:[#allocation2 + $0x90] sm:$0xff] %vm605_vm0, %v599_v18  ;;  %625 = vst.msk [vmem:[#allocation2 + $0x98] sm:$0xff] %vm605_vm0, %v600_v19  ;;  %v602_v21 = vld [vmem:[%s5352_s23 + $0xa8] sm:$0xff]  ;;  %v603_v22 = vld [vmem:[%s5352_s23 + $0xb0] sm:$0xff] }
  0x2d   : > { %626 = vst.msk [vmem:[#allocation2 + $0xa0] sm:$0xff] %vm605_vm0, %v601_v20  ;;  %v604_v23 = vld [vmem:[%s5352_s23 + $0xb8] sm:$0xff]  ;;  %627 = vst.msk [vmem:[#allocation2 + $0xa8] sm:$0xff] %vm605_vm0, %v602_v21 }
  0x2e   : > { %628 = vst.msk [vmem:[#allocation2 + $0xb0] sm:$0xff] %vm605_vm0, %v603_v22  ;;  %629 = vst.msk [vmem:[#allocation2 + $0xb8] sm:$0xff] %vm605_vm0, %v604_v23 }
  0x2f PF: > { %v5449_v24 = vld [vmem:[#allocation2] sm:$0xff]  ;;  %vm655_vm1 = vcmask 64512   ;;  %v5453_v26 = vld [vmem:[#allocation2 + $0x8] sm:$0xff]  ;;  %v5465_v32 = vld [vmem:[#allocation2 + $0x10] sm:$0xff]  ;;  %s8102_s17 = scalar_lea.vmem %s8004_s1, %s5362_s29  ;;  %vm1081_vm2 = vcmask 1043456   ;;  %s5261_s26 = smov 120  }
  0x30   : > { %v5451_v25 = vld [vmem:[#allocation2 + $0x60] sm:$0xff]  ;;  %v656_v27 = vsel %vm655_vm1, %v5449_v24, 0.0  ;;  %v5459_v29 = vld [vmem:[#allocation2 + $0x68] sm:$0xff]  ;;  %v659_v30 = vsel %vm655_vm1, %v5453_v26, 0.0  ;;  %v5467_v33 = vld [vmem:[#allocation2 + $0x18] sm:$0xff]  ;;  %v662_v34 = vsel %vm655_vm1, %v5465_v32, 0.0 }
  0x31   : > { %v692_v28 = vsel %vm655_vm1, %v5451_v25, 0.0  ;;  %657 = vadd.xlane.f32.xlu0 %v656_v27  ;;  %v695_v31 = vsel %vm655_vm1, %v5459_v29, 0.0  ;;  %v665_v35 = vsel %vm655_vm1, %v5467_v33, 0.0  ;;  %v5473_v36 = vld [vmem:[#allocation2 + $0x70] sm:$0xff]  ;;  %v5475_v37 = vld [vmem:[#allocation2 + $0x78] sm:$0xff]  ;;  %v5481_v40 = vld [vmem:[#allocation2 + $0x20] sm:$0xff] }
  0x32   : > { %693 = vadd.xlane.f32.xlu1 %v692_v28  ;;  %v698_v38 = vsel %vm655_vm1, %v5473_v36, 0.0  ;;  %v701_v39 = vsel %vm655_vm1, %v5475_v37, 0.0  ;;  %v5483_v41 = vld [vmem:[#allocation2 + $0x28] sm:$0xff]  ;;  %v668_v42 = vsel %vm655_vm1, %v5481_v40, 0.0  ;;  %v5489_v44 = vld [vmem:[#allocation2 + $0x80] sm:$0xff]  ;;  %v5497_v48 = vld [vmem:[#allocation2 + $0x30] sm:$0xff] }
  0x33   : > { %v671_v43 = vsel %vm655_vm1, %v5483_v41, 0.0  ;;  %v5491_v45 = vld [vmem:[#allocation2 + $0x88] sm:$0xff]  ;;  %v704_v46 = vsel %vm655_vm1, %v5489_v44, 0.0  ;;  %v5499_v49 = vld [vmem:[#allocation2 + $0x38] sm:$0xff]  ;;  %v674_v50 = vsel %vm655_vm1, %v5497_v48, 0.0  ;;  %v5505_v52 = vld [vmem:[#allocation2 + $0x90] sm:$0xff] }
  0x34   : > { %v707_v47 = vsel %vm655_vm1, %v5491_v45, 0.0  ;;  %v677_v51 = vsel %vm655_vm1, %v5499_v49, 0.0  ;;  %v5507_v53 = vld [vmem:[#allocation2 + $0x98] sm:$0xff]  ;;  %v710_v54 = vsel %vm655_vm1, %v5505_v52, 0.0  ;;  %v5513_v56 = vld [vmem:[#allocation2 + $0x40] sm:$0xff]  ;;  %v5515_v57 = vld [vmem:[#allocation2 + $0x48] sm:$0xff] }
  0x35   : > { %660 = vadd.xlane.f32.xlu0 %v659_v30  ;;  %v713_v55 = vsel %vm655_vm1, %v5507_v53, 0.0  ;;  %v680_v58 = vsel %vm655_vm1, %v5513_v56, 0.0  ;;  %v683_v59 = vsel %vm655_vm1, %v5515_v57, 0.0  ;;  %v5521_v60 = vld [vmem:[#allocation2 + $0xa0] sm:$0xff]  ;;  %v5523_v61 = vld [vmem:[#allocation2 + $0xa8] sm:$0xff]  ;;  %v5529_v0 = vld [vmem:[#allocation2 + $0x50] sm:$0xff] }
  0x36   : > { %696 = vadd.xlane.f32.xlu1 %v695_v31  ;;  %v716_v62 = vsel %vm655_vm1, %v5521_v60, 0.0  ;;  %v719_v63 = vsel %vm655_vm1, %v5523_v61, 0.0  ;;  %v5531_v1 = vld [vmem:[#allocation2 + $0x58] sm:$0xff]  ;;  %v686_v2 = vsel %vm655_vm1, %v5529_v0, 0.0  ;;  %v5537_v4 = vld [vmem:[#allocation2 + $0xb0] sm:$0xff]  ;;  %s5262_s18 = smov 124  }
  0x37   : > { %v689_v3 = vsel %vm655_vm1, %v5531_v1, 0.0  ;;  %v5539_v5 = vld [vmem:[#allocation2 + $0xb8] sm:$0xff]  ;;  %v722_v6 = vsel %vm655_vm1, %v5537_v4, 0.0  ;;  %vm1311_vm3 = vcmask 31744   ;;  %s5263_s20 = smov 112   ;;  %vm2588_vm4 = vcmask 1041408  }
  0x38   : > { %v725_v7 = vsel %vm655_vm1, %v5539_v5, 0.0  ;;  %s5264_s19 = smov 108   ;;  %vm3585_vm5 = vcmask 261120   ;;  %p4505_p8 = scmp.ne.s32.totalorder %s5243_s30, 2 }
  0x39   : > { %663 = vadd.xlane.f32.xlu0 %v662_v34 }
  0x3a   : > { %666 = vadd.xlane.f32.xlu1 %v665_v35 }
  0x3d   : > { %699 = vadd.xlane.f32.xlu0 %v698_v38 }
  0x3e   : > { %702 = vadd.xlane.f32.xlu1 %v701_v39 }
  0x41   : > { %669 = vadd.xlane.f32.xlu0 %v668_v42 }
  0x42   : > { %672 = vadd.xlane.f32.xlu1 %v671_v43 }
  0x45   : > { %705 = vadd.xlane.f32.xlu0 %v704_v46 }
  0x46   : > { %708 = vadd.xlane.f32.xlu1 %v707_v47 }
  0x49   : > { %675 = vadd.xlane.f32.xlu0 %v674_v50 }
  0x4a   : > { %678 = vadd.xlane.f32.xlu1 %v677_v51 }
  0x4d   : > { %711 = vadd.xlane.f32.xlu0 %v710_v54 }
  0x4e   : > { %714 = vadd.xlane.f32.xlu1 %v713_v55 }
  0x51   : > { %681 = vadd.xlane.f32.xlu0 %v680_v58 }
  0x52   : > { %684 = vadd.xlane.f32.xlu1 %v683_v59 }
  0x55   : > { %717 = vadd.xlane.f32.xlu0 %v716_v62 }
  0x56   : > { %720 = vadd.xlane.f32.xlu1 %v719_v63 }
  0x59   : > { %687 = vadd.xlane.f32.xlu0 %v686_v2 }
  0x5a   : > { %690 = vadd.xlane.f32.xlu1 %v689_v3 }
  0x5d   : > { %723 = vadd.xlane.f32.xlu0 %v722_v6 }
  0x5e   : > { %726 = vadd.xlane.f32.xlu1 %v725_v7 }
  0xba   : > { %v658_v8 = vpop.xlane.xlu0 %657 }
  0xbb   : > { %v694_v9 = vpop.xlane.xlu1 %693  ;;  %v729_v10 = vmul.f32 0.125, %v658_v8 }
  0xbc   : > { %v741_v11 = vmul.f32 0.125, %v694_v9 }
  0xbd   : > { %v5546_v12 = vsub.f32 %v5449_v24, %v729_v10 }
  0xbe   : > { %v5549_v13 = vsub.f32 %v5451_v25, %v741_v11  ;;  %v661_v14 = vpop.xlane.xlu0 %660 }
  0xbf   : > { %v697_v15 = vpop.xlane.xlu1 %696  ;;  %v730_v16 = vmul.f32 0.125, %v661_v14  ;;  %v777_v18 = vmul.f32 %v5546_v12, %v5546_v12 }
  0xc0   : > { %v742_v17 = vmul.f32 0.125, %v697_v15  ;;  %v789_v19 = vmul.f32 %v5549_v13, %v5549_v13 }
  0xc1   : > { %v5556_v20 = vsub.f32 %v5453_v26, %v730_v16  ;;  %v801_v22 = vsel %vm655_vm1, %v777_v18, 0.0 }
  0xc2   : > { %v5559_v21 = vsub.f32 %v5459_v29, %v742_v17  ;;  %802 = vadd.xlane.f32.xlu0 %v801_v22  ;;  %v664_v23 = vpop.xlane.xlu0 %663  ;;  %v837_v25 = vsel %vm655_vm1, %v789_v19, 0.0 }
  0xc3   : > { %v667_v24 = vpop.xlane.xlu1 %666  ;;  %v731_v27 = vmul.f32 0.125, %v664_v23  ;;  %v778_v30 = vmul.f32 %v5556_v20, %v5556_v20 }
  0xc4   : > { %v732_v28 = vmul.f32 0.125, %v667_v24  ;;  %v790_v31 = vmul.f32 %v5559_v21, %v5559_v21 }
  0xc5   : > { %v5568_v26 = vsub.f32 %v5465_v32, %v731_v27  ;;  %v804_v34 = vsel %vm655_vm1, %v778_v30, 0.0 }
  0xc6   : > { %v5571_v29 = vsub.f32 %v5467_v33, %v732_v28  ;;  %838 = vadd.xlane.f32.xlu0 %v837_v25  ;;  %805 = vadd.xlane.f32.xlu1 %v804_v34  ;;  %v700_v35 = vpop.xlane.xlu0 %699  ;;  %v840_v39 = vsel %vm655_vm1, %v790_v31, 0.0 }
  0xc7   : > { %v703_v38 = vpop.xlane.xlu1 %702  ;;  %v743_v42 = vmul.f32 0.125, %v700_v35  ;;  %v779_v46 = vmul.f32 %v5568_v26, %v5568_v26 }
  0xc8   : > { %v744_v43 = vmul.f32 0.125, %v703_v38  ;;  %v780_v32 = vmul.f32 %v5571_v29, %v5571_v29 }
  0xc9   : > { %v5580_v47 = vsub.f32 %v5473_v36, %v743_v42  ;;  %v807_v50 = vsel %vm655_vm1, %v779_v46, 0.0 }
  0xca   : > { %v5583_v33 = vsub.f32 %v5475_v37, %v744_v43  ;;  %841 = vadd.xlane.f32.xlu1 %v840_v39  ;;  %808 = vadd.xlane.f32.xlu0 %v807_v50  ;;  %v670_v51 = vpop.xlane.xlu0 %669  ;;  %v810_v55 = vsel %vm655_vm1, %v780_v32, 0.0 }
  0xcb   : > { %v673_v54 = vpop.xlane.xlu1 %672  ;;  %v733_v58 = vmul.f32 0.125, %v670_v51  ;;  %v791_v62 = vmul.f32 %v5580_v47, %v5580_v47 }
  0xcc   : > { %v734_v59 = vmul.f32 0.125, %v673_v54  ;;  %v792_v36 = vmul.f32 %v5583_v33, %v5583_v33 }
  0xcd   : > { %v5592_v63 = vsub.f32 %v5481_v40, %v733_v58  ;;  %v843_v2 = vsel %vm655_vm1, %v791_v62, 0.0 }
  0xce   : > { %v5595_v37 = vsub.f32 %v5483_v41, %v734_v59  ;;  %811 = vadd.xlane.f32.xlu1 %v810_v55  ;;  %844 = vadd.xlane.f32.xlu0 %v843_v2  ;;  %v706_v3 = vpop.xlane.xlu0 %705  ;;  %v846_v7 = vsel %vm655_vm1, %v792_v36, 0.0 }
  0xcf   : > { %v709_v6 = vpop.xlane.xlu1 %708  ;;  %v745_v8 = vmul.f32 0.125, %v706_v3  ;;  %v781_v10 = vmul.f32 %v5592_v63, %v5592_v63 }
  0xd0   : > { %v746_v9 = vmul.f32 0.125, %v709_v6  ;;  %v782_v40 = vmul.f32 %v5595_v37, %v5595_v37 }
  0xd1   : > { %v5604_v11 = vsub.f32 %v5489_v44, %v745_v8  ;;  %v813_v14 = vsel %vm655_vm1, %v781_v10, 0.0 }
  0xd2   : > { %v5607_v41 = vsub.f32 %v5491_v45, %v746_v9  ;;  %847 = vadd.xlane.f32.xlu1 %v846_v7  ;;  %814 = vadd.xlane.f32.xlu0 %v813_v14  ;;  %v676_v15 = vpop.xlane.xlu0 %675  ;;  %v816_v17 = vsel %vm655_vm1, %v782_v40, 0.0 }
  0xd3   : > { %v679_v16 = vpop.xlane.xlu1 %678  ;;  %v735_v18 = vmul.f32 0.125, %v676_v15  ;;  %v793_v22 = vmul.f32 %v5604_v11, %v5604_v11 }
  0xd4   : > { %v736_v19 = vmul.f32 0.125, %v679_v16  ;;  %v794_v44 = vmul.f32 %v5607_v41, %v5607_v41 }
  0xd5   : > { %v5616_v23 = vsub.f32 %v5497_v48, %v735_v18  ;;  %v849_v24 = vsel %vm655_vm1, %v793_v22, 0.0 }
  0xd6   : > { %v5619_v45 = vsub.f32 %v5499_v49, %v736_v19  ;;  %817 = vadd.xlane.f32.xlu1 %v816_v17  ;;  %850 = vadd.xlane.f32.xlu0 %v849_v24  ;;  %v712_v25 = vpop.xlane.xlu0 %711  ;;  %v852_v28 = vsel %vm655_vm1, %v794_v44, 0.0 }
  0xd7   : > { %v715_v27 = vpop.xlane.xlu1 %714  ;;  %v747_v30 = vmul.f32 0.125, %v712_v25  ;;  %v783_v34 = vmul.f32 %v5616_v23, %v5616_v23 }
  0xd8   : > { %v748_v31 = vmul.f32 0.125, %v715_v27  ;;  %v784_v48 = vmul.f32 %v5619_v45, %v5619_v45 }
  0xd9   : > { %v5628_v35 = vsub.f32 %v5505_v52, %v747_v30  ;;  %v819_v38 = vsel %vm655_vm1, %v783_v34, 0.0 }
  0xda   : > { %v5631_v49 = vsub.f32 %v5507_v53, %v748_v31  ;;  %853 = vadd.xlane.f32.xlu1 %v852_v28  ;;  %820 = vadd.xlane.f32.xlu0 %v819_v38  ;;  %v682_v39 = vpop.xlane.xlu0 %681  ;;  %v822_v43 = vsel %vm655_vm1, %v784_v48, 0.0 }
  0xdb   : > { %v685_v42 = vpop.xlane.xlu1 %684  ;;  %v737_v46 = vmul.f32 0.125, %v682_v39  ;;  %v795_v50 = vmul.f32 %v5628_v35, %v5628_v35 }
  0xdc   : > { %v738_v32 = vmul.f32 0.125, %v685_v42  ;;  %v796_v52 = vmul.f32 %v5631_v49, %v5631_v49 }
  0xdd   : > { %v5640_v51 = vsub.f32 %v5513_v56, %v737_v46  ;;  %v855_v54 = vsel %vm655_vm1, %v795_v50, 0.0 }
  0xde   : > { %v5643_v53 = vsub.f32 %v5515_v57, %v738_v32  ;;  %823 = vadd.xlane.f32.xlu1 %v822_v43  ;;  %856 = vadd.xlane.f32.xlu0 %v855_v54  ;;  %v718_v55 = vpop.xlane.xlu0 %717  ;;  %v858_v59 = vsel %vm655_vm1, %v796_v52, 0.0  ;;  %v969_v52 = vlaneseq }
  0xdf   : > { %v721_v58 = vpop.xlane.xlu1 %720  ;;  %v749_v62 = vmul.f32 0.125, %v718_v55  ;;  %v785_v2 = vmul.f32 %v5640_v51, %v5640_v51 }
  0xe0   : > { %v750_v36 = vmul.f32 0.125, %v721_v58  ;;  %v786_v56 = vmul.f32 %v5643_v53, %v5643_v53 }
  0xe1   : > { %v5652_v3 = vsub.f32 %v5521_v60, %v749_v62  ;;  %v825_v6 = vsel %vm655_vm1, %v785_v2, 0.0  ;;  %v5697_v2 = vshrl.u32 %v969_v52, 7 }
  0xe2   : > { %v5655_v57 = vsub.f32 %v5523_v61, %v750_v36  ;;  %859 = vadd.xlane.f32.xlu1 %v858_v59  ;;  %826 = vadd.xlane.f32.xlu0 %v825_v6  ;;  %v688_v7 = vpop.xlane.xlu0 %687  ;;  %v828_v9 = vsel %vm655_vm1, %v786_v56, 0.0 }
  0xe3   : > { %v691_v8 = vpop.xlane.xlu1 %690  ;;  %v739_v10 = vmul.f32 0.125, %v688_v7  ;;  %v797_v14 = vmul.f32 %v5652_v3, %v5652_v3  ;;  %8103 = vst [vmem:[#allocation8_spill] sm:$0xff] %v5697_v2 }
  0xe4   : > { %v740_v40 = vmul.f32 0.125, %v691_v8  ;;  %v798_v60 = vmul.f32 %v5655_v57, %v5655_v57 }
  0xe5   : > { %v5664_v15 = vsub.f32 %v5529_v0, %v739_v10  ;;  %v861_v16 = vsel %vm655_vm1, %v797_v14, 0.0 }
  0xe6   : > { %v5667_v61 = vsub.f32 %v5531_v1, %v740_v40  ;;  %829 = vadd.xlane.f32.xlu1 %v828_v9  ;;  %862 = vadd.xlane.f32.xlu0 %v861_v16  ;;  %v724_v17 = vpop.xlane.xlu0 %723  ;;  %v864_v19 = vsel %vm655_vm1, %v798_v60, 0.0  ;;  %v8017_v40 = vsub.s32 0, %v5697_v2  ;;  %v654_v16 = vld [vmem:[%s5385_s0] sm:$0xff] }
  0xe7   : > { %v727_v18 = vpop.xlane.xlu1 %726  ;;  %v751_v22 = vmul.f32 0.125, %v724_v17  ;;  %v787_v24 = vmul.f32 %v5664_v15, %v5664_v15 }
  0xe8   : > { %v752_v44 = vmul.f32 0.125, %v727_v18  ;;  %v788_v0 = vmul.f32 %v5667_v61, %v5667_v61 }
  0xe9   : > { %v5676_v1 = vsub.f32 %v5537_v4, %v751_v22  ;;  %v831_v27 = vsel %vm655_vm1, %v787_v24, 0.0  ;;  %v1025_v4 = vld [vmem:[%s8102_s17] sm:$0xf]  ;;  %v5703_v24 = vrot.slane %v654_v16, %v8017_v40 }
  0xea   : > { %v5679_v25 = vsub.f32 %v5539_v5, %v752_v44  ;;  %865 = vadd.xlane.f32.xlu1 %v864_v19  ;;  %832 = vadd.xlane.f32.xlu0 %v831_v27  ;;  %v834_v28 = vsel %vm655_vm1, %v788_v0, 0.0  ;;  %v1083_v48 = vsel %vm1081_vm2, %v1025_v4, 0  ;;  %v8016_v0 = vsub.s32 1, %v5697_v2 }
  0xeb   : > { %v799_v30 = vmul.f32 %v5676_v1, %v5676_v1  ;;  %4708 = vmatprep.subr.msk.bf16.mxu0 %vm1081_vm2, %v1025_v4  ;;  %4709 = vmatprep.subr.msk.bf16.mxu1 %vm1081_vm2, %v1025_v4 }
  0xec   : > { %v800_v31 = vmul.f32 %v5679_v25, %v5679_v25  ;;  %4575 = vmatpush3.bf16.msra.mxu0 %v1083_v48  ;;  %4707 = vmatpush3.bf16.msra.mxu1 %v1083_v48 }
  0xed   : > { %v867_v34 = vsel %vm655_vm1, %v799_v30, 0.0 }
  0xee   : > { %835 = vadd.xlane.f32.xlu1 %v834_v28  ;;  %868 = vadd.xlane.f32.xlu0 %v867_v34  ;;  %v870_v5 = vsel %vm655_vm1, %v800_v31, 0.0 }
  0xf2   : > { %871 = vadd.xlane.f32.xlu1 %v870_v5 }
 0x14b   : > { %v803_v38 = vpop.xlane.xlu0 %802 }
 0x14c   : > { %v873_v39 = vmul.f32 0.125, %v803_v38 }
 0x14e   : > { %v897_v42 = vadd.f32 1e-05, %v873_v39  ;;  %v5710_v39 = vrot.slane %v654_v16, %v8016_v0 }
 0x14f   : > { %v806_v43 = vpop.xlane.xlu1 %805  ;;  %v839_v46 = vpop.xlane.xlu0 %838 }
 0x150   : > { %4763 = vrsqrt.f32 %v897_v42  ;;  %v874_v32 = vmul.f32 0.125, %v806_v43  ;;  %v885_v50 = vmul.f32 0.125, %v839_v46 }
 0x152   : > { %v898_v54 = vadd.f32 1e-05, %v874_v32  ;;  %v909_v55 = vadd.f32 1e-05, %v885_v50 }
 0x153   : > { %v842_v58 = vpop.xlane.xlu1 %841  ;;  %v809_v59 = vpop.xlane.xlu0 %808 }
 0x154   : > { %4765 = vrsqrt.f32 %v898_v54  ;;  %v886_v62 = vmul.f32 0.125, %v842_v58  ;;  %v875_v36 = vmul.f32 0.125, %v809_v59 }
 0x155   : > { %4767 = vrsqrt.f32 %v909_v55 }
 0x156   : > { %v910_v56 = vadd.f32 1e-05, %v886_v62  ;;  %v899_v6 = vadd.f32 1e-05, %v875_v36 }
 0x157   : > { %v812_v7 = vpop.xlane.xlu1 %811  ;;  %v845_v8 = vpop.xlane.xlu0 %844 }
 0x158   : > { %4769 = vrsqrt.f32 %v910_v56  ;;  %v876_v9 = vmul.f32 0.125, %v812_v7  ;;  %v887_v10 = vmul.f32 0.125, %v845_v8 }
 0x159   : > { %4771 = vrsqrt.f32 %v899_v6 }
 0x15a   : > { %v900_v14 = vadd.f32 1e-05, %v876_v9  ;;  %v911_v60 = vadd.f32 1e-05, %v887_v10 }
 0x15b   : > { %v848_v17 = vpop.xlane.xlu1 %847  ;;  %v815_v18 = vpop.xlane.xlu0 %814 }
 0x15c   : > { %4773 = vrsqrt.f32 %v900_v14  ;;  %v888_v19 = vmul.f32 0.125, %v848_v17  ;;  %v877_v22 = vmul.f32 0.125, %v815_v18 }
 0x15d   : > { %v4764_v44 = vpop.eup %4763  ;;  %4775 = vrsqrt.f32 %v911_v60 }
 0x15e   : > { %v912_v27 = vadd.f32 1e-05, %v888_v19  ;;  %v901_v28 = vadd.f32 1e-05, %v877_v22  ;;  %v945_v30 = vmul.f32 %v4764_v44, %v5546_v12 }
 0x15f   : > { %v818_v31 = vpop.xlane.xlu1 %817  ;;  %v851_v34 = vpop.xlane.xlu0 %850 }
 0x160   : > { %4777 = vrsqrt.f32 %v912_v27  ;;  %v878_v4 = vmul.f32 0.125, %v818_v31  ;;  %v889_v5 = vmul.f32 0.125, %v851_v34  ;;  %v973_v38 = vmul.f32 %v5703_v24, %v945_v30 }
 0x161   : > { %v4766_v48 = vpop.eup %4765  ;;  %4779 = vrsqrt.f32 %v901_v28 }
 0x162   : > { %v4768_v42 = vpop.eup %4767  ;;  %v902_v43 = vadd.f32 1e-05, %v878_v4  ;;  %v913_v46 = vadd.f32 1e-05, %v889_v5  ;;  %v946_v32 = vmul.f32 %v4766_v48, %v5556_v20  ;;  %v1001_v62 = vadd.f32 %v5710_v39, %v973_v38 }
 0x163   : > { %v854_v50 = vpop.xlane.xlu1 %853  ;;  %v821_v12 = vpop.xlane.xlu0 %820  ;;  %v957_v52 = vmul.f32 %v4768_v42, %v5549_v13 }
 0x164   : > { %4781 = vrsqrt.f32 %v902_v43  ;;  %v890_v54 = vmul.f32 0.125, %v854_v50  ;;  %v879_v55 = vmul.f32 0.125, %v821_v12  ;;  %v974_v58 = vmul.f32 %v5703_v24, %v946_v32 }
 0x165   : > { %v4770_v59 = vpop.eup %4769  ;;  %4783 = vrsqrt.f32 %v913_v46  ;;  %v985_v13 = vmul.f32 %v5703_v24, %v957_v52 }
 0x166   : > { %v4772_v36 = vpop.eup %4771  ;;  %v914_v56 = vadd.f32 1e-05, %v890_v54  ;;  %v903_v6 = vadd.f32 1e-05, %v879_v55  ;;  %v1002_v7 = vadd.f32 %v5710_v39, %v974_v58  ;;  %v958_v20 = vmul.f32 %v4770_v59, %v5559_v21 }
 0x167   : > { %v824_v8 = vpop.xlane.xlu1 %823  ;;  %v857_v9 = vpop.xlane.xlu0 %856  ;;  %v947_v10 = vmul.f32 %v4772_v36, %v5568_v26  ;;  %v1013_v26 = vadd.f32 %v5710_v39, %v985_v13 }
 0x168   : > { %4785 = vrsqrt.f32 %v914_v56  ;;  %v880_v14 = vmul.f32 0.125, %v824_v8  ;;  %v891_v60 = vmul.f32 0.125, %v857_v9  ;;  %v1026_v16 = vpack.c.bf16 %v1002_v7, %v1001_v62 }
 0x169   : > { %v4774_v17 = vpop.eup %4773  ;;  %4787 = vrsqrt.f32 %v903_v6  ;;  %v986_v18 = vmul.f32 %v5703_v24, %v958_v20  ;;  %v975_v19 = vmul.f32 %v5703_v24, %v947_v10 }
 0x16a   : > { %v4776_v22 = vpop.eup %4775  ;;  %v904_v44 = vadd.f32 1e-05, %v880_v14  ;;  %v915_v27 = vadd.f32 1e-05, %v891_v60  ;;  %4576 = vmatprep.mubr.msk.bf16.mxu0 %vm655_vm1, %v1026_v16  ;;  %v948_v21 = vmul.f32 %v4774_v17, %v5571_v29 }
 0x16b   : > { %v860_v28 = vpop.xlane.xlu1 %859  ;;  %v827_v30 = vpop.xlane.xlu0 %826  ;;  %v1014_v31 = vadd.f32 %v5710_v39, %v986_v18  ;;  %v959_v34 = vmul.f32 %v4776_v22, %v5580_v47  ;;  %v1003_v43 = vadd.f32 %v5710_v39, %v975_v19 }
 0x16c   : > { %4789 = vrsqrt.f32 %v904_v44  ;;  %v892_v4 = vmul.f32 0.125, %v860_v28  ;;  %v881_v5 = vmul.f32 0.125, %v827_v30  ;;  %v976_v48 = vmul.f32 %v5703_v24, %v948_v21 }
 0x16d   : > { %v4778_v38 = vpop.eup %4777  ;;  %4791 = vrsqrt.f32 %v915_v27  ;;  %v1032_v42 = vpack.c.bf16 %v1014_v31, %v1013_v26  ;;  %v987_v54 = vmul.f32 %v5703_v24, %v959_v34 }
 0x16e   : > { %v4780_v46 = vpop.eup %4779  ;;  %v916_v29 = vadd.f32 1e-05, %v892_v4  ;;  %v905_v32 = vadd.f32 1e-05, %v881_v5  ;;  %v1004_v50 = vadd.f32 %v5710_v39, %v976_v48  ;;  %v960_v12 = vmul.f32 %v4778_v38, %v5583_v33 }
 0x16f   : > { %4588 = vmatprep.mubr.msk.bf16.mxu1 %vm655_vm1, %v1032_v42  ;;  %v830_v47 = vpop.xlane.xlu1 %829  ;;  %v863_v52 = vpop.xlane.xlu0 %862  ;;  %v949_v55 = vmul.f32 %v4780_v46, %v5592_v63  ;;  %v1015_v63 = vadd.f32 %v5710_v39, %v987_v54 }
 0x170   : > { %4793 = vrsqrt.f32 %v916_v29  ;;  %v882_v58 = vmul.f32 0.125, %v830_v47  ;;  %v893_v59 = vmul.f32 0.125, %v863_v52  ;;  %v1027_v62 = vpack.c.bf16 %v1004_v50, %v1003_v43 }
 0x171   : > { %v4782_v36 = vpop.eup %4781  ;;  %4795 = vrsqrt.f32 %v905_v32  ;;  %v988_v56 = vmul.f32 %v5703_v24, %v960_v12  ;;  %v977_v6 = vmul.f32 %v5703_v24, %v949_v55 }
 0x172   : > { %v4784_v7 = vpop.eup %4783  ;;  %v906_v33 = vadd.f32 1e-05, %v882_v58  ;;  %v917_v20 = vadd.f32 1e-05, %v893_v59  ;;  %4577 = vmatmul.mubr.msk.bf16.vlgmr.msra.gmra.mxu0 %vm655_vm1, %v1027_v62  ;;  %v950_v8 = vmul.f32 %v4782_v36, %v5595_v37 }
 0x173   : > { %v866_v9 = vpop.xlane.xlu1 %865  ;;  %v833_v13 = vpop.xlane.xlu0 %832  ;;  %v1016_v10 = vadd.f32 %v5710_v39, %v988_v56  ;;  %v961_v14 = vmul.f32 %v4784_v7, %v5604_v11  ;;  %v1005_v22 = vadd.f32 %v5710_v39, %v977_v6 }
 0x174   : > { %4797 = vrsqrt.f32 %v906_v33  ;;  %v894_v60 = vmul.f32 0.125, %v866_v9  ;;  %v883_v16 = vmul.f32 0.125, %v833_v13  ;;  %v978_v17 = vmul.f32 %v5703_v24, %v950_v8 }
 0x175   : > { %v4786_v18 = vpop.eup %4785  ;;  %4799 = vrsqrt.f32 %v917_v20  ;;  %v1033_v19 = vpack.c.bf16 %v1016_v10, %v1015_v63  ;;  %v989_v26 = vmul.f32 %v5703_v24, %v961_v14 }
 0x176   : > { %v4788_v44 = vpop.eup %4787  ;;  %v918_v37 = vadd.f32 1e-05, %v894_v60  ;;  %v907_v27 = vadd.f32 1e-05, %v883_v16  ;;  %v1006_v21 = vadd.f32 %v5710_v39, %v978_v17  ;;  %v962_v28 = vmul.f32 %v4786_v18, %v5607_v41 }
 0x177   : > { %4589 = vmatmul.mubr.msk.bf16.vlgmr.msra.gmra.mxu1 %vm655_vm1, %v1033_v19  ;;  %v836_v11 = vpop.xlane.xlu1 %835  ;;  %v869_v30 = vpop.xlane.xlu0 %868  ;;  %v951_v31 = vmul.f32 %v4788_v44, %v5616_v23  ;;  %v1017_v23 = vadd.f32 %v5710_v39, %v989_v26 }
 0x178   : > { %4801 = vrsqrt.f32 %v918_v37  ;;  %v884_v34 = vmul.f32 0.125, %v836_v11  ;;  %v895_v4 = vmul.f32 0.125, %v869_v30  ;;  %v1028_v5 = vpack.c.bf16 %v1006_v21, %v1005_v22 }
 0x179   : > { %v4790_v48 = vpop.eup %4789  ;;  %4803 = vrsqrt.f32 %v907_v27  ;;  %v990_v38 = vmul.f32 %v5703_v24, %v962_v28  ;;  %v979_v42 = vmul.f32 %v5703_v24, %v951_v31 }
 0x17a   : > { %v4792_v43 = vpop.eup %4791  ;;  %v908_v41 = vadd.f32 1e-05, %v884_v34  ;;  %v919_v46 = vadd.f32 1e-05, %v895_v4  ;;  %4580 = vmatprep.mubr.msk.bf16.mxu0 %vm655_vm1, %v1028_v5  ;;  %v952_v29 = vmul.f32 %v4790_v48, %v5619_v45 }
 0x17b   : > { %v872_v32 = vpop.xlane.xlu1 %871  ;;  %v1018_v50 = vadd.f32 %v5710_v39, %v990_v38  ;;  %v963_v12 = vmul.f32 %v4792_v43, %v5628_v35  ;;  %v1007_v58 = vadd.f32 %v5710_v39, %v979_v42  ;;  %v5799_v43 = vld [vmem:[%s559_s16] ss:$0 sm:$0xff]  ;;  %s8163_s16 = scalar_lea.vmem %s8005_s2, %s5362_s29 }
 0x17c   : > { %4805 = vrsqrt.f32 %v908_v41  ;;  %v896_v47 = vmul.f32 0.125, %v872_v32  ;;  %v980_v52 = vmul.f32 %v5703_v24, %v952_v29 }
 0x17d   : > { %v4794_v54 = vpop.eup %4793  ;;  %4807 = vrsqrt.f32 %v919_v46  ;;  %v1034_v55 = vpack.c.bf16 %v1018_v50, %v1017_v23  ;;  %v991_v56 = vmul.f32 %v5703_v24, %v963_v12 }
 0x17e   : > { %v4796_v59 = vpop.eup %4795  ;;  %v920_v62 = vadd.f32 1e-05, %v896_v47  ;;  %v1008_v45 = vadd.f32 %v5710_v39, %v980_v52  ;;  %v964_v36 = vmul.f32 %v4794_v54, %v5631_v49 }
 0x17f   : > { %4592 = vmatprep.mubr.msk.bf16.mxu1 %vm655_vm1, %v1034_v55  ;;  %v953_v35 = vmul.f32 %v4796_v59, %v5640_v51  ;;  %v1019_v8 = vadd.f32 %v5710_v39, %v991_v56 }
 0x180   : > { %4809 = vrsqrt.f32 %v920_v62  ;;  %v1029_v6 = vpack.c.bf16 %v1008_v45, %v1007_v58  ;;  %v992_v7 = vmul.f32 %v5703_v24, %v964_v36 }
 0x181   : > { %v4798_v33 = vpop.eup %4797  ;;  %v981_v13 = vmul.f32 %v5703_v24, %v953_v35 }
 0x182   : > { %v4800_v20 = vpop.eup %4799  ;;  %4581 = vmatmul.mubr.msk.bf16.gmra.mxu0 %vm655_vm1, %v1029_v6  ;;  %v1020_v9 = vadd.f32 %v5710_v39, %v992_v7  ;;  %v954_v49 = vmul.f32 %v4798_v33, %v5643_v53 }
 0x183   : > { %v965_v63 = vmul.f32 %v4800_v20, %v5652_v3  ;;  %v1009_v16 = vadd.f32 %v5710_v39, %v981_v13 }
 0x184   : > { %v1035_v10 = vpack.c.bf16 %v1020_v9, %v1019_v8  ;;  %v982_v51 = vmul.f32 %v5703_v24, %v954_v49 }
 0x185   : > { %v4802_v14 = vpop.eup %4801  ;;  %v993_v19 = vmul.f32 %v5703_v24, %v965_v63 }
 0x186   : > { %v4804_v60 = vpop.eup %4803  ;;  %4593 = vmatmul.mubr.msk.bf16.gmra.mxu1 %vm655_vm1, %v1035_v10  ;;  %v1010_v17 = vadd.f32 %v5710_v39, %v982_v51  ;;  %v966_v18 = vmul.f32 %v4802_v14, %v5655_v57 }
 0x187   : > { %v955_v53 = vmul.f32 %v4804_v60, %v5664_v15  ;;  %v1021_v27 = vadd.f32 %v5710_v39, %v993_v19 }
 0x188   : > { %v1030_v22 = vpack.c.bf16 %v1010_v17, %v1009_v16  ;;  %v994_v3 = vmul.f32 %v5703_v24, %v966_v18 }
 0x189   : > { %v4806_v44 = vpop.eup %4805  ;;  %v983_v11 = vmul.f32 %v5703_v24, %v955_v53 }
 0x18a   : > { %v4808_v37 = vpop.eup %4807  ;;  %4584 = vmatprep.mubr.msk.bf16.mxu0 %vm655_vm1, %v1030_v22  ;;  %v1022_v21 = vadd.f32 %v5710_v39, %v994_v3  ;;  %v956_v28 = vmul.f32 %v4806_v44, %v5667_v61 }
 0x18b   : > { %v967_v57 = vmul.f32 %v4808_v37, %v5676_v1  ;;  %v1011_v31 = vadd.f32 %v5710_v39, %v983_v11 }
 0x18c   : > { %v1036_v30 = vpack.c.bf16 %v1022_v21, %v1021_v27  ;;  %v984_v15 = vmul.f32 %v5703_v24, %v956_v28 }
 0x18d   : > { %v4810_v26 = vpop.eup %4809  ;;  %v995_v5 = vmul.f32 %v5703_v24, %v967_v57 }
 0x18e   : > { %4596 = vmatprep.mubr.msk.bf16.mxu1 %vm655_vm1, %v1036_v30  ;;  %v1012_v34 = vadd.f32 %v5710_v39, %v984_v15  ;;  %v968_v4 = vmul.f32 %v4810_v26, %v5679_v25 }
 0x18f   : > { %v1023_v1 = vadd.f32 %v5710_v39, %v995_v5 }
 0x190   : > { %v1031_v61 = vpack.c.bf16 %v1012_v34, %v1011_v31  ;;  %v996_v48 = vmul.f32 %v5703_v24, %v968_v4 }
 0x192   : > { %4585 = vmatmul.mubr.msk.bf16.gmra.mxu0 %vm655_vm1, %v1031_v61  ;;  %v1024_v38 = vadd.f32 %v5710_v39, %v996_v48 }
 0x194   : > { %v1037_v42 = vpack.c.bf16 %v1024_v38, %v1023_v1 }
 0x196   : > { %4597 = vmatmul.mubr.msk.bf16.gmra.mxu1 %vm655_vm1, %v1037_v42 }
 0x232   : > { %v4578_v25 = vpop.f32.mrf.mxu0 }
 0x233   : > { %v5802_v41 = vadd.f32 %v4578_v25, %v5799_v43 }
 0x234   : > { %v1119_v24 = vpop.f32.mrf.mxu0 }
 0x235   : > { %8104 = vst [vmem:[#allocation9_spill] sm:$0xff] %v5802_v41  ;;  %1255 = vrot.lane.b32.xlu0 %v5802_v41, %s5261_s26  ;;  %v5815_v50 = vadd.f32 %v5799_v43, %v1119_v24  ;;  %v1216_v30 = vmul.f32 0.5, %v5802_v41 }
 0x236   : > { %v4579_v23 = vpop.f32.mrf.mxu0 }
 0x237   : > { %v4590_v46 = vpop.f32.mrf.mxu1  ;;  %8107 = vst [vmem:[#allocation12_spill] sm:$0xff] %v5815_v50  ;;  %v5820_v12 = vadd.f32 %v4579_v23, %v5799_v43 }
 0x238   : > { %v5807_v39 = vadd.f32 %v4590_v46, %v5799_v43  ;;  %v1122_v52 = vpop.f32.mrf.mxu0 }
 0x239   : > { %v1167_v29 = vpop.f32.mrf.mxu1  ;;  %8108 = vst [vmem:[#allocation13_spill] sm:$0xff] %v5820_v12  ;;  %v5837_v62 = vadd.f32 %v5799_v43, %v1122_v52  ;;  %v1217_v48 = vmul.f32 0.5, %v5820_v12 }
 0x23a   : > { %8105 = vst [vmem:[#allocation10_spill] sm:$0xff] %v5807_v39  ;;  %v5810_v32 = vadd.f32 %v5799_v43, %v1167_v29  ;;  %1400 = vrot.lane.b32.xlu0 %v5807_v39, %s5261_s26  ;;  %v1228_v5 = vmul.f32 0.5, %v5807_v39 }
 0x23b   : > { %v4591_v47 = vpop.f32.mrf.mxu1 }
 0x23c   : > { %8106 = vst [vmem:[#allocation11_spill] sm:$0xff] %v5810_v32  ;;  %1396 = vrot.lane.b32.xlu1 %v5810_v32, %s5261_s26  ;;  %v5827_v54 = vadd.f32 %v4591_v47, %v5799_v43 }
 0x23d   : > { %v1170_v59 = vpop.f32.mrf.mxu1 }
 0x23e   : > { %1251 = vrot.lane.b32.xlu0 %v5815_v50, %s5261_s26  ;;  %8109 = vst [vmem:[#allocation14_spill] sm:$0xff] %v5827_v54  ;;  %v5847_v35 = vadd.f32 %v5799_v43, %v1170_v59  ;;  %v1229_v24 = vmul.f32 0.5, %v5827_v54 }
 0x240   : > { %1257 = vrot.lane.b32.xlu1 %v5820_v12, %s5261_s26  ;;  %8112 = vst [vmem:[#allocation17_spill] sm:$0xff] %v5847_v35 }
 0x242   : > { %v4582_v55 = vpop.f32.mrf.mxu0 }
 0x243   : > { %v5830_v58 = vadd.f32 %v4582_v55, %v5799_v43 }
 0x244   : > { %1402 = vrot.lane.b32.xlu1 %v5827_v54, %s5261_s26  ;;  %v1135_v36 = vpop.f32.mrf.mxu0 }
 0x245   : > { %8110 = vst [vmem:[#allocation15_spill] sm:$0xff] %v5830_v58  ;;  %1263 = vrot.lane.b32.xlu0 %v5830_v58, %s5261_s26  ;;  %v5850_v6 = vadd.f32 %v5799_v43, %v1135_v36 }
 0x246   : > { %v4594_v45 = vpop.f32.mrf.mxu1  ;;  %v4583_v7 = vpop.f32.mrf.mxu0 }
 0x247   : > { %v5840_v56 = vadd.f32 %v4594_v45, %v5799_v43  ;;  %8113 = vst [vmem:[#allocation18_spill] sm:$0xff] %v5850_v6  ;;  %v5857_v20 = vadd.f32 %v4583_v7, %v5799_v43 }
 0x248   : > { %1253 = vrot.lane.b32.xlu1 %v5837_v62, %s5261_s26  ;;  %v1183_v33 = vpop.f32.mrf.mxu1  ;;  %v1138_v49 = vpop.f32.mrf.mxu0 }
 0x249   : > { %8111 = vst [vmem:[#allocation16_spill] sm:$0xff] %v5840_v56  ;;  %1408 = vrot.lane.b32.xlu0 %v5840_v56, %s5261_s26  ;;  %8114 = vst [vmem:[#allocation19_spill] sm:$0xff] %v5857_v20  ;;  %v5860_v8 = vadd.f32 %v5799_v43, %v1183_v33  ;;  %v5877_v14 = vadd.f32 %v5799_v43, %v1138_v49 }
 0x24a   : > { %v4595_v9 = vpop.f32.mrf.mxu1 }
 0x24b   : > { %8115 = vst [vmem:[#allocation20_spill] sm:$0xff] %v5860_v8  ;;  %v5867_v13 = vadd.f32 %v4595_v9, %v5799_v43  ;;  %8118 = vst [vmem:[#allocation23_spill] sm:$0xff] %v5877_v14  ;;  %v1214_v9 = vmul.f32 0.5, %v5815_v50 }
 0x24c   : > { %1398 = vrot.lane.b32.xlu1 %v5847_v35, %s5261_s26  ;;  %v1186_v51 = vpop.f32.mrf.mxu1 }
 0x24d   : > { %1259 = vrot.lane.b32.xlu0 %v5850_v6, %s5261_s26  ;;  %8116 = vst [vmem:[#allocation21_spill] sm:$0xff] %v5867_v13  ;;  %v5887_v18 = vadd.f32 %v5799_v43, %v1186_v51 }
 0x24f   : > { %8120 = vst [vmem:[#allocation25_spill] sm:$0xff] %v5887_v18 }
 0x250   : > { %1265 = vrot.lane.b32.xlu1 %v5857_v20, %s5261_s26 }
 0x251   : > { %1404 = vrot.lane.b32.xlu0 %v5860_v8, %s5261_s26 }
 0x252   : > { %v4586_v63 = vpop.f32.mrf.mxu0 }
 0x253   : > { %v5870_v10 = vadd.f32 %v4586_v63, %v5799_v43 }
 0x254   : > { %1410 = vrot.lane.b32.xlu1 %v5867_v13, %s5261_s26  ;;  %v1151_v16 = vpop.f32.mrf.mxu0 }
 0x255   : > { %8117 = vst [vmem:[#allocation22_spill] sm:$0xff] %v5870_v10  ;;  %1271 = vrot.lane.b32.xlu0 %v5870_v10, %s5261_s26  ;;  %v5890_v19 = vadd.f32 %v5799_v43, %v1151_v16 }
 0x256   : > { %v4598_v60 = vpop.f32.mrf.mxu1  ;;  %v4587_v53 = vpop.f32.mrf.mxu0 }
 0x257   : > { %v5880_v17 = vadd.f32 %v4598_v60, %v5799_v43  ;;  %8121 = vst [vmem:[#allocation26_spill] sm:$0xff] %v5890_v19  ;;  %v5897_v3 = vadd.f32 %v4587_v53, %v5799_v43  ;;  %v1226_v60 = vmul.f32 0.5, %v5810_v32  ;;  %v1215_v53 = vmul.f32 0.5, %v5837_v62 }
 0x258   : > { %1261 = vrot.lane.b32.xlu1 %v5877_v14, %s5261_s26  ;;  %v1199_v22 = vpop.f32.mrf.mxu1  ;;  %v1154_v21 = vpop.f32.mrf.mxu0 }
 0x259   : > { %8119 = vst [vmem:[#allocation24_spill] sm:$0xff] %v5880_v17  ;;  %1416 = vrot.lane.b32.xlu0 %v5880_v17, %s5261_s26  ;;  %8122 = vst [vmem:[#allocation27_spill] sm:$0xff] %v5897_v3  ;;  %v5900_v44 = vadd.f32 %v5799_v43, %v1199_v22  ;;  %v5912_v28 = vadd.f32 %v5799_v43, %v1154_v21 }
 0x25a   : > { %v4599_v37 = vpop.f32.mrf.mxu1 }
 0x25b   : > { %8123 = vst [vmem:[#allocation28_spill] sm:$0xff] %v5900_v44  ;;  %v5907_v27 = vadd.f32 %v4599_v37, %v5799_v43  ;;  %8125 = vst [vmem:[#allocation30_spill] sm:$0xff] %v5912_v28 }
 0x25c   : > { %1406 = vrot.lane.b32.xlu1 %v5887_v18, %s5261_s26  ;;  %v1202_v11 = vpop.f32.mrf.mxu1 }
 0x25d   : > { %1267 = vrot.lane.b32.xlu0 %v5890_v19, %s5261_s26  ;;  %8124 = vst [vmem:[#allocation29_spill] sm:$0xff] %v5907_v27  ;;  %v5917_v57 = vadd.f32 %v5799_v43, %v1202_v11 }
 0x25f   : > { %8126 = vst [vmem:[#allocation31_spill] sm:$0xff] %v5917_v57 }
 0x260   : > { %1273 = vrot.lane.b32.xlu1 %v5897_v3, %s5261_s26 }
 0x261   : > { %1412 = vrot.lane.b32.xlu0 %v5900_v44, %s5261_s26 }
 0x264   : > { %1418 = vrot.lane.b32.xlu1 %v5907_v27, %s5261_s26 }
 0x268   : > { %1269 = vrot.lane.b32.xlu1 %v5912_v28, %s5261_s26 }
 0x26c   : > { %1414 = vrot.lane.b32.xlu1 %v5917_v57, %s5261_s26 }
 0x2a7   : > { %v1256_v15 = vpop.permute.xlu0 %1255 }
 0x2a8   : > { %v1289_v26 = vmul.f32 %v1256_v15, %v1216_v30  ;;  %v1301_v61 = vmul.f32 %v1256_v15, %v1228_v5 }
 0x2aa   : > { %1880 = vrot.lane.b32.xlu0 %v1289_v26, %s5262_s18  ;;  %v1318_v23 = vsel %vm1311_vm3, %v1289_v26, 0.0  ;;  %v1354_v52 = vsel %vm1311_vm3, %v1301_v61, 0.0 }
 0x2ac   : > { %v1401_v31 = vpop.permute.xlu0 %1400 }
 0x2ad   : > { %v1434_v34 = vmul.f32 %v1401_v31, %v1216_v30  ;;  %v1446_v42 = vmul.f32 %v1401_v31, %v1228_v5  ;;  %v1227_v30 = vmul.f32 0.5, %v5847_v35 }
 0x2ae   : > { %v1397_v4 = vpop.permute.xlu1 %1396 }
 0x2af   : > { %2048 = vrot.lane.b32.xlu0 %v1434_v34, %s5262_s18  ;;  %v1462_v47 = vsel %vm1311_vm3, %v1434_v34, 0.0  ;;  %v1498_v55 = vsel %vm1311_vm3, %v1446_v42, 0.0  ;;  %v1432_v63 = vmul.f32 %v1397_v4, %v1214_v9  ;;  %v1444_v21 = vmul.f32 %v1397_v4, %v1226_v60 }
 0x2b0   : > { %v1252_v33 = vpop.permute.xlu0 %1251 }
 0x2b1   : > { %v1287_v49 = vmul.f32 %v1252_v33, %v1214_v9  ;;  %v1299_v16 = vmul.f32 %v1252_v33, %v1226_v60  ;;  %v1456_v34 = vsel %vm1311_vm3, %v1432_v63, 0.0  ;;  %v1492_v5 = vsel %vm1311_vm3, %v1444_v21, 0.0 }
 0x2b2   : > { %v1258_v1 = vpop.permute.xlu1 %1257 }
 0x2b3   : > { %v1290_v38 = vmul.f32 %v1258_v1, %v1217_v48  ;;  %1904 = vrot.lane.b32.xlu0 %v1301_v61, %s5262_s18  ;;  %v1302_v46 = vmul.f32 %v1258_v1, %v1229_v24  ;;  %v1312_v31 = vsel %vm1311_vm3, %v1287_v49, 0.0  ;;  %v1348_v4 = vsel %vm1311_vm3, %v1299_v16, 0.0 }
 0x2b5   : > { %1882 = vrot.lane.b32.xlu1 %v1290_v38, %s5262_s18  ;;  %v1321_v59 = vsel %vm1311_vm3, %v1290_v38, 0.0  ;;  %v1357_v36 = vsel %vm1311_vm3, %v1302_v46, 0.0 }
 0x2b6   : > { %v1403_v43 = vpop.permute.xlu1 %1402 }
 0x2b7   : > { %v1435_v25 = vmul.f32 %v1403_v43, %v1217_v48  ;;  %2072 = vrot.lane.b32.xlu0 %v1446_v42, %s5262_s18  ;;  %v1447_v29 = vmul.f32 %v1403_v43, %v1229_v24  ;;  %v1264_v42 = vpop.permute.xlu0 %1263 }
 0x2b9   : > { %2050 = vrot.lane.b32.xlu1 %v1435_v25, %s5262_s18  ;;  %v1465_v45 = vsel %vm1311_vm3, %v1435_v25, 0.0  ;;  %v1501_v7 = vsel %vm1311_vm3, %v1447_v29, 0.0  ;;  %v1220_v25 = vmul.f32 0.5, %v5830_v58 }
 0x2ba   : > { %v1254_v51 = vpop.permute.xlu1 %1253 }
 0x2bb   : > { %v1288_v22 = vmul.f32 %v1254_v51, %v1215_v53  ;;  %v1300_v15 = vmul.f32 %v1254_v51, %v1227_v30  ;;  %v1293_v24 = vmul.f32 %v1264_v42, %v1220_v25 }
 0x2bd   : > { %1906 = vrot.lane.b32.xlu1 %v1302_v46, %s5262_s18  ;;  %v1315_v61 = vsel %vm1311_vm3, %v1288_v22, 0.0  ;;  %v1351_v1 = vsel %vm1311_vm3, %v1300_v15, 0.0  ;;  %v1221_v46 = vmul.f32 0.5, %v5857_v20  ;;  %v1235_v20 = vmul.f32 0.5, %v5917_v57 }
 0x2be   : > { %v1399_v37 = vpop.permute.xlu1 %1398 }
 0x2bf   : > { %v1433_v11 = vmul.f32 %v1399_v37, %v1215_v53  ;;  %v1445_v26 = vmul.f32 %v1399_v37, %v1227_v30  ;;  %v1218_v30 = vmul.f32 0.5, %v5850_v6 }
 0x2c1   : > { %2074 = vrot.lane.b32.xlu1 %v1447_v29, %s5262_s18  ;;  %v1459_v48 = vsel %vm1311_vm3, %v1433_v11, 0.0  ;;  %v1495_v38 = vsel %vm1311_vm3, %v1445_v26, 0.0  ;;  %v1409_v29 = vpop.permute.xlu0 %1408 }
 0x2c2   : > { %v1266_v43 = vpop.permute.xlu1 %1265 }
 0x2d6   : > { %1319 = vadd.xlane.f32.xlu0 %v1318_v23  ;;  %v1294_v23 = vmul.f32 %v1266_v43, %v1221_v46 }
 0x2d8   : > { %v1333_v51 = vsel %vm1311_vm3, %v1294_v23, 0.0 }
 0x2da   : > { %1463 = vadd.xlane.f32.xlu0 %v1462_v47  ;;  %v1411_v47 = vpop.permute.xlu1 %1410 }
 0x2de   : > { %1355 = vadd.xlane.f32.xlu0 %v1354_v52  ;;  %v1438_v52 = vmul.f32 %v1409_v29, %v1220_v25 }
 0x2e2   : > { %1499 = vadd.xlane.f32.xlu0 %v1498_v55  ;;  %v1232_v55 = vmul.f32 0.5, %v5840_v56 }
 0x2e4   : > { %v1450_v33 = vmul.f32 %v1409_v29, %v1232_v55 }
 0x2e5   : > { %1322 = vadd.xlane.f32.xlu1 %v1321_v59  ;;  %v1439_v59 = vmul.f32 %v1411_v47, %v1221_v46 }
 0x2e6   : > { %v1510_v53 = vsel %vm1311_vm3, %v1450_v33, 0.0 }
 0x2e9   : > { %1466 = vadd.xlane.f32.xlu1 %v1465_v45  ;;  %v1305_v45 = vmul.f32 %v1264_v42, %v1232_v55 }
 0x2eb   : > { %v1366_v60 = vsel %vm1311_vm3, %v1305_v45, 0.0 }
 0x2ed   : > { %1358 = vadd.xlane.f32.xlu1 %v1357_v36  ;;  %v1233_v36 = vmul.f32 0.5, %v5867_v13 }
 0x2ef   : > { %v1451_v9 = vmul.f32 %v1411_v47, %v1233_v36 }
 0x2f1   : > { %1502 = vadd.xlane.f32.xlu1 %v1501_v7  ;;  %v1306_v7 = vmul.f32 %v1266_v43, %v1233_v36  ;;  %v1513_v37 = vsel %vm1311_vm3, %v1451_v9, 0.0 }
 0x2f8   : > { %1876 = vrot.lane.b32.xlu0 %v1287_v49, %s5262_s18  ;;  %v1330_v49 = vsel %vm1311_vm3, %v1293_v24, 0.0 }
 0x2fc   : > { %2044 = vrot.lane.b32.xlu0 %v1432_v63, %s5262_s18  ;;  %v1474_v63 = vsel %vm1311_vm3, %v1438_v52, 0.0 }
 0x300   : > { %1900 = vrot.lane.b32.xlu0 %v1299_v16, %s5262_s18  ;;  %v1477_v16 = vsel %vm1311_vm3, %v1439_v59, 0.0 }
 0x302   : > { %1878 = vrot.lane.b32.xlu1 %v1288_v22, %s5262_s18  ;;  %v1369_v22 = vsel %vm1311_vm3, %v1306_v7, 0.0 }
 0x304   : > { %2068 = vrot.lane.b32.xlu0 %v1444_v21, %s5262_s18  ;;  %v1260_v21 = vpop.permute.xlu0 %1259 }
 0x306   : > { %2046 = vrot.lane.b32.xlu1 %v1433_v11, %s5262_s18  ;;  %v1262_v11 = vpop.permute.xlu1 %1261 }
 0x30a   : > { %1902 = vrot.lane.b32.xlu1 %v1300_v15, %s5262_s18  ;;  %v1291_v15 = vmul.f32 %v1260_v21, %v1218_v30 }
 0x30e   : > { %2070 = vrot.lane.b32.xlu1 %v1445_v26, %s5262_s18  ;;  %v1219_v26 = vmul.f32 0.5, %v5877_v14 }
 0x323   : > { %1313 = vadd.xlane.f32.xlu0 %v1312_v31  ;;  %v1405_v31 = vpop.permute.xlu0 %1404 }
 0x327   : > { %1457 = vadd.xlane.f32.xlu0 %v1456_v34  ;;  %v1292_v34 = vmul.f32 %v1262_v11, %v1219_v26 }
 0x329   : > { %v1327_v36 = vsel %vm1311_vm3, %v1292_v34, 0.0 }
 0x32b   : > { %1349 = vadd.xlane.f32.xlu0 %v1348_v4  ;;  %v1407_v4 = vpop.permute.xlu1 %1406 }
 0x32f   : > { %1493 = vadd.xlane.f32.xlu0 %v1492_v5  ;;  %v1436_v5 = vmul.f32 %v1405_v31, %v1218_v30  ;;  %v1274_v47 = vpop.permute.xlu1 %1273  ;;  %v1224_v30 = vmul.f32 0.5, %v5870_v10 }
 0x332   : > { %1316 = vadd.xlane.f32.xlu1 %v1315_v61  ;;  %v1230_v61 = vmul.f32 0.5, %v5860_v8 }
 0x333   : > { %1460 = vadd.xlane.f32.xlu0 %v1459_v48  ;;  %v1437_v48 = vmul.f32 %v1407_v4, %v1219_v26 }
 0x334   : > { %v1448_v43 = vmul.f32 %v1405_v31, %v1230_v61  ;;  %v1225_v31 = vmul.f32 0.5, %v5897_v3 }
 0x336   : > { %1352 = vadd.xlane.f32.xlu1 %v1351_v1  ;;  %v1303_v1 = vmul.f32 %v1260_v21, %v1230_v61 }
 0x33a   : > { %1496 = vadd.xlane.f32.xlu1 %v1495_v38  ;;  %v1231_v38 = vmul.f32 0.5, %v5887_v18 }
 0x33c   : > { %v1304_v42 = vmul.f32 %v1262_v11, %v1231_v38  ;;  %v1449_v25 = vmul.f32 %v1407_v4, %v1231_v38  ;;  %v1298_v4 = vmul.f32 %v1274_v47, %v1225_v31 }
 0x349   : > { %1888 = vrot.lane.b32.xlu0 %v1293_v24, %s5262_s18  ;;  %v1272_v24 = vpop.permute.xlu0 %1271 }
 0x34a   : > { %v1297_v26 = vmul.f32 %v1272_v24, %v1224_v30 }
 0x34b   : > { %1890 = vrot.lane.b32.xlu1 %v1294_v23, %s5262_s18 }
 0x34d   : > { %2056 = vrot.lane.b32.xlu0 %v1438_v52, %s5262_s18  ;;  %v1417_v46 = vpop.permute.xlu0 %1416  ;;  %v1324_v52 = vsel %vm1311_vm3, %v1291_v15, 0.0 }
 0x34f   : > { %2058 = vrot.lane.b32.xlu1 %v1439_v59, %s5262_s18  ;;  %v1468_v59 = vsel %vm1311_vm3, %v1436_v5, 0.0 }
 0x351   : > { %1912 = vrot.lane.b32.xlu0 %v1305_v45, %s5262_s18  ;;  %v5993_v29 = vpop.permute.xlu0 %1267  ;;  %v1419_v45 = vpop.permute.xlu1 %1418 }
 0x353   : > { %1914 = vrot.lane.b32.xlu1 %v1306_v7, %s5262_s18  ;;  %v1360_v7 = vsel %vm1311_vm3, %v1303_v1, 0.0 }
 0x355   : > { %2080 = vrot.lane.b32.xlu0 %v1450_v33, %s5262_s18  ;;  %v5995_v23 = vpop.permute.xlu0 %1412 }
 0x357   : > { %2082 = vrot.lane.b32.xlu1 %v1451_v9, %s5262_s18  ;;  %v1471_v9 = vsel %vm1311_vm3, %v1437_v48, 0.0 }
 0x359   : > { %v5998_v55 = vpop.permute.xlu0 %1880 }
 0x35d   : > { %v6003_v33 = vpop.permute.xlu0 %2048 }
 0x374   : > { %1331 = vadd.xlane.f32.xlu0 %v1330_v49  ;;  %v6006_v49 = vpop.permute.xlu1 %1269 }
 0x378   : > { %1475 = vadd.xlane.f32.xlu0 %v1474_v63  ;;  %v1504_v63 = vsel %vm1311_vm3, %v1448_v43, 0.0 }
 0x37b   : > { %1334 = vadd.xlane.f32.xlu1 %v1333_v51  ;;  %v6009_v51 = vpop.permute.xlu0 %1904 }
 0x37c   : > { %1367 = vadd.xlane.f32.xlu0 %v1366_v60  ;;  %v1363_v60 = vsel %vm1311_vm3, %v1304_v42, 0.0 }
 0x37f   : > { %1478 = vadd.xlane.f32.xlu1 %v1477_v16  ;;  %v6012_v16 = vpop.permute.xlu1 %1414 }
 0x380   : > { %1511 = vadd.xlane.f32.xlu0 %v1510_v53  ;;  %v1507_v53 = vsel %vm1311_vm3, %v1449_v25, 0.0  ;;  %v6131_v58 = vmul.f32 %v6012_v16, %v1235_v20 }
 0x383   : > { %1370 = vadd.xlane.f32.xlu1 %v1369_v22  ;;  %v6015_v22 = vpop.permute.xlu0 %2072 }
 0x387   : > { %1514 = vadd.xlane.f32.xlu1 %v1513_v37  ;;  %v6017_v37 = vpop.permute.xlu1 %1882  ;;  %v6019_v21 = vpop.xlane.xlu0 %1319 }
 0x38b   : > { %v6021_v11 = vpop.permute.xlu1 %2050 }
 0x396   : > { %1884 = vrot.lane.b32.xlu0 %v1291_v15, %s5262_s18  ;;  %v6024_v15 = vpop.xlane.xlu0 %1463 }
 0x398   : > { %1886 = vrot.lane.b32.xlu1 %v1292_v34, %s5262_s18  ;;  %v6027_v34 = vpop.permute.xlu1 %1906 }
 0x39a   : > { %2052 = vrot.lane.b32.xlu0 %v1436_v5, %s5262_s18  ;;  %v1442_v5 = vmul.f32 %v1417_v46, %v1224_v30  ;;  %v6030_v61 = vpop.xlane.xlu0 %1355 }
 0x39c   : > { %2054 = vrot.lane.b32.xlu1 %v1437_v48, %s5262_s18  ;;  %v1236_v48 = vmul.f32 0.5, %v5880_v17  ;;  %v6035_v38 = vpop.permute.xlu1 %2074  ;;  %v1486_v40 = vsel %vm1311_vm3, %v1442_v5, 0.0 }
 0x39e   : > { %1908 = vrot.lane.b32.xlu0 %v1303_v1, %s5262_s18  ;;  %v1443_v1 = vmul.f32 %v1419_v45, %v1225_v31 }
 0x3a0   : > { %1910 = vrot.lane.b32.xlu1 %v1304_v42, %s5262_s18  ;;  %v6037_v42 = vmul.f32 %v1272_v24, %v1236_v48  ;;  %v1489_v17 = vsel %vm1311_vm3, %v1443_v1, 0.0 }
 0x3a2   : > { %2076 = vrot.lane.b32.xlu0 %v1448_v43, %s5262_s18  ;;  %v1237_v43 = vmul.f32 0.5, %v5907_v27  ;;  %v1345_v27 = vsel %vm1311_vm3, %v1298_v4, 0.0 }
 0x3a4   : > { %2078 = vrot.lane.b32.xlu1 %v1449_v25, %s5262_s18  ;;  %v6041_v25 = vmul.f32 %v1274_v47, %v1237_v43  ;;  %v6053_v24 = vmul.f32 %v1419_v45, %v1237_v43  ;;  %v1342_v43 = vsel %vm1311_vm3, %v1297_v26, 0.0 }
 0x3c1   : > { %1325 = vadd.xlane.f32.xlu0 %v1324_v52  ;;  %v6043_v52 = vpop.xlane.xlu0 %1499 }
 0x3c5   : > { %1469 = vadd.xlane.f32.xlu0 %v1468_v59  ;;  %v6047_v59 = vpop.xlane.xlu1 %1322 }
 0x3c8   : > { %1328 = vadd.xlane.f32.xlu1 %v1327_v36  ;;  %v6049_v36 = vmul.f32 %v1417_v46, %v1236_v48 }
 0x3c9   : > { %1361 = vadd.xlane.f32.xlu0 %v1360_v7  ;;  %v6057_v7 = vpop.permute.xlu0 %1876  ;;  %v6061_v47 = vpop.xlane.xlu1 %1466 }
 0x3cc   : > { %1472 = vadd.xlane.f32.xlu1 %v1471_v9 }
 0x3cd   : > { %1505 = vadd.xlane.f32.xlu0 %v1504_v63  ;;  %v6063_v9 = vpop.permute.xlu0 %2044  ;;  %v6065_v63 = vpop.xlane.xlu1 %1358 }
 0x3d0   : > { %1364 = vadd.xlane.f32.xlu1 %v1363_v60 }
 0x3d1   : > { %v6067_v46 = vpop.permute.xlu0 %1900  ;;  %v6069_v60 = vpop.xlane.xlu1 %1502 }
 0x3d4   : > { %1508 = vadd.xlane.f32.xlu1 %v1507_v53 }
 0x3d5   : > { %v6071_v45 = vpop.permute.xlu0 %2068  ;;  %v6073_v53 = vpop.permute.xlu1 %1878 }
 0x3d9   : > { %v6075_v30 = vpop.xlane.xlu0 %1313  ;;  %v6077_v31 = vpop.permute.xlu1 %2046 }
 0x3dd   : > { %v6079_v48 = vpop.xlane.xlu0 %1457  ;;  %v6082_v0 = vpop.permute.xlu1 %1902 }
 0x3e1   : > { %v6085_v2 = vpop.xlane.xlu0 %1349  ;;  %v6088_v3 = vpop.permute.xlu1 %2070 }
 0x3e3   : > { %1896 = vrot.lane.b32.xlu0 %v1297_v26, %s5262_s18 }
 0x3e5   : > { %1898 = vrot.lane.b32.xlu1 %v1298_v4, %s5262_s18  ;;  %v6091_v10 = vpop.xlane.xlu0 %1493  ;;  %v6093_v8 = vpop.xlane.xlu1 %1316 }
 0x3e7   : > { %2064 = vrot.lane.b32.xlu0 %v1442_v5, %s5262_s18 }
 0x3e9   : > { %2066 = vrot.lane.b32.xlu1 %v1443_v1, %s5262_s18  ;;  %v6095_v26 = vpop.xlane.xlu0 %1460 }
 0x3eb   : > { %1920 = vrot.lane.b32.xlu0 %v6037_v42, %s5262_s18 }
 0x3ed   : > { %1922 = vrot.lane.b32.xlu1 %v6041_v25, %s5262_s18  ;;  %v6100_v5 = vpop.permute.xlu0 %1888 }
 0x3ef   : > { %2088 = vrot.lane.b32.xlu0 %v6049_v36, %s5262_s18 }
 0x3f1   : > { %2090 = vrot.lane.b32.xlu1 %v6053_v24, %s5262_s18  ;;  %v6110_v18 = vpop.permute.xlu0 %2056 }
 0x3f5   : > { %v6122_v56 = vpop.permute.xlu0 %1912 }
 0x40e   : > { %1343 = vadd.xlane.f32.xlu0 %v1342_v43  ;;  %v6097_v43 = vpop.xlane.xlu1 %1352 }
 0x412   : > { %1487 = vadd.xlane.f32.xlu0 %v1486_v40  ;;  %v1222_v40 = vmul.f32 0.5, %v5890_v19  ;;  %v6104_v6 = vpop.xlane.xlu1 %1496  ;;  %v1234_v19 = vmul.f32 0.5, %v5900_v44 }
 0x414   : > { %v1295_v4 = vmul.f32 %v5993_v29, %v1222_v40  ;;  %v6125_v44 = vmul.f32 %v5995_v23, %v1234_v19 }
 0x415   : > { %1346 = vadd.xlane.f32.xlu1 %v1345_v27  ;;  %v1223_v27 = vmul.f32 0.5, %v5912_v28  ;;  %v1307_v28 = vmul.f32 %v5993_v29, %v1234_v19  ;;  %v6137_v29 = vpop.permute.xlu0 %2080 }
 0x416   : > { %v6114_v13 = vpop.permute.xlu1 %1890  ;;  %v1336_v41 = vsel %vm1311_vm3, %v1295_v4, 0.0 }
 0x417   : > { %v1296_v1 = vmul.f32 %v6006_v49, %v1223_v27  ;;  %v1441_v14 = vmul.f32 %v6012_v16, %v1223_v27 }
 0x419   : > { %1490 = vadd.xlane.f32.xlu1 %v1489_v17  ;;  %v1440_v17 = vmul.f32 %v5995_v23, %v1222_v40  ;;  %v1308_v40 = vmul.f32 %v6006_v49, %v1235_v20  ;;  %v6141_v57 = vpop.xlane.xlu0 %1331 }
 0x41a   : > { %v6127_v27 = vpop.permute.xlu1 %2058  ;;  %8127 = vst [vmem:[#allocation32_spill] sm:$0xff] %v6141_v57 }
 0x41b   : > { %v1480_v57 = vsel %vm1311_vm3, %v1440_v17, 0.0 }
 0x41d   : > { %v6145_v23 = vpop.xlane.xlu0 %1475 }
 0x41e   : > { %v6139_v49 = vpop.permute.xlu1 %1914  ;;  %8128 = vst [vmem:[#allocation33_spill] sm:$0xff] %v6145_v23 }
 0x421   : > { %v6149_v20 = vpop.xlane.xlu0 %1367 }
 0x422   : > { %v6143_v19 = vpop.permute.xlu1 %2082  ;;  %8130 = vst [vmem:[#allocation35_spill] sm:$0xff] %v6149_v20  ;;  %v1339_v20 = vsel %vm1311_vm3, %v1296_v1, 0.0 }
 0x425   : > { %v6153_v12 = vpop.xlane.xlu0 %1511 }
 0x426   : > { %v6147_v54 = vpop.xlane.xlu1 %1334  ;;  %8131 = vst [vmem:[#allocation36_spill] sm:$0xff] %v6153_v12  ;;  %v1372_v12 = vsel %vm1311_vm3, %v1307_v28, 0.0 }
 0x427   : > { %8129 = vst [vmem:[#allocation34_spill] sm:$0xff] %v6147_v54 }
 0x428   : > { %1892 = vrot.lane.b32.xlu0 %v1295_v4, %s5262_s18  ;;  %v1483_v4 = vsel %vm1311_vm3, %v1441_v14, 0.0 }
 0x429   : > { %v6158_v32 = vpop.permute.xlu0 %1884 }
 0x42a   : > { %1894 = vrot.lane.b32.xlu1 %v1296_v1, %s5262_s18  ;;  %v6151_v16 = vpop.xlane.xlu1 %1478  ;;  %v2122_v1 = vsel %vm1311_vm3, %v6003_v33, 0.0  ;;  %v2158_v33 = vsel %vm1311_vm3, %v6015_v22, 0.0  ;;  %v2116_v22 = vsel %vm1311_vm3, %v6063_v9, 0.0  ;;  %v2152_v9 = vsel %vm1311_vm3, %v6071_v45, 0.0 }
 0x42b   : > { %v2134_v45 = vsel %vm1311_vm3, %v6110_v18, 0.0 }
 0x42c   : > { %2060 = vrot.lane.b32.xlu0 %v1440_v17, %s5262_s18  ;;  %v1375_v17 = vsel %vm1311_vm3, %v1308_v40, 0.0 }
 0x42d   : > { %v6163_v23 = vpop.permute.xlu0 %2052 }
 0x42e   : > { %2062 = vrot.lane.b32.xlu1 %v1441_v14, %s5262_s18  ;;  %v6155_v39 = vpop.xlane.xlu1 %1370 }
 0x42f   : > { %8132 = vst [vmem:[#allocation37_spill] sm:$0xff] %v6155_v39 }
 0x430   : > { %1916 = vrot.lane.b32.xlu0 %v1307_v28, %s5262_s18 }
 0x431   : > { %v6172_v39 = vpop.permute.xlu0 %1908 }
 0x432   : > { %1918 = vrot.lane.b32.xlu1 %v1308_v40, %s5262_s18  ;;  %v6160_v50 = vpop.xlane.xlu1 %1514  ;;  %v2125_v40 = vsel %vm1311_vm3, %v6021_v11, 0.0  ;;  %v2161_v11 = vsel %vm1311_vm3, %v6035_v38, 0.0  ;;  %v2119_v38 = vsel %vm1311_vm3, %v6077_v31, 0.0  ;;  %v2155_v31 = vsel %vm1311_vm3, %v6088_v3, 0.0 }
 0x433   : > { %v2137_v3 = vsel %vm1311_vm3, %v6127_v27, 0.0  ;;  %v2128_v27 = vsel %vm1311_vm3, %v6163_v23, 0.0 }
 0x434   : > { %2084 = vrot.lane.b32.xlu0 %v6125_v44, %s5262_s18 }
 0x435   : > { %v6179_v28 = vpop.permute.xlu0 %2076 }
 0x436   : > { %2086 = vrot.lane.b32.xlu1 %v6131_v58, %s5262_s18  ;;  %v6166_v54 = vpop.permute.xlu1 %1886  ;;  %v2164_v23 = vsel %vm1311_vm3, %v6179_v28, 0.0 }
 0x453   : > { %1337 = vadd.xlane.f32.xlu0 %v1336_v41  ;;  %v1954_v41 = vsel %vm1311_vm3, %v5998_v55, 0.0  ;;  %v1990_v55 = vsel %vm1311_vm3, %v6009_v51, 0.0  ;;  %v1948_v51 = vsel %vm1311_vm3, %v6057_v7, 0.0  ;;  %v1984_v7 = vsel %vm1311_vm3, %v6067_v46, 0.0 }
 0x454   : > { %v1966_v46 = vsel %vm1311_vm3, %v6100_v5, 0.0 }
 0x457   : > { %1481 = vadd.xlane.f32.xlu0 %v1480_v57  ;;  %v6174_v57 = vpop.permute.xlu1 %2054 }
 0x45a   : > { %1340 = vadd.xlane.f32.xlu1 %v1339_v20  ;;  %v6187_v20 = vpop.xlane.xlu0 %1325 }
 0x45b   : > { %1373 = vadd.xlane.f32.xlu0 %v1372_v12  ;;  %v1957_v12 = vsel %vm1311_vm3, %v6017_v37, 0.0  ;;  %v6183_v14 = vpop.permute.xlu1 %1910  ;;  %v1993_v37 = vsel %vm1311_vm3, %v6027_v34, 0.0  ;;  %v1951_v34 = vsel %vm1311_vm3, %v6073_v53, 0.0  ;;  %v1987_v53 = vsel %vm1311_vm3, %v6082_v0, 0.0 }
 0x45c   : > { %v2002_v0 = vsel %vm1311_vm3, %v6122_v56, 0.0  ;;  %v1960_v56 = vsel %vm1311_vm3, %v6158_v32, 0.0  ;;  %v1996_v32 = vsel %vm1311_vm3, %v6172_v39, 0.0 }
 0x45e   : > { %1484 = vadd.xlane.f32.xlu1 %v1483_v4 }
 0x45f   : > { %1955 = vadd.xlane.f32.xlu0 %v1954_v41  ;;  %v6193_v4 = vpop.permute.xlu1 %2078  ;;  %v6199_v41 = vpop.xlane.xlu0 %1469 }
 0x462   : > { %1376 = vadd.xlane.f32.xlu1 %v1375_v17 }
 0x463   : > { %2123 = vadd.xlane.f32.xlu0 %v2122_v1  ;;  %v6201_v17 = vpop.xlane.xlu1 %1328  ;;  %v6207_v1 = vpop.xlane.xlu0 %1361 }
 0x466   : > { %1958 = vadd.xlane.f32.xlu1 %v1957_v12 }
 0x467   : > { %1991 = vadd.xlane.f32.xlu0 %v1990_v55  ;;  %v6211_v12 = vpop.xlane.xlu1 %1472  ;;  %v6219_v55 = vpop.xlane.xlu0 %1505 }
 0x46a   : > { %2126 = vadd.xlane.f32.xlu1 %v2125_v40 }
 0x46b   : > { %2159 = vadd.xlane.f32.xlu0 %v2158_v33  ;;  %v6221_v40 = vpop.xlane.xlu1 %1364  ;;  %v1897_v33 = vpop.permute.xlu0 %1896 }
 0x46c   : > { %v1978_v39 = vsel %vm1311_vm3, %v1897_v33, 0.0 }
 0x46e   : > { %1994 = vadd.xlane.f32.xlu1 %v1993_v37 }
 0x46f   : > { %1949 = vadd.xlane.f32.xlu0 %v1948_v51  ;;  %v6229_v37 = vpop.xlane.xlu1 %1508  ;;  %v1969_v51 = vsel %vm1311_vm3, %v6114_v13, 0.0  ;;  %v2065_v5 = vpop.permute.xlu0 %2064  ;;  %v2005_v13 = vsel %vm1311_vm3, %v6139_v49, 0.0  ;;  %v1963_v49 = vsel %vm1311_vm3, %v6166_v54, 0.0  ;;  %v1999_v54 = vsel %vm1311_vm3, %v6183_v14, 0.0 }
 0x470   : > { %v2146_v28 = vsel %vm1311_vm3, %v2065_v5, 0.0 }
 0x472   : > { %2162 = vadd.xlane.f32.xlu1 %v2161_v11 }
 0x473   : > { %2117 = vadd.xlane.f32.xlu0 %v2116_v22  ;;  %v1899_v11 = vpop.permute.xlu1 %1898  ;;  %v2170_v22 = vsel %vm1311_vm3, %v6137_v29, 0.0  ;;  %v6241_v18 = vpop.permute.xlu0 %1920 }
 0x476   : > { %1952 = vadd.xlane.f32.xlu1 %v1951_v34 }
 0x477   : > { %1985 = vadd.xlane.f32.xlu0 %v1984_v7  ;;  %v2067_v34 = vpop.permute.xlu1 %2066  ;;  %v2173_v7 = vsel %vm1311_vm3, %v6143_v19, 0.0  ;;  %v6251_v29 = vpop.permute.xlu0 %2088  ;;  %v2131_v19 = vsel %vm1311_vm3, %v6174_v57, 0.0  ;;  %v2167_v57 = vsel %vm1311_vm3, %v6193_v4, 0.0 }
 0x47a   : > { %2120 = vadd.xlane.f32.xlu1 %v2119_v38 }
 0x47b   : > { %2153 = vadd.xlane.f32.xlu0 %v2152_v9  ;;  %v6253_v38 = vpop.permute.xlu1 %1922 }
 0x47e   : > { %1988 = vadd.xlane.f32.xlu1 %v1987_v53 }
 0x47f   : > { %1967 = vadd.xlane.f32.xlu0 %v1966_v46  ;;  %v6263_v53 = vpop.permute.xlu1 %2090 }
 0x482   : > { %2156 = vadd.xlane.f32.xlu1 %v2155_v31 }
 0x483   : > { %2135 = vadd.xlane.f32.xlu0 %v2134_v45 }
 0x486   : > { %1970 = vadd.xlane.f32.xlu1 %v1969_v51 }
 0x487   : > { %2003 = vadd.xlane.f32.xlu0 %v2002_v0  ;;  %v1981_v0 = vsel %vm1311_vm3, %v1899_v11, 0.0 }
 0x48a   : > { %2138 = vadd.xlane.f32.xlu1 %v2137_v3  ;;  %v1528_v3 = vmax.f32 %v6075_v30, %v6079_v48 }
 0x48b   : > { %2171 = vadd.xlane.f32.xlu0 %v2170_v22  ;;  %v1529_v22 = vmax.f32 %v6093_v8, %v6095_v26 }
 0x48d   : > { %v1553_v11 = vsub.f32 %v6093_v8, %v1529_v22 }
 0x48e   : > { %2006 = vadd.xlane.f32.xlu1 %v2005_v13  ;;  %v2149_v13 = vsel %vm1311_vm3, %v2067_v34, 0.0  ;;  %v1516_v34 = vsel %vm1311_vm3, %v6125_v44, 0.0  ;;  %v1542_v44 = vmax.f32 %v6030_v61, %v6043_v52 }
 0x48f   : > { %1961 = vadd.xlane.f32.xlu0 %v1960_v56  ;;  %v1552_v56 = vsub.f32 %v6075_v30, %v1528_v3 }
 0x492   : > { %2174 = vadd.xlane.f32.xlu1 %v2173_v7  ;;  %v1625_v7 = vsub.f32 %v6095_v26, %v1529_v22  ;;  %v1530_v26 = vmax.f32 %v6019_v21, %v6024_v15  ;;  %v1543_v22 = vmax.f32 %v6065_v63, %v6069_v60 }
 0x493   : > { %2129 = vadd.xlane.f32.xlu0 %v2128_v27 }
 0x496   : > { %1964 = vadd.xlane.f32.xlu1 %v1963_v49 }
 0x497   : > { %1997 = vadd.xlane.f32.xlu0 %v1996_v32  ;;  %v6259_v9 = vpop.xlane.xlu0 %1343  ;;  %v1624_v32 = vsub.f32 %v6079_v48, %v1528_v3  ;;  %v1626_v3 = vsub.f32 %v6024_v15, %v1530_v26  ;;  %v1540_v15 = vmax.f32 %v6085_v2, %v6091_v10 }
 0x49a   : > { %2132 = vadd.xlane.f32.xlu1 %v2131_v19 }
 0x49b   : > { %2165 = vadd.xlane.f32.xlu0 %v2164_v23  ;;  %v6267_v46 = vpop.xlane.xlu0 %1487  ;;  %v1576_v23 = vmul.f32 1.442695, %v1552_v56 }
 0x49d   : > { %4811 = vpow2.f32 %v1576_v23 }
 0x49e   : > { %v6271_v31 = vpop.xlane.xlu1 %1346  ;;  %2000 = vadd.xlane.f32.xlu1 %v1999_v54  ;;  %v1578_v54 = vmul.f32 1.442695, %v1553_v11 }
 0x49f   : > { %1979 = vadd.xlane.f32.xlu0 %v1978_v39  ;;  %v1893_v45 = vpop.permute.xlu0 %1892  ;;  %v1650_v39 = vmul.f32 1.442695, %v1625_v7  ;;  %v1567_v7 = vsub.f32 %v6065_v63, %v1543_v22 }
 0x4a0   : > { %v1972_v14 = vsel %vm1311_vm3, %v1893_v45, 0.0  ;;  %v1648_v45 = vmul.f32 1.442695, %v1624_v32  ;;  %4813 = vpow2.f32 %v1578_v54 }
 0x4a1   : > { %4815 = vpow2.f32 %v1650_v39 }
 0x4a2   : > { %v6276_v51 = vpop.xlane.xlu1 %1490  ;;  %2168 = vadd.xlane.f32.xlu1 %v2167_v57  ;;  %v1519_v57 = vsel %vm1311_vm3, %v6131_v58, 0.0  ;;  %4817 = vpow2.f32 %v1648_v45  ;;  %v1381_v58 = vsel %vm1311_vm3, %v6041_v25, 0.0  ;;  %v1525_v25 = vsel %vm1311_vm3, %v6053_v24, 0.0 }
 0x4a3   : > { %2147 = vadd.xlane.f32.xlu0 %v2146_v28  ;;  %v2061_v33 = vpop.permute.xlu0 %2060  ;;  %v1636_v24 = vsub.f32 %v6091_v10, %v1540_v15 }
 0x4a4   : > { %v2140_v5 = vsel %vm1311_vm3, %v2061_v33, 0.0  ;;  %v1566_v33 = vsub.f32 %v6030_v61, %v1542_v44  ;;  %v1652_v61 = vmul.f32 1.442695, %v1626_v3 }
 0x4a5   : > { %v1672_v10 = vmul.f32 1.442695, %v1636_v24 }
 0x4a6   : > { %1982 = vadd.xlane.f32.xlu1 %v1981_v0  ;;  %v1895_v4 = vpop.permute.xlu1 %1894  ;;  %v1554_v0 = vsub.f32 %v6019_v21, %v1530_v26  ;;  %v1378_v21 = vsel %vm1311_vm3, %v6037_v42, 0.0  ;;  %v1604_v11 = vmul.f32 1.442695, %v1566_v33  ;;  %v1522_v42 = vsel %vm1311_vm3, %v6049_v36, 0.0 }
 0x4a7   : > { %1973 = vadd.xlane.f32.xlu0 %v1972_v14  ;;  %v1917_v27 = vpop.permute.xlu0 %1916  ;;  %v1975_v49 = vsel %vm1311_vm3, %v1895_v4, 0.0  ;;  %v1531_v14 = vmax.f32 %v6047_v59, %v6061_v47  ;;  %v1638_v4 = vsub.f32 %v6043_v52, %v1542_v44  ;;  %v2017_v36 = vsel %vm1311_vm3, %v6253_v38, 0.0 }
 0x4a8   : > { %v2008_v8 = vsel %vm1311_vm3, %v1917_v27, 0.0  ;;  %v1639_v27 = vsub.f32 %v6069_v60, %v1543_v22  ;;  %v1606_v60 = vmul.f32 1.442695, %v1567_v7  ;;  %v8135_v7 = vld [vmem:[#allocation12_spill] sm:$0xff] }
 0x4a9   : > { %v1627_v56 = vsub.f32 %v6061_v47, %v1531_v14  ;;  %v1676_v52 = vmul.f32 1.442695, %v1638_v4  ;;  %v1541_v47 = vmax.f32 %v6097_v43, %v6104_v6 }
 0x4aa   : > { %2150 = vadd.xlane.f32.xlu1 %v2149_v13  ;;  %v2063_v19 = vpop.permute.xlu1 %2062  ;;  %v1580_v13 = vmul.f32 1.442695, %v1554_v0  ;;  %v4812_v32 = vpop.eup %4811  ;;  %v1678_v54 = vmul.f32 1.442695, %v1639_v27 }
 0x4ab   : > { %2141 = vadd.xlane.f32.xlu0 %v2140_v5  ;;  %v2143_v30 = vsel %vm1311_vm3, %v2063_v19, 0.0  ;;  %v2085_v48 = vpop.permute.xlu0 %2084  ;;  %v1555_v5 = vsub.f32 %v6047_v59, %v1531_v14  ;;  %v1654_v63 = vmul.f32 1.442695, %v1627_v56  ;;  %v1565_v45 = vsub.f32 %v6097_v43, %v1541_v47  ;;  %v8134_v56 = vld [vmem:[#allocation32_spill] sm:$0xff] }
 0x4ac   : > { %v2176_v28 = vsel %vm1311_vm3, %v2085_v48, 0.0  ;;  %4819 = vpow2.f32 %v1580_v13  ;;  %v2185_v14 = vsel %vm1311_vm3, %v6263_v53, 0.0 }
 0x4ad   : > { %v1582_v59 = vmul.f32 1.442695, %v1555_v5  ;;  %4821 = vpow2.f32 %v1652_v61  ;;  %v8133_v61 = vld [vmem:[#allocation33_spill] sm:$0xff] }
 0x4ae   : > { %1976 = vadd.xlane.f32.xlu1 %v1975_v49  ;;  %v1564_v49 = vsub.f32 %v6085_v2, %v1540_v15  ;;  %v1919_v19 = vpop.permute.xlu1 %1918  ;;  %4823 = vpow2.f32 %v1604_v11  ;;  %v2014_v2 = vsel %vm1311_vm3, %v6241_v18, 0.0  ;;  %v2182_v18 = vsel %vm1311_vm3, %v6251_v29, 0.0 }
 0x4af   : > { %1517 = vadd.xlane.f32.xlu0 %v1516_v34  ;;  %v4814_v34 = vpop.eup %4813  ;;  %4825 = vpow2.f32 %v1676_v52  ;;  %v2011_v38 = vsel %vm1311_vm3, %v1919_v19, 0.0  ;;  %v1534_v11 = vmax.f32 %v8134_v56, %v8133_v61  ;;  %v8136_v52 = vld [vmem:[#allocation11_spill] sm:$0xff] }
 0x4b0   : > { %v4816_v23 = vpop.eup %4815  ;;  %4827 = vpow2.f32 %v1582_v59 }
 0x4b1   : > { %v4818_v39 = vpop.eup %4817  ;;  %4829 = vpow2.f32 %v1654_v63  ;;  %v1697_v26 = vadd.f32 %v4816_v23, %v4814_v34  ;;  %v1769_v13 = vmul.f32 %v4816_v23, %v5847_v35  ;;  %v8139_v23 = vld [vmem:[#allocation35_spill] sm:$0xff] }
 0x4b2   : > { %2144 = vadd.xlane.f32.xlu1 %v2143_v30  ;;  %v1600_v30 = vmul.f32 1.442695, %v1564_v49  ;;  %4831 = vpow2.f32 %v1606_v60  ;;  %v1696_v48 = vadd.f32 %v4818_v39, %v4812_v32  ;;  %v2087_v44 = vpop.permute.xlu1 %2086  ;;  %v1768_v27 = vmul.f32 %v4818_v39, %v8136_v52 }
 0x4b3   : > { %2009 = vadd.xlane.f32.xlu0 %v2008_v8  ;;  %v1637_v8 = vsub.f32 %v6104_v6, %v1541_v47  ;;  %4833 = vpow2.f32 %v1678_v54  ;;  %v8137_v47 = vld [vmem:[#allocation34_spill] sm:$0xff] }
 0x4b4   : > { %4835 = vpow2.f32 %v1600_v30  ;;  %v1535_v63 = vmax.f32 %v8137_v47, %v6151_v16 }
 0x4b5   : > { %4837 = vpow2.f32 %v1672_v10  ;;  %v1674_v43 = vmul.f32 1.442695, %v1637_v8 }
 0x4b6   : > { %1520 = vadd.xlane.f32.xlu1 %v1519_v57  ;;  %v1602_v57 = vmul.f32 1.442695, %v1565_v45  ;;  %4839 = vrcp.f32 %v1697_v26  ;;  %v1630_v45 = vsub.f32 %v8133_v61, %v1534_v11  ;;  %v1559_v8 = vsub.f32 %v8137_v47, %v1535_v63  ;;  %v8140_v26 = vld [vmem:[#allocation37_spill] sm:$0xff] }
 0x4b7   : > { %2177 = vadd.xlane.f32.xlu0 %v2176_v28  ;;  %v2179_v28 = vsel %vm1311_vm3, %v2087_v44, 0.0  ;;  %4841 = vrcp.f32 %v1696_v48 }
 0x4b8   : > { %4843 = vpow2.f32 %v1602_v57  ;;  %v1590_v61 = vmul.f32 1.442695, %v1559_v8 }
 0x4b9   : > { %v6339_v6 = vpop.eup %4819  ;;  %4845 = vpow2.f32 %v1674_v43 }
 0x4ba   : > { %1382 = vadd.xlane.f32.xlu1 %v1381_v58  ;;  %v6341_v0 = vpop.eup %4821 }
 0x4bb   : > { %1379 = vadd.xlane.f32.xlu0 %v1378_v21  ;;  %v6345_v29 = vpop.eup %4823  ;;  %v1745_v21 = vmul.f32 %v4814_v34, %v5837_v62  ;;  %v1698_v53 = vadd.f32 %v6341_v0, %v6339_v6 }
 0x4bc   : > { %v6347_v3 = vpop.eup %4825 }
 0x4bd   : > { %v6349_v33 = vpop.eup %4827  ;;  %v1710_v59 = vadd.f32 %v6347_v3, %v6345_v29  ;;  %v1793_v24 = vadd.f32 %v1769_v13, %v1745_v21  ;;  %4847 = vrcp.f32 %v1698_v53  ;;  %v1660_v13 = vmul.f32 1.442695, %v1630_v45 }
 0x4be   : > { %1526 = vadd.xlane.f32.xlu1 %v1525_v25  ;;  %v6351_v22 = vpop.eup %4829  ;;  %v1744_v25 = vmul.f32 %v4812_v32, %v8135_v7  ;;  %v1558_v32 = vsub.f32 %v8134_v56, %v1534_v11 }
 0x4bf   : > { %1523 = vadd.xlane.f32.xlu0 %v1522_v42  ;;  %v6353_v58 = vpop.eup %4831  ;;  %v1699_v34 = vadd.f32 %v6351_v22, %v6349_v33  ;;  %4849 = vrcp.f32 %v1710_v59 }
 0x4c0   : > { %v6355_v4 = vpop.eup %4833  ;;  %v1588_v43 = vmul.f32 1.442695, %v1558_v32 }
 0x4c1   : > { %v6359_v5 = vpop.eup %4835  ;;  %v1711_v30 = vadd.f32 %v6355_v4, %v6353_v58  ;;  %4851 = vrcp.f32 %v1699_v34 }
 0x4c2   : > { %2018 = vadd.xlane.f32.xlu1 %v2017_v36  ;;  %v6363_v15 = vpop.eup %4837  ;;  %v8138_v36 = vld [vmem:[#allocation36_spill] sm:$0xff] }
 0x4c3   : > { %2015 = vadd.xlane.f32.xlu0 %v2014_v2  ;;  %v4840_v42 = vpop.eup %4839  ;;  %v1546_v54 = vmax.f32 %v8139_v23, %v8138_v36  ;;  %v1792_v2 = vadd.f32 %v1768_v27, %v1744_v25  ;;  %v1708_v10 = vadd.f32 %v6363_v15, %v6359_v5  ;;  %4853 = vrcp.f32 %v1711_v30 }
 0x4c4   : > { %v4842_v49 = vpop.eup %4841  ;;  %v1817_v39 = vmul.f32 %v4840_v42, %v1793_v24  ;;  %v1538_v30 = vmax.f32 %v6259_v9, %v6267_v46 }
 0x4c5   : > { %v6373_v19 = vpop.eup %4843  ;;  %v1816_v48 = vmul.f32 %v4842_v49, %v1792_v2  ;;  %v1642_v53 = vsub.f32 %v8138_v36, %v1546_v54  ;;  %4855 = vrcp.f32 %v1708_v10  ;;  %v1544_v49 = vmax.f32 %v6207_v1, %v6219_v55 }
 0x4c6   : > { %2012 = vadd.xlane.f32.xlu1 %v2011_v38  ;;  %v6377_v60 = vpop.eup %4845  ;;  %v1547_v38 = vmax.f32 %v8140_v26, %v6160_v50 }
 0x4c7   : > { %2183 = vadd.xlane.f32.xlu0 %v2182_v18  ;;  %v1709_v44 = vadd.f32 %v6377_v60, %v6373_v19  ;;  %v1631_v18 = vsub.f32 %v6151_v16, %v1535_v63  ;;  %v1840_v21 = vpack.c.bf16 %v1817_v39, %v1816_v48  ;;  %v1533_v16 = vmax.f32 %v6201_v17, %v6211_v12 }
 0x4c8   : > { %v1571_v56 = vsub.f32 %v8140_v26, %v1547_v38  ;;  %v1643_v25 = vsub.f32 %v6160_v50, %v1547_v38  ;;  %v1684_v47 = vmul.f32 1.442695, %v1642_v53 }
 0x4c9   : > { %4857 = vrcp.f32 %v1709_v44  ;;  %v1662_v11 = vmul.f32 1.442695, %v1631_v18  ;;  %v1557_v34 = vsub.f32 %v6201_v17, %v1533_v16  ;;  %v1629_v36 = vsub.f32 %v6211_v12, %v1533_v16 }
 0x4ca   : > { %2180 = vadd.xlane.f32.xlu1 %v2179_v28  ;;  %v1570_v28 = vsub.f32 %v8139_v23, %v1546_v54  ;;  %4859 = vpow2.f32 %v1588_v43  ;;  %v1614_v24 = vmul.f32 1.442695, %v1571_v56  ;;  %v1686_v50 = vmul.f32 1.442695, %v1643_v25  ;;  %v6418_v54 = vpop.eup %4847 }
 0x4cb   : > { %4861 = vpow2.f32 %v1660_v13  ;;  %v1640_v17 = vsub.f32 %v6219_v55, %v1544_v49  ;;  %v1586_v12 = vmul.f32 1.442695, %v1557_v34  ;;  %v1658_v8 = vmul.f32 1.442695, %v1629_v36 }
 0x4cc   : > { %v1612_v42 = vmul.f32 1.442695, %v1570_v28  ;;  %4863 = vpow2.f32 %v1590_v61  ;;  %v6424_v45 = vpop.eup %4849  ;;  %v1562_v18 = vsub.f32 %v6259_v9, %v1538_v30  ;;  %v1539_v43 = vmax.f32 %v6271_v31, %v6276_v51 }
 0x4cd   : > { %4865 = vpow2.f32 %v1662_v11  ;;  %v1680_v44 = vmul.f32 1.442695, %v1640_v17 }
 0x4ce   : > { %2186 = vadd.xlane.f32.xlu1 %v2185_v14  ;;  %v1532_v14 = vmax.f32 %v6187_v20, %v6199_v41  ;;  %4867 = vpow2.f32 %v1612_v42  ;;  %v6429_v48 = vpop.eup %4851  ;;  %v1596_v11 = vmul.f32 1.442695, %v1562_v18  ;;  %v8144_v18 = vld [vmem:[#allocation10_spill] sm:$0xff] }
 0x4cf   : > { %4869 = vpow2.f32 %v1684_v47 }
 0x4d0   : > { %v1556_v59 = vsub.f32 %v6187_v20, %v1532_v14  ;;  %v1628_v63 = vsub.f32 %v6199_v41, %v1532_v14  ;;  %v1545_v20 = vmax.f32 %v6221_v40, %v6229_v37  ;;  %v1568_v41 = vsub.f32 %v6207_v1, %v1544_v49  ;;  %v6435_v28 = vpop.eup %4853 }
 0x4d1   : > { %4871 = vpow2.f32 %v1614_v24  ;;  %v1634_v14 = vsub.f32 %v6267_v46, %v1538_v30  ;;  %v1563_v46 = vsub.f32 %v6271_v31, %v1539_v43 }
 0x4d2   : > { %v1584_v2 = vmul.f32 1.442695, %v1556_v59  ;;  %v1656_v39 = vmul.f32 1.442695, %v1628_v63  ;;  %4873 = vpow2.f32 %v1686_v50  ;;  %v1569_v26 = vsub.f32 %v6221_v40, %v1545_v20 }
 0x4d3   : > { %v1608_v1 = vmul.f32 1.442695, %v1568_v41  ;;  %v1641_v55 = vsub.f32 %v6229_v37, %v1545_v20  ;;  %v1668_v42 = vmul.f32 1.442695, %v1634_v14  ;;  %v1635_v59 = vsub.f32 %v6276_v51, %v1539_v43 }
 0x4d4   : > { %4875 = vpow2.f32 %v1584_v2  ;;  %v1610_v13 = vmul.f32 1.442695, %v1569_v26  ;;  %v1598_v51 = vmul.f32 1.442695, %v1563_v46  ;;  %v1770_v43 = vmul.f32 %v6341_v0, %v8144_v18 }
 0x4d5   : > { %4877 = vpow2.f32 %v1656_v39  ;;  %v1682_v9 = vmul.f32 1.442695, %v1641_v55  ;;  %v1670_v17 = vmul.f32 1.442695, %v1635_v59  ;;  %v8143_v55 = vld [vmem:[#allocation9_spill] sm:$0xff]  ;;  %v1782_v0 = vmul.f32 %v6347_v3, %v8144_v18 }
 0x4d6   : > { %4879 = vpow2.f32 %v1586_v12  ;;  %v8146_v3 = vld [vmem:[#allocation13_spill] sm:$0xff] }
 0x4d7   : > { %4881 = vpow2.f32 %v1658_v8 }
 0x4d8   : > { %4883 = vpow2.f32 %v1608_v1 }
 0x4d9   : > { %4885 = vpow2.f32 %v1680_v44  ;;  %v1746_v44 = vmul.f32 %v6339_v6, %v8143_v55 }
 0x4dc   : > { %v6393_v57 = vpop.xlane.xlu0 %1337 }
 0x4df   : > { %2733 = vrot.lane.b32.xlu1 %v1840_v21, %s5263_s20  ;;  %v6440_v21 = vpop.eup %4855  ;;  %4887 = vpow2.f32 %v1610_v13 }
 0x4e0   : > { %v6404_v27 = vpop.xlane.xlu0 %1481  ;;  %v6444_v61 = vpop.eup %4857  ;;  %4889 = vpow2.f32 %v1682_v9 }
 0x4e1   : > { %v1536_v37 = vmax.f32 %v6393_v57, %v6404_v27  ;;  %v6446_v16 = vpop.eup %4859  ;;  %4891 = vpow2.f32 %v1596_v11 }
 0x4e2   : > { %v6449_v25 = vpop.eup %4861  ;;  %4893 = vpow2.f32 %v1668_v42 }
 0x4e3   : > { %v6411_v32 = vpop.xlane.xlu1 %1340  ;;  %v6452_v24 = vpop.eup %4863  ;;  %v1560_v34 = vsub.f32 %v6393_v57, %v1536_v37  ;;  %v1632_v31 = vsub.f32 %v6404_v27, %v1536_v37 }
 0x4e4   : > { %v6416_v23 = vpop.xlane.xlu0 %1373  ;;  %v6457_v36 = vpop.eup %4865 }
 0x4e5   : > { %8141 = vst [vmem:[#allocation33_spill] sm:$0xff] %v6416_v23  ;;  %v6460_v41 = vpop.eup %4867  ;;  %v1592_v8 = vmul.f32 1.442695, %v1560_v34  ;;  %v1664_v1 = vmul.f32 1.442695, %v1632_v31  ;;  %v1747_v31 = vmul.f32 %v6349_v33, %v8146_v3 }
 0x4e6   : > { %v6462_v39 = vpop.eup %4869 }
 0x4e7   : > { %v6426_v10 = vpop.xlane.xlu1 %1484  ;;  %v6466_v12 = vpop.eup %4871  ;;  %v1714_v34 = vadd.f32 %v6462_v39, %v6460_v41 }
 0x4e8   : > { %v1956_v38 = vpop.xlane.xlu0 %1955  ;;  %v1537_v57 = vmax.f32 %v6411_v32, %v6426_v10 }
 0x4ea   : > { %v1561_v11 = vsub.f32 %v6411_v32, %v1537_v57  ;;  %v1633_v42 = vsub.f32 %v6426_v10, %v1537_v57  ;;  %v1794_v57 = vadd.f32 %v1770_v43, %v1746_v44 }
 0x4eb   : > { %v6438_v40 = vpop.xlane.xlu1 %1376 }
 0x4ec   : > { %8142 = vst [vmem:[#allocation32_spill] sm:$0xff] %v6438_v40  ;;  %v2124_v53 = vpop.xlane.xlu0 %2123 }
 0x4ed   : > { %v2190_v56 = vmax.f32 %v1956_v38, %v2124_v53 }
 0x4ef   : > { %v2214_v49 = vsub.f32 %v1956_v38, %v2190_v56  ;;  %v2286_v47 = vsub.f32 %v2124_v53, %v2190_v56  ;;  %v1959_v63 = vpop.xlane.xlu1 %1958  ;;  %v6470_v38 = vpop.eup %4873  ;;  %v1758_v53 = vmul.f32 %v6345_v29, %v8143_v55  ;;  %v1702_v56 = vadd.f32 %v6449_v25, %v6446_v16 }
 0x4f0   : > { %v6455_v50 = vpop.xlane.xlu0 %1991  ;;  %v6476_v14 = vpop.eup %4875  ;;  %v1715_v33 = vadd.f32 %v6470_v38, %v6466_v12 }
 0x4f1   : > { %v2240_v20 = vmul.f32 1.442695, %v2214_v49  ;;  %v2312_v2 = vmul.f32 1.442695, %v2286_v47  ;;  %v6480_v9 = vpop.eup %4877 }
 0x4f2   : > { %v6489_v46 = vpop.eup %4879  ;;  %v1700_v44 = vadd.f32 %v6480_v9, %v6476_v14 }
 0x4f3   : > { %v2127_v30 = vpop.xlane.xlu1 %2126  ;;  %4895 = vpow2.f32 %v2240_v20  ;;  %v6492_v47 = vpop.eup %4881  ;;  %v8147_v20 = vld [vmem:[#allocation14_spill] sm:$0xff] }
 0x4f4   : > { %v2191_v26 = vmax.f32 %v1959_v63, %v2127_v30  ;;  %v6468_v27 = vpop.xlane.xlu0 %2159  ;;  %4897 = vpow2.f32 %v2312_v2  ;;  %v6496_v32 = vpop.eup %4883  ;;  %v1771_v10 = vmul.f32 %v6351_v22, %v8147_v20  ;;  %v6513_v22 = vmul.f32 %v6418_v54, %v1794_v57 }
 0x4f5   : > { %4899 = vpow2.f32 %v1598_v51  ;;  %8145 = vst [vmem:[#allocation12_spill] sm:$0xff] %v6496_v32  ;;  %v6504_v2 = vpop.eup %4885  ;;  %v1594_v51 = vmul.f32 1.442695, %v1561_v11  ;;  %v1701_v11 = vadd.f32 %v6492_v47, %v6489_v46 }
 0x4f6   : > { %v2215_v13 = vsub.f32 %v1959_v63, %v2191_v26  ;;  %v2287_v37 = vsub.f32 %v2127_v30, %v2191_v26  ;;  %4901 = vpow2.f32 %v1670_v17  ;;  %v1703_v63 = vadd.f32 %v6457_v36, %v6452_v24  ;;  %8148 = vst [vmem:[#allocation34_spill] sm:$0xff] %v6504_v2 }
 0x4f7   : > { %v6485_v6 = vpop.xlane.xlu1 %1994  ;;  %4903 = vpow2.f32 %v1592_v8  ;;  %v1666_v30 = vmul.f32 1.442695, %v1633_v42  ;;  %v1806_v26 = vadd.f32 %v1782_v0, %v1758_v53  ;;  %v1795_v43 = vadd.f32 %v1771_v10, %v1747_v31 }
 0x4f8   : > { %v2242_v59 = vmul.f32 1.442695, %v2215_v13  ;;  %v2314_v29 = vmul.f32 1.442695, %v2287_v37  ;;  %v1950_v49 = vpop.xlane.xlu0 %1949  ;;  %4905 = vpow2.f32 %v1664_v1  ;;  %v6508_v1 = vpop.eup %4887  ;;  %v1759_v53 = vmul.f32 %v6353_v58, %v8146_v3 }
 0x4f9   : > { %8149 = vst [vmem:[#allocation36_spill] sm:$0xff] %v6508_v1  ;;  %v6515_v37 = vpop.eup %4889  ;;  %v1783_v58 = vmul.f32 %v6355_v4, %v8147_v20  ;;  %v1756_v10 = vmul.f32 %v6359_v5, %v8135_v7  ;;  %v1781_v4 = vmul.f32 %v6377_v60, %v5847_v35  ;;  %v2202_v5 = vmax.f32 %v6455_v50, %v6468_v27 }
 0x4fa   : > { %4907 = vpow2.f32 %v2242_v59  ;;  %8150 = vst [vmem:[#allocation35_spill] sm:$0xff] %v6515_v37 }
 0x4fb   : > { %4909 = vpow2.f32 %v2314_v29  ;;  %v6506_v17 = vpop.xlane.xlu1 %2162  ;;  %v1712_v29 = vadd.f32 %v6504_v2, %v6496_v32  ;;  %v8152_v32 = vld [vmem:[#allocation15_spill] sm:$0xff] }
 0x4fc   : > { %4911 = vrcp.f32 %v1702_v56  ;;  %v2118_v8 = vpop.xlane.xlu0 %2117  ;;  %v6521_v56 = vpop.eup %4891 }
 0x4fd   : > { %4913 = vrcp.f32 %v1703_v63  ;;  %v2188_v13 = vmax.f32 %v1950_v49, %v2118_v8  ;;  %v6525_v59 = vpop.eup %4893 }
 0x4fe   : > { %4915 = vrcp.f32 %v1714_v34  ;;  %v6532_v34 = vmul.f32 %v6429_v48, %v1795_v43  ;;  %v1757_v48 = vmul.f32 %v6373_v19, %v5837_v62  ;;  %v1706_v19 = vadd.f32 %v6525_v59, %v6521_v56 }
 0x4ff   : > { %4917 = vpow2.f32 %v1594_v51  ;;  %v2212_v0 = vsub.f32 %v1950_v49, %v2188_v13  ;;  %v2284_v42 = vsub.f32 %v2118_v8, %v2188_v13  ;;  %v1953_v54 = vpop.xlane.xlu1 %1952  ;;  %v1780_v51 = vmul.f32 %v6363_v15, %v8136_v52 }
 0x500   : > { %4919 = vpow2.f32 %v1666_v30  ;;  %v6529_v63 = vpop.xlane.xlu0 %1985  ;;  %v6536_v31 = vpop.eup %4895  ;;  %v6555_v13 = vmul.f32 %v6424_v45, %v1806_v26 }
 0x501   : > { %4921 = vrcp.f32 %v1715_v33  ;;  %v2236_v49 = vmul.f32 1.442695, %v2212_v0  ;;  %v6542_v57 = vpop.eup %4897  ;;  %v2308_v30 = vmul.f32 1.442695, %v2284_v42  ;;  %v1713_v33 = vadd.f32 %v6515_v37, %v6508_v1  ;;  %v8153_v37 = vld [vmem:[#allocation16_spill] sm:$0xff] }
 0x502   : > { %4923 = vrcp.f32 %v1700_v44  ;;  %v6548_v8 = vpop.eup %4899  ;;  %8151 = vst [vmem:[#allocation37_spill] sm:$0xff] %v6555_v13  ;;  %v2358_v42 = vadd.f32 %v6542_v57, %v6536_v31  ;;  %v1804_v26 = vadd.f32 %v1780_v51, %v1756_v10  ;;  %v1805_v13 = vadd.f32 %v1781_v4, %v1757_v48 }
 0x503   : > { %4925 = vrcp.f32 %v1701_v11  ;;  %v2121_v15 = vpop.xlane.xlu1 %2120  ;;  %v6557_v44 = vpop.eup %4901  ;;  %v1807_v11 = vadd.f32 %v1783_v58, %v1759_v53  ;;  %v2226_v53 = vsub.f32 %v6455_v50, %v2202_v5  ;;  %v1774_v45 = vmul.f32 %v6449_v25, %v8153_v37 }
 0x504   : > { %4927 = vrcp.f32 %v1712_v29  ;;  %v2189_v60 = vmax.f32 %v1953_v54, %v2121_v15  ;;  %v6561_v43 = vpop.xlane.xlu0 %2153  ;;  %v6563_v0 = vpop.eup %4903  ;;  %v1707_v50 = vadd.f32 %v6557_v44, %v6548_v8  ;;  %v2203_v25 = vmax.f32 %v6485_v6, %v6506_v17 }
 0x505   : > { %4929 = vpow2.f32 %v2236_v49  ;;  %v6569_v40 = vpop.eup %4905  ;;  %v1750_v49 = vmul.f32 %v6446_v16, %v8152_v32  ;;  %v6604_v1 = vmul.f32 %v6440_v21, %v1804_v26  ;;  %v6607_v35 = vmul.f32 %v6435_v28, %v1807_v11 }
 0x506   : > { %4931 = vpow2.f32 %v2308_v30  ;;  %v2213_v29 = vsub.f32 %v1953_v54, %v2189_v60  ;;  %v2285_v23 = vsub.f32 %v2121_v15, %v2189_v60  ;;  %v2298_v54 = vsub.f32 %v6468_v27, %v2202_v5  ;;  %v8155_v15 = vld [vmem:[#allocation21_spill] sm:$0xff] }
 0x507   : > { %v6571_v2 = vpop.eup %4907  ;;  %4933 = vrcp.f32 %v1713_v33  ;;  %v6574_v58 = vpop.xlane.xlu1 %1988  ;;  %v1704_v27 = vadd.f32 %v6569_v40, %v6563_v0  ;;  %8157 = vst [vmem:[#allocation39_spill] sm:$0xff] %v6604_v1  ;;  %8158 = vst [vmem:[#allocation40_spill] sm:$0xff] %v6607_v35  ;;  %v2227_v21 = vsub.f32 %v6485_v6, %v2203_v25  ;;  %v2299_v28 = vsub.f32 %v6506_v17, %v2203_v25 }
 0x508   : > { %v6580_v10 = vpop.eup %4909  ;;  %4935 = vrcp.f32 %v1706_v19  ;;  %v2238_v51 = vmul.f32 1.442695, %v2213_v29  ;;  %v2310_v30 = vmul.f32 1.442695, %v2285_v23  ;;  %v6583_v48 = vpop.xlane.xlu0 %1967  ;;  %v8154_v23 = vld [vmem:[#allocation19_spill] sm:$0xff]  ;;  %v1775_v19 = vmul.f32 %v6457_v36, %v8155_v15 }
 0x509   : > { %v4912_v4 = vpop.eup %4911  ;;  %4937 = vrcp.f32 %v2358_v42  ;;  %v2359_v16 = vadd.f32 %v6580_v10, %v6571_v2  ;;  %v1751_v5 = vmul.f32 %v6452_v24, %v8154_v23  ;;  %v2264_v42 = vmul.f32 1.442695, %v2226_v53 }
 0x50a   : > { %v6591_v33 = vpop.eup %4913  ;;  %4939 = vpow2.f32 %v2238_v51  ;;  %v2336_v51 = vmul.f32 1.442695, %v2298_v54  ;;  %v2200_v24 = vmax.f32 %v6529_v63, %v6561_v43  ;;  %v1798_v11 = vadd.f32 %v1774_v45, %v1750_v49 }
 0x50b   : > { %v6599_v60 = vpop.eup %4915  ;;  %4941 = vrcp.f32 %v2359_v16  ;;  %v6601_v29 = vpop.xlane.xlu1 %2156  ;;  %v6616_v16 = vmul.f32 %v6444_v61, %v1805_v13  ;;  %v1799_v54 = vadd.f32 %v1775_v19, %v1751_v5  ;;  %v6630_v61 = vmul.f32 %v6462_v39, %v8153_v37 }
 0x50c   : > { %8156 = vst [vmem:[#allocation38_spill] sm:$0xff] %v6599_v60  ;;  %v6609_v52 = vpop.eup %4917  ;;  %4943 = vpow2.f32 %v2310_v30  ;;  %v6613_v36 = vpop.xlane.xlu0 %2135  ;;  %v6626_v30 = vmul.f32 %v6460_v41, %v8152_v32  ;;  %v6636_v6 = vmul.f32 %v4912_v4, %v1798_v11  ;;  %v6640_v17 = vmul.f32 %v6466_v12, %v8154_v23  ;;  %v1238_v41 = vld [vmem:[%s8163_s16] sm:$0xf]  ;;  %v8167_v23 = vld [vmem:[#allocation25_spill] sm:$0xff] }
 0x50d   : > { %8159 = vst [vmem:[#allocation41_spill] sm:$0xff] %v6616_v16  ;;  %v6618_v53 = vpop.eup %4919  ;;  %4945 = vrcp.f32 %v1707_v50  ;;  %8162 = vst [vmem:[#allocation44_spill] sm:$0xff] %v6630_v61  ;;  %v6644_v45 = vmul.f32 %v6470_v38, %v8155_v15  ;;  %v2224_v4 = vsub.f32 %v6529_v63, %v2200_v24  ;;  %v4453_v12 = vcombine.low %v1238_v41, %v1238_v41 }
 0x50e   : > { %v6622_v26 = vpop.eup %4921  ;;  %4947 = vrcp.f32 %v1704_v27  ;;  %8161 = vst [vmem:[#allocation43_spill] sm:$0xff] %v6626_v30  ;;  %v1705_v49 = vadd.f32 %v6618_v53, %v6609_v52  ;;  %v2266_v38 = vmul.f32 1.442695, %v2227_v21  ;;  %v2338_v5 = vmul.f32 1.442695, %v2299_v28  ;;  %4711 = vmatprep.subr.msk.bf16.mxu0 %vm2588_vm4, %v1238_v41 }
 0x50f   : > { %8160 = vst [vmem:[#allocation42_spill] sm:$0xff] %v6622_v26  ;;  %v6632_v13 = vpop.eup %4923  ;;  %4949 = vpow2.f32 %v2264_v42  ;;  %v6634_v50 = vpop.xlane.xlu1 %1970  ;;  %v2201_v19 = vmax.f32 %v6574_v58, %v6601_v29  ;;  %v2406_v42 = vmul.f32 %v6536_v31, %v8143_v55  ;;  %v2296_v37 = vsub.f32 %v6561_v43, %v2200_v24 }
 0x510   : > { %v6651_v39 = vpop.eup %4925  ;;  %4951 = vpow2.f32 %v2336_v51  ;;  %v6656_v25 = vpop.xlane.xlu0 %2003  ;;  %v2430_v63 = vmul.f32 %v6542_v57, %v8144_v18  ;;  %v6669_v51 = vrot.slane %v4453_v12, 2  ;;  %v2194_v21 = vmax.f32 %v6583_v48, %v6613_v36  ;;  %v8166_v18 = vld [vmem:[#allocation23_spill] sm:$0xff] }
 0x511   : > { %v6658_v27 = vpop.eup %4927  ;;  %v2407_v31 = vmul.f32 %v6571_v2, %v8146_v3  ;;  %v2431_v55 = vmul.f32 %v6580_v10, %v8147_v20  ;;  %v2794_v57 = vsel %vm2588_vm4, %v1238_v41, 0  ;;  %4953 = vrcp.f32 %v1705_v49  ;;  %v8168_v49 = vld [vmem:[#allocation18_spill] sm:$0xff] }
 0x512   : > { %8164 = vst [vmem:[#allocation45_spill] sm:$0xff] %v6658_v27  ;;  %v6664_v11 = vpop.eup %4929  ;;  %v2260_v24 = vmul.f32 1.442695, %v2224_v4  ;;  %v1749_v15 = vmul.f32 %v6489_v46, %v8166_v18  ;;  %v1773_v60 = vmul.f32 %v6492_v47, %v8167_v23  ;;  %4627 = vmatpush3.bf16.msra.mxu0 %v2794_v57  ;;  %4710 = vmatprep.subr.msk.bf16.mxu1 %vm2588_vm4, %v6669_v51  ;;  %4955 = vpow2.f32 %v2266_v38  ;;  %v8169_v57 = vld [vmem:[#allocation20_spill] sm:$0xff] }
 0x513   : > { %v6671_v32 = vpop.eup %4931  ;;  %v6675_v28 = vpop.xlane.xlu1 %2138  ;;  %v2225_v10 = vsub.f32 %v6574_v58, %v2201_v19  ;;  %v1748_v4 = vmul.f32 %v6476_v14, %v8168_v49  ;;  %4957 = vpow2.f32 %v2338_v5  ;;  %v2297_v47 = vsub.f32 %v6601_v29, %v2201_v19 }
 0x514   : > { %v6683_v43 = vpop.eup %4933  ;;  %v6685_v12 = vpop.xlane.xlu0 %2171  ;;  %v2195_v41 = vmax.f32 %v6634_v50, %v6675_v28  ;;  %v2356_v46 = vadd.f32 %v6671_v32, %v6664_v11  ;;  %v1772_v3 = vmul.f32 %v6480_v9, %v8169_v57  ;;  %v2332_v38 = vmul.f32 1.442695, %v2296_v37 }
 0x515   : > { %8165 = vst [vmem:[#allocation46_spill] sm:$0xff] %v6683_v43  ;;  %v6693_v2 = vpop.eup %4935  ;;  %v2218_v58 = vsub.f32 %v6583_v48, %v2194_v21  ;;  %v2454_v26 = vadd.f32 %v2430_v63, %v2406_v42  ;;  %v2455_v61 = vadd.f32 %v2431_v55, %v2407_v31  ;;  %4959 = vpow2.f32 %v2260_v24 }
 0x516   : > { %v4938_v20 = vpop.eup %4937  ;;  %v2290_v5 = vsub.f32 %v6613_v36, %v2194_v21  ;;  %v1797_v35 = vadd.f32 %v1773_v60, %v1749_v15  ;;  %v6712_v29 = vmul.f32 %v6591_v33, %v1799_v54  ;;  %v2262_v9 = vmul.f32 1.442695, %v2225_v10  ;;  %v8170_v21 = vld [vmem:[#allocation22_spill] sm:$0xff] }
 0x517   : > { %v6705_v27 = vpop.eup %4939  ;;  %v6708_v43 = vpop.xlane.xlu1 %2006  ;;  %v2219_v37 = vsub.f32 %v6634_v50, %v2195_v41  ;;  %v2478_v16 = vmul.f32 %v4938_v20, %v2454_v26  ;;  %4961 = vrcp.f32 %v2356_v46  ;;  %v2334_v42 = vmul.f32 1.442695, %v2297_v47 }
 0x518   : > { %v4942_v14 = vpop.eup %4941  ;;  %v1962_v30 = vpop.xlane.xlu0 %1961  ;;  %v2291_v36 = vsub.f32 %v6675_v28, %v2195_v41  ;;  %4963 = vpow2.f32 %v2332_v38  ;;  %v2248_v33 = vmul.f32 1.442695, %v2218_v58  ;;  %v1796_v63 = vadd.f32 %v1772_v3, %v1748_v4  ;;  %v8172_v4 = vld [vmem:[#allocation27_spill] sm:$0xff]  ;;  %v8173_v38 = vld [vmem:[#allocation29_spill] sm:$0xff] }
 0x519   : > { %v6714_v19 = vpop.eup %4943  ;;  %v2479_v48 = vmul.f32 %v4942_v14, %v2455_v61  ;;  %v2320_v20 = vmul.f32 1.442695, %v2290_v5  ;;  %v1821_v61 = vmul.f32 %v6651_v39, %v1797_v35  ;;  %v1754_v31 = vmul.f32 %v6521_v56, %v8170_v21 }
 0x51a   : > { %v6717_v1 = vpop.eup %4945  ;;  %v2357_v55 = vadd.f32 %v6714_v19, %v6705_v27  ;;  %v2250_v28 = vmul.f32 1.442695, %v2219_v37  ;;  %v2322_v41 = vmul.f32 1.442695, %v2291_v36  ;;  %v1755_v46 = vmul.f32 %v6548_v8, %v8172_v4  ;;  %v8174_v8 = vld [vmem:[#allocation30_spill] sm:$0xff] }
 0x51b   : > { %v6722_v15 = vpop.eup %4947  ;;  %v6724_v60 = vpop.xlane.xlu1 %2174  ;;  %v2501_v54 = vpack.c.bf16 %v2479_v48, %v2478_v16  ;;  %v8171_v16 = vld [vmem:[#allocation24_spill] sm:$0xff]  ;;  %v2590_v35 = vsel %vm2588_vm4, %v6669_v51, 0  ;;  %v1779_v58 = vmul.f32 %v6557_v44, %v8173_v38  ;;  %v1843_v5 = vpack.c.bf16 %v6712_v29, %v6636_v6  ;;  %v8176_v48 = vld [vmem:[#allocation31_spill] sm:$0xff] }
 0x51c   : > { %v6726_v50 = vpop.eup %4949  ;;  %4965 = vrcp.f32 %v2357_v55  ;;  %v2130_v26 = vpop.xlane.xlu0 %2129  ;;  %v1778_v3 = vmul.f32 %v6525_v59, %v8171_v16  ;;  %4601 = vmatpush3.bf16.msra.mxu1 %v2590_v35  ;;  %v1820_v59 = vmul.f32 %v6632_v13, %v1796_v63  ;;  %v8175_v44 = vpack.c.bf16 %v6532_v34, %v6513_v22  ;;  %v8178_v63 = vld [vmem:[#allocation28_spill] sm:$0xff] }
 0x51d   : > { %v6731_v24 = vpop.eup %4951  ;;  %4967 = vpow2.f32 %v2262_v9  ;;  %2526 = vrot.lane.b32.xlu1 %v2501_v54, %s5264_s19  ;;  %v2192_v10 = vmax.f32 %v1962_v30, %v2130_v26  ;;  %v1753_v9 = vmul.f32 %v6609_v52, %v8174_v8  ;;  %v1777_v13 = vmul.f32 %v6618_v53, %v8176_v48 }
 0x51e   : > { %4969 = vpow2.f32 %v2334_v42  ;;  %v4954_v51 = vpop.eup %4953  ;;  %v1842_v29 = vpack.c.bf16 %v1821_v61, %v1820_v59  ;;  %v1802_v52 = vadd.f32 %v1778_v3, %v1754_v31  ;;  %v2404_v22 = vmul.f32 %v6664_v11, %v8135_v7  ;;  %v8179_v31 = vld [vmem:[#allocation11_spill] sm:$0xff] }
 0x51f   : > { %4971 = vpow2.f32 %v2248_v33  ;;  %v2216_v56 = vsub.f32 %v1962_v30, %v2192_v10  ;;  %v2288_v39 = vsub.f32 %v2130_v26, %v2192_v10  ;;  %v1965_v47 = vpop.xlane.xlu1 %1964  ;;  %v2206_v30 = vmax.f32 %v6656_v25, %v6685_v12  ;;  %v6757_v55 = vpop.eup %4955  ;;  %v8177_v33 = vld [vmem:[#allocation26_spill] sm:$0xff]  ;;  %v8180_v10 = vld [vmem:[#allocation17_spill] sm:$0xff] }
 0x520   : > { %4973 = vpow2.f32 %v2320_v20  ;;  %v6742_v14 = vpop.xlane.xlu0 %1997  ;;  %v6759_v42 = vpop.eup %4957  ;;  %v1752_v54 = vmul.f32 %v6563_v0, %v8177_v33  ;;  %v1776_v20 = vmul.f32 %v6569_v40, %v8178_v63  ;;  %v1803_v34 = vadd.f32 %v1779_v58, %v1755_v46 }
 0x521   : > { %4975 = vpow2.f32 %v2250_v28  ;;  %v2244_v37 = vmul.f32 1.442695, %v2216_v56  ;;  %2735 = vrot.lane.b32.xlu1 %v8175_v44, %s5263_s20  ;;  %v2316_v6 = vmul.f32 1.442695, %v2288_v39  ;;  %v2405_v61 = vmul.f32 %v6705_v27, %v5837_v62 }
 0x522   : > { %4977 = vpow2.f32 %v2322_v41  ;;  %v2428_v28 = vmul.f32 %v6671_v32, %v8179_v31  ;;  %v2429_v3 = vmul.f32 %v6714_v19, %v8180_v10  ;;  %v6775_v0 = vpop.eup %4959  ;;  %v2230_v40 = vsub.f32 %v6656_v25, %v2206_v30 }
 0x523   : > { %v2133_v36 = vpop.xlane.xlu1 %2132  ;;  %v2207_v11 = vmax.f32 %v6708_v43, %v6724_v60  ;;  %4979 = vpow2.f32 %v2244_v37  ;;  %v1801_v41 = vadd.f32 %v1777_v13, %v1753_v9  ;;  %v1827_v35 = vmul.f32 %v6717_v1, %v1803_v34 }
 0x524   : > { %v2193_v53 = vmax.f32 %v1965_v47, %v2133_v36  ;;  %v6767_v26 = vpop.xlane.xlu0 %2165  ;;  %4981 = vpow2.f32 %v2316_v6  ;;  %v4962_v32 = vpop.eup %4961  ;;  %v2370_v19 = vadd.f32 %v6731_v24, %v6726_v50  ;;  %v2302_v56 = vsub.f32 %v6685_v12, %v2206_v30 }
 0x525   : > { %2737 = vrot.lane.b32.xlu1 %v1842_v29, %s5263_s20  ;;  %v1800_v25 = vadd.f32 %v1776_v20, %v1752_v54  ;;  %v1825_v58 = vmul.f32 %v4954_v51, %v1801_v41  ;;  %v6787_v59 = vpop.eup %4963  ;;  %v2452_v13 = vadd.f32 %v2428_v28, %v2404_v22  ;;  %v2371_v1 = vadd.f32 %v6759_v42, %v6757_v55 }
 0x526   : > { %v2217_v46 = vsub.f32 %v1965_v47, %v2193_v53  ;;  %v2289_v27 = vsub.f32 %v2133_v36, %v2193_v53  ;;  %v2453_v47 = vadd.f32 %v2429_v3, %v2405_v61  ;;  %v2272_v29 = vmul.f32 1.442695, %v2230_v40 }
 0x527   : > { %v6785_v39 = vpop.xlane.xlu1 %2000  ;;  %v2231_v36 = vsub.f32 %v6708_v43, %v2207_v11  ;;  %v1824_v12 = vmul.f32 %v6722_v15, %v1800_v25  ;;  %v2303_v51 = vsub.f32 %v6724_v60, %v2207_v11  ;;  %v2476_v54 = vmul.f32 %v4962_v32, %v2452_v13  ;;  %v8181_v32 = vld [vmem:[#allocation36_spill] sm:$0xff]  ;;  %v8182_v13 = vld [vmem:[#allocation35_spill] sm:$0xff] }
 0x528   : > { %v2246_v37 = vmul.f32 1.442695, %v2217_v46  ;;  %v2318_v44 = vmul.f32 1.442695, %v2289_v27  ;;  %v1980_v9 = vpop.xlane.xlu0 %1979  ;;  %v2344_v34 = vmul.f32 1.442695, %v2302_v56  ;;  %v1826_v43 = vmul.f32 %v6693_v2, %v1802_v52 }
 0x529   : > { %v4966_v6 = vpop.eup %4965  ;;  %2739 = vrot.lane.b32.xlu1 %v1843_v5, %s5263_s20  ;;  %v1844_v61 = vpack.c.bf16 %v1825_v58, %v1824_v12  ;;  %v2368_v15 = vadd.f32 %v6787_v59, %v6775_v0  ;;  %v6808_v60 = vmax.f32 %v6742_v14, %v6767_v26  ;;  %v2274_v11 = vmul.f32 1.442695, %v2231_v36 }
 0x52a   : > { %v6794_v30 = vpop.eup %4967  ;;  %4983 = vpow2.f32 %v2246_v37  ;;  %v2477_v20 = vmul.f32 %v4966_v6, %v2453_v47  ;;  %v1811_v2 = vadd.f32 %v6644_v45, %v6640_v17  ;;  %v2346_v46 = vmul.f32 1.442695, %v2303_v51 }
 0x52b   : > { %v6797_v22 = vpop.eup %4969  ;;  %4985 = vrcp.f32 %v2370_v19  ;;  %v6799_v53 = vpop.xlane.xlu1 %2168  ;;  %v1845_v27 = vpack.c.bf16 %v1827_v35, %v1826_v43  ;;  %v1761_v19 = vmul.f32 %v8181_v32, %v8166_v18  ;;  %v2228_v45 = vsub.f32 %v6742_v14, %v6808_v60  ;;  %v8185_v14 = vld [vmem:[#allocation39_spill] sm:$0xff]  ;;  %v8191_v32 = vld [vmem:[#allocation42_spill] sm:$0xff] }
 0x52c   : > { %v6802_v28 = vpop.eup %4971  ;;  %4987 = vpow2.f32 %v2318_v44  ;;  %v2500_v5 = vpack.c.bf16 %v2477_v20, %v2476_v54  ;;  %v2148_v3 = vpop.xlane.xlu0 %2147  ;;  %v2369_v25 = vadd.f32 %v6797_v22, %v6794_v30  ;;  %v1785_v47 = vmul.f32 %v8182_v13, %v8167_v23  ;;  %v8186_v54 = vld [vmem:[#allocation41_spill] sm:$0xff] }
 0x52d   : > { %v6810_v40 = vpop.eup %4973  ;;  %4989 = vrcp.f32 %v2371_v1  ;;  %2741 = vrot.lane.b32.xlu1 %v1844_v61, %s5263_s20  ;;  %v2198_v41 = vmax.f32 %v1980_v9, %v2148_v3  ;;  %v8183_v1 = vld [vmem:[#allocation12_spill] sm:$0xff]  ;;  %v1846_v20 = vpack.c.bf16 %v8186_v54, %v8185_v14  ;;  %v2268_v13 = vmul.f32 1.442695, %v2228_v45 }
 0x52e   : > { %v6815_v52 = vpop.eup %4975  ;;  %4991 = vpow2.f32 %v2272_v29  ;;  %2524 = vrot.lane.b32.xlu0 %v2500_v5, %s5264_s19  ;;  %v2362_v17 = vadd.f32 %v6810_v40, %v6802_v28  ;;  %v8184_v29 = vld [vmem:[#allocation34_spill] sm:$0xff]  ;;  %v8188_v61 = vld [vmem:[#allocation40_spill] sm:$0xff] }
 0x52f   : > { %v6820_v56 = vpop.eup %4977  ;;  %4993 = vpow2.f32 %v2344_v34  ;;  %v2222_v58 = vsub.f32 %v1980_v9, %v2198_v41  ;;  %v2294_v37 = vsub.f32 %v2148_v3, %v2198_v41  ;;  %v1983_v44 = vpop.xlane.xlu1 %1982  ;;  %v1760_v9 = vmul.f32 %v8183_v1, %v8168_v49  ;;  %v8187_v34 = vld [vmem:[#allocation37_spill] sm:$0xff]  ;;  %v8190_v41 = vld [vmem:[#allocation44_spill] sm:$0xff] }
 0x530   : > { %4995 = vrcp.f32 %v2368_v15  ;;  %v1974_v35 = vpop.xlane.xlu0 %1973  ;;  %v1784_v36 = vmul.f32 %v8184_v29, %v8169_v57  ;;  %v6835_v12 = vpop.eup %4979  ;;  %v2363_v51 = vadd.f32 %v6820_v56, %v6815_v52  ;;  %v1847_v43 = vpack.c.bf16 %v8188_v61, %v8187_v34  ;;  %v8192_v61 = vld [vmem:[#allocation46_spill] sm:$0xff] }
 0x531   : > { %4997 = vpow2.f32 %v2274_v11  ;;  %v2256_v6 = vmul.f32 1.442695, %v2222_v58  ;;  %2743 = vrot.lane.b32.xlu1 %v1845_v27, %s5263_s20  ;;  %v6843_v15 = vpop.eup %4981  ;;  %v2328_v5 = vmul.f32 1.442695, %v2294_v37  ;;  %v8189_v11 = vld [vmem:[#allocation43_spill] sm:$0xff]  ;;  %v6848_v58 = vmul.f32 %v8191_v32, %v1811_v2 }
 0x532   : > { %4999 = vpow2.f32 %v2346_v46  ;;  %v1810_v27 = vadd.f32 %v8190_v41, %v8189_v11  ;;  %v1809_v29 = vadd.f32 %v1785_v47, %v1761_v19  ;;  %v2360_v14 = vadd.f32 %v6843_v15, %v6835_v12 }
 0x533   : > { %5001 = vrcp.f32 %v2369_v25  ;;  %v2151_v3 = vpop.xlane.xlu1 %2150  ;;  %v1808_v37 = vadd.f32 %v1784_v36, %v1760_v9  ;;  %v8194_v36 = vld [vmem:[#allocation45_spill] sm:$0xff] }
 0x534   : > { %5003 = vrcp.f32 %v2362_v17  ;;  %v2199_v46 = vmax.f32 %v1983_v44, %v2151_v3  ;;  %v2142_v1 = vpop.xlane.xlu0 %2141  ;;  %v1833_v11 = vmul.f32 %v8192_v61, %v1809_v29  ;;  %v2300_v17 = vsub.f32 %v6767_v26, %v6808_v60  ;;  %v8195_v26 = vld [vmem:[#allocation33_spill] sm:$0xff]  ;;  %v8197_v61 = vld [vmem:[#allocation38_spill] sm:$0xff] }
 0x535   : > { %5005 = vpow2.f32 %v2256_v6  ;;  %2745 = vrot.lane.b32.xlu1 %v1846_v20, %s5263_s20  ;;  %v2196_v25 = vmax.f32 %v1974_v35, %v2142_v1 }
 0x536   : > { %5007 = vrcp.f32 %v2363_v51  ;;  %v2223_v54 = vsub.f32 %v1983_v44, %v2199_v46  ;;  %v2295_v34 = vsub.f32 %v2151_v3, %v2199_v46  ;;  %v1832_v44 = vmul.f32 %v8194_v36, %v1808_v37 }
 0x537   : > { %v6854_v2 = vpop.eup %4983  ;;  %5009 = vpow2.f32 %v2328_v5  ;;  %v2220_v19 = vsub.f32 %v1974_v35, %v2196_v25  ;;  %v2292_v45 = vsub.f32 %v2142_v1, %v2196_v25  ;;  %v1977_v47 = vpop.xlane.xlu1 %1976  ;;  %v2205_v3 = vmax.f32 %v6785_v39, %v6799_v53 }
 0x538   : > { %v6858_v41 = vpop.eup %4985  ;;  %5011 = vpow2.f32 %v2268_v13  ;;  %v2258_v6 = vmul.f32 1.442695, %v2223_v54  ;;  %v2330_v20 = vmul.f32 1.442695, %v2295_v34  ;;  %v1518_v9 = vpop.xlane.xlu0 %1517  ;;  %v1848_v46 = vpack.c.bf16 %v1833_v11, %v1832_v44 }
 0x539   : > { %8193 = vst [vmem:[#allocation22_spill] sm:$0xff] %v6858_v41  ;;  %v6861_v51 = vpop.eup %4987  ;;  %5013 = vrcp.f32 %v2360_v14  ;;  %v2252_v32 = vmul.f32 1.442695, %v2220_v19  ;;  %2747 = vrot.lane.b32.xlu1 %v1847_v43, %s5263_s20  ;;  %v1548_v60 = vmax.f32 %v8195_v26, %v1518_v9  ;;  %v2324_v13 = vmul.f32 1.442695, %v2292_v45  ;;  %v8202_v41 = vld [vmem:[#allocation16_spill] sm:$0xff] }
 0x53a   : > { %v6867_v35 = vpop.eup %4989  ;;  %v2361_v5 = vadd.f32 %v6861_v51, %v6854_v2  ;;  %5015 = vpow2.f32 %v2258_v6  ;;  %v2340_v29 = vmul.f32 1.442695, %v2300_v17  ;;  %v1834_v19 = vmul.f32 %v8197_v61, %v1810_v27 }
 0x53b   : > { %8196 = vst [vmem:[#allocation24_spill] sm:$0xff] %v6867_v35  ;;  %v6871_v1 = vpop.eup %4991  ;;  %5017 = vpow2.f32 %v2330_v20  ;;  %v1572_v14 = vsub.f32 %v8195_v26, %v1548_v60  ;;  %v1644_v25 = vsub.f32 %v1518_v9, %v1548_v60  ;;  %v2145_v37 = vpop.xlane.xlu1 %2144  ;;  %v2229_v45 = vsub.f32 %v6785_v39, %v2205_v3 }
 0x53c   : > { %v6874_v54 = vpop.eup %4993  ;;  %5019 = vrcp.f32 %v2361_v5  ;;  %v2197_v43 = vmax.f32 %v1977_v47, %v2145_v37  ;;  %v2010_v34 = vpop.xlane.xlu0 %2009  ;;  %v2301_v20 = vsub.f32 %v6799_v53, %v2205_v3  ;;  %v1849_v60 = vpack.c.bf16 %v6848_v58, %v1834_v19  ;;  %v8198_v5 = vld [vmem:[#allocation19_spill] sm:$0xff] }
 0x53d   : > { %v6877_v36 = vpop.eup %4995  ;;  %5021 = vpow2.f32 %v2252_v32  ;;  %v1616_v11 = vmul.f32 1.442695, %v1572_v14  ;;  %v1688_v6 = vmul.f32 1.442695, %v1644_v25  ;;  %2749 = vrot.lane.b32.xlu1 %v1848_v46, %s5263_s20  ;;  %v2411_v39 = vmul.f32 %v6815_v52, %v8198_v5  ;;  %v8199_v25 = vld [vmem:[#allocation32_spill] sm:$0xff] }
 0x53e   : > { %v6881_v17 = vpop.eup %4997  ;;  %5023 = vpow2.f32 %v2324_v13  ;;  %v2221_v9 = vsub.f32 %v1977_v47, %v2197_v43  ;;  %v2293_v44 = vsub.f32 %v2145_v37, %v2197_v43  ;;  %v2270_v47 = vmul.f32 1.442695, %v2229_v45 }
 0x53f   : > { %v6884_v26 = vpop.eup %4999  ;;  %5025 = vpow2.f32 %v2340_v29  ;;  %v1521_v27 = vpop.xlane.xlu1 %1520  ;;  %v8200_v29 = vld [vmem:[#allocation21_spill] sm:$0xff]  ;;  %v2342_v52 = vmul.f32 1.442695, %v2301_v20  ;;  %v2408_v45 = vmul.f32 %v6835_v12, %v8168_v49  ;;  %v2409_v20 = vmul.f32 %v6854_v2, %v8166_v18 }
 0x540   : > { %v6889_v32 = vpop.eup %5001  ;;  %5027 = vpow2.f32 %v1616_v11  ;;  %v2254_v46 = vmul.f32 1.442695, %v2221_v9  ;;  %v2326_v14 = vmul.f32 1.442695, %v2293_v44  ;;  %v1549_v61 = vmax.f32 %v8199_v25, %v1521_v27  ;;  %v2178_v53 = vpop.xlane.xlu0 %2177 }
 0x541   : > { %v6892_v3 = vpop.eup %5003  ;;  %5029 = vpow2.f32 %v1688_v6  ;;  %2751 = vrot.lane.b32.xlu1 %v1849_v60, %s5263_s20  ;;  %v2208_v13 = vmax.f32 %v2010_v34, %v2178_v53  ;;  %v2435_v58 = vmul.f32 %v6820_v56, %v8200_v29  ;;  %v2432_v6 = vmul.f32 %v6843_v15, %v8169_v57  ;;  %v8201_v15 = vld [vmem:[#allocation15_spill] sm:$0xff] }
 0x542   : > { %v6897_v37 = vpop.eup %5005  ;;  %5031 = vpow2.f32 %v2254_v46  ;;  %v1573_v43 = vsub.f32 %v8199_v25, %v1549_v61  ;;  %v1645_v19 = vsub.f32 %v1521_v27, %v1549_v61  ;;  %v2433_v27 = vmul.f32 %v6861_v51, %v8167_v23 }
 0x543   : > { %v5008_v11 = vpop.eup %5007  ;;  %5033 = vpow2.f32 %v2326_v14  ;;  %v2232_v9 = vsub.f32 %v2010_v34, %v2208_v13  ;;  %v1383_v44 = vpop.xlane.xlu1 %1382  ;;  %v2304_v34 = vsub.f32 %v2178_v53, %v2208_v13  ;;  %v2410_v25 = vmul.f32 %v6802_v28, %v8201_v15 }
 0x544   : > { %v6904_v60 = vpop.eup %5009  ;;  %v1618_v56 = vmul.f32 1.442695, %v1573_v43  ;;  %v1690_v29 = vmul.f32 1.442695, %v1645_v19  ;;  %v1380_v5 = vpop.xlane.xlu0 %1379  ;;  %5035 = vpow2.f32 %v2270_v47  ;;  %v2456_v19 = vadd.f32 %v2432_v6, %v2408_v45 }
 0x545   : > { %v6910_v46 = vpop.eup %5011  ;;  %v2366_v12 = vadd.f32 %v6904_v60, %v6897_v37  ;;  %v2276_v43 = vmul.f32 1.442695, %v2232_v9  ;;  %v2434_v51 = vmul.f32 %v6810_v40, %v8202_v41  ;;  %v2457_v53 = vadd.f32 %v2433_v27, %v2409_v20 }
 0x546   : > { %v5014_v14 = vpop.eup %5013  ;;  %5037 = vpow2.f32 %v1618_v56  ;;  %v2459_v13 = vadd.f32 %v2435_v58, %v2411_v39  ;;  %v2348_v23 = vmul.f32 1.442695, %v2304_v34 }
 0x547   : > { %v6916_v61 = vpop.eup %5015  ;;  %5039 = vpow2.f32 %v2342_v52  ;;  %v1527_v2 = vpop.xlane.xlu1 %1526  ;;  %v2480_v15 = vmul.f32 %v5014_v14, %v2456_v19  ;;  %v2458_v39 = vadd.f32 %v2434_v51, %v2410_v25 }
 0x548   : > { %v6920_v57 = vpop.eup %5017  ;;  %5041 = vpow2.f32 %v1690_v29  ;;  %v1551_v47 = vmax.f32 %v1383_v44, %v1527_v2  ;;  %v1524_v49 = vpop.xlane.xlu0 %1523  ;;  %v2483_v58 = vmul.f32 %v5008_v11, %v2459_v13 }
 0x549   : > { %v5020_v56 = vpop.eup %5019  ;;  %5043 = vrcp.f32 %v2366_v12  ;;  %v1550_v28 = vmax.f32 %v1380_v5, %v1524_v49  ;;  %v2367_v52 = vadd.f32 %v6920_v57, %v6916_v61  ;;  %v2482_v11 = vmul.f32 %v6892_v3, %v2458_v39 }
 0x54a   : > { %v6922_v18 = vpop.eup %5021  ;;  %v1575_v9 = vsub.f32 %v1383_v44, %v1551_v47  ;;  %v1647_v45 = vsub.f32 %v1527_v2, %v1551_v47  ;;  %v2481_v40 = vmul.f32 %v5020_v56, %v2457_v53  ;;  %5045 = vpow2.f32 %v2276_v43 }
 0x54b   : > { %v6926_v6 = vpop.eup %5023  ;;  %v1574_v29 = vsub.f32 %v1380_v5, %v1550_v28  ;;  %v6928_v41 = vpop.xlane.xlu1 %2018  ;;  %v1646_v34 = vsub.f32 %v1524_v49, %v1550_v28  ;;  %5047 = vpow2.f32 %v2348_v23  ;;  %v2503_v51 = vpack.c.bf16 %v2483_v58, %v2482_v11  ;;  %v8203_v11 = vld [vmem:[#allocation9_spill] sm:$0xff] }
 0x54c   : > { %v6930_v20 = vpop.eup %5025  ;;  %v1622_v27 = vmul.f32 1.442695, %v1575_v9  ;;  %v1694_v12 = vmul.f32 1.442695, %v1647_v45  ;;  %v2502_v14 = vpack.c.bf16 %v2481_v40, %v2480_v15  ;;  %v2016_v19 = vpop.xlane.xlu0 %2015  ;;  %v2364_v44 = vadd.f32 %v6926_v6, %v6922_v18 }
 0x54d   : > { %v6932_v35 = vpop.eup %5027  ;;  %5049 = vrcp.f32 %v2367_v52  ;;  %v1620_v5 = vmul.f32 1.442695, %v1574_v29  ;;  %v1692_v15 = vmul.f32 1.442695, %v1646_v34  ;;  %v2372_v28 = vadd.f32 %v6930_v20, %v6910_v46 }
 0x54e   : > { %v6936_v2 = vpop.eup %5029  ;;  %2528 = vrot.lane.b32.xlu0 %v2502_v14, %s5264_s19  ;;  %5051 = vpow2.f32 %v1622_v27 }
 0x54f   : > { %v5032_v25 = vpop.eup %5031  ;;  %v2013_v43 = vpop.xlane.xlu1 %2012  ;;  %5053 = vpow2.f32 %v1694_v12  ;;  %v1716_v23 = vadd.f32 %v6936_v2, %v6932_v35 }
 0x550   : > { %v5034_v49 = vpop.eup %5033  ;;  %v2184_v47 = vpop.xlane.xlu0 %2183  ;;  %5055 = vrcp.f32 %v2364_v44 }
 0x551   : > { %v2365_v53 = vadd.f32 %v5034_v49, %v5032_v25  ;;  %v2210_v13 = vmax.f32 %v2016_v19, %v2184_v47  ;;  %v6942_v56 = vpop.eup %5035  ;;  %5057 = vpow2.f32 %v1620_v5 }
 0x552   : > { %2530 = vrot.lane.b32.xlu0 %v2503_v51, %s5264_s19 }
 0x553   : > { %v6945_v3 = vpop.eup %5037  ;;  %5059 = vrcp.f32 %v2365_v53  ;;  %v2234_v52 = vsub.f32 %v2016_v19, %v2210_v13  ;;  %v2306_v9 = vsub.f32 %v2184_v47, %v2210_v13  ;;  %v2181_v45 = vpop.xlane.xlu1 %2180  ;;  %v6956_v19 = vmul.f32 %v6726_v50, %v8203_v11 }
 0x554   : > { %v6949_v40 = vpop.eup %5039  ;;  %5061 = vpow2.f32 %v1692_v15  ;;  %v2209_v29 = vmax.f32 %v2013_v43, %v2181_v45 }
 0x555   : > { %v5042_v39 = vpop.eup %5041  ;;  %5063 = vrcp.f32 %v1716_v23  ;;  %v2280_v58 = vmul.f32 1.442695, %v2234_v52  ;;  %v2352_v34 = vmul.f32 1.442695, %v2306_v9  ;;  %v8204_v23 = vld [vmem:[#allocation13_spill] sm:$0xff]  ;;  %v2373_v13 = vadd.f32 %v6949_v40, %v6942_v56 }
 0x556   : > { %v6951_v27 = vpop.eup %5043  ;;  %v1717_v12 = vadd.f32 %v5042_v39, %v6945_v3  ;;  %v2233_v14 = vsub.f32 %v2013_v43, %v2209_v29  ;;  %v2305_v44 = vsub.f32 %v2181_v45, %v2209_v29  ;;  %5065 = vrcp.f32 %v2372_v28 }
 0x557   : > { %v2187_v5 = vpop.xlane.xlu1 %2186  ;;  %v6958_v51 = vpop.eup %5045  ;;  %v6962_v53 = vmul.f32 %v6757_v55, %v8204_v23  ;;  %v2417_v28 = vmul.f32 %v6794_v30, %v5837_v62  ;;  %v2412_v52 = vmul.f32 %v6922_v18, %v8177_v33  ;;  %v2413_v9 = vmul.f32 %v5032_v25, %v8174_v8 }
 0x558   : > { %5067 = vrcp.f32 %v1717_v12  ;;  %v2278_v15 = vmul.f32 1.442695, %v2233_v14  ;;  %v2350_v47 = vmul.f32 1.442695, %v2305_v44  ;;  %v2211_v43 = vmax.f32 %v6928_v41, %v2187_v5  ;;  %v6969_v50 = vpop.eup %5047 }
 0x559   : > { %5069 = vpow2.f32 %v2280_v58  ;;  %v2436_v55 = vmul.f32 %v6926_v6, %v8178_v63  ;;  %v2437_v14 = vmul.f32 %v5034_v49, %v8176_v48  ;;  %v2374_v30 = vadd.f32 %v6874_v54, %v6871_v1 }
 0x55a   : > { %5071 = vpow2.f32 %v2352_v34  ;;  %v5050_v45 = vpop.eup %5049  ;;  %v2235_v29 = vsub.f32 %v6928_v41, %v2211_v43  ;;  %v2307_v58 = vsub.f32 %v2187_v5, %v2211_v43  ;;  %v2375_v18 = vadd.f32 %v6884_v26, %v6881_v17 }
 0x55b   : > { %5073 = vpow2.f32 %v2278_v15  ;;  %v2734_v12 = vpop.permute.xlu1 %2733  ;;  %v6978_v62 = vpop.eup %5051  ;;  %v2441_v6 = vmul.f32 %v6797_v22, %v8180_v10  ;;  %v2415_v49 = vmul.f32 %v6916_v61, %v8172_v4  ;;  %v2439_v44 = vmul.f32 %v6920_v57, %v8173_v38 }
 0x55c   : > { %5075 = vpow2.f32 %v2350_v47  ;;  %4628 = vmatprep.mubr.msk.bf16.mxu0 %vm1311_vm3, %v2734_v12  ;;  %v6987_v25 = vpop.eup %5053  ;;  %v2282_v41 = vmul.f32 1.442695, %v2235_v29  ;;  %v2354_v34 = vmul.f32 1.442695, %v2307_v58  ;;  %v2414_v15 = vmul.f32 %v6897_v37, %v8170_v21 }
 0x55d   : > { %v5056_v5 = vpop.eup %5055  ;;  %5077 = vrcp.f32 %v2373_v13  ;;  %v1719_v11 = vadd.f32 %v6987_v25, %v6978_v62  ;;  %v2438_v10 = vmul.f32 %v6904_v60, %v8171_v16  ;;  %v2460_v47 = vadd.f32 %v2436_v55, %v2412_v52 }
 0x55e   : > { %v6999_v22 = vpop.eup %5057  ;;  %5079 = vpow2.f32 %v2282_v41  ;;  %v2461_v23 = vadd.f32 %v2437_v14, %v2413_v9  ;;  %v1764_v61 = vmul.f32 %v6932_v35, %v8177_v33  ;;  %v1765_v13 = vmul.f32 %v6945_v3, %v8174_v8  ;;  %v8205_v3 = vld [vmem:[#allocation14_spill] sm:$0xff] }
 0x55f   : > { %5081 = vrcp.f32 %v1719_v11  ;;  %v1788_v43 = vmul.f32 %v6936_v2, %v8178_v63  ;;  %v1789_v37 = vmul.f32 %v5042_v39, %v8176_v48  ;;  %v2484_v60 = vmul.f32 %v5056_v5, %v2460_v47  ;;  %v8206_v5 = vld [vmem:[#allocation10_spill] sm:$0xff] }
 0x560   : > { %v5060_v57 = vpop.eup %5059  ;;  %5083 = vpow2.f32 %v2354_v34  ;;  %v2463_v12 = vadd.f32 %v2439_v44, %v2415_v49  ;;  %v2416_v35 = vmul.f32 %v6775_v0, %v8135_v7  ;;  %v2440_v55 = vmul.f32 %v6787_v59, %v8179_v31 }
 0x561   : > { %v5062_v29 = vpop.eup %5061  ;;  %v2485_v58 = vmul.f32 %v5060_v57, %v2461_v23  ;;  %v2443_v14 = vmul.f32 %v6759_v42, %v8205_v3  ;;  %5085 = vrcp.f32 %v2375_v18  ;;  %v2462_v39 = vadd.f32 %v2438_v10, %v2414_v15  ;;  %v8207_v57 = vld [vmem:[#allocation24_spill] sm:$0xff]  ;;  %v8212_v3 = vld [vmem:[#allocation22_spill] sm:$0xff] }
 0x562   : > { %v5064_v52 = vpop.eup %5063  ;;  %v1718_v9 = vadd.f32 %v5062_v29, %v6999_v22  ;;  %v2487_v41 = vmul.f32 %v5050_v45, %v2463_v12  ;;  %v1812_v49 = vadd.f32 %v1788_v43, %v1764_v61  ;;  %v1813_v44 = vadd.f32 %v1789_v37, %v1765_v13  ;;  %v8208_v43 = vld [vmem:[#allocation23_spill] sm:$0xff] }
 0x563   : > { %v2504_v2 = vpack.c.bf16 %v2485_v58, %v2484_v60  ;;  %v7015_v34 = vpop.eup %5065  ;;  %v2442_v11 = vmul.f32 %v6731_v24, %v8206_v5  ;;  %v2486_v7 = vmul.f32 %v6951_v27, %v2462_v39  ;;  %v2465_v31 = vadd.f32 %v2441_v6, %v2417_v28  ;;  %v8209_v60 = vld [vmem:[#allocation25_spill] sm:$0xff] }
 0x564   : > { %5087 = vrcp.f32 %v1718_v9  ;;  %v2376_v0 = vadd.f32 %v6969_v50, %v6958_v51  ;;  %v1836_v59 = vmul.f32 %v5064_v52, %v1812_v49  ;;  %v2464_v10 = vadd.f32 %v2440_v55, %v2416_v35  ;;  %v8210_v9 = vld [vmem:[#allocation18_spill] sm:$0xff]  ;;  %v8211_v35 = vld [vmem:[#allocation20_spill] sm:$0xff] }
 0x565   : > { %v5068_v47 = vpop.eup %5067  ;;  %5089 = vrcp.f32 %v2374_v30  ;;  %2532 = vrot.lane.b32.xlu0 %v2504_v2, %s5264_s19  ;;  %v2505_v15 = vpack.c.bf16 %v2487_v41, %v2486_v7  ;;  %v2489_v24 = vmul.f32 %v6889_v32, %v2465_v31  ;;  %v2467_v30 = vadd.f32 %v2443_v14, %v6962_v53  ;;  %v8213_v41 = vld [vmem:[#allocation19_spill] sm:$0xff]  ;;  %v8216_v31 = vld [vmem:[#allocation16_spill] sm:$0xff] }
 0x566   : > { %v7021_v42 = vpop.eup %5069  ;;  %v1837_v45 = vmul.f32 %v5068_v47, %v1813_v44  ;;  %v2466_v27 = vadd.f32 %v2442_v11, %v6956_v19  ;;  %v2488_v6 = vmul.f32 %v6877_v36, %v2464_v10  ;;  %v2421_v37 = vmul.f32 %v6942_v56, %v8208_v43  ;;  %v8215_v47 = vld [vmem:[#allocation15_spill] sm:$0xff] }
 0x567   : > { %v7025_v18 = vpop.eup %5071  ;;  %v2491_v13 = vmul.f32 %v8207_v57, %v2467_v30  ;;  %v2445_v58 = vmul.f32 %v6949_v40, %v8209_v60  ;;  %5091 = vrcp.f32 %v2376_v0  ;;  %v1767_v19 = vmul.f32 %v6978_v62, %v8172_v4 }
 0x568   : > { %v5074_v23 = vpop.eup %5073  ;;  %v1850_v61 = vpack.c.bf16 %v1837_v45, %v1836_v59  ;;  %v1791_v53 = vmul.f32 %v6987_v25, %v8173_v38  ;;  %v2378_v36 = vadd.f32 %v7025_v18, %v7021_v42  ;;  %v2506_v52 = vpack.c.bf16 %v2489_v24, %v2488_v6 }
 0x569   : > { %v5076_v28 = vpop.eup %5075  ;;  %2534 = vrot.lane.b32.xlu0 %v2505_v15, %s5264_s19  ;;  %v2420_v56 = vmul.f32 %v6910_v46, %v8210_v9  ;;  %v2444_v40 = vmul.f32 %v6930_v20, %v8211_v35  ;;  %v2490_v14 = vmul.f32 %v8212_v3, %v2466_v27  ;;  %v1766_v62 = vmul.f32 %v6999_v22, %v8170_v21  ;;  %v8214_v46 = vld [vmem:[#allocation21_spill] sm:$0xff] }
 0x56a   : > { %v2377_v32 = vadd.f32 %v5076_v28, %v5074_v23  ;;  %2753 = vrot.lane.b32.xlu1 %v1850_v61, %s5263_s20  ;;  %v5078_v12 = vpop.eup %5077  ;;  %v1790_v25 = vmul.f32 %v5062_v29, %v8171_v16  ;;  %v2469_v39 = vadd.f32 %v2445_v58, %v2421_v37  ;;  %v2423_v49 = vmul.f32 %v6881_v17, %v8213_v41 }
 0x56b   : > { %v5080_v55 = vpop.eup %5079  ;;  %v2447_v44 = vmul.f32 %v6884_v26, %v8214_v46  ;;  %v2507_v5 = vpack.c.bf16 %v2491_v13, %v2490_v14  ;;  %v1815_v11 = vadd.f32 %v1791_v53, %v1767_v19  ;;  %v2422_v7 = vmul.f32 %v6871_v1, %v8215_v47 }
 0x56c   : > { %5093 = vrcp.f32 %v2377_v32  ;;  %v5082_v2 = vpop.eup %5081  ;;  %v2446_v22 = vmul.f32 %v6874_v54, %v8216_v31  ;;  %v2468_v0 = vadd.f32 %v2444_v40, %v2420_v56  ;;  %v2493_v59 = vmul.f32 %v5078_v12, %v2469_v39 }
 0x56d   : > { %2536 = vrot.lane.b32.xlu0 %v2506_v52, %s5264_s19  ;;  %v5084_v20 = vpop.eup %5083  ;;  %5095 = vrcp.f32 %v2378_v36  ;;  %v1814_v15 = vadd.f32 %v1790_v25, %v1766_v62  ;;  %v1839_v10 = vmul.f32 %v5082_v2, %v1815_v11  ;;  %v2471_v24 = vadd.f32 %v2447_v44, %v2423_v49 }
 0x56e   : > { %v2379_v29 = vadd.f32 %v5084_v20, %v5080_v55  ;;  %v5086_v45 = vpop.eup %5085  ;;  %v2492_v26 = vmul.f32 %v7015_v34, %v2468_v0  ;;  %v2470_v27 = vadd.f32 %v2446_v22, %v2422_v7  ;;  %v2424_v54 = vmul.f32 %v6958_v51, %v8177_v33 }
 0x56f   : > { %v2495_v6 = vmul.f32 %v5086_v45, %v2471_v24  ;;  %v2425_v13 = vmul.f32 %v5074_v23, %v8174_v8  ;;  %v2448_v43 = vmul.f32 %v6969_v50, %v8178_v63  ;;  %v2449_v37 = vmul.f32 %v5076_v28, %v8176_v48  ;;  %v5147_v24 = vld [vmem:[#allocation2 + $0x10] sm:$0xff] }
 0x570   : > { %5097 = vrcp.f32 %v2379_v29  ;;  %v2508_v1 = vpack.c.bf16 %v2493_v59, %v2492_v26  ;;  %v2426_v8 = vmul.f32 %v7021_v42, %v8170_v21  ;;  %v2427_v33 = vmul.f32 %v5080_v55, %v8172_v4  ;;  %v8217_v59 = vld [vmem:[#allocation8_spill] sm:$0xff] }
 0x571   : > { %v5088_v17 = vpop.eup %5087  ;;  %2538 = vrot.lane.b32.xlu0 %v2507_v5, %s5264_s19  ;;  %v2472_v32 = vadd.f32 %v2448_v43, %v2424_v54  ;;  %v2473_v19 = vadd.f32 %v2449_v37, %v2425_v13  ;;  %v2450_v48 = vmul.f32 %v7025_v18, %v8171_v16  ;;  %v2451_v63 = vmul.f32 %v5084_v20, %v8173_v38 }
 0x572   : > { %v5090_v30 = vpop.eup %5089  ;;  %v1838_v61 = vmul.f32 %v5088_v17, %v1814_v15  ;;  %v2951_v45 = vsub.s32 2, %v8217_v59 }
 0x573   : > { %v2494_v34 = vmul.f32 %v5090_v30, %v2470_v27  ;;  %v2474_v12 = vadd.f32 %v2450_v48, %v2426_v8  ;;  %v2475_v36 = vadd.f32 %v2451_v63, %v2427_v33  ;;  %v5149_v27 = vld [vmem:[#allocation2] sm:$0xff] }
 0x574   : > { %v1851_v57 = vpack.c.bf16 %v1839_v10, %v1838_v61  ;;  %v5092_v60 = vpop.eup %5091  ;;  %v7105_v61 = vld [vmem:[%s5385_s0] sm:$0xff] }
 0x575   : > { %2540 = vrot.lane.b32.xlu0 %v2508_v1, %s5264_s19  ;;  %v2509_v58 = vpack.c.bf16 %v2495_v6, %v2494_v34  ;;  %v2496_v51 = vmul.f32 %v5092_v60, %v2472_v32  ;;  %v7108_v1 = vrot.slane %v7105_v61, %v2951_v45  ;;  %v5150_v60 = vld [vmem:[#allocation2 + $0x18] sm:$0xff]  ;;  %v5151_v32 = vld [vmem:[#allocation2 + $0x8] sm:$0xff] }
 0x576   : > { %2755 = vrot.lane.b32.xlu1 %v1851_v57, %s5263_s20 }
 0x579   : > { %v5094_v53 = vpop.eup %5093  ;;  %2542 = vrot.lane.b32.xlu0 %v2509_v58, %s5264_s19 }
 0x57a   : > { %v2497_v50 = vmul.f32 %v5094_v53, %v2473_v19  ;;  %v5096_v23 = vpop.eup %5095 }
 0x57b   : > { %v2498_v9 = vmul.f32 %v5096_v23, %v2474_v12 }
 0x57c   : > { %v2510_v28 = vpack.c.bf16 %v2497_v50, %v2496_v51 }
 0x57d   : > { %v5098_v52 = vpop.eup %5097 }
 0x57e   : > { %2544 = vrot.lane.b32.xlu0 %v2510_v28, %s5264_s19  ;;  %v2499_v56 = vmul.f32 %v5098_v52, %v2475_v36 }
 0x580   : > { %v2511_v35 = vpack.c.bf16 %v2499_v56, %v2498_v9 }
 0x582   : > { %2546 = vrot.lane.b32.xlu0 %v2511_v35, %s5264_s19 }
 0x58f   : > { %v2527_v21 = vpop.permute.xlu1 %2526 }
 0x593   : > { %v2736_v4 = vpop.permute.xlu1 %2735 }
 0x594   : > { %4629 = vmatmul.mubr.msk.bf16.vlgmr.msra.gmra.mxu0 %vm1311_vm3, %v2736_v4 }
 0x597   : > { %v2738_v16 = vpop.permute.xlu1 %2737 }
 0x598   : > { %4632 = vmatprep.mubr.msk.bf16.mxu0 %vm1311_vm3, %v2738_v16 }
 0x59b   : > { %v2740_v38 = vpop.permute.xlu1 %2739 }
 0x59c   : > { %4633 = vmatmul.mubr.msk.bf16.gmra.mxu0 %vm1311_vm3, %v2740_v38  ;;  %v5152_v38 = vld [vmem:[#allocation2 + $0x30] sm:$0xff] }
 0x59f   : > { %v2742_v42 = vpop.permute.xlu1 %2741 }
 0x5a0   : > { %v2525_v18 = vpop.permute.xlu0 %2524  ;;  %4636 = vmatprep.mubr.msk.bf16.mxu0 %vm1311_vm3, %v2742_v42 }
 0x5a1   : > { %4602 = vmatprep.mubr.msk.bf16.mxu1 %vm1311_vm3, %v2525_v18  ;;  %v5153_v18 = vld [vmem:[#allocation2 + $0x20] sm:$0xff] }
 0x5a2   : > { %4603 = vmatmul.mubr.msk.bf16.vlgmr.msra.gmra.mxu1 %vm1311_vm3, %v2527_v21 }
 0x5a3   : > { %v2744_v40 = vpop.permute.xlu1 %2743 }
 0x5a4   : > { %4637 = vmatmul.mubr.msk.bf16.gmra.mxu0 %vm1311_vm3, %v2744_v40 }
 0x5a7   : > { %v2746_v55 = vpop.permute.xlu1 %2745 }
 0x5a8   : > { %4640 = vmatprep.mubr.msk.bf16.mxu0 %vm1311_vm3, %v2746_v55 }
 0x5ab   : > { %v2748_v3 = vpop.permute.xlu1 %2747 }
 0x5ac   : > { %4641 = vmatmul.mubr.msk.bf16.gmra.mxu0 %vm1311_vm3, %v2748_v3 }
 0x5af   : > { %v2750_v14 = vpop.permute.xlu1 %2749 }
 0x5b0   : > { %4644 = vmatprep.mubr.msk.bf16.mxu0 %vm1311_vm3, %v2750_v14 }
 0x5b3   : > { %v2752_v62 = vpop.permute.xlu1 %2751 }
 0x5b4   : > { %4645 = vmatmul.mubr.msk.bf16.gmra.mxu0 %vm1311_vm3, %v2752_v62 }
 0x5c0   : > { %v2529_v25 = vpop.permute.xlu0 %2528 }
 0x5c1   : > { %4606 = vmatprep.mubr.msk.bf16.mxu1 %vm1311_vm3, %v2529_v25 }
 0x5c4   : > { %v2531_v2 = vpop.permute.xlu0 %2530 }
 0x5c5   : > { %4607 = vmatmul.mubr.msk.bf16.gmra.mxu1 %vm1311_vm3, %v2531_v2 }
 0x5d7   : > { %v2533_v39 = vpop.permute.xlu0 %2532 }
 0x5d8   : > { %4610 = vmatprep.mubr.msk.bf16.mxu1 %vm1311_vm3, %v2533_v39  ;;  %v5154_v39 = vld [vmem:[#allocation2 + $0x38] sm:$0xff] }
 0x5db   : > { %v2535_v41 = vpop.permute.xlu0 %2534 }
 0x5dc   : > { %v2754_v49 = vpop.permute.xlu1 %2753  ;;  %4611 = vmatmul.mubr.msk.bf16.gmra.mxu1 %vm1311_vm3, %v2535_v41 }
 0x5dd   : > { %4648 = vmatprep.mubr.msk.bf16.mxu0 %vm1311_vm3, %v2754_v49  ;;  %v5155_v49 = vld [vmem:[#allocation2 + $0x28] sm:$0xff] }
 0x5df   : > { %v2537_v46 = vpop.permute.xlu0 %2536 }
 0x5e0   : > { %4614 = vmatprep.mubr.msk.bf16.mxu1 %vm1311_vm3, %v2537_v46 }
 0x5e3   : > { %v2539_v44 = vpop.permute.xlu0 %2538 }
 0x5e4   : > { %4615 = vmatmul.mubr.msk.bf16.gmra.mxu1 %vm1311_vm3, %v2539_v44 }
 0x5e7   : > { %v2541_v20 = vpop.permute.xlu0 %2540 }
 0x5e8   : > { %v2756_v5 = vpop.permute.xlu1 %2755  ;;  %4618 = vmatprep.mubr.msk.bf16.mxu1 %vm1311_vm3, %v2541_v20 }
 0x5e9   : > { %4649 = vmatmul.mubr.msk.bf16.gmra.mxu0 %vm1311_vm3, %v2756_v5 }
 0x5eb   : > { %v2543_v11 = vpop.permute.xlu0 %2542 }
 0x5ec   : > { %4619 = vmatmul.mubr.msk.bf16.gmra.mxu1 %vm1311_vm3, %v2543_v11 }
 0x5f0   : > { %v2545_v47 = vpop.permute.xlu0 %2544 }
 0x5f1   : > { %4622 = vmatprep.mubr.msk.bf16.mxu1 %vm1311_vm3, %v2545_v47 }
 0x5f4   : > { %v2547_v7 = vpop.permute.xlu0 %2546 }
 0x5f5   : > { %4623 = vmatmul.mubr.msk.bf16.gmra.mxu1 %vm1311_vm3, %v2547_v7 }
 0x654   : > { %v4630_v31 = vpop.f32.mrf.mxu0 }
 0x656   : > { %v2830_v22 = vpop.f32.mrf.mxu0 }
 0x658   : > { %v4631_v15 = vpop.f32.mrf.mxu0 }
 0x65a   : > { %v2833_v57 = vpop.f32.mrf.mxu0 }
 0x65c   : > { %v4634_v51 = vpop.f32.mrf.mxu0 }
 0x65e   : > { %v2846_v23 = vpop.f32.mrf.mxu0 }
 0x660   : > { %v4635_v28 = vpop.f32.mrf.mxu0 }
 0x662   : > { %v4604_v29 = vpop.f32.mrf.mxu1  ;;  %v2849_v12 = vpop.f32.mrf.mxu0 }
 0x663   : > { %v2839_v0 = vadd.f32 %v4630_v31, %v4604_v29 }
 0x664   : > { %v2626_v10 = vpop.f32.mrf.mxu1  ;;  %v4638_v36 = vpop.f32.mrf.mxu0 }
 0x665   : > { %v2831_v17 = vadd.f32 %v2830_v22, %v2626_v10  ;;  %v2927_v30 = vadd.f32 %v5147_v24, %v2839_v0 }
 0x666   : > { %v4605_v26 = vpop.f32.mrf.mxu1  ;;  %v2862_v9 = vpop.f32.mrf.mxu0 }
 0x667   : > { %v2925_v6 = vadd.f32 %v5149_v27, %v2831_v17  ;;  %v2842_v54 = vadd.f32 %v4631_v15, %v4605_v26  ;;  %v7114_v34 = vadd.f32 %v7108_v1, %v2927_v30  ;;  %v5156_v26 = vld [vmem:[#allocation2 + $0x50] sm:$0xff]  ;;  %v5157_v27 = vld [vmem:[#allocation2 + $0x40] sm:$0xff] }
 0x668   : > { %v2629_v13 = vpop.f32.mrf.mxu1  ;;  %v4639_v16 = vpop.f32.mrf.mxu0 }
 0x669   : > { %v7111_v43 = vadd.f32 %v7108_v1, %v2925_v6  ;;  %v2834_v37 = vadd.f32 %v2833_v57, %v2629_v13  ;;  %v2928_v58 = vadd.f32 %v5150_v60, %v2842_v54  ;;  %v2989_v48 = vsel %vm655_vm1, %v7114_v34, 0.0 }
 0x66a   : > { %v2865_v25 = vpop.f32.mrf.mxu0 }
 0x66b   : > { %v2926_v19 = vadd.f32 %v5151_v32, %v2834_v37  ;;  %v2983_v53 = vsel %vm655_vm1, %v7111_v43, 0.0  ;;  %v7122_v33 = vadd.f32 %v7108_v1, %v2928_v58 }
 0x66c   : > { %2984 = vadd.xlane.f32.xlu0 %v2983_v53  ;;  %v4642_v5 = vpop.f32.mrf.mxu0 }
 0x66d   : > { %v7119_v8 = vadd.f32 %v7108_v1, %v2926_v19  ;;  %v2992_v50 = vsel %vm655_vm1, %v7122_v33, 0.0  ;;  %v5158_v19 = vld [vmem:[#allocation2 + $0x58] sm:$0xff] }
 0x66e   : > { %v2878_v31 = vpop.f32.mrf.mxu0 }
 0x66f   : > { %v2986_v63 = vsel %vm655_vm1, %v7119_v8, 0.0 }
 0x670   : > { %2990 = vadd.xlane.f32.xlu0 %v2989_v48  ;;  %2987 = vadd.xlane.f32.xlu1 %v2986_v63  ;;  %v4643_v29 = vpop.f32.mrf.mxu0  ;;  %v5159_v48 = vld [vmem:[#allocation2 + $0x48] sm:$0xff] }
 0x672   : > { %v2881_v15 = vpop.f32.mrf.mxu0 }
 0x674   : > { %2993 = vadd.xlane.f32.xlu0 %v2992_v50  ;;  %v4646_v57 = vpop.f32.mrf.mxu0 }
 0x685   : > { %v4608_v52 = vpop.f32.mrf.mxu1 }
 0x686   : > { %v2855_v56 = vadd.f32 %v4634_v51, %v4608_v52  ;;  %v5160_v52 = vld [vmem:[#allocation2 + $0x70] sm:$0xff] }
 0x687   : > { %v2642_v35 = vpop.f32.mrf.mxu1 }
 0x688   : > { %v2847_v21 = vadd.f32 %v2846_v23, %v2642_v35  ;;  %v2931_v42 = vadd.f32 %v5152_v38, %v2855_v56  ;;  %v2894_v23 = vpop.f32.mrf.mxu0 }
 0x689   : > { %v4609_v4 = vpop.f32.mrf.mxu1 }
 0x68a   : > { %v2929_v40 = vadd.f32 %v5153_v18, %v2847_v21  ;;  %v2858_v55 = vadd.f32 %v4635_v28, %v4609_v4  ;;  %v7134_v2 = vadd.f32 %v7108_v1, %v2931_v42  ;;  %v5161_v4 = vld [vmem:[#allocation2 + $0x60] sm:$0xff]  ;;  %v4647_v18 = vpop.f32.mrf.mxu0 }
 0x68b   : > { %v2645_v3 = vpop.f32.mrf.mxu1 }
 0x68c   : > { %v7131_v14 = vadd.f32 %v7108_v1, %v2929_v40  ;;  %v2850_v62 = vadd.f32 %v2849_v12, %v2645_v3  ;;  %v2932_v41 = vadd.f32 %v5154_v39, %v2858_v55  ;;  %v3001_v47 = vsel %vm655_vm1, %v7134_v2, 0.0 }
 0x68e   : > { %v2930_v46 = vadd.f32 %v5155_v49, %v2850_v62  ;;  %v2995_v44 = vsel %vm655_vm1, %v7131_v14, 0.0  ;;  %v7142_v11 = vadd.f32 %v7108_v1, %v2932_v41  ;;  %v5163_v49 = vld [vmem:[#allocation2 + $0x68] sm:$0xff] }
 0x68f   : > { %2996 = vadd.xlane.f32.xlu0 %v2995_v44 }
 0x690   : > { %v7139_v20 = vadd.f32 %v7108_v1, %v2930_v46  ;;  %v3004_v22 = vsel %vm655_vm1, %v7142_v11, 0.0 }
 0x692   : > { %v2998_v7 = vsel %vm655_vm1, %v7139_v20, 0.0 }
 0x693   : > { %3002 = vadd.xlane.f32.xlu0 %v3001_v47  ;;  %2999 = vadd.xlane.f32.xlu1 %v2998_v7  ;;  %v2897_v7 = vpop.f32.mrf.mxu0 }
 0x697   : > { %3005 = vadd.xlane.f32.xlu1 %v3004_v22 }
 0x69c   : > { %v4612_v0 = vpop.f32.mrf.mxu1 }
 0x69d   : > { %v2871_v45 = vadd.f32 %v4638_v36, %v4612_v0 }
 0x69e   : > { %v2658_v10 = vpop.f32.mrf.mxu1 }
 0x69f   : > { %v2863_v17 = vadd.f32 %v2862_v9, %v2658_v10  ;;  %v2935_v24 = vadd.f32 %v5156_v26, %v2871_v45 }
 0x6a0   : > { %v4613_v30 = vpop.f32.mrf.mxu1 }
 0x6a1   : > { %v2933_v6 = vadd.f32 %v5157_v27, %v2863_v17  ;;  %v2874_v54 = vadd.f32 %v4639_v16, %v4613_v30  ;;  %v7154_v58 = vadd.f32 %v7108_v1, %v2935_v24  ;;  %v5164_v17 = vld [vmem:[#allocation2 + $0x90] sm:$0xff]  ;;  %v5165_v24 = vld [vmem:[#allocation2 + $0x80] sm:$0xff] }
 0x6a2   : > { %v2661_v13 = vpop.f32.mrf.mxu1 }
 0x6a3   : > { %v7151_v37 = vadd.f32 %v7108_v1, %v2933_v6  ;;  %v2866_v60 = vadd.f32 %v2865_v25, %v2661_v13  ;;  %v2936_v53 = vadd.f32 %v5158_v19, %v2874_v54  ;;  %v3013_v35 = vsel %vm655_vm1, %v7154_v58, 0.0  ;;  %v5162_v25 = vld [vmem:[#allocation2 + $0x78] sm:$0xff] }
 0x6a4   : > { %v4616_v32 = vpop.f32.mrf.mxu1 }
 0x6a5   : > { %v2934_v63 = vadd.f32 %v5159_v48, %v2866_v60  ;;  %v2887_v51 = vadd.f32 %v4642_v5, %v4616_v32  ;;  %v3007_v50 = vsel %vm655_vm1, %v7151_v37, 0.0  ;;  %v7164_v21 = vadd.f32 %v7108_v1, %v2936_v53  ;;  %v5166_v53 = vld [vmem:[#allocation2 + $0x98] sm:$0xff] }
 0x6a6   : > { %3008 = vadd.xlane.f32.xlu0 %v3007_v50  ;;  %v2674_v28 = vpop.f32.mrf.mxu1 }
 0x6a7   : > { %v7159_v12 = vadd.f32 %v7108_v1, %v2934_v63  ;;  %v2879_v36 = vadd.f32 %v2878_v31, %v2674_v28  ;;  %v2939_v9 = vadd.f32 %v5160_v52, %v2887_v51  ;;  %v3016_v5 = vsel %vm655_vm1, %v7164_v21, 0.0  ;;  %v5167_v63 = vld [vmem:[#allocation2 + $0x88] sm:$0xff] }
 0x6a8   : > { %v4617_v56 = vpop.f32.mrf.mxu1 }
 0x6a9   : > { %v2937_v16 = vadd.f32 %v5161_v4, %v2879_v36  ;;  %v2890_v38 = vadd.f32 %v4643_v29, %v4617_v56  ;;  %v3010_v42 = vsel %vm655_vm1, %v7159_v12, 0.0  ;;  %v7172_v62 = vadd.f32 %v7108_v1, %v2939_v9  ;;  %v4650_v0 = vpop.f32.mrf.mxu0 }
 0x6aa   : > { %3014 = vadd.xlane.f32.xlu0 %v3013_v35  ;;  %3011 = vadd.xlane.f32.xlu1 %v3010_v42  ;;  %v2677_v40 = vpop.f32.mrf.mxu1  ;;  %v5168_v42 = vld [vmem:[#allocation2 + $0xb0] sm:$0xff] }
 0x6ab   : > { %v7169_v55 = vadd.f32 %v7108_v1, %v2937_v16  ;;  %v2882_v3 = vadd.f32 %v2881_v15, %v2677_v40  ;;  %v2940_v39 = vadd.f32 %v5162_v25, %v2890_v38  ;;  %v3025_v10 = vsel %vm655_vm1, %v7172_v62, 0.0  ;;  %v2910_v60 = vpop.f32.mrf.mxu0  ;;  %v5169_v40 = vld [vmem:[#allocation2 + $0xa0] sm:$0xff] }
 0x6ac   : > { %v4620_v41 = vpop.f32.mrf.mxu1 }
 0x6ad   : > { %v2938_v46 = vadd.f32 %v5163_v49, %v2882_v3  ;;  %v2903_v44 = vadd.f32 %v4646_v57, %v4620_v41  ;;  %v3019_v47 = vsel %vm655_vm1, %v7169_v55, 0.0  ;;  %v7182_v45 = vadd.f32 %v7108_v1, %v2940_v39  ;;  %v4651_v52 = vpop.f32.mrf.mxu0 }
 0x6ae   : > { %3017 = vadd.xlane.f32.xlu1 %v3016_v5  ;;  %3020 = vadd.xlane.f32.xlu0 %v3019_v47  ;;  %v2690_v31 = vpop.f32.mrf.mxu1  ;;  %v5170_v47 = vld [vmem:[#allocation2 + $0xb8] sm:$0xff] }
 0x6af   : > { %v7179_v22 = vadd.f32 %v7108_v1, %v2938_v46  ;;  %v2895_v29 = vadd.f32 %v2894_v23, %v2690_v31  ;;  %v2943_v26 = vadd.f32 %v5164_v17, %v2903_v44  ;;  %v3028_v32 = vsel %vm655_vm1, %v7182_v45, 0.0  ;;  %v2913_v39 = vpop.f32.mrf.mxu0  ;;  %v5171_v31 = vld [vmem:[#allocation2 + $0xa8] sm:$0xff] }
 0x6b0   : > { %v4621_v15 = vpop.f32.mrf.mxu1 }
 0x6b1   : > { %v2941_v30 = vadd.f32 %v5165_v24, %v2895_v29  ;;  %v2906_v27 = vadd.f32 %v4647_v18, %v4621_v15  ;;  %v3022_v6 = vsel %vm655_vm1, %v7179_v22, 0.0  ;;  %v7194_v19 = vadd.f32 %v7108_v1, %v2943_v26 }
 0x6b2   : > { %3026 = vadd.xlane.f32.xlu0 %v3025_v10  ;;  %3023 = vadd.xlane.f32.xlu1 %v3022_v6  ;;  %v2693_v54 = vpop.f32.mrf.mxu1 }
 0x6b3   : > { %v7189_v57 = vadd.f32 %v7108_v1, %v2941_v30  ;;  %v2898_v13 = vadd.f32 %v2897_v7, %v2693_v54  ;;  %v2944_v48 = vadd.f32 %v5166_v53, %v2906_v27  ;;  %v3037_v4 = vsel %vm655_vm1, %v7194_v19, 0.0 }
 0x6b5   : > { %v2942_v51 = vadd.f32 %v5167_v63, %v2898_v13  ;;  %v3031_v50 = vsel %vm655_vm1, %v7189_v57, 0.0  ;;  %v4624_v23 = vpop.f32.mrf.mxu1  ;;  %v7202_v56 = vadd.f32 %v7108_v1, %v2944_v48 }
 0x6b6   : > { %3029 = vadd.xlane.f32.xlu1 %v3028_v32  ;;  %3032 = vadd.xlane.f32.xlu0 %v3031_v50  ;;  %v2919_v36 = vadd.f32 %v4650_v0, %v4624_v23 }
 0x6b7   : > { %v7199_v28 = vadd.f32 %v7108_v1, %v2942_v51  ;;  %v2706_v9 = vpop.f32.mrf.mxu1  ;;  %v3040_v44 = vsel %vm655_vm1, %v7202_v56, 0.0 }
 0x6b8   : > { %v2911_v35 = vadd.f32 %v2910_v60, %v2706_v9  ;;  %v2947_v18 = vadd.f32 %v5168_v42, %v2919_v36 }
 0x6b9   : > { %v3034_v16 = vsel %vm655_vm1, %v7199_v28, 0.0  ;;  %v4625_v38 = vpop.f32.mrf.mxu1 }
 0x6ba   : > { %3038 = vadd.xlane.f32.xlu0 %v3037_v4  ;;  %3035 = vadd.xlane.f32.xlu1 %v3034_v16  ;;  %v2945_v3 = vadd.f32 %v5169_v40, %v2911_v35  ;;  %v2922_v25 = vadd.f32 %v4651_v52, %v4625_v38  ;;  %v7214_v5 = vadd.f32 %v7108_v1, %v2947_v18 }
 0x6bb   : > { %v2709_v41 = vpop.f32.mrf.mxu1 }
 0x6bc   : > { %v7209_v49 = vadd.f32 %v7108_v1, %v2945_v3  ;;  %v2914_v46 = vadd.f32 %v2913_v39, %v2709_v41  ;;  %v2948_v7 = vadd.f32 %v5170_v47, %v2922_v25  ;;  %v3049_v17 = vsel %vm655_vm1, %v7214_v5, 0.0 }
 0x6be   : > { %3041 = vadd.xlane.f32.xlu1 %v3040_v44  ;;  %v2946_v29 = vadd.f32 %v5171_v31, %v2914_v46  ;;  %v3043_v0 = vsel %vm655_vm1, %v7209_v49, 0.0  ;;  %v7222_v10 = vadd.f32 %v7108_v1, %v2948_v7 }
 0x6bf   : > { %3044 = vadd.xlane.f32.xlu0 %v3043_v0 }
 0x6c0   : > { %v7219_v15 = vadd.f32 %v7108_v1, %v2946_v29  ;;  %v3052_v24 = vsel %vm655_vm1, %v7222_v10, 0.0 }
 0x6c2   : > { %8218 = vst [vmem:[#allocation27_spill] sm:$0xff] %v7219_v15  ;;  %v3046_v26 = vsel %vm655_vm1, %v7219_v15, 0.0 }
 0x6c3   : > { %3050 = vadd.xlane.f32.xlu0 %v3049_v17  ;;  %3047 = vadd.xlane.f32.xlu1 %v3046_v26 }
 0x6c7   : > { %3053 = vadd.xlane.f32.xlu1 %v3052_v24 }
 0x6f5   : > { %v2985_v30 = vpop.xlane.xlu0 %2984 }
 0x6f6   : > { %v3055_v27 = vmul.f32 0.125, %v2985_v30  ;;  %v2977_v30 = vld [vmem:[%s535_s14] sm:$0xf] }
 0x6f7   : > { %4712 = vmatprep.subr.msk.bf16.mxu1 %vm1081_vm2, %v2977_v30 }
 0x6f8   : > { %v7231_v6 = vsub.f32 %v7111_v43, %v3055_v27  ;;  %v3406_v27 = vsel %vm1081_vm2, %v2977_v30, 0 }
 0x6f9   : > { %v2988_v54 = vpop.xlane.xlu1 %2987  ;;  %v2991_v1 = vpop.xlane.xlu0 %2990  ;;  %4653 = vmatpush3.bf16.msra.mxu1 %v3406_v27 }
 0x6fa   : > { %v3056_v13 = vmul.f32 0.125, %v2988_v54  ;;  %v3057_v60 = vmul.f32 0.125, %v2991_v1  ;;  %v3103_v32 = vmul.f32 %v7231_v6, %v7231_v6 }
 0x6fc   : > { %v7236_v53 = vsub.f32 %v7119_v8, %v3056_v13  ;;  %v7239_v48 = vsub.f32 %v7114_v34, %v3057_v60  ;;  %v3127_v63 = vsel %vm655_vm1, %v3103_v32, 0.0 }
 0x6fd   : > { %3128 = vadd.xlane.f32.xlu0 %v3127_v63  ;;  %v2994_v51 = vpop.xlane.xlu0 %2993 }
 0x6fe   : > { %v3058_v50 = vmul.f32 0.125, %v2994_v51  ;;  %v3104_v23 = vmul.f32 %v7236_v53, %v7236_v53  ;;  %v3105_v36 = vmul.f32 %v7239_v48, %v7239_v48 }
 0x700   : > { %v7247_v52 = vsub.f32 %v7122_v33, %v3058_v50  ;;  %v3130_v9 = vsel %vm655_vm1, %v3104_v23, 0.0  ;;  %v3133_v35 = vsel %vm655_vm1, %v3105_v36, 0.0 }
 0x701   : > { %3131 = vadd.xlane.f32.xlu1 %v3130_v9  ;;  %3134 = vadd.xlane.f32.xlu0 %v3133_v35 }
 0x702   : > { %v3106_v4 = vmul.f32 %v7247_v52, %v7247_v52 }
 0x704   : > { %v3136_v16 = vsel %vm655_vm1, %v3106_v4, 0.0 }
 0x705   : > { %3137 = vadd.xlane.f32.xlu1 %v3136_v16 }
 0x718   : > { %v2997_v38 = vpop.xlane.xlu0 %2996 }
 0x719   : > { %v3059_v42 = vmul.f32 0.125, %v2997_v38 }
 0x71b   : > { %v7255_v18 = vsub.f32 %v7131_v14, %v3059_v42 }
 0x71c   : > { %v3000_v40 = vpop.xlane.xlu1 %2999  ;;  %v3003_v3 = vpop.xlane.xlu0 %3002 }
 0x71d   : > { %v3060_v25 = vmul.f32 0.125, %v3000_v40  ;;  %v3061_v39 = vmul.f32 0.125, %v3003_v3  ;;  %v3107_v41 = vmul.f32 %v7255_v18, %v7255_v18 }
 0x71f   : > { %v7260_v46 = vsub.f32 %v7139_v20, %v3060_v25  ;;  %v7263_v44 = vsub.f32 %v7134_v2, %v3061_v39  ;;  %v3139_v47 = vsel %vm655_vm1, %v3107_v41, 0.0 }
 0x720   : > { %v3006_v7 = vpop.xlane.xlu1 %3005  ;;  %3140 = vadd.xlane.f32.xlu0 %v3139_v47 }
 0x721   : > { %v3062_v31 = vmul.f32 0.125, %v3006_v7  ;;  %v3108_v29 = vmul.f32 %v7260_v46, %v7260_v46  ;;  %v3109_v0 = vmul.f32 %v7263_v44, %v7263_v44 }
 0x723   : > { %v7271_v17 = vsub.f32 %v7142_v11, %v3062_v31  ;;  %v3142_v26 = vsel %vm655_vm1, %v3108_v29, 0.0  ;;  %v3145_v24 = vsel %vm655_vm1, %v3109_v0, 0.0 }
 0x724   : > { %3143 = vadd.xlane.f32.xlu1 %v3142_v26  ;;  %3146 = vadd.xlane.f32.xlu0 %v3145_v24 }
 0x725   : > { %v3110_v54 = vmul.f32 %v7271_v17, %v7271_v17 }
 0x727   : > { %v3148_v1 = vsel %vm655_vm1, %v3110_v54, 0.0 }
 0x728   : > { %3149 = vadd.xlane.f32.xlu1 %v3148_v1 }
 0x72f   : > { %v3009_v13 = vpop.xlane.xlu0 %3008 }
 0x730   : > { %v3063_v60 = vmul.f32 0.125, %v3009_v13 }
 0x732   : > { %v7286_v32 = vsub.f32 %v7151_v37, %v3063_v60 }
 0x733   : > { %v3012_v63 = vpop.xlane.xlu1 %3011  ;;  %v3015_v51 = vpop.xlane.xlu0 %3014 }
 0x734   : > { %v3064_v50 = vmul.f32 0.125, %v3012_v63  ;;  %v3065_v23 = vmul.f32 0.125, %v3015_v51  ;;  %v3111_v36 = vmul.f32 %v7286_v32, %v7286_v32 }
 0x736   : > { %v7291_v9 = vsub.f32 %v7159_v12, %v3064_v50  ;;  %v7294_v35 = vsub.f32 %v7154_v58, %v3065_v23  ;;  %v3151_v4 = vsel %vm655_vm1, %v3111_v36, 0.0 }
 0x737   : > { %v3018_v16 = vpop.xlane.xlu1 %3017  ;;  %3152 = vadd.xlane.f32.xlu0 %v3151_v4  ;;  %v3021_v38 = vpop.xlane.xlu0 %3020 }
 0x738   : > { %v3066_v42 = vmul.f32 0.125, %v3018_v16  ;;  %v3067_v40 = vmul.f32 0.125, %v3021_v38  ;;  %v3112_v3 = vmul.f32 %v7291_v9, %v7291_v9  ;;  %v3113_v25 = vmul.f32 %v7294_v35, %v7294_v35 }
 0x73a   : > { %v7302_v39 = vsub.f32 %v7164_v21, %v3066_v42  ;;  %v7305_v41 = vsub.f32 %v7169_v55, %v3067_v40  ;;  %v3154_v47 = vsel %vm655_vm1, %v3112_v3, 0.0  ;;  %v3157_v7 = vsel %vm655_vm1, %v3113_v25, 0.0 }
 0x73b   : > { %v3024_v31 = vpop.xlane.xlu1 %3023  ;;  %3155 = vadd.xlane.f32.xlu1 %v3154_v47  ;;  %3158 = vadd.xlane.f32.xlu0 %v3157_v7  ;;  %v3027_v29 = vpop.xlane.xlu0 %3026 }
 0x73c   : > { %v3068_v0 = vmul.f32 0.125, %v3024_v31  ;;  %v3069_v26 = vmul.f32 0.125, %v3027_v29  ;;  %v3114_v24 = vmul.f32 %v7302_v39, %v7302_v39  ;;  %v3115_v30 = vmul.f32 %v7305_v41, %v7305_v41 }
 0x73e   : > { %v7314_v27 = vsub.f32 %v7179_v22, %v3068_v0  ;;  %v7317_v54 = vsub.f32 %v7172_v62, %v3069_v26  ;;  %v3160_v1 = vsel %vm655_vm1, %v3114_v24, 0.0  ;;  %v3163_v13 = vsel %vm655_vm1, %v3115_v30, 0.0 }
 0x73f   : > { %v3030_v60 = vpop.xlane.xlu1 %3029  ;;  %3161 = vadd.xlane.f32.xlu1 %v3160_v1  ;;  %3164 = vadd.xlane.f32.xlu0 %v3163_v13  ;;  %v3033_v63 = vpop.xlane.xlu0 %3032 }
 0x740   : > { %v3070_v51 = vmul.f32 0.125, %v3030_v60  ;;  %v3071_v50 = vmul.f32 0.125, %v3033_v63  ;;  %v3116_v23 = vmul.f32 %v7314_v27, %v7314_v27  ;;  %v3117_v36 = vmul.f32 %v7317_v54, %v7317_v54 }
 0x742   : > { %v7326_v4 = vsub.f32 %v7182_v45, %v3070_v51  ;;  %v7329_v16 = vsub.f32 %v7189_v57, %v3071_v50  ;;  %v3166_v38 = vsel %vm655_vm1, %v3116_v23, 0.0  ;;  %v3169_v42 = vsel %vm655_vm1, %v3117_v36, 0.0 }
 0x743   : > { %v3036_v40 = vpop.xlane.xlu1 %3035  ;;  %3167 = vadd.xlane.f32.xlu1 %v3166_v38  ;;  %3170 = vadd.xlane.f32.xlu0 %v3169_v42  ;;  %v3039_v3 = vpop.xlane.xlu0 %3038 }
 0x744   : > { %v3072_v25 = vmul.f32 0.125, %v3036_v40  ;;  %v3073_v47 = vmul.f32 0.125, %v3039_v3  ;;  %v3118_v7 = vmul.f32 %v7326_v4, %v7326_v4  ;;  %v3119_v31 = vmul.f32 %v7329_v16, %v7329_v16 }
 0x746   : > { %v7338_v29 = vsub.f32 %v7199_v28, %v3072_v25  ;;  %v7341_v0 = vsub.f32 %v7194_v19, %v3073_v47  ;;  %v3172_v26 = vsel %vm655_vm1, %v3118_v7, 0.0  ;;  %v3175_v24 = vsel %vm655_vm1, %v3119_v31, 0.0 }
 0x747   : > { %v3042_v30 = vpop.xlane.xlu1 %3041  ;;  %3173 = vadd.xlane.f32.xlu1 %v3172_v26  ;;  %3176 = vadd.xlane.f32.xlu0 %v3175_v24 }
 0x748   : > { %v3074_v1 = vmul.f32 0.125, %v3042_v30  ;;  %v3120_v13 = vmul.f32 %v7338_v29, %v7338_v29  ;;  %v3121_v60 = vmul.f32 %v7341_v0, %v7341_v0  ;;  %v3045_v63 = vpop.xlane.xlu0 %3044 }
 0x749   : > { %v3075_v50 = vmul.f32 0.125, %v3045_v63 }
 0x74a   : > { %v7350_v51 = vsub.f32 %v7202_v56, %v3074_v1  ;;  %v3178_v23 = vsel %vm655_vm1, %v3120_v13, 0.0  ;;  %v3181_v36 = vsel %vm655_vm1, %v3121_v60, 0.0 }
 0x74b   : > { %3179 = vadd.xlane.f32.xlu1 %v3178_v23  ;;  %3182 = vadd.xlane.f32.xlu0 %v3181_v36  ;;  %v7355_v38 = vsub.f32 %v7209_v49, %v3075_v50 }
 0x74c   : > { %v3122_v42 = vmul.f32 %v7350_v51, %v7350_v51  ;;  %v3048_v40 = vpop.xlane.xlu1 %3047  ;;  %v3051_v3 = vpop.xlane.xlu0 %3050 }
 0x74d   : > { %v3076_v25 = vmul.f32 0.125, %v3048_v40  ;;  %v3077_v47 = vmul.f32 0.125, %v3051_v3  ;;  %v3123_v31 = vmul.f32 %v7355_v38, %v7355_v38 }
 0x74e   : > { %v3184_v7 = vsel %vm655_vm1, %v3122_v42, 0.0 }
 0x74f   : > { %3185 = vadd.xlane.f32.xlu1 %v3184_v7  ;;  %v7363_v26 = vsub.f32 %v7219_v15, %v3076_v25  ;;  %v7366_v24 = vsub.f32 %v7214_v5, %v3077_v47  ;;  %v3187_v30 = vsel %vm655_vm1, %v3123_v31, 0.0 }
 0x750   : > { %v3054_v1 = vpop.xlane.xlu1 %3053  ;;  %3188 = vadd.xlane.f32.xlu0 %v3187_v30 }
 0x751   : > { %v3078_v13 = vmul.f32 0.125, %v3054_v1  ;;  %v3124_v60 = vmul.f32 %v7363_v26, %v7363_v26  ;;  %v3125_v63 = vmul.f32 %v7366_v24, %v7366_v24 }
 0x753   : > { %v7374_v50 = vsub.f32 %v7222_v10, %v3078_v13  ;;  %v3190_v23 = vsel %vm655_vm1, %v3124_v60, 0.0  ;;  %v3193_v36 = vsel %vm655_vm1, %v3125_v63, 0.0 }
 0x754   : > { %3191 = vadd.xlane.f32.xlu1 %v3190_v23  ;;  %3194 = vadd.xlane.f32.xlu0 %v3193_v36  ;;  %v3297_v36 = vsub.s32 3, %v8217_v59 }
 0x755   : > { %v3126_v42 = vmul.f32 %v7374_v50, %v7374_v50 }
 0x757   : > { %v3196_v40 = vsel %vm655_vm1, %v3126_v42, 0.0 }
 0x758   : > { %3197 = vadd.xlane.f32.xlu1 %v3196_v40  ;;  %v7383_v40 = vrot.slane %v7105_v61, %v3297_v36 }
 0x786   : > { %v3129_v3 = vpop.xlane.xlu0 %3128 }
 0x787   : > { %v3199_v25 = vmul.f32 0.125, %v3129_v3 }
 0x789   : > { %v3223_v47 = vadd.f32 1e-05, %v3199_v25  ;;  %v3325_v25 = vsub.s32 4, %v8217_v59 }
 0x78a   : > { %v3132_v7 = vpop.xlane.xlu1 %3131  ;;  %v3135_v31 = vpop.xlane.xlu0 %3134 }
 0x78b   : > { %5099 = vrsqrt.f32 %v3223_v47  ;;  %v3200_v30 = vmul.f32 0.125, %v3132_v7  ;;  %v3201_v1 = vmul.f32 0.125, %v3135_v31 }
 0x78d   : > { %v3224_v13 = vadd.f32 1e-05, %v3200_v30  ;;  %v3225_v60 = vadd.f32 1e-05, %v3201_v1 }
 0x78e   : > { %v3138_v15 = vpop.xlane.xlu1 %3137 }
 0x78f   : > { %5101 = vrsqrt.f32 %v3224_v13  ;;  %v3202_v63 = vmul.f32 0.125, %v3138_v15  ;;  %v7390_v15 = vrot.slane %v7105_v61, %v3325_v25 }
 0x790   : > { %5103 = vrsqrt.f32 %v3225_v60 }
 0x791   : > { %v3226_v23 = vadd.f32 1e-05, %v3202_v63 }
 0x793   : > { %5105 = vrsqrt.f32 %v3226_v23 }
 0x798   : > { %v5100_v42 = vpop.eup %5099 }
 0x799   : > { %v3271_v3 = vmul.f32 %v5100_v42, %v7231_v6 }
 0x79b   : > { %v3299_v30 = vmul.f32 %v7383_v40, %v3271_v3 }
 0x79c   : > { %v5102_v47 = vpop.eup %5101 }
 0x79d   : > { %v5104_v7 = vpop.eup %5103  ;;  %v3272_v31 = vmul.f32 %v5102_v47, %v7236_v53  ;;  %v3327_v23 = vadd.f32 %v7390_v15, %v3299_v30 }
 0x79e   : > { %v3273_v1 = vmul.f32 %v5104_v7, %v7239_v48 }
 0x79f   : > { %v3300_v13 = vmul.f32 %v7383_v40, %v3272_v31 }
 0x7a0   : > { %v5106_v60 = vpop.eup %5105  ;;  %v3301_v63 = vmul.f32 %v7383_v40, %v3273_v1 }
 0x7a1   : > { %v3274_v6 = vmul.f32 %v5106_v60, %v7247_v52  ;;  %v3328_v36 = vadd.f32 %v7390_v15, %v3300_v13 }
 0x7a2   : > { %v3329_v61 = vadd.f32 %v7390_v15, %v3301_v63 }
 0x7a3   : > { %v3302_v53 = vmul.f32 %v7383_v40, %v3274_v6  ;;  %v3351_v42 = vpack.c.bf16 %v3328_v36, %v3327_v23 }
 0x7a5   : > { %4654 = vmatprep.mubr.msk.bf16.mxu1 %vm655_vm1, %v3351_v42  ;;  %v3330_v48 = vadd.f32 %v7390_v15, %v3302_v53 }
 0x7a7   : > { %v3352_v3 = vpack.c.bf16 %v3330_v48, %v3329_v61 }
 0x7a9   : > { %4655 = vmatmul.mubr.msk.bf16.vlgmr.msra.gmra.mxu1 %vm655_vm1, %v3352_v3  ;;  %v3141_v25 = vpop.xlane.xlu0 %3140 }
 0x7aa   : > { %v3203_v47 = vmul.f32 0.125, %v3141_v25 }
 0x7ac   : > { %v3227_v7 = vadd.f32 1e-05, %v3203_v47 }
 0x7ad   : > { %v3144_v52 = vpop.xlane.xlu1 %3143  ;;  %v3147_v31 = vpop.xlane.xlu0 %3146 }
 0x7ae   : > { %5107 = vrsqrt.f32 %v3227_v7  ;;  %v3204_v30 = vmul.f32 0.125, %v3144_v52  ;;  %v3205_v1 = vmul.f32 0.125, %v3147_v31 }
 0x7b0   : > { %v3228_v13 = vadd.f32 1e-05, %v3204_v30  ;;  %v3229_v60 = vadd.f32 1e-05, %v3205_v1 }
 0x7b1   : > { %v3150_v6 = vpop.xlane.xlu1 %3149 }
 0x7b2   : > { %5109 = vrsqrt.f32 %v3228_v13  ;;  %v3206_v23 = vmul.f32 0.125, %v3150_v6 }
 0x7b3   : > { %5111 = vrsqrt.f32 %v3229_v60 }
 0x7b4   : > { %v3230_v63 = vadd.f32 1e-05, %v3206_v23 }
 0x7b6   : > { %5113 = vrsqrt.f32 %v3230_v63 }
 0x7bb   : > { %v5108_v36 = vpop.eup %5107 }
 0x7bc   : > { %v3275_v53 = vmul.f32 %v5108_v36, %v7255_v18 }
 0x7be   : > { %v3303_v25 = vmul.f32 %v7383_v40, %v3275_v53 }
 0x7bf   : > { %v5110_v42 = vpop.eup %5109 }
 0x7c0   : > { %v5112_v61 = vpop.eup %5111  ;;  %v3153_v48 = vpop.xlane.xlu0 %3152  ;;  %v3276_v3 = vmul.f32 %v5110_v42, %v7260_v46  ;;  %v3331_v60 = vadd.f32 %v7390_v15, %v3303_v25 }
 0x7c1   : > { %v3207_v47 = vmul.f32 0.125, %v3153_v48  ;;  %v3277_v7 = vmul.f32 %v5112_v61, %v7263_v44 }
 0x7c2   : > { %v3304_v52 = vmul.f32 %v7383_v40, %v3276_v3 }
 0x7c3   : > { %v5114_v31 = vpop.eup %5113  ;;  %v3231_v30 = vadd.f32 1e-05, %v3207_v47  ;;  %v3305_v23 = vmul.f32 %v7383_v40, %v3277_v7 }
 0x7c4   : > { %v3156_v1 = vpop.xlane.xlu1 %3155  ;;  %v3159_v13 = vpop.xlane.xlu0 %3158  ;;  %v3332_v18 = vadd.f32 %v7390_v15, %v3304_v52  ;;  %v3278_v6 = vmul.f32 %v5114_v31, %v7271_v17 }
 0x7c5   : > { %5115 = vrsqrt.f32 %v3231_v30  ;;  %v3208_v46 = vmul.f32 0.125, %v3156_v1  ;;  %v3209_v63 = vmul.f32 0.125, %v3159_v13  ;;  %v3333_v3 = vadd.f32 %v7390_v15, %v3305_v23 }
 0x7c6   : > { %v3353_v36 = vpack.c.bf16 %v3332_v18, %v3331_v60  ;;  %v3306_v44 = vmul.f32 %v7383_v40, %v3278_v6 }
 0x7c7   : > { %v3232_v53 = vadd.f32 1e-05, %v3208_v46  ;;  %v3233_v42 = vadd.f32 1e-05, %v3209_v63 }
 0x7c8   : > { %4658 = vmatprep.mubr.msk.bf16.mxu1 %vm655_vm1, %v3353_v36  ;;  %v3162_v61 = vpop.xlane.xlu1 %3161  ;;  %v3165_v48 = vpop.xlane.xlu0 %3164  ;;  %v3334_v25 = vadd.f32 %v7390_v15, %v3306_v44 }
 0x7c9   : > { %5117 = vrsqrt.f32 %v3232_v53  ;;  %v3210_v17 = vmul.f32 0.125, %v3162_v61  ;;  %v3211_v47 = vmul.f32 0.125, %v3165_v48 }
 0x7ca   : > { %5119 = vrsqrt.f32 %v3233_v42  ;;  %v3354_v7 = vpack.c.bf16 %v3334_v25, %v3333_v3 }
 0x7cb   : > { %v3234_v52 = vadd.f32 1e-05, %v3210_v17  ;;  %v3235_v31 = vadd.f32 1e-05, %v3211_v47 }
 0x7cc   : > { %4659 = vmatmul.mubr.msk.bf16.gmra.mxu1 %vm655_vm1, %v3354_v7  ;;  %v3168_v30 = vpop.xlane.xlu1 %3167  ;;  %v3171_v1 = vpop.xlane.xlu0 %3170 }
 0x7cd   : > { %5121 = vrsqrt.f32 %v3234_v52  ;;  %v3212_v13 = vmul.f32 0.125, %v3168_v30  ;;  %v3213_v60 = vmul.f32 0.125, %v3171_v1 }
 0x7ce   : > { %5123 = vrsqrt.f32 %v3235_v31 }
 0x7cf   : > { %v3236_v18 = vadd.f32 1e-05, %v3212_v13  ;;  %v3237_v6 = vadd.f32 1e-05, %v3213_v60 }
 0x7d0   : > { %v3174_v23 = vpop.xlane.xlu1 %3173  ;;  %v3177_v46 = vpop.xlane.xlu0 %3176 }
 0x7d1   : > { %5125 = vrsqrt.f32 %v3236_v18  ;;  %v3214_v63 = vmul.f32 0.125, %v3174_v23  ;;  %v3215_v36 = vmul.f32 0.125, %v3177_v46 }
 0x7d2   : > { %v5116_v44 = vpop.eup %5115  ;;  %5127 = vrsqrt.f32 %v3237_v6 }
 0x7d3   : > { %v3238_v53 = vadd.f32 1e-05, %v3214_v63  ;;  %v3239_v42 = vadd.f32 1e-05, %v3215_v36  ;;  %v3279_v61 = vmul.f32 %v5116_v44, %v7286_v32 }
 0x7d4   : > { %v3180_v48 = vpop.xlane.xlu1 %3179  ;;  %v3183_v3 = vpop.xlane.xlu0 %3182 }
 0x7d5   : > { %5129 = vrsqrt.f32 %v3238_v53  ;;  %v3216_v25 = vmul.f32 0.125, %v3180_v48  ;;  %v3217_v17 = vmul.f32 0.125, %v3183_v3  ;;  %v3307_v7 = vmul.f32 %v7383_v40, %v3279_v61 }
 0x7d6   : > { %v5118_v47 = vpop.eup %5117  ;;  %5131 = vrsqrt.f32 %v3239_v42 }
 0x7d7   : > { %v5120_v52 = vpop.eup %5119  ;;  %v3240_v31 = vadd.f32 1e-05, %v3216_v25  ;;  %v3241_v30 = vadd.f32 1e-05, %v3217_v17  ;;  %v3280_v1 = vmul.f32 %v5118_v47, %v7291_v9  ;;  %v3335_v46 = vadd.f32 %v7390_v15, %v3307_v7 }
 0x7d8   : > { %v3186_v13 = vpop.xlane.xlu1 %3185  ;;  %v3281_v60 = vmul.f32 %v5120_v52, %v7294_v35 }
 0x7d9   : > { %5133 = vrsqrt.f32 %v3240_v31  ;;  %v3218_v18 = vmul.f32 0.125, %v3186_v13  ;;  %v3308_v32 = vmul.f32 %v7383_v40, %v3280_v1  ;;  %v3189_v23 = vpop.xlane.xlu0 %3188 }
 0x7da   : > { %v5122_v6 = vpop.eup %5121  ;;  %5135 = vrsqrt.f32 %v3241_v30  ;;  %v3309_v63 = vmul.f32 %v7383_v40, %v3281_v60  ;;  %v3219_v53 = vmul.f32 0.125, %v3189_v23 }
 0x7db   : > { %v5124_v36 = vpop.eup %5123  ;;  %v3242_v44 = vadd.f32 1e-05, %v3218_v18  ;;  %v3336_v42 = vadd.f32 %v7390_v15, %v3308_v32  ;;  %v3282_v9 = vmul.f32 %v5122_v6, %v7302_v39 }
 0x7dc   : > { %v3283_v35 = vmul.f32 %v5124_v36, %v7305_v41  ;;  %v3243_v61 = vadd.f32 1e-05, %v3219_v53  ;;  %v3337_v7 = vadd.f32 %v7390_v15, %v3309_v63 }
 0x7dd   : > { %5137 = vrsqrt.f32 %v3242_v44  ;;  %v3355_v48 = vpack.c.bf16 %v3336_v42, %v3335_v46  ;;  %v3310_v3 = vmul.f32 %v7383_v40, %v3282_v9  ;;  %v3192_v17 = vpop.xlane.xlu1 %3191  ;;  %v3195_v47 = vpop.xlane.xlu0 %3194 }
 0x7de   : > { %v5126_v25 = vpop.eup %5125  ;;  %5139 = vrsqrt.f32 %v3243_v61  ;;  %v3220_v31 = vmul.f32 0.125, %v3192_v17  ;;  %v3221_v30 = vmul.f32 0.125, %v3195_v47  ;;  %v3311_v1 = vmul.f32 %v7383_v40, %v3283_v35 }
 0x7df   : > { %v5128_v52 = vpop.eup %5127  ;;  %4662 = vmatprep.mubr.msk.bf16.mxu1 %vm655_vm1, %v3355_v48  ;;  %v3338_v39 = vadd.f32 %v7390_v15, %v3310_v3  ;;  %v3284_v41 = vmul.f32 %v5126_v25, %v7314_v27 }
 0x7e0   : > { %v3285_v13 = vmul.f32 %v5128_v52, %v7317_v54  ;;  %v3244_v60 = vadd.f32 1e-05, %v3220_v31  ;;  %v3245_v18 = vadd.f32 1e-05, %v3221_v30  ;;  %v3339_v53 = vadd.f32 %v7390_v15, %v3311_v1 }
 0x7e1   : > { %v3356_v32 = vpack.c.bf16 %v3338_v39, %v3337_v7  ;;  %v3198_v23 = vpop.xlane.xlu1 %3197  ;;  %v3312_v46 = vmul.f32 %v7383_v40, %v3284_v41 }
 0x7e2   : > { %v5130_v6 = vpop.eup %5129  ;;  %v3313_v63 = vmul.f32 %v7383_v40, %v3285_v13  ;;  %5141 = vrsqrt.f32 %v3244_v60  ;;  %v3222_v44 = vmul.f32 0.125, %v3198_v23 }
 0x7e3   : > { %v5132_v36 = vpop.eup %5131  ;;  %4663 = vmatmul.mubr.msk.bf16.gmra.mxu1 %vm655_vm1, %v3356_v32  ;;  %v3286_v27 = vmul.f32 %v5130_v6, %v7326_v4  ;;  %5143 = vrsqrt.f32 %v3245_v18  ;;  %v3340_v54 = vadd.f32 %v7390_v15, %v3312_v46 }
 0x7e4   : > { %v3287_v42 = vmul.f32 %v5132_v36, %v7329_v16  ;;  %v3246_v9 = vadd.f32 1e-05, %v3222_v44  ;;  %v3341_v3 = vadd.f32 %v7390_v15, %v3313_v63 }
 0x7e5   : > { %v3314_v35 = vmul.f32 %v7383_v40, %v3286_v27  ;;  %v3357_v48 = vpack.c.bf16 %v3340_v54, %v3339_v53  ;;  %v4761_v27 = vld [vmem:[%s5379_s11 + $0x8] sm:$0xff]   ;;  %v4762_v53 = vld [vmem:[%s5379_s11] sm:$0xff]  }
 0x7e6   : > { %v5134_v61 = vpop.eup %5133  ;;  %5145 = vrsqrt.f32 %v3246_v9  ;;  %v3315_v47 = vmul.f32 %v7383_v40, %v3287_v42  ;;  %4678 = vmatprep.subr.bf16.mxu0 %v4761_v27 }
 0x7e7   : > { %v5136_v25 = vpop.eup %5135  ;;  %v3342_v17 = vadd.f32 %v7390_v15, %v3314_v35  ;;  %v3288_v4 = vmul.f32 %v5134_v61, %v7338_v29  ;;  %4666 = vmatprep.mubr.msk.bf16.mxu1 %vm655_vm1, %v3357_v48  ;;  %4679 = vmatpush3.bf16.msra.mxu0 %v4761_v27 }
 0x7e8   : > { %v3289_v7 = vmul.f32 %v5136_v25, %v7341_v0  ;;  %v3343_v30 = vadd.f32 %v7390_v15, %v3315_v47  ;;  %4680 = vmatprep.subr.bf16.mxu0 %v4762_v53 }
 0x7e9   : > { %v3358_v16 = vpack.c.bf16 %v3342_v17, %v3341_v3  ;;  %v3316_v52 = vmul.f32 %v7383_v40, %v3288_v4  ;;  %v7480_v17 = vld [vmem:[%s566_s15] ss:$0 sm:$0xff] }
 0x7ea   : > { %v5138_v31 = vpop.eup %5137  ;;  %v3317_v29 = vmul.f32 %v7383_v40, %v3289_v7 }
 0x7eb   : > { %4667 = vmatmul.mubr.msk.bf16.gmra.mxu1 %vm655_vm1, %v3358_v16  ;;  %v3344_v39 = vadd.f32 %v7390_v15, %v3316_v52  ;;  %v3290_v41 = vmul.f32 %v5138_v31, %v7350_v51  ;;  %v5140_v1 = vpop.eup %5139  ;;  %4681 = vmatpush3.bf16.msra.mxu0 %v4762_v53 }
 0x7ec   : > { %v3291_v60 = vmul.f32 %v5140_v1, %v7355_v38  ;;  %v3345_v18 = vadd.f32 %v7390_v15, %v3317_v29 }
 0x7ed   : > { %v3359_v13 = vpack.c.bf16 %v3344_v39, %v3343_v30  ;;  %v3318_v0 = vmul.f32 %v7383_v40, %v3290_v41 }
 0x7ee   : > { %v3319_v63 = vmul.f32 %v7383_v40, %v3291_v60 }
 0x7ef   : > { %4670 = vmatprep.mubr.msk.bf16.mxu1 %vm655_vm1, %v3359_v13  ;;  %v3346_v32 = vadd.f32 %v7390_v15, %v3318_v0  ;;  %v5142_v6 = vpop.eup %5141 }
 0x7f0   : > { %v5144_v23 = vpop.eup %5143  ;;  %v3292_v51 = vmul.f32 %v5142_v6, %v7363_v26  ;;  %v3347_v54 = vadd.f32 %v7390_v15, %v3319_v63 }
 0x7f1   : > { %v3360_v46 = vpack.c.bf16 %v3346_v32, %v3345_v18  ;;  %v3293_v36 = vmul.f32 %v5144_v23, %v7366_v24 }
 0x7f2   : > { %v3320_v44 = vmul.f32 %v7383_v40, %v3292_v51 }
 0x7f3   : > { %4671 = vmatmul.mubr.msk.bf16.gmra.mxu1 %vm655_vm1, %v3360_v46  ;;  %v5146_v38 = vpop.eup %5145  ;;  %v3321_v26 = vmul.f32 %v7383_v40, %v3293_v36 }
 0x7f4   : > { %v3348_v42 = vadd.f32 %v7390_v15, %v3320_v44  ;;  %v3294_v9 = vmul.f32 %v5146_v38, %v7374_v50 }
 0x7f5   : > { %v3349_v61 = vadd.f32 %v7390_v15, %v3321_v26 }
 0x7f6   : > { %v3361_v35 = vpack.c.bf16 %v3348_v42, %v3347_v54  ;;  %v3322_v24 = vmul.f32 %v7383_v40, %v3294_v9 }
 0x7f8   : > { %4674 = vmatprep.mubr.msk.bf16.mxu1 %vm655_vm1, %v3361_v35  ;;  %v3350_v48 = vadd.f32 %v7390_v15, %v3322_v24 }
 0x7fa   : > { %v3362_v3 = vpack.c.bf16 %v3350_v48, %v3349_v61 }
 0x7fc   : > { %4675 = vmatmul.mubr.msk.bf16.gmra.mxu1 %vm655_vm1, %v3362_v3 }
 0x869   : > { %v4656_v25 = vpop.f32.mrf.mxu1 }
 0x86a   : > { %v3451_v7 = vadd.f32 %v4656_v25, %v7480_v17 }
 0x86b   : > { %v3442_v50 = vpop.f32.mrf.mxu1 }
 0x86c   : > { %v3443_v4 = vadd.f32 %v7480_v17, %v3442_v50  ;;  %v3539_v39 = vmax.f32 %v3451_v7, 0.0 }
 0x86d   : > { %v4657_v40 = vpop.f32.mrf.mxu1 }
 0x86e   : > { %v3454_v47 = vadd.f32 %v4657_v40, %v7480_v17  ;;  %v3537_v31 = vmax.f32 %v3443_v4, 0.0 }
 0x86f   : > { %v3445_v15 = vpop.f32.mrf.mxu1 }
 0x870   : > { %v3446_v16 = vadd.f32 %v7480_v17, %v3445_v15  ;;  %v3540_v52 = vmax.f32 %v3454_v47, 0.0 }
 0x872   : > { %v3538_v30 = vmax.f32 %v3446_v16, 0.0  ;;  %v3562_v29 = vpack.c.bf16 %v3540_v52, %v3539_v39 }
 0x874   : > { %v3561_v41 = vpack.c.bf16 %v3538_v30, %v3537_v31 }
 0x876   : > { %4682 = vmatprep.mubr.msk.bf16.mxu0 %vm3585_vm5, %v3561_v41 }
 0x877   : > { %4683 = vmatmul.mubr.msk.bf16.vlgmr.msra.gmra.mxu0 %vm3585_vm5, %v3562_v29 }
 0x88c   : > { %v4660_v1 = vpop.f32.mrf.mxu1 }
 0x88d   : > { %v3467_v32 = vadd.f32 %v4660_v1, %v7480_v17 }
 0x88e   : > { %v3458_v13 = vpop.f32.mrf.mxu1 }
 0x88f   : > { %v3459_v60 = vadd.f32 %v7480_v17, %v3458_v13  ;;  %v3543_v36 = vmax.f32 %v3467_v32, 0.0 }
 0x890   : > { %v4661_v0 = vpop.f32.mrf.mxu1 }
 0x891   : > { %v3470_v18 = vadd.f32 %v4661_v0, %v7480_v17  ;;  %v3541_v51 = vmax.f32 %v3459_v60, 0.0 }
 0x892   : > { %v3461_v6 = vpop.f32.mrf.mxu1 }
 0x893   : > { %v3462_v23 = vadd.f32 %v7480_v17, %v3461_v6  ;;  %v3544_v46 = vmax.f32 %v3470_v18, 0.0 }
 0x895   : > { %v3542_v63 = vmax.f32 %v3462_v23, 0.0  ;;  %v3564_v38 = vpack.c.bf16 %v3544_v46, %v3543_v36 }
 0x897   : > { %v3563_v44 = vpack.c.bf16 %v3542_v63, %v3541_v51 }
 0x899   : > { %4686 = vmatprep.mubr.msk.bf16.mxu0 %vm3585_vm5, %v3563_v44 }
 0x89a   : > { %4687 = vmatmul.mubr.msk.bf16.gmra.mxu0 %vm3585_vm5, %v3564_v38 }
 0x8a3   : > { %v4664_v27 = vpop.f32.mrf.mxu1 }
 0x8a4   : > { %v3483_v26 = vadd.f32 %v4664_v27, %v7480_v17 }
 0x8a5   : > { %v3474_v53 = vpop.f32.mrf.mxu1 }
 0x8a6   : > { %v3475_v42 = vadd.f32 %v7480_v17, %v3474_v53  ;;  %v3547_v50 = vmax.f32 %v3483_v26, 0.0 }
 0x8a7   : > { %v4665_v54 = vpop.f32.mrf.mxu1 }
 0x8a8   : > { %v3486_v9 = vadd.f32 %v4665_v54, %v7480_v17  ;;  %v3545_v3 = vmax.f32 %v3475_v42, 0.0 }
 0x8a9   : > { %v3477_v35 = vpop.f32.mrf.mxu1 }
 0x8aa   : > { %v3478_v24 = vadd.f32 %v7480_v17, %v3477_v35  ;;  %v3548_v61 = vmax.f32 %v3486_v9, 0.0 }
 0x8ab   : > { %v4668_v48 = vpop.f32.mrf.mxu1 }
 0x8ac   : > { %v3546_v25 = vmax.f32 %v3478_v24, 0.0  ;;  %v3566_v47 = vpack.c.bf16 %v3548_v61, %v3547_v50  ;;  %v3499_v52 = vadd.f32 %v4668_v48, %v7480_v17 }
 0x8ad   : > { %v3490_v40 = vpop.f32.mrf.mxu1 }
 0x8ae   : > { %v3565_v4 = vpack.c.bf16 %v3546_v25, %v3545_v3  ;;  %v3491_v15 = vadd.f32 %v7480_v17, %v3490_v40  ;;  %v3551_v13 = vmax.f32 %v3499_v52, 0.0 }
 0x8af   : > { %v4669_v7 = vpop.f32.mrf.mxu1 }
 0x8b0   : > { %v3502_v16 = vadd.f32 %v4669_v7, %v7480_v17  ;;  %4690 = vmatprep.mubr.msk.bf16.mxu0 %vm3585_vm5, %v3565_v4  ;;  %v3549_v29 = vmax.f32 %v3491_v15, 0.0  ;;  %v3777_v15 = vsub.s32 5, %v8217_v59 }
 0x8b1   : > { %v3493_v31 = vpop.f32.mrf.mxu1  ;;  %4691 = vmatmul.mubr.msk.bf16.gmra.mxu0 %vm3585_vm5, %v3566_v47 }
 0x8b2   : > { %v3494_v30 = vadd.f32 %v7480_v17, %v3493_v31  ;;  %v3552_v39 = vmax.f32 %v3502_v16, 0.0  ;;  %v5172_v16 = vld [vmem:[%s5385_s0] sm:$0xff] }
 0x8b3   : > { %v4672_v41 = vpop.f32.mrf.mxu1  ;;  %v7520_v52 = vrot.slane %v5172_v16, %v3777_v15 }
 0x8b4   : > { %v3550_v1 = vmax.f32 %v3494_v30, 0.0  ;;  %v3568_v18 = vpack.c.bf16 %v3552_v39, %v3551_v13  ;;  %v3515_v46 = vadd.f32 %v4672_v41, %v7480_v17 }
 0x8b5   : > { %v3506_v0 = vpop.f32.mrf.mxu1 }
 0x8b6   : > { %v3567_v60 = vpack.c.bf16 %v3550_v1, %v3549_v29  ;;  %v3507_v6 = vadd.f32 %v7480_v17, %v3506_v0  ;;  %v3555_v27 = vmax.f32 %v3515_v46, 0.0 }
 0x8b7   : > { %v4673_v32 = vpop.f32.mrf.mxu1 }
 0x8b8   : > { %v3518_v23 = vadd.f32 %v4673_v32, %v7480_v17  ;;  %4694 = vmatprep.mubr.msk.bf16.mxu0 %vm3585_vm5, %v3567_v60  ;;  %v3553_v44 = vmax.f32 %v3507_v6, 0.0 }
 0x8b9   : > { %v3509_v51 = vpop.f32.mrf.mxu1  ;;  %4695 = vmatmul.mubr.msk.bf16.gmra.mxu0 %vm3585_vm5, %v3568_v18 }
 0x8ba   : > { %v3510_v63 = vadd.f32 %v7480_v17, %v3509_v51  ;;  %v3556_v36 = vmax.f32 %v3518_v23, 0.0 }
 0x8bc   : > { %v3554_v38 = vmax.f32 %v3510_v63, 0.0  ;;  %v4676_v53 = vpop.f32.mrf.mxu1  ;;  %v3570_v42 = vpack.c.bf16 %v3556_v36, %v3555_v27 }
 0x8bd   : > { %v3531_v61 = vadd.f32 %v4676_v53, %v7480_v17 }
 0x8be   : > { %v3569_v54 = vpack.c.bf16 %v3554_v38, %v3553_v44  ;;  %v3522_v9 = vpop.f32.mrf.mxu1 }
 0x8bf   : > { %v3523_v35 = vadd.f32 %v7480_v17, %v3522_v9  ;;  %v3559_v4 = vmax.f32 %v3531_v61, 0.0 }
 0x8c0   : > { %4698 = vmatprep.mubr.msk.bf16.mxu0 %vm3585_vm5, %v3569_v54  ;;  %v4677_v26 = vpop.f32.mrf.mxu1 }
 0x8c1   : > { %4699 = vmatmul.mubr.msk.bf16.gmra.mxu0 %vm3585_vm5, %v3570_v42  ;;  %v3534_v24 = vadd.f32 %v4677_v26, %v7480_v17  ;;  %v3557_v50 = vmax.f32 %v3523_v35, 0.0 }
 0x8c2   : > { %v3525_v48 = vpop.f32.mrf.mxu1 }
 0x8c3   : > { %v3526_v3 = vadd.f32 %v7480_v17, %v3525_v48  ;;  %v3560_v25 = vmax.f32 %v3534_v24, 0.0 }
 0x8c5   : > { %v3558_v40 = vmax.f32 %v3526_v3, 0.0  ;;  %v3572_v7 = vpack.c.bf16 %v3560_v25, %v3559_v4 }
 0x8c7   : > { %v3571_v47 = vpack.c.bf16 %v3558_v40, %v3557_v50 }
 0x8c9   : > { %4702 = vmatprep.mubr.msk.bf16.mxu0 %vm3585_vm5, %v3571_v47 }
 0x8ca   : > { %4703 = vmatmul.mubr.msk.bf16.gmra.mxu0 %vm3585_vm5, %v3572_v7 }
 0x937   : > { %v4684_v31 = vpop.f32.mrf.mxu0 }
 0x938   : > { %v3753_v30 = vadd.f32 %v4684_v31, %v7114_v34 }
 0x939   : > { %v3656_v39 = vpop.f32.mrf.mxu0 }
 0x93a   : > { %v7524_v17 = vadd.f32 %v7520_v52, %v3753_v30  ;;  %v3751_v41 = vadd.f32 %v3656_v39, %v7111_v43 }
 0x93b   : > { %v4685_v29 = vpop.f32.mrf.mxu0 }
 0x93c   : > { %3805 = vst.msk [vmem:[#allocation2 + $0x10] sm:$0xff] %vm655_vm1, %v7524_v17  ;;  %v7530_v1 = vadd.f32 %v7520_v52, %v3751_v41  ;;  %v3754_v59 = vadd.f32 %v4685_v29, %v7122_v33 }
 0x93d   : > { %v3659_v13 = vpop.f32.mrf.mxu0 }
 0x93e   : > { %3803 = vst.msk [vmem:[#allocation2] sm:$0xff] %vm655_vm1, %v7530_v1  ;;  %v7536_v34 = vadd.f32 %v7520_v52, %v3754_v59  ;;  %v3752_v0 = vadd.f32 %v3659_v13, %v7119_v8 }
 0x940   : > { %3806 = vst.msk [vmem:[#allocation2 + $0x18] sm:$0xff] %vm655_vm1, %v7536_v34  ;;  %v7542_v43 = vadd.f32 %v7520_v52, %v3752_v0 }
 0x942   : > { %3804 = vst.msk [vmem:[#allocation2 + $0x8] sm:$0xff] %vm655_vm1, %v7542_v43 }
 0x95a   : > { %v4688_v60 = vpop.f32.mrf.mxu0 }
 0x95b   : > { %v3757_v33 = vadd.f32 %v4688_v60, %v7134_v2 }
 0x95c   : > { %v3672_v18 = vpop.f32.mrf.mxu0 }
 0x95d   : > { %v7548_v32 = vadd.f32 %v7520_v52, %v3757_v33  ;;  %v3755_v6 = vadd.f32 %v3672_v18, %v7131_v14  ;;  %v8219_v33 = vld [vmem:[#allocation27_spill] sm:$0xff] }
 0x95e   : > { %v4689_v23 = vpop.f32.mrf.mxu0 }
 0x95f   : > { %3809 = vst.msk [vmem:[#allocation2 + $0x30] sm:$0xff] %vm655_vm1, %v7548_v32  ;;  %v7554_v8 = vadd.f32 %v7520_v52, %v3755_v6  ;;  %v3758_v46 = vadd.f32 %v4689_v23, %v7142_v11 }
 0x960   : > { %v3675_v51 = vpop.f32.mrf.mxu0 }
 0x961   : > { %3807 = vst.msk [vmem:[#allocation2 + $0x20] sm:$0xff] %vm655_vm1, %v7554_v8  ;;  %v7560_v2 = vadd.f32 %v7520_v52, %v3758_v46  ;;  %v3756_v63 = vadd.f32 %v3675_v51, %v7139_v20 }
 0x963   : > { %3810 = vst.msk [vmem:[#allocation2 + $0x38] sm:$0xff] %vm655_vm1, %v7560_v2  ;;  %v7566_v14 = vadd.f32 %v7520_v52, %v3756_v63 }
 0x965   : > { %3808 = vst.msk [vmem:[#allocation2 + $0x28] sm:$0xff] %vm655_vm1, %v7566_v14 }
 0x971   : > { %v4692_v36 = vpop.f32.mrf.mxu0 }
 0x972   : > { %v3761_v11 = vadd.f32 %v4692_v36, %v7154_v58 }
 0x973   : > { %v3688_v44 = vpop.f32.mrf.mxu0 }
 0x974   : > { %v7572_v38 = vadd.f32 %v7520_v52, %v3761_v11  ;;  %v3759_v27 = vadd.f32 %v3688_v44, %v7151_v37 }
 0x975   : > { %v4693_v53 = vpop.f32.mrf.mxu0 }
 0x976   : > { %3813 = vst.msk [vmem:[#allocation2 + $0x50] sm:$0xff] %vm655_vm1, %v7572_v38  ;;  %v7578_v20 = vadd.f32 %v7520_v52, %v3759_v27  ;;  %v3762_v54 = vadd.f32 %v4693_v53, %v7164_v21 }
 0x977   : > { %v3691_v42 = vpop.f32.mrf.mxu0 }
 0x978   : > { %3811 = vst.msk [vmem:[#allocation2 + $0x40] sm:$0xff] %vm655_vm1, %v7578_v20  ;;  %v7584_v58 = vadd.f32 %v7520_v52, %v3762_v54  ;;  %v3760_v9 = vadd.f32 %v3691_v42, %v7159_v12 }
 0x979   : > { %v4696_v26 = vpop.f32.mrf.mxu0 }
 0x97a   : > { %3814 = vst.msk [vmem:[#allocation2 + $0x58] sm:$0xff] %vm655_vm1, %v7584_v58  ;;  %v7590_v37 = vadd.f32 %v7520_v52, %v3760_v9  ;;  %v3765_v35 = vadd.f32 %v4696_v26, %v7172_v62 }
 0x97b   : > { %v3704_v24 = vpop.f32.mrf.mxu0 }
 0x97c   : > { %3812 = vst.msk [vmem:[#allocation2 + $0x48] sm:$0xff] %vm655_vm1, %v7590_v37  ;;  %v7596_v21 = vadd.f32 %v7520_v52, %v3765_v35  ;;  %v3763_v61 = vadd.f32 %v3704_v24, %v7169_v55 }
 0x97d   : > { %v4697_v48 = vpop.f32.mrf.mxu0 }
 0x97e   : > { %3817 = vst.msk [vmem:[#allocation2 + $0x70] sm:$0xff] %vm655_vm1, %v7596_v21  ;;  %v7602_v12 = vadd.f32 %v7520_v52, %v3763_v61  ;;  %v3766_v3 = vadd.f32 %v4697_v48, %v7182_v45 }
 0x97f   : > { %v3707_v25 = vpop.f32.mrf.mxu0 }
 0x980   : > { %3815 = vst.msk [vmem:[#allocation2 + $0x60] sm:$0xff] %vm655_vm1, %v7602_v12  ;;  %v7608_v62 = vadd.f32 %v7520_v52, %v3766_v3  ;;  %v3764_v50 = vadd.f32 %v3707_v25, %v7179_v22 }
 0x981   : > { %v4700_v40 = vpop.f32.mrf.mxu0 }
 0x982   : > { %3818 = vst.msk [vmem:[#allocation2 + $0x78] sm:$0xff] %vm655_vm1, %v7608_v62  ;;  %v7614_v55 = vadd.f32 %v7520_v52, %v3764_v50  ;;  %v3769_v4 = vadd.f32 %v4700_v40, %v7194_v19 }
 0x983   : > { %v3720_v47 = vpop.f32.mrf.mxu0 }
 0x984   : > { %3816 = vst.msk [vmem:[#allocation2 + $0x68] sm:$0xff] %vm655_vm1, %v7614_v55  ;;  %v7620_v45 = vadd.f32 %v7520_v52, %v3769_v4  ;;  %v3767_v7 = vadd.f32 %v3720_v47, %v7189_v57 }
 0x985   : > { %v4701_v15 = vpop.f32.mrf.mxu0 }
 0x986   : > { %3821 = vst.msk [vmem:[#allocation2 + $0x90] sm:$0xff] %vm655_vm1, %v7620_v45  ;;  %v7626_v22 = vadd.f32 %v7520_v52, %v3767_v7  ;;  %v3770_v16 = vadd.f32 %v4701_v15, %v7202_v56 }
 0x987   : > { %v3723_v31 = vpop.f32.mrf.mxu0 }
 0x988   : > { %3819 = vst.msk [vmem:[#allocation2 + $0x80] sm:$0xff] %vm655_vm1, %v7626_v22  ;;  %v7632_v19 = vadd.f32 %v7520_v52, %v3770_v16  ;;  %v3768_v30 = vadd.f32 %v3723_v31, %v7199_v28 }
 0x98a   : > { %3822 = vst.msk [vmem:[#allocation2 + $0x98] sm:$0xff] %vm655_vm1, %v7632_v19  ;;  %v7638_v57 = vadd.f32 %v7520_v52, %v3768_v30  ;;  %v4704_v39 = vpop.f32.mrf.mxu0 }
 0x98b   : > { %v3773_v56 = vadd.f32 %v4704_v39, %v7214_v5 }
 0x98c   : > { %3820 = vst.msk [vmem:[#allocation2 + $0x88] sm:$0xff] %vm655_vm1, %v7638_v57  ;;  %v3736_v41 = vpop.f32.mrf.mxu0 }
 0x98d   : > { %v7644_v29 = vadd.f32 %v7520_v52, %v3773_v56  ;;  %v3771_v59 = vadd.f32 %v3736_v41, %v7209_v49 }
 0x98e   : > { %v4705_v13 = vpop.f32.mrf.mxu0 }
 0x98f   : > { %3825 = vst.msk [vmem:[#allocation2 + $0xb0] sm:$0xff] %vm655_vm1, %v7644_v29  ;;  %v7650_v28 = vadd.f32 %v7520_v52, %v3771_v59  ;;  %v3774_v0 = vadd.f32 %v4705_v13, %v7222_v10 }
 0x990   : > { %v3739_v60 = vpop.f32.mrf.mxu0 }
 0x991   : > { %3823 = vst.msk [vmem:[#allocation2 + $0xa0] sm:$0xff] %vm655_vm1, %v7650_v28  ;;  %v7656_v5 = vadd.f32 %v7520_v52, %v3774_v0  ;;  %v3772_v18 = vadd.f32 %v3739_v60, %v8219_v33  ;;  %3830 = sbr.rel (%p4505_p8) target bundleno = 2811 (0xafb), region = 64 }
 0x993   : > { %3826 = vst.msk [vmem:[#allocation2 + $0xb8] sm:$0xff] %vm655_vm1, %v7656_v5  ;;  %v7662_v49 = vadd.f32 %v7520_v52, %v3772_v18 }
 0x995   : > { %3824 = vst.msk [vmem:[#allocation2 + $0xa8] sm:$0xff] %vm655_vm1, %v7662_v49 }
 0x996   : > { %v3832_v10 = vsel %vm655_vm1, %v7530_v1, 0.0  ;;  %v3838_v6 = vsel %vm655_vm1, %v7524_v17, 0.0  ;;  %v3835_v23 = vsel %vm655_vm1, %v7542_v43, 0.0  ;;  %v3841_v52 = vsel %vm655_vm1, %v7536_v34, 0.0 }
 0x997   : > { %3833 = vadd.xlane.f32.xlu0 %v3832_v10  ;;  %3839 = vadd.xlane.f32.xlu1 %v3838_v6  ;;  %v3844_v46 = vsel %vm655_vm1, %v7554_v8, 0.0  ;;  %v3847_v51 = vsel %vm655_vm1, %v7566_v14, 0.0  ;;  %v3850_v63 = vsel %vm655_vm1, %v7548_v32, 0.0  ;;  %v3853_v36 = vsel %vm655_vm1, %v7560_v2, 0.0 }
 0x998   : > { %v3856_v11 = vsel %vm655_vm1, %v7578_v20, 0.0  ;;  %v3859_v44 = vsel %vm655_vm1, %v7590_v37, 0.0  ;;  %v3862_v27 = vsel %vm655_vm1, %v7572_v38, 0.0  ;;  %v3865_v53 = vsel %vm655_vm1, %v7584_v58, 0.0 }
 0x999   : > { %v3868_v54 = vsel %vm655_vm1, %v7602_v12, 0.0  ;;  %v3871_v42 = vsel %vm655_vm1, %v7614_v55, 0.0  ;;  %v3874_v9 = vsel %vm655_vm1, %v7596_v21, 0.0  ;;  %v3877_v26 = vsel %vm655_vm1, %v7608_v62, 0.0 }
 0x99a   : > { %v3880_v35 = vsel %vm655_vm1, %v7626_v22, 0.0  ;;  %v3883_v24 = vsel %vm655_vm1, %v7638_v57, 0.0  ;;  %v3886_v61 = vsel %vm655_vm1, %v7620_v45, 0.0  ;;  %v3889_v48 = vsel %vm655_vm1, %v7632_v19, 0.0 }
 0x99b   : > { %3836 = vadd.xlane.f32.xlu0 %v3835_v23  ;;  %3842 = vadd.xlane.f32.xlu1 %v3841_v52  ;;  %v3892_v3 = vsel %vm655_vm1, %v7650_v28, 0.0  ;;  %v3895_v25 = vsel %vm655_vm1, %v7662_v49, 0.0  ;;  %v3898_v50 = vsel %vm655_vm1, %v7644_v29, 0.0  ;;  %v3901_v40 = vsel %vm655_vm1, %v7656_v5, 0.0 }
 0x99f   : > { %3845 = vadd.xlane.f32.xlu0 %v3844_v46  ;;  %3848 = vadd.xlane.f32.xlu1 %v3847_v51 }
 0x9a3   : > { %3851 = vadd.xlane.f32.xlu0 %v3850_v63  ;;  %3854 = vadd.xlane.f32.xlu1 %v3853_v36 }
 0x9a7   : > { %3857 = vadd.xlane.f32.xlu0 %v3856_v11  ;;  %3860 = vadd.xlane.f32.xlu1 %v3859_v44 }
 0x9ab   : > { %3863 = vadd.xlane.f32.xlu0 %v3862_v27  ;;  %3866 = vadd.xlane.f32.xlu1 %v3865_v53 }
 0x9af   : > { %3869 = vadd.xlane.f32.xlu0 %v3868_v54  ;;  %3872 = vadd.xlane.f32.xlu1 %v3871_v42 }
 0x9b3   : > { %3875 = vadd.xlane.f32.xlu0 %v3874_v9  ;;  %3878 = vadd.xlane.f32.xlu1 %v3877_v26 }
 0x9b7   : > { %3881 = vadd.xlane.f32.xlu0 %v3880_v35  ;;  %3884 = vadd.xlane.f32.xlu1 %v3883_v24 }
 0x9bb   : > { %3887 = vadd.xlane.f32.xlu0 %v3886_v61  ;;  %3890 = vadd.xlane.f32.xlu1 %v3889_v48 }
 0x9bf   : > { %3893 = vadd.xlane.f32.xlu0 %v3892_v3  ;;  %3896 = vadd.xlane.f32.xlu1 %v3895_v25 }
 0x9c3   : > { %3899 = vadd.xlane.f32.xlu0 %v3898_v50  ;;  %3902 = vadd.xlane.f32.xlu1 %v3901_v40 }
 0xa20   : > { %v3834_v4 = vpop.xlane.xlu0 %3833  ;;  %v3840_v47 = vpop.xlane.xlu1 %3839 }
 0xa21   : > { %v3904_v7 = vmul.f32 0.125, %v3834_v4  ;;  %v3906_v15 = vmul.f32 0.125, %v3840_v47 }
 0xa23   : > { %v7716_v16 = vsub.f32 %v7530_v1, %v3904_v7  ;;  %v7719_v31 = vsub.f32 %v7524_v17, %v3906_v15 }
 0xa24   : > { %v3837_v30 = vpop.xlane.xlu0 %3836  ;;  %v3843_v39 = vpop.xlane.xlu1 %3842 }
 0xa25   : > { %v3905_v56 = vmul.f32 0.125, %v3837_v30  ;;  %v3907_v41 = vmul.f32 0.125, %v3843_v39  ;;  %v3952_v59 = vmul.f32 %v7716_v16, %v7716_v16  ;;  %v3954_v13 = vmul.f32 %v7719_v31, %v7719_v31 }
 0xa27   : > { %v7726_v0 = vsub.f32 %v7542_v43, %v3905_v56  ;;  %v7729_v60 = vsub.f32 %v7536_v34, %v3907_v41  ;;  %v3976_v1 = vsel %vm655_vm1, %v3952_v59, 0.0  ;;  %v3982_v18 = vsel %vm655_vm1, %v3954_v13, 0.0 }
 0xa28   : > { %3977 = vadd.xlane.f32.xlu0 %v3976_v1  ;;  %v3846_v17 = vpop.xlane.xlu0 %3845  ;;  %v3849_v33 = vpop.xlane.xlu1 %3848 }
 0xa29   : > { %v3908_v10 = vmul.f32 0.125, %v3846_v17  ;;  %v3909_v6 = vmul.f32 0.125, %v3849_v33  ;;  %v3953_v23 = vmul.f32 %v7726_v0, %v7726_v0  ;;  %v3955_v52 = vmul.f32 %v7729_v60, %v7729_v60 }
 0xa2b   : > { %v7738_v43 = vsub.f32 %v7554_v8, %v3908_v10  ;;  %v7741_v34 = vsub.f32 %v7566_v14, %v3909_v6  ;;  %v3979_v46 = vsel %vm655_vm1, %v3953_v23, 0.0  ;;  %v3985_v36 = vsel %vm655_vm1, %v3955_v52, 0.0 }
 0xa2c   : > { %3983 = vadd.xlane.f32.xlu0 %v3982_v18  ;;  %3980 = vadd.xlane.f32.xlu1 %v3979_v46  ;;  %v3852_v51 = vpop.xlane.xlu0 %3851  ;;  %v3855_v63 = vpop.xlane.xlu1 %3854 }
 0xa2d   : > { %v3910_v11 = vmul.f32 0.125, %v3852_v51  ;;  %v3911_v44 = vmul.f32 0.125, %v3855_v63  ;;  %v3956_v27 = vmul.f32 %v7738_v43, %v7738_v43  ;;  %v3957_v8 = vmul.f32 %v7741_v34, %v7741_v34 }
 0xa2f   : > { %v7750_v53 = vsub.f32 %v7548_v32, %v3910_v11  ;;  %v7753_v14 = vsub.f32 %v7560_v2, %v3911_v44  ;;  %v3988_v54 = vsel %vm655_vm1, %v3956_v27, 0.0  ;;  %v3991_v26 = vsel %vm655_vm1, %v3957_v8, 0.0 }
 0xa30   : > { %3986 = vadd.xlane.f32.xlu1 %v3985_v36  ;;  %3989 = vadd.xlane.f32.xlu0 %v3988_v54  ;;  %v3858_v42 = vpop.xlane.xlu0 %3857  ;;  %v3861_v9 = vpop.xlane.xlu1 %3860 }
 0xa31   : > { %v3912_v35 = vmul.f32 0.125, %v3858_v42  ;;  %v3913_v24 = vmul.f32 0.125, %v3861_v9  ;;  %v3958_v61 = vmul.f32 %v7750_v53, %v7750_v53  ;;  %v3959_v32 = vmul.f32 %v7753_v14, %v7753_v14 }
 0xa33   : > { %v7762_v48 = vsub.f32 %v7578_v20, %v3912_v35  ;;  %v7765_v2 = vsub.f32 %v7590_v37, %v3913_v24  ;;  %v3994_v3 = vsel %vm655_vm1, %v3958_v61, 0.0  ;;  %v3997_v40 = vsel %vm655_vm1, %v3959_v32, 0.0 }
 0xa34   : > { %3992 = vadd.xlane.f32.xlu1 %v3991_v26  ;;  %3995 = vadd.xlane.f32.xlu0 %v3994_v3  ;;  %v3864_v25 = vpop.xlane.xlu0 %3863  ;;  %v3867_v50 = vpop.xlane.xlu1 %3866 }
 0xa35   : > { %v3914_v4 = vmul.f32 0.125, %v3864_v25  ;;  %v3915_v47 = vmul.f32 0.125, %v3867_v50  ;;  %v3960_v7 = vmul.f32 %v7762_v48, %v7762_v48  ;;  %v3961_v20 = vmul.f32 %v7765_v2, %v7765_v2 }
 0xa37   : > { %v7774_v15 = vsub.f32 %v7572_v38, %v3914_v4  ;;  %v7777_v37 = vsub.f32 %v7584_v58, %v3915_v47  ;;  %v4000_v30 = vsel %vm655_vm1, %v3960_v7, 0.0  ;;  %v4003_v41 = vsel %vm655_vm1, %v3961_v20, 0.0 }
 0xa38   : > { %3998 = vadd.xlane.f32.xlu1 %v3997_v40  ;;  %4001 = vadd.xlane.f32.xlu0 %v4000_v30  ;;  %v3870_v39 = vpop.xlane.xlu0 %3869  ;;  %v3873_v56 = vpop.xlane.xlu1 %3872 }
 0xa39   : > { %v3916_v59 = vmul.f32 0.125, %v3870_v39  ;;  %v3917_v13 = vmul.f32 0.125, %v3873_v56  ;;  %v3962_v1 = vmul.f32 %v7774_v15, %v7774_v15  ;;  %v3963_v38 = vmul.f32 %v7777_v37, %v7777_v37 }
 0xa3b   : > { %v7786_v17 = vsub.f32 %v7602_v12, %v3916_v59  ;;  %v7789_v58 = vsub.f32 %v7614_v55, %v3917_v13  ;;  %v4006_v33 = vsel %vm655_vm1, %v3962_v1, 0.0  ;;  %v4009_v6 = vsel %vm655_vm1, %v3963_v38, 0.0 }
 0xa3c   : > { %4004 = vadd.xlane.f32.xlu1 %v4003_v41  ;;  %4007 = vadd.xlane.f32.xlu0 %v4006_v33  ;;  %v3876_v18 = vpop.xlane.xlu0 %3875  ;;  %v3879_v10 = vpop.xlane.xlu1 %3878 }
 0xa3d   : > { %v3918_v23 = vmul.f32 0.125, %v3876_v18  ;;  %v3919_v52 = vmul.f32 0.125, %v3879_v10  ;;  %v3964_v46 = vmul.f32 %v7786_v17, %v7786_v17  ;;  %v3965_v12 = vmul.f32 %v7789_v58, %v7789_v58 }
 0xa3f   : > { %v7798_v51 = vsub.f32 %v7596_v21, %v3918_v23  ;;  %v7801_v55 = vsub.f32 %v7608_v62, %v3919_v52  ;;  %v4012_v63 = vsel %vm655_vm1, %v3964_v46, 0.0  ;;  %v4015_v44 = vsel %vm655_vm1, %v3965_v12, 0.0 }
 0xa40   : > { %4010 = vadd.xlane.f32.xlu1 %v4009_v6  ;;  %4013 = vadd.xlane.f32.xlu0 %v4012_v63  ;;  %v3882_v36 = vpop.xlane.xlu0 %3881  ;;  %v3885_v11 = vpop.xlane.xlu1 %3884 }
 0xa41   : > { %v3920_v27 = vmul.f32 0.125, %v3882_v36  ;;  %v3921_v8 = vmul.f32 0.125, %v3885_v11  ;;  %v3966_v54 = vmul.f32 %v7798_v51, %v7798_v51  ;;  %v3967_v21 = vmul.f32 %v7801_v55, %v7801_v55 }
 0xa43   : > { %v7810_v42 = vsub.f32 %v7626_v22, %v3920_v27  ;;  %v7813_v62 = vsub.f32 %v7638_v57, %v3921_v8  ;;  %v4018_v9 = vsel %vm655_vm1, %v3966_v54, 0.0  ;;  %v4021_v24 = vsel %vm655_vm1, %v3967_v21, 0.0 }
 0xa44   : > { %4016 = vadd.xlane.f32.xlu1 %v4015_v44  ;;  %4019 = vadd.xlane.f32.xlu0 %v4018_v9  ;;  %v3888_v26 = vpop.xlane.xlu0 %3887  ;;  %v3891_v35 = vpop.xlane.xlu1 %3890 }
 0xa45   : > { %v3922_v61 = vmul.f32 0.125, %v3888_v26  ;;  %v3923_v32 = vmul.f32 0.125, %v3891_v35  ;;  %v3968_v3 = vmul.f32 %v7810_v42, %v7810_v42  ;;  %v3969_v22 = vmul.f32 %v7813_v62, %v7813_v62 }
 0xa47   : > { %v7822_v25 = vsub.f32 %v7620_v45, %v3922_v61  ;;  %v7825_v57 = vsub.f32 %v7632_v19, %v3923_v32  ;;  %v4024_v50 = vsel %vm655_vm1, %v3968_v3, 0.0  ;;  %v4027_v47 = vsel %vm655_vm1, %v3969_v22, 0.0 }
 0xa48   : > { %4022 = vadd.xlane.f32.xlu1 %v4021_v24  ;;  %4025 = vadd.xlane.f32.xlu0 %v4024_v50  ;;  %v3894_v40 = vpop.xlane.xlu0 %3893  ;;  %v3897_v4 = vpop.xlane.xlu1 %3896 }
 0xa49   : > { %v3924_v7 = vmul.f32 0.125, %v3894_v40  ;;  %v3925_v20 = vmul.f32 0.125, %v3897_v4  ;;  %v3970_v30 = vmul.f32 %v7822_v25, %v7822_v25  ;;  %v3971_v45 = vmul.f32 %v7825_v57, %v7825_v57  ;;  %v3831_v40 = vld [vmem:[%s5359_s28] sm:$0x3] }
 0xa4b   : > { %v7834_v39 = vsub.f32 %v7650_v28, %v3924_v7  ;;  %v7837_v19 = vsub.f32 %v7662_v49, %v3925_v20  ;;  %v4030_v56 = vsel %vm655_vm1, %v3970_v30, 0.0  ;;  %v4033_v13 = vsel %vm655_vm1, %v3971_v45, 0.0  ;;  %v8220_v30 = vld [vmem:[#allocation8_spill] sm:$0xff] }
 0xa4c   : > { %4028 = vadd.xlane.f32.xlu1 %v4027_v47  ;;  %4031 = vadd.xlane.f32.xlu0 %v4030_v56  ;;  %v3900_v41 = vpop.xlane.xlu0 %3899  ;;  %v3903_v59 = vpop.xlane.xlu1 %3902  ;;  %v8221_v45 = vsub.s32 0, %v8220_v30 }
 0xa4d   : > { %v3926_v1 = vmul.f32 0.125, %v3900_v41  ;;  %v3927_v38 = vmul.f32 0.125, %v3903_v59  ;;  %v3972_v33 = vmul.f32 %v7834_v39, %v7834_v39  ;;  %v3973_v28 = vmul.f32 %v7837_v19, %v7837_v19 }
 0xa4e   : > { %v7862_v56 = vrot.slane %v3831_v40, %v8221_v45 }
 0xa4f   : > { %v7846_v18 = vsub.f32 %v7644_v29, %v3926_v1  ;;  %v7849_v49 = vsub.f32 %v7656_v5, %v3927_v38  ;;  %v4036_v10 = vsel %vm655_vm1, %v3972_v33, 0.0  ;;  %v4039_v6 = vsel %vm655_vm1, %v3973_v28, 0.0 }
 0xa50   : > { %4034 = vadd.xlane.f32.xlu1 %v4033_v13  ;;  %4037 = vadd.xlane.f32.xlu0 %v4036_v10  ;;  %v8222_v38 = vsub.s32 1, %v8220_v30 }
 0xa51   : > { %v3974_v23 = vmul.f32 %v7846_v18, %v7846_v18  ;;  %v3975_v52 = vmul.f32 %v7849_v49, %v7849_v49 }
 0xa52   : > { %v7867_v33 = vrot.slane %v3831_v40, %v8222_v38 }
 0xa53   : > { %v4042_v46 = vsel %vm655_vm1, %v3974_v23, 0.0  ;;  %v4045_v29 = vsel %vm655_vm1, %v3975_v52, 0.0 }
 0xa54   : > { %4040 = vadd.xlane.f32.xlu1 %v4039_v6  ;;  %4043 = vadd.xlane.f32.xlu0 %v4042_v46 }
 0xa58   : > { %4046 = vadd.xlane.f32.xlu1 %v4045_v29 }
 0xab1   : > { %v3978_v5 = vpop.xlane.xlu0 %3977 }
 0xab2   : > { %v4048_v12 = vmul.f32 0.125, %v3978_v5 }
 0xab4   : > { %v4072_v63 = vadd.f32 1e-05, %v4048_v12 }
 0xab5   : > { %v3981_v36 = vpop.xlane.xlu1 %3980  ;;  %v3984_v11 = vpop.xlane.xlu0 %3983 }
 0xab6   : > { %5173 = vrsqrt.f32 %v4072_v63  ;;  %v4049_v44 = vmul.f32 0.125, %v3981_v36  ;;  %v4050_v27 = vmul.f32 0.125, %v3984_v11 }
 0xab8   : > { %v4073_v8 = vadd.f32 1e-05, %v4049_v44  ;;  %v4074_v54 = vadd.f32 1e-05, %v4050_v27 }
 0xab9   : > { %v3987_v21 = vpop.xlane.xlu1 %3986  ;;  %v3990_v9 = vpop.xlane.xlu0 %3989 }
 0xaba   : > { %5175 = vrsqrt.f32 %v4073_v8  ;;  %v4051_v26 = vmul.f32 0.125, %v3987_v21  ;;  %v4052_v35 = vmul.f32 0.125, %v3990_v9 }
 0xabb   : > { %5177 = vrsqrt.f32 %v4074_v54 }
 0xabc   : > { %v4075_v24 = vadd.f32 1e-05, %v4051_v26  ;;  %v4076_v61 = vadd.f32 1e-05, %v4052_v35 }
 0xabd   : > { %v3993_v32 = vpop.xlane.xlu1 %3992  ;;  %v3996_v3 = vpop.xlane.xlu0 %3995 }
 0xabe   : > { %5179 = vrsqrt.f32 %v4075_v24  ;;  %v4053_v22 = vmul.f32 0.125, %v3993_v32  ;;  %v4054_v50 = vmul.f32 0.125, %v3996_v3 }
 0xabf   : > { %5181 = vrsqrt.f32 %v4076_v61 }
 0xac0   : > { %v4077_v4 = vadd.f32 1e-05, %v4053_v22  ;;  %v4078_v47 = vadd.f32 1e-05, %v4054_v50 }
 0xac1   : > { %v3999_v7 = vpop.xlane.xlu1 %3998  ;;  %v4002_v20 = vpop.xlane.xlu0 %4001 }
 0xac2   : > { %5183 = vrsqrt.f32 %v4077_v4  ;;  %v4055_v41 = vmul.f32 0.125, %v3999_v7  ;;  %v4056_v59 = vmul.f32 0.125, %v4002_v20 }
 0xac3   : > { %v5174_v13 = vpop.eup %5173  ;;  %5185 = vrsqrt.f32 %v4078_v47 }
 0xac4   : > { %v4120_v1 = vmul.f32 %v5174_v13, %v7716_v16  ;;  %v4079_v28 = vadd.f32 1e-05, %v4055_v41  ;;  %v4080_v10 = vadd.f32 1e-05, %v4056_v59 }
 0xac5   : > { %v4005_v6 = vpop.xlane.xlu1 %4004  ;;  %v4008_v23 = vpop.xlane.xlu0 %4007 }
 0xac6   : > { %v4148_v52 = vmul.f32 %v7862_v56, %v4120_v1  ;;  %5187 = vrsqrt.f32 %v4079_v28  ;;  %v4057_v46 = vmul.f32 0.125, %v4005_v6  ;;  %v4058_v29 = vmul.f32 0.125, %v4008_v23 }
 0xac7   : > { %v5176_v5 = vpop.eup %5175  ;;  %5189 = vrsqrt.f32 %v4080_v10 }
 0xac8   : > { %v5178_v12 = vpop.eup %5177  ;;  %v4176_v63 = vadd.f32 %v7867_v33, %v4148_v52  ;;  %v4121_v16 = vmul.f32 %v5176_v5, %v7726_v0  ;;  %v4081_v36 = vadd.f32 1e-05, %v4057_v46  ;;  %v4082_v11 = vadd.f32 1e-05, %v4058_v29 }
 0xac9   : > { %v4122_v44 = vmul.f32 %v5178_v12, %v7719_v31  ;;  %v4011_v27 = vpop.xlane.xlu1 %4010  ;;  %v4014_v8 = vpop.xlane.xlu0 %4013 }
 0xaca   : > { %4200 = vst.msk [vmem:[%s5398_s8] sm:$0xff] %vm655_vm1, %v4176_v63  ;;  %v4149_v54 = vmul.f32 %v7862_v56, %v4121_v16  ;;  %5191 = vrsqrt.f32 %v4081_v36  ;;  %v4059_v21 = vmul.f32 0.125, %v4011_v27  ;;  %v4060_v9 = vmul.f32 0.125, %v4014_v8 }
 0xacb   : > { %v5180_v26 = vpop.eup %5179  ;;  %v4150_v35 = vmul.f32 %v7862_v56, %v4122_v44  ;;  %5193 = vrsqrt.f32 %v4082_v11 }
 0xacc   : > { %v5182_v0 = vpop.eup %5181  ;;  %v4177_v24 = vadd.f32 %v7867_v33, %v4149_v54  ;;  %v4123_v31 = vmul.f32 %v5180_v26, %v7729_v60  ;;  %v4083_v61 = vadd.f32 1e-05, %v4059_v21  ;;  %v4084_v32 = vadd.f32 1e-05, %v4060_v9 }
 0xacd   : > { %v4178_v3 = vadd.f32 %v7867_v33, %v4150_v35  ;;  %v4124_v22 = vmul.f32 %v5182_v0, %v7738_v43  ;;  %v4017_v50 = vpop.xlane.xlu1 %4016  ;;  %v4020_v40 = vpop.xlane.xlu0 %4019 }
 0xace   : > { %4201 = vst.msk [vmem:[%s5398_s8 + $0x8] sm:$0xff] %vm655_vm1, %v4177_v24  ;;  %v4151_v4 = vmul.f32 %v7862_v56, %v4123_v31  ;;  %5195 = vrsqrt.f32 %v4083_v61  ;;  %v4061_v47 = vmul.f32 0.125, %v4017_v50  ;;  %v4062_v7 = vmul.f32 0.125, %v4020_v40 }
 0xacf   : > { %v5184_v20 = vpop.eup %5183  ;;  %4202 = vst.msk [vmem:[%s5398_s8 + $0x10] sm:$0xff] %vm655_vm1, %v4178_v3  ;;  %v4152_v60 = vmul.f32 %v7862_v56, %v4124_v22  ;;  %5197 = vrsqrt.f32 %v4084_v32 }
 0xad0   : > { %v5186_v30 = vpop.eup %5185  ;;  %v4179_v43 = vadd.f32 %v7867_v33, %v4151_v4  ;;  %v4125_v45 = vmul.f32 %v5184_v20, %v7741_v34  ;;  %v4085_v41 = vadd.f32 1e-05, %v4061_v47  ;;  %v4086_v59 = vadd.f32 1e-05, %v4062_v7 }
 0xad1   : > { %v4180_v13 = vadd.f32 %v7867_v33, %v4152_v60  ;;  %v4126_v1 = vmul.f32 %v5186_v30, %v7750_v53  ;;  %v4023_v38 = vpop.xlane.xlu1 %4022  ;;  %v4026_v28 = vpop.xlane.xlu0 %4025 }
 0xad2   : > { %4203 = vst.msk [vmem:[%s5398_s8 + $0x18] sm:$0xff] %vm655_vm1, %v4179_v43  ;;  %v4153_v10 = vmul.f32 %v7862_v56, %v4125_v45  ;;  %5199 = vrsqrt.f32 %v4085_v41  ;;  %v4063_v6 = vmul.f32 0.125, %v4023_v38  ;;  %v4064_v23 = vmul.f32 0.125, %v4026_v28 }
 0xad3   : > { %v5188_v52 = vpop.eup %5187  ;;  %4204 = vst.msk [vmem:[%s5398_s8 + $0x20] sm:$0xff] %vm655_vm1, %v4180_v13  ;;  %v4154_v34 = vmul.f32 %v7862_v56, %v4126_v1  ;;  %5201 = vrsqrt.f32 %v4086_v59 }
 0xad4   : > { %v5190_v46 = vpop.eup %5189  ;;  %v4181_v53 = vadd.f32 %v7867_v33, %v4153_v10  ;;  %v4127_v29 = vmul.f32 %v5188_v52, %v7753_v14  ;;  %v4087_v5 = vadd.f32 1e-05, %v4063_v6  ;;  %v4088_v12 = vadd.f32 1e-05, %v4064_v23 }
 0xad5   : > { %v4182_v63 = vadd.f32 %v7867_v33, %v4154_v34  ;;  %v4128_v16 = vmul.f32 %v5190_v46, %v7762_v48  ;;  %v4029_v36 = vpop.xlane.xlu1 %4028  ;;  %v4032_v11 = vpop.xlane.xlu0 %4031 }
 0xad6   : > { %4205 = vst.msk [vmem:[%s5398_s8 + $0x28] sm:$0xff] %vm655_vm1, %v4181_v53  ;;  %v4155_v44 = vmul.f32 %v7862_v56, %v4127_v29  ;;  %5203 = vrsqrt.f32 %v4087_v5  ;;  %v4065_v27 = vmul.f32 0.125, %v4029_v36  ;;  %v4066_v8 = vmul.f32 0.125, %v4032_v11 }
 0xad7   : > { %v5192_v54 = vpop.eup %5191  ;;  %4206 = vst.msk [vmem:[%s5398_s8 + $0x30] sm:$0xff] %vm655_vm1, %v4182_v63  ;;  %v4156_v14 = vmul.f32 %v7862_v56, %v4128_v16  ;;  %5205 = vrsqrt.f32 %v4088_v12 }
 0xad8   : > { %v5194_v21 = vpop.eup %5193  ;;  %v4183_v48 = vadd.f32 %v7867_v33, %v4155_v44  ;;  %v4129_v9 = vmul.f32 %v5192_v54, %v7765_v2  ;;  %v4089_v26 = vadd.f32 1e-05, %v4065_v27  ;;  %v4090_v35 = vadd.f32 1e-05, %v4066_v8 }
 0xad9   : > { %v4184_v0 = vadd.f32 %v7867_v33, %v4156_v14  ;;  %v4130_v24 = vmul.f32 %v5194_v21, %v7774_v15  ;;  %v4035_v31 = vpop.xlane.xlu1 %4034  ;;  %v4038_v61 = vpop.xlane.xlu0 %4037 }
 0xada   : > { %4207 = vst.msk [vmem:[%s5398_s8 + $0x38] sm:$0xff] %vm655_vm1, %v4183_v48  ;;  %v4157_v32 = vmul.f32 %v7862_v56, %v4129_v9  ;;  %5207 = vrsqrt.f32 %v4089_v26  ;;  %v4067_v3 = vmul.f32 0.125, %v4035_v31  ;;  %v4068_v22 = vmul.f32 0.125, %v4038_v61 }
 0xadb   : > { %v5196_v50 = vpop.eup %5195  ;;  %4208 = vst.msk [vmem:[%s5398_s8 + $0x40] sm:$0xff] %vm655_vm1, %v4184_v0  ;;  %v4158_v2 = vmul.f32 %v7862_v56, %v4130_v24  ;;  %5209 = vrsqrt.f32 %v4090_v35 }
 0xadc   : > { %v5198_v40 = vpop.eup %5197  ;;  %v4185_v15 = vadd.f32 %v7867_v33, %v4157_v32  ;;  %v4131_v4 = vmul.f32 %v5196_v50, %v7777_v37  ;;  %v4091_v47 = vadd.f32 1e-05, %v4067_v3  ;;  %v4092_v7 = vadd.f32 1e-05, %v4068_v22 }
 0xadd   : > { %v4186_v20 = vadd.f32 %v7867_v33, %v4158_v2  ;;  %v4132_v60 = vmul.f32 %v5198_v40, %v7786_v17  ;;  %v4041_v30 = vpop.xlane.xlu1 %4040  ;;  %v4044_v43 = vpop.xlane.xlu0 %4043 }
 0xade   : > { %4209 = vst.msk [vmem:[%s5398_s8 + $0x48] sm:$0xff] %vm655_vm1, %v4185_v15  ;;  %v4159_v45 = vmul.f32 %v7862_v56, %v4131_v4  ;;  %5211 = vrsqrt.f32 %v4091_v47  ;;  %v4069_v41 = vmul.f32 0.125, %v4041_v30  ;;  %v4070_v59 = vmul.f32 0.125, %v4044_v43 }
 0xadf   : > { %v5200_v13 = vpop.eup %5199  ;;  %4210 = vst.msk [vmem:[%s5398_s8 + $0x50] sm:$0xff] %vm655_vm1, %v4186_v20  ;;  %v4160_v37 = vmul.f32 %v7862_v56, %v4132_v60  ;;  %5213 = vrsqrt.f32 %v4092_v7 }
 0xae0   : > { %v5202_v1 = vpop.eup %5201  ;;  %v4187_v17 = vadd.f32 %v7867_v33, %v4159_v45  ;;  %v4133_v38 = vmul.f32 %v5200_v13, %v7789_v58  ;;  %v4093_v28 = vadd.f32 1e-05, %v4069_v41  ;;  %v4094_v10 = vadd.f32 1e-05, %v4070_v59 }
 0xae1   : > { %v4188_v6 = vadd.f32 %v7867_v33, %v4160_v37  ;;  %v4134_v23 = vmul.f32 %v5202_v1, %v7798_v51  ;;  %v4047_v52 = vpop.xlane.xlu1 %4046 }
 0xae2   : > { %4211 = vst.msk [vmem:[%s5398_s8 + $0x58] sm:$0xff] %vm655_vm1, %v4187_v17  ;;  %v4161_v34 = vmul.f32 %v7862_v56, %v4133_v38  ;;  %5215 = vrsqrt.f32 %v4093_v28  ;;  %v4071_v46 = vmul.f32 0.125, %v4047_v52 }
 0xae3   : > { %v5204_v53 = vpop.eup %5203  ;;  %4212 = vst.msk [vmem:[%s5398_s8 + $0x60] sm:$0xff] %vm655_vm1, %v4188_v6  ;;  %v4162_v58 = vmul.f32 %v7862_v56, %v4134_v23  ;;  %5217 = vrsqrt.f32 %v4094_v10 }
 0xae4   : > { %v5206_v29 = vpop.eup %5205  ;;  %v4189_v5 = vadd.f32 %v7867_v33, %v4161_v34  ;;  %v4135_v51 = vmul.f32 %v5204_v53, %v7801_v55  ;;  %v4095_v12 = vadd.f32 1e-05, %v4071_v46 }
 0xae5   : > { %v4190_v63 = vadd.f32 %v7867_v33, %v4162_v58  ;;  %v4136_v16 = vmul.f32 %v5206_v29, %v7810_v42 }
 0xae6   : > { %4213 = vst.msk [vmem:[%s5398_s8 + $0x68] sm:$0xff] %vm655_vm1, %v4189_v5  ;;  %v4163_v36 = vmul.f32 %v7862_v56, %v4135_v51  ;;  %5219 = vrsqrt.f32 %v4095_v12 }
 0xae7   : > { %v5208_v11 = vpop.eup %5207  ;;  %4214 = vst.msk [vmem:[%s5398_s8 + $0x70] sm:$0xff] %vm655_vm1, %v4190_v63  ;;  %v4164_v44 = vmul.f32 %v7862_v56, %v4136_v16 }
 0xae8   : > { %v5210_v27 = vpop.eup %5209  ;;  %v4191_v55 = vadd.f32 %v7867_v33, %v4163_v36  ;;  %v4137_v8 = vmul.f32 %v5208_v11, %v7813_v62 }
 0xae9   : > { %v4192_v54 = vadd.f32 %v7867_v33, %v4164_v44  ;;  %v4138_v42 = vmul.f32 %v5210_v27, %v7822_v25 }
 0xaea   : > { %4215 = vst.msk [vmem:[%s5398_s8 + $0x78] sm:$0xff] %vm655_vm1, %v4191_v55  ;;  %v4165_v14 = vmul.f32 %v7862_v56, %v4137_v8 }
 0xaeb   : > { %v5212_v21 = vpop.eup %5211  ;;  %4216 = vst.msk [vmem:[%s5398_s8 + $0x80] sm:$0xff] %vm655_vm1, %v4192_v54  ;;  %v4166_v48 = vmul.f32 %v7862_v56, %v4138_v42 }
 0xaec   : > { %v5214_v9 = vpop.eup %5213  ;;  %v4193_v26 = vadd.f32 %v7867_v33, %v4165_v14  ;;  %v4139_v62 = vmul.f32 %v5212_v21, %v7825_v57 }
 0xaed   : > { %v4194_v35 = vadd.f32 %v7867_v33, %v4166_v48  ;;  %v4140_v25 = vmul.f32 %v5214_v9, %v7834_v39 }
 0xaee   : > { %4217 = vst.msk [vmem:[%s5398_s8 + $0x88] sm:$0xff] %vm655_vm1, %v4193_v26  ;;  %v4167_v0 = vmul.f32 %v7862_v56, %v4139_v62 }
 0xaef   : > { %v5216_v24 = vpop.eup %5215  ;;  %4218 = vst.msk [vmem:[%s5398_s8 + $0x90] sm:$0xff] %vm655_vm1, %v4194_v35  ;;  %v4168_v31 = vmul.f32 %v7862_v56, %v4140_v25 }
 0xaf0   : > { %v5218_v61 = vpop.eup %5217  ;;  %v4195_v32 = vadd.f32 %v7867_v33, %v4167_v0  ;;  %v4141_v57 = vmul.f32 %v5216_v24, %v7837_v19 }
 0xaf1   : > { %v4196_v3 = vadd.f32 %v7867_v33, %v4168_v31  ;;  %v4142_v39 = vmul.f32 %v5218_v61, %v7846_v18 }
 0xaf2   : > { %4219 = vst.msk [vmem:[%s5398_s8 + $0x98] sm:$0xff] %vm655_vm1, %v4195_v32  ;;  %v4169_v22 = vmul.f32 %v7862_v56, %v4141_v57 }
 0xaf3   : > { %v5220_v50 = vpop.eup %5219  ;;  %4220 = vst.msk [vmem:[%s5398_s8 + $0xa0] sm:$0xff] %vm655_vm1, %v4196_v3  ;;  %v4170_v2 = vmul.f32 %v7862_v56, %v4142_v39 }
 0xaf4   : > { %v4197_v40 = vadd.f32 %v7867_v33, %v4169_v22  ;;  %v4143_v15 = vmul.f32 %v5220_v50, %v7849_v49 }
 0xaf5   : > { %v4198_v4 = vadd.f32 %v7867_v33, %v4170_v2 }
 0xaf6   : > { %4221 = vst.msk [vmem:[%s5398_s8 + $0xa8] sm:$0xff] %vm655_vm1, %v4197_v40  ;;  %v4171_v19 = vmul.f32 %v7862_v56, %v4143_v15 }
 0xaf7   : > { %4222 = vst.msk [vmem:[%s5398_s8 + $0xb0] sm:$0xff] %vm655_vm1, %v4198_v4 }
 0xaf8   : > { %v4199_v18 = vadd.f32 %v7867_v33, %v4171_v19 }
 0xafa   : > { %4223 = vst.msk [vmem:[%s5398_s8 + $0xb8] sm:$0xff] %vm655_vm1, %v4199_v18 }
 0xafb PF: > { %s8223_s30 = sld [smem:[#allocation5_spill]] }
 0xafc   : > { %s8225_s10 = sld [smem:[#allocation4_spill]] }
 0xafd   : > { %s8226_s11 = sld [smem:[#allocation6_spill]] }
 0xafe   : > { %s8227_s12 = sld [smem:[#allocation7_spill]] }
 0xb01   : > { %s19_s13 = sadd.s32 1, %s8223_s30   ;;  %s8224_s30 = sld [smem:[#allocation3_spill]] }
 0xb02   : > { %p16_p9 = scmp.ge.s32.totalorder %s19_s13, 11  }
 0xb04   :  { %18 = sbr.rel (!%p16_p9) target bundleno = 4 (0x4), region = 118 }

</bundles_post_ra>
